<compile_context>
chip_gen: v6e
topology: v6e:2x2x1
jax: 0.10.0
libtpu: 0.0.40
codegen_flags: <defaults>
</compile_context>

<pallas_src>
import functools

import jax
import jax.numpy as jnp
from jax.experimental import pallas as pl
from jax.experimental.pallas import tpu as pltpu


def _derive_vmem_limit():
    """Generation-aware scoped-VMEM cap: ~5/8 of physical VMEM.

    ~40 MiB on v7x (64 MiB physical), ~80 MiB on v5e/v6e (128 MiB physical),
    clamped to 96 MiB.  Falls back to the v7x-safe value if the query fails.
    """
    cap = 64 * 1024 * 1024
    try:
        cap = int(pltpu.get_tpu_info().vmem_capacity_bytes)
    except Exception:
        pass
    return min((cap * 5) // 8, 96 * 1024 * 1024)


VMEM_LIMIT_BYTES = _derive_vmem_limit()


def _pick_tile(dim, target, align):
    """Largest aligned divisor of `dim` that is <= target (or the full dim)."""
    if dim <= target:
        return dim
    t = (target // align) * align
    while t >= align:
        if dim % t == 0:
            return t
        t -= align
    # TODO(synk): for non-128-divisible dims, pad the operand instead of
    # falling back to the whole dimension (handled explicitly for the vocab
    # axis in lm_head(); all other dims in this script are 128-divisible).
    return dim


# ----------------------------------------------------------------------------
# Tiled linear:  y = activation(x @ W + b)
# ----------------------------------------------------------------------------

def _linear_kernel(x_ref, w_ref, b_ref, o_ref, acc_ref, *, activation):
    @pl.when(pl.program_id(2) == 0)
    def _():
        acc_ref[...] = jnp.zeros_like(acc_ref)

    acc_ref[...] += jnp.dot(x_ref[...], w_ref[...],
                            preferred_element_type=jnp.float32)

    @pl.when(pl.program_id(2) == pl.num_programs(2) - 1)
    def _():
        y = acc_ref[...] + b_ref[...]                       # f32 epilogue math
        if activation == "gelu":
            # tanh-approx GELU (standard BERT approximation).
            c = jnp.float32(0.7978845608028654)             # sqrt(2/pi)
            y = 0.5 * y * (1.0 + jnp.tanh(c * (y + 0.044715 * y * y * y)))
        elif activation == "tanh":
            y = jnp.tanh(y)
        o_ref[...] = y.astype(o_ref.dtype)


def linear(x, w, b=None, activation="none", out_dtype=jnp.bfloat16):
    """x: (M, K), w: (K, N), b: (N,) or None."""
    M, K = x.shape
    N = w.shape[1]
    tm = _pick_tile(M, 512, 8)
    tn = _pick_tile(N, 512, 128)
    tk = _pick_tile(K, 512, 128)
    gm, gn, gk = M // tm, N // tn, K // tk
    b2 = (jnp.zeros((1, N), jnp.float32) if b is None
          else b.reshape(1, N).astype(jnp.float32))
    return pl.pallas_call(
        functools.partial(_linear_kernel, activation=activation),
        out_shape=jax.ShapeDtypeStruct((M, N), out_dtype),
        grid_spec=pltpu.PrefetchScalarGridSpec(
            num_scalar_prefetch=0,
            grid=(gm, gn, gk),
            in_specs=[
                pl.BlockSpec((tm, tk), lambda i, j, k: (i, k)),
                pl.BlockSpec((tk, tn), lambda i, j, k: (k, j)),
                pl.BlockSpec((1, tn), lambda i, j, k: (0, j)),
            ],
            out_specs=pl.BlockSpec((tm, tn), lambda i, j, k: (i, j)),
            scratch_shapes=[pltpu.VMEM((tm, tn), jnp.float32)],
        ),
        compiler_params=pltpu.CompilerParams(
            dimension_semantics=("parallel", "parallel", "arbitrary"),
            vmem_limit_bytes=VMEM_LIMIT_BYTES),
    )(x.astype(jnp.bfloat16), w.astype(jnp.bfloat16), b2)


# ----------------------------------------------------------------------------
# Tiled linear fused with residual add + LayerNorm epilogue:
#   y = LayerNorm(residual + x @ W + b)   (full feature dim per output tile)
# ----------------------------------------------------------------------------

def _linear_add_ln_kernel(x_ref, w_ref, b_ref, r_ref, g_ref, be_ref,
                          o_ref, acc_ref, *, eps):
    @pl.when(pl.program_id(1) == 0)
    def _():
        acc_ref[...] = jnp.zeros_like(acc_ref)

    acc_ref[...] += jnp.dot(x_ref[...], w_ref[...],
                            preferred_element_type=jnp.float32)

    @pl.when(pl.program_id(1) == pl.num_programs(1) - 1)
    def _():
        # Residual arrives as bf16 (half the DMA); upcast for f32 LN math.
        z = acc_ref[...] + b_ref[...] + r_ref[...].astype(jnp.float32)
        mean = jnp.mean(z, axis=-1, keepdims=True)
        zc = z - mean
        var = jnp.mean(zc * zc, axis=-1, keepdims=True)
        y = zc * jax.lax.rsqrt(var + eps) * g_ref[...] + be_ref[...]
        o_ref[...] = y.astype(o_ref.dtype)


def linear_add_layernorm(x, w, b, residual, gamma, beta, eps=1e-5,
                         out_dtype=jnp.bfloat16):
    M, K = x.shape
    N = w.shape[1]
    tm = _pick_tile(M, 512, 8)
    tk = _pick_tile(K, 512, 128)
    gm, gk = M // tm, K // tk
    return pl.pallas_call(
        functools.partial(_linear_add_ln_kernel, eps=eps),
        out_shape=jax.ShapeDtypeStruct((M, N), out_dtype),
        grid_spec=pltpu.PrefetchScalarGridSpec(
            num_scalar_prefetch=0,
            grid=(gm, gk),
            in_specs=[
                pl.BlockSpec((tm, tk), lambda i, k: (i, k)),
                pl.BlockSpec((tk, N), lambda i, k: (k, 0)),
                pl.BlockSpec((1, N), lambda i, k: (0, 0)),
                pl.BlockSpec((tm, N), lambda i, k: (i, 0)),
                pl.BlockSpec((1, N), lambda i, k: (0, 0)),
                pl.BlockSpec((1, N), lambda i, k: (0, 0)),
            ],
            out_specs=pl.BlockSpec((tm, N), lambda i, k: (i, 0)),
            scratch_shapes=[pltpu.VMEM((tm, N), jnp.float32)],
        ),
        compiler_params=pltpu.CompilerParams(
            dimension_semantics=("parallel", "arbitrary"),
            vmem_limit_bytes=VMEM_LIMIT_BYTES),
    )(x.astype(jnp.bfloat16), w.astype(jnp.bfloat16),
      b.reshape(1, N).astype(jnp.float32),
      residual.astype(jnp.bfloat16),
      gamma.reshape(1, N).astype(jnp.float32),
      beta.reshape(1, N).astype(jnp.float32))


# ----------------------------------------------------------------------------
# Attention: one grid step per batch element, all heads per step.
# q/k/v are sliced straight out of the fused QKV tensor via column index_maps;
# ctx is written directly in (B, S, d_model) layout (lane-dense 128-wide).
# ----------------------------------------------------------------------------

def _attention_kernel(q_ref, k_ref, v_ref, m_ref, o_ref, p_ref, *,
                      scale, n_head, d_head):
    q = q_ref[0]                 # (S, d_model) bf16
    k = k_ref[0]
    v = v_ref[0]
    mask = m_ref[0]              # (1, S) f32, 1.0 where the key is pad
    neg = jnp.float32(-1e9)
    ctx_parts = []
    # Heads live in the lane dimension -> static unroll over lane slices.
    for h in range(n_head):
        lo = h * d_head
        qh = q[:, lo:lo + d_head]
        kh = k[:, lo:lo + d_head]
        vh = v[:, lo:lo + d_head]
        sc = jax.lax.dot_general(               # (S, S) f32  == qh @ kh.T
            qh, kh, (((1,), (1,)), ((), ())),
            preferred_element_type=jnp.float32) * scale
        sc = jnp.where(mask > 0.5, neg, sc)     # mask broadcasts over queries
        mx = jnp.max(sc, axis=-1, keepdims=True)
        e = jnp.exp(sc - mx)
        s = jnp.sum(e, axis=-1, keepdims=True)
        ph = e * pl.reciprocal(s, approx=True)  # EUP reciprocal, not VALU div
        ctx_parts.append(jnp.dot(ph.astype(vh.dtype), vh,
                                 preferred_element_type=jnp.float32))
        p_ref[0, h] = ph.astype(p_ref.dtype)
    # Single lane-dense (S, d_model) store (128-wide unmasked vst).
    o_ref[0] = jnp.concatenate(ctx_parts, axis=-1).astype(o_ref.dtype)


def attention(qkv, key_pad_mask, scale, n_head, d_model,
              out_dtype=jnp.bfloat16):
    """qkv: (B, S, 3*d_model) bf16; key_pad_mask: (B, 1, S) f32 (1.0 = pad)."""
    B, S, _ = qkv.shape
    d_head = d_model // n_head

    def sect_spec(section):
        # Column block index `section` selects the q / k / v slice of qkv.
        return pl.BlockSpec((1, S, d_model), lambda b, s=section: (b, 0, s))

    # TODO(synk): at large S (>~1k on v7x), key-tile the softmax (flash-style)
    # instead of materializing the full (S, S) scores per head.
    return pl.pallas_call(
        functools.partial(_attention_kernel, scale=scale, n_head=n_head,
                          d_head=d_head),
        out_shape=(jax.ShapeDtypeStruct((B, S, d_model), out_dtype),
                   jax.ShapeDtypeStruct((B, n_head, S, S), jnp.bfloat16)),
        grid=(B,),
        in_specs=[sect_spec(0), sect_spec(1), sect_spec(2),
                  pl.BlockSpec((1, 1, S), lambda b: (b, 0, 0))],
        out_specs=(pl.BlockSpec((1, S, d_model), lambda b: (b, 0, 0)),
                   pl.BlockSpec((1, n_head, S, S), lambda b: (b, 0, 0, 0))),
        compiler_params=pltpu.CompilerParams(
            dimension_semantics=("parallel",),
            vmem_limit_bytes=VMEM_LIMIT_BYTES),
    )(qkv, qkv, qkv, key_pad_mask)


# ----------------------------------------------------------------------------
# Tied masked-LM head: logits = x @ emb.T  (emb pre-transposed once to (D, V),
# vocab padded to 128, vocab-outer grid so emb streams exactly once, bf16 out)
# ----------------------------------------------------------------------------

def _lm_head_kernel(x_ref, e_ref, o_ref):
    o_ref[...] = jnp.dot(x_ref[...], e_ref[...],
                         preferred_element_type=jnp.float32).astype(o_ref.dtype)


def lm_head(x, emb, out_dtype=jnp.bfloat16):
    M, D = x.shape
    V = emb.shape[0]
    Vp = ((V + 127) // 128) * 128
    emb_t = jnp.transpose(emb).astype(jnp.bfloat16)   # one-time (D, V) transpose
    if Vp != V:
        emb_t = jnp.pad(emb_t, ((0, 0), (0, Vp - V)))
    tm = _pick_tile(M, 512, 8)
    tv = _pick_tile(Vp, 512, 128)
    gm, gv = M // tm, Vp // tv
    logits = pl.pallas_call(
        _lm_head_kernel,
        out_shape=jax.ShapeDtypeStruct((M, Vp), out_dtype),
        grid_spec=pltpu.PrefetchScalarGridSpec(
            num_scalar_prefetch=0,
            grid=(gv, gm),  # vocab outer: emb block resident across the M loop
            in_specs=[pl.BlockSpec((tm, D), lambda j, i: (i, 0)),
                      pl.BlockSpec((D, tv), lambda j, i: (0, j))],
            out_specs=pl.BlockSpec((tm, tv), lambda j, i: (i, j)),
        ),
        compiler_params=pltpu.CompilerParams(
            dimension_semantics=("parallel", "parallel"),
            vmem_limit_bytes=VMEM_LIMIT_BYTES),
    )(x.astype(jnp.bfloat16), emb_t)
    return logits[:, :V] if Vp != V else logits


# ----------------------------------------------------------------------------
# Parameters (deterministic, synthetic)
# ----------------------------------------------------------------------------

def init_params(key, vocab_size, n_seg_type, d_model, seq_len_size):
    def dense(k, din, dout):
        kw, kb = jax.random.split(k)
        w = jax.random.normal(kw, (din, dout), jnp.float32) * 0.02
        b = jax.random.normal(kb, (dout,), jnp.float32) * 0.02
        return w, b

    keys = jax.random.split(key, 14)
    p = {}
    p["enc_emb"] = jax.random.normal(keys[0], (vocab_size, d_model), jnp.float32) * 0.02
    p["pos_emb"] = jax.random.normal(keys[1], (seq_len_size + 1, d_model), jnp.float32) * 0.02
    p["seg_emb"] = jax.random.normal(keys[2], (n_seg_type, d_model), jnp.float32) * 0.02
    for name, kk in zip(["mQ", "mK", "mV", "WQ", "WK", "WV", "Wo"], keys[3:10]):
        w, b = dense(kk, d_model, d_model)
        p[name + "_w"], p[name + "_b"] = w, b
    p["ln_g"] = jnp.ones((d_model,), jnp.float32)
    p["ln_b"] = jnp.zeros((d_model,), jnp.float32)
    p["ff1_w"], p["ff1_b"] = dense(keys[10], d_model, 4 * d_model)
    p["ff2_w"], p["ff2_b"] = dense(keys[11], 4 * d_model, d_model)
    p["pool_w"], p["pool_b"] = dense(keys[12], d_model, d_model)
    p["cls_w"] = jax.random.normal(keys[13], (d_model, 2), jnp.float32) * 0.02
    # projection_mask weight is tied to enc_emb (as in the reference __init__)
    return p


def fuse_params(p):
    """Fold the m_{Q,K,V} -> W_{Q,K,V} chains into one fused QKV projection.

    (x @ A + a) @ B + b  ==  x @ (A @ B) + (a @ B + b); weights are shared
    across all n_head layer reuses, so fold once per forward.
    """
    def fold(tag):
        w = p["m%s_w" % tag] @ p["W%s_w" % tag]
        b = p["m%s_b" % tag] @ p["W%s_w" % tag] + p["W%s_b" % tag]
        return w, b

    wq, bq = fold("Q")
    wk, bk = fold("K")
    wv, bv = fold("V")
    return {
        "qkv_w": jnp.concatenate([wq, wk, wv], axis=1),
        "qkv_b": jnp.concatenate([bq, bk, bv], axis=0),
    }


# ----------------------------------------------------------------------------
# Model forward (glue in plain JAX, hot paths in Pallas kernels)
# ----------------------------------------------------------------------------

def encoder_layer(params, fused, x, key_pad_mask, B, S, n_head, d_model):
    d_head = d_model // n_head
    xf = x.reshape(B * S, d_model)

    # Fused Q/K/V projection (single kernel, single read of x).
    qkv = linear(xf, fused["qkv_w"], fused["qkv_b"], out_dtype=jnp.bfloat16)
    qkv = qkv.reshape(B, S, 3 * d_model)   # leading-dim split: free reshape

    scale = 1.0 / float(d_head) ** 2       # reference quirk: / K.size(-1) ** 2
    ctx, probs = attention(qkv, key_pad_mask, scale, n_head, d_model)
    ctx = ctx.reshape(B * S, d_model)      # free reshape (no transpose)

    # Wo projection with residual-add + LayerNorm fused into the epilogue.
    # TODO(synk): the reference adds a torch.random "first_hidden_state" as the
    # residual; we use the layer input (standard residual) instead.
    an = linear_add_layernorm(ctx, params["Wo_w"], params["Wo_b"],
                              xf, params["ln_g"], params["ln_b"])

    # TODO(synk): reference FFN Linear in/out sizes are swapped/broken; we use
    # the intended d_model -> 4*d_model -> d_model with GELU.  No second
    # Add&Norm after the FFN, matching the reference layer.
    h = linear(an, params["ff1_w"], params["ff1_b"], activation="gelu",
               out_dtype=jnp.bfloat16)
    out = linear(h, params["ff2_w"], params["ff2_b"], out_dtype=jnp.bfloat16)

    return out.reshape(B, S, d_model), probs


def bert_pretrain_forward(params, inputs, segments, i_pad, n_head):
    B, S = inputs.shape
    d_model = params["enc_emb"].shape[1]

    # positions = arange + 1, zeroed on pad tokens (embedding gathers in XLA).
    positions = jnp.broadcast_to(jnp.arange(S, dtype=jnp.int32) + 1, (B, S))
    pad_mask = (inputs == i_pad)
    positions = jnp.where(pad_mask, 0, positions)

    x = (jnp.take(params["enc_emb"], inputs, axis=0)
         + jnp.take(params["pos_emb"], positions, axis=0)
         + jnp.take(params["seg_emb"], segments, axis=0))

    # Compact pad mask (B, 1, S); broadcast over queries/heads inside kernel.
    key_pad_mask = pad_mask[:, None, :].astype(jnp.float32)

    fused = fuse_params(params)

    # TODO(synk): the reference Encoder loops the *same* Encoder_Layer n_head
    # times (with a broken call signature); we reuse the shared weights n_head
    # times with the pad mask each time.
    soft_mats = []
    for _ in range(n_head):
        x, probs = encoder_layer(params, fused, x, key_pad_mask,
                                 B, S, n_head, d_model)
        soft_mats.append(probs)
    outputs = x  # (B, S, d_model) bf16

    # BERT head: pooled CLS = tanh(Linear(outputs[:, 0])).  Tiny matmuls:
    # plain jnp is cheaper than a pallas_call launch at M=B, N<=d_model.
    cls = outputs[:, 0, :].astype(jnp.float32)
    pooled = jnp.tanh(cls @ params["pool_w"] + params["pool_b"])

    # TODO(synk): BERTPretrain.forward is `pass` in the reference; we implement
    # the standard pretraining heads implied by __init__.
    logits_cls = pooled @ params["cls_w"]                       # no bias
    logits_lm = lm_head(outputs.reshape(B * S, d_model), params["enc_emb"])
    logits_lm = logits_lm.reshape(B, S, -1)

    return outputs, pooled, logits_cls, logits_lm, soft_mats


# ----------------------------------------------------------------------------
# Driver
# ----------------------------------------------------------------------------

if __name__ == "__main__":
    # Small but lane-friendly shapes (128-multiple feature / seq dims).
    vocab_size = 512
    n_seg_type = 2
    n_head = 4
    batch_size = 2
    d_model = 128
    seq_len_size = 128
    i_pad = 0

    key = jax.random.PRNGKey(0)
    kp, ki = jax.random.split(key)
    params = init_params(kp, vocab_size, n_seg_type, d_model, seq_len_size)

    inputs = jax.random.randint(ki, (batch_size, seq_len_size), 1, vocab_size,
                                dtype=jnp.int32)
    inputs = inputs.at[:, -8:].set(i_pad)  # a few pad tokens per sequence
    segments = jnp.concatenate(
        [jnp.zeros((batch_size, seq_len_size // 2), jnp.int32),
         jnp.ones((batch_size, seq_len_size - seq_len_size // 2), jnp.int32)],
        axis=1)

    fwd = jax.jit(functools.partial(bert_pretrain_forward,
                                    i_pad=i_pad, n_head=n_head))
    outs = fwd(params, inputs, segments)
    jax.block_until_ready(outs)

    outputs, pooled, logits_cls, logits_lm, soft_mats = outs
    assert outputs.shape == (batch_size, seq_len_size, d_model)
    assert pooled.shape == (batch_size, d_model)
    assert logits_cls.shape == (batch_size, 2)
    assert logits_lm.shape == (batch_size, seq_len_size, vocab_size)
    assert len(soft_mats) == n_head
    assert soft_mats[0].shape == (batch_size, n_head, seq_len_size, seq_len_size)

    print("KERNEL_OK")
</pallas_src>

<mosaic_0001>
module attributes {stable_mosaic.version = 11 : i64} {
  func.func @_linear_kernel(%arg0: i32, %arg1: i32, %arg2: i32, %arg3: memref<256x128xbf16, #tpu.memory_space<vmem>>, %arg4: memref<128x384xbf16, #tpu.memory_space<vmem>>, %arg5: memref<1x384xf32, #tpu.memory_space<vmem>>, %arg6: memref<256x384xbf16, #tpu.memory_space<vmem>>, %arg7: memref<256x384xf32, #tpu.memory_space<vmem>>) attributes {dimension_semantics = [#tpu.dimension_semantics<parallel>, #tpu.dimension_semantics<parallel>, #tpu.dimension_semantics<arbitrary>], iteration_bounds = array<i64: 1, 1, 1>, scalar_prefetch = 0 : i64, scratch_operands = 1 : i64, tpu.core_type = #tpu.core_type<tc>, window_params = [{transform_indices = @transform_0, window_bounds = array<i64: 256, 128>}, {transform_indices = @transform_1, window_bounds = array<i64: 128, 384>}, {transform_indices = @transform_2, window_bounds = array<i64: 1, 384>}, {transform_indices = @transform_3, window_bounds = array<i64: 256, 384>}]} {
    %c0_i32 = arith.constant 0 : i32
    %0 = arith.cmpi eq, %arg2, %c0_i32 : i32
    %1 = arith.extui %0 : i1 to i32
    %c0_i32_0 = arith.constant 0 : i32
    %2 = arith.cmpi ne, %1, %c0_i32_0 : i32
    scf.if %2 {
      %cst_10 = arith.constant 0.000000e+00 : f32
      %12 = vector.broadcast %cst_10 : f32 to vector<256x384xf32>
      %c0_11 = arith.constant 0 : index
      %c0_12 = arith.constant 0 : index
      %13 = vector.load %arg7[%c0_11, %c0_12] : memref<256x384xf32, #tpu.memory_space<vmem>>, vector<256x384xf32>
      tpu.vector_store %arg7[%c0_11, %c0_12], %12 {strides = array<i32>} : memref<256x384xf32, #tpu.memory_space<vmem>>, vector<256x384xf32>,
    } else {
    }
    %c0 = arith.constant 0 : index
    %c0_1 = arith.constant 0 : index
    %3 = vector.load %arg7[%c0, %c0_1] : memref<256x384xf32, #tpu.memory_space<vmem>>, vector<256x384xf32>
    %c0_2 = arith.constant 0 : index
    %c0_3 = arith.constant 0 : index
    %4 = vector.load %arg3[%c0_2, %c0_3] : memref<256x128xbf16, #tpu.memory_space<vmem>>, vector<256x128xbf16>
    %c0_4 = arith.constant 0 : index
    %c0_5 = arith.constant 0 : index
    %5 = vector.load %arg4[%c0_4, %c0_5] : memref<128x384xbf16, #tpu.memory_space<vmem>>, vector<128x384xbf16>
    %cst = arith.constant dense<0.000000e+00> : vector<256x384xf32>
    %6 = tpu.matmul %4, %5, %cst {dimension_numbers = #tpu.dot_dimension_numbers<[1], [0], [0], [1], [0, 0, 1, 1], [], []>} : vector<256x128xbf16>, vector<128x384xbf16>, vector<256x384xf32> -> vector<256x384xf32>
    %7 = arith.addf %3, %6 : vector<256x384xf32>
    %c0_6 = arith.constant 0 : index
    %c0_7 = arith.constant 0 : index
    %8 = vector.load %arg7[%c0_6, %c0_7] : memref<256x384xf32, #tpu.memory_space<vmem>>, vector<256x384xf32>
    tpu.vector_store %arg7[%c0_6, %c0_7], %7 {strides = array<i32>} : memref<256x384xf32, #tpu.memory_space<vmem>>, vector<256x384xf32>,
    %c0_i32_8 = arith.constant 0 : i32
    %9 = arith.cmpi eq, %arg2, %c0_i32_8 : i32
    %10 = arith.extui %9 : i1 to i32
    %c0_i32_9 = arith.constant 0 : i32
    %11 = arith.cmpi ne, %10, %c0_i32_9 : i32
    scf.if %11 {
      %c0_10 = arith.constant 0 : index
      %c0_11 = arith.constant 0 : index
      %12 = vector.load %arg7[%c0_10, %c0_11] : memref<256x384xf32, #tpu.memory_space<vmem>>, vector<256x384xf32>
      %c0_12 = arith.constant 0 : index
      %c0_13 = arith.constant 0 : index
      %13 = vector.load %arg5[%c0_12, %c0_13] : memref<1x384xf32, #tpu.memory_space<vmem>>, vector<1x384xf32>
      %14 = vector.broadcast %13 : vector<1x384xf32> to vector<256x384xf32>
      %15 = arith.addf %12, %14 : vector<256x384xf32>
      %16 = arith.truncf %15 : vector<256x384xf32> to vector<256x384xbf16>
      %c0_14 = arith.constant 0 : index
      %c0_15 = arith.constant 0 : index
      %17 = vector.load %arg6[%c0_14, %c0_15] : memref<256x384xbf16, #tpu.memory_space<vmem>>, vector<256x384xbf16>
      tpu.vector_store %arg6[%c0_14, %c0_15], %16 {strides = array<i32>} : memref<256x384xbf16, #tpu.memory_space<vmem>>, vector<256x384xbf16>,
    } else {
    }
    return
  }
  func.func @transform_0(%arg0: i32, %arg1: i32, %arg2: i32) -> (i32, i32) {
    %c0_i32 = arith.constant 0 : i32
    return %arg0, %arg2 : i32, i32
  }
  func.func @transform_1(%arg0: i32, %arg1: i32, %arg2: i32) -> (i32, i32) {
    %c0_i32 = arith.constant 0 : i32
    return %arg2, %arg1 : i32, i32
  }
  func.func @transform_2(%arg0: i32, %arg1: i32, %arg2: i32) -> (i32, i32) {
    %c0_i32 = arith.constant 0 : i32
    %c0_i32_0 = arith.constant 0 : i32
    return %c0_i32, %arg1 : i32, i32
  }
  func.func @transform_3(%arg0: i32, %arg1: i32, %arg2: i32) -> (i32, i32) {
    %c0_i32 = arith.constant 0 : i32
    return %arg0, %arg1 : i32, i32
  }
}

module attributes {stable_mosaic.version = 11 : i64} {
  func.func @_attention_kernel(%arg0: i32, %arg1: memref<1x128x128xbf16, #tpu.memory_space<vmem>>, %arg2: memref<1x128x128xbf16, #tpu.memory_space<vmem>>, %arg3: memref<1x128x128xbf16, #tpu.memory_space<vmem>>, %arg4: memref<1x1x128xf32, #tpu.memory_space<vmem>>, %arg5: memref<1x128x128xbf16, #tpu.memory_space<vmem>>, %arg6: memref<1x4x128x128xbf16, #tpu.memory_space<vmem>>) attributes {dimension_semantics = [#tpu.dimension_semantics<parallel>], iteration_bounds = array<i64: 2>, scalar_prefetch = 0 : i64, scratch_operands = 0 : i64, tpu.core_type = #tpu.core_type<tc>, window_params = [{transform_indices = @transform_0, window_bounds = array<i64: 1, 128, 128>}, {transform_indices = @transform_1, window_bounds = array<i64: 1, 128, 128>}, {transform_indices = @transform_2, window_bounds = array<i64: 1, 128, 128>}, {transform_indices = @transform_3, window_bounds = array<i64: 1, 1, 128>}, {transform_indices = @transform_4, window_bounds = array<i64: 1, 128, 128>}, {transform_indices = @transform_5, window_bounds = array<i64: 1, 4, 128, 128>}]} {
    %c0 = arith.constant 0 : index
    %c0_0 = arith.constant 0 : index
    %c0_1 = arith.constant 0 : index
    %0 = vector.load %arg1[%c0, %c0_0, %c0_1] : memref<1x128x128xbf16, #tpu.memory_space<vmem>>, vector<1x128x128xbf16>
    %1 = vector.shape_cast %0 : vector<1x128x128xbf16> to vector<128x128xbf16>
    %c0_2 = arith.constant 0 : index
    %c0_3 = arith.constant 0 : index
    %c0_4 = arith.constant 0 : index
    %2 = vector.load %arg2[%c0_2, %c0_3, %c0_4] : memref<1x128x128xbf16, #tpu.memory_space<vmem>>, vector<1x128x128xbf16>
    %3 = vector.shape_cast %2 : vector<1x128x128xbf16> to vector<128x128xbf16>
    %c0_5 = arith.constant 0 : index
    %c0_6 = arith.constant 0 : index
    %c0_7 = arith.constant 0 : index
    %4 = vector.load %arg3[%c0_5, %c0_6, %c0_7] : memref<1x128x128xbf16, #tpu.memory_space<vmem>>, vector<1x128x128xbf16>
    %5 = vector.shape_cast %4 : vector<1x128x128xbf16> to vector<128x128xbf16>
    %c0_8 = arith.constant 0 : index
    %c0_9 = arith.constant 0 : index
    %c0_10 = arith.constant 0 : index
    %6 = vector.load %arg4[%c0_8, %c0_9, %c0_10] : memref<1x1x128xf32, #tpu.memory_space<vmem>>, vector<1x1x128xf32>
    %7 = vector.shape_cast %6 : vector<1x1x128xf32> to vector<1x128xf32>
    %8 = vector.extract_strided_slice %1 {offsets = [0, 0], sizes = [128, 32], strides = [1, 1]} : vector<128x128xbf16> to vector<128x32xbf16>
    %9 = vector.extract_strided_slice %3 {offsets = [0, 0], sizes = [128, 32], strides = [1, 1]} : vector<128x128xbf16> to vector<128x32xbf16>
    %10 = vector.extract_strided_slice %5 {offsets = [0, 0], sizes = [128, 32], strides = [1, 1]} : vector<128x128xbf16> to vector<128x32xbf16>
    %cst = arith.constant dense<0.000000e+00> : vector<128x128xf32>
    %11 = tpu.matmul %8, %9, %cst {dimension_numbers = #tpu.dot_dimension_numbers<[1], [1], [0], [0], [0, 0, 1, 0], [], []>} : vector<128x32xbf16>, vector<128x32xbf16>, vector<128x128xf32> -> vector<128x128xf32>
    %cst_11 = arith.constant 9.765625E-4 : f32
    %12 = vector.broadcast %cst_11 : f32 to vector<128x128xf32>
    %13 = arith.mulf %11, %12 : vector<128x128xf32>
    %cst_12 = arith.constant 5.000000e-01 : f32
    %14 = vector.broadcast %cst_12 : f32 to vector<1x128xf32>
    %15 = arith.cmpf ogt, %7, %14 : vector<1x128xf32>
    %cst_13 = arith.constant -1.000000e+09 : f32
    %16 = vector.shape_cast %15 : vector<1x128xi1> to vector<1x128xi1>
    %17 = vector.broadcast %16 : vector<1x128xi1> to vector<128x128xi1>
    %18 = vector.broadcast %cst_13 : f32 to vector<128x128xf32>
    %19 = arith.select %17, %18, %13 : vector<128x128xi1>, vector<128x128xf32>
    %cst_14 = arith.constant dense<0xFF800000> : vector<128xf32>
    %20 = vector.multi_reduction <maximumf>, %19, %cst_14 [1] : vector<128x128xf32> to vector<128xf32>
    %21 = vector.shape_cast %20 : vector<128xf32> to vector<128x1xf32>
    %22 = vector.broadcast %21 : vector<128x1xf32> to vector<128x128xf32>
    %23 = arith.subf %19, %22 : vector<128x128xf32>
    %24 = math.exp %23 : vector<128x128xf32>
    %cst_15 = arith.constant dense<0.000000e+00> : vector<128xf32>
    %25 = vector.multi_reduction <add>, %24, %cst_15 [1] : vector<128x128xf32> to vector<128xf32>
    %26 = vector.shape_cast %25 : vector<128xf32> to vector<128x1xf32>
    %27 = tpu.reciprocal %26 {approx = true} : vector<128x1xf32> -> vector<128x1xf32>
    %28 = vector.broadcast %27 : vector<128x1xf32> to vector<128x128xf32>
    %29 = arith.mulf %24, %28 : vector<128x128xf32>
    %30 = arith.truncf %29 : vector<128x128xf32> to vector<128x128xbf16>
    %cst_16 = arith.constant dense<0.000000e+00> : vector<128x32xf32>
    %31 = tpu.matmul %30, %10, %cst_16 {dimension_numbers = #tpu.dot_dimension_numbers<[1], [0], [0], [1], [0, 0, 1, 1], [], []>} : vector<128x128xbf16>, vector<128x32xbf16>, vector<128x32xf32> -> vector<128x32xf32>
    %32 = arith.truncf %29 : vector<128x128xf32> to vector<128x128xbf16>
    %c0_17 = arith.constant 0 : index
    %c0_18 = arith.constant 0 : index
    %c0_19 = arith.constant 0 : index
    %c0_20 = arith.constant 0 : index
    %33 = vector.load %arg6[%c0_17, %c0_18, %c0_19, %c0_20] : memref<1x4x128x128xbf16, #tpu.memory_space<vmem>>, vector<1x1x128x128xbf16>
    %34 = vector.shape_cast %33 : vector<1x1x128x128xbf16> to vector<128x128xbf16>
    %35 = vector.shape_cast %32 : vector<128x128xbf16> to vector<1x1x128x128xbf16>
    tpu.vector_store %arg6[%c0_17, %c0_18, %c0_19, %c0_20], %35 {strides = array<i32>} : memref<1x4x128x128xbf16, #tpu.memory_space<vmem>>, vector<1x1x128x128xbf16>,
    %36 = vector.extract_strided_slice %1 {offsets = [0, 32], sizes = [128, 32], strides = [1, 1]} : vector<128x128xbf16> to vector<128x32xbf16>
    %37 = vector.extract_strided_slice %3 {offsets = [0, 32], sizes = [128, 32], strides = [1, 1]} : vector<128x128xbf16> to vector<128x32xbf16>
    %38 = vector.extract_strided_slice %5 {offsets = [0, 32], sizes = [128, 32], strides = [1, 1]} : vector<128x128xbf16> to vector<128x32xbf16>
    %cst_21 = arith.constant dense<0.000000e+00> : vector<128x128xf32>
    %39 = tpu.matmul %36, %37, %cst_21 {dimension_numbers = #tpu.dot_dimension_numbers<[1], [1], [0], [0], [0, 0, 1, 0], [], []>} : vector<128x32xbf16>, vector<128x32xbf16>, vector<128x128xf32> -> vector<128x128xf32>
    %cst_22 = arith.constant 9.765625E-4 : f32
    %40 = vector.broadcast %cst_22 : f32 to vector<128x128xf32>
    %41 = arith.mulf %39, %40 : vector<128x128xf32>
    %cst_23 = arith.constant 5.000000e-01 : f32
    %42 = vector.broadcast %cst_23 : f32 to vector<1x128xf32>
    %43 = arith.cmpf ogt, %7, %42 : vector<1x128xf32>
    %cst_24 = arith.constant -1.000000e+09 : f32
    %44 = vector.shape_cast %43 : vector<1x128xi1> to vector<1x128xi1>
    %45 = vector.broadcast %44 : vector<1x128xi1> to vector<128x128xi1>
    %46 = vector.broadcast %cst_24 : f32 to vector<128x128xf32>
    %47 = arith.select %45, %46, %41 : vector<128x128xi1>, vector<128x128xf32>
    %cst_25 = arith.constant dense<0xFF800000> : vector<128xf32>
    %48 = vector.multi_reduction <maximumf>, %47, %cst_25 [1] : vector<128x128xf32> to vector<128xf32>
    %49 = vector.shape_cast %48 : vector<128xf32> to vector<128x1xf32>
    %50 = vector.broadcast %49 : vector<128x1xf32> to vector<128x128xf32>
    %51 = arith.subf %47, %50 : vector<128x128xf32>
    %52 = math.exp %51 : vector<128x128xf32>
    %cst_26 = arith.constant dense<0.000000e+00> : vector<128xf32>
    %53 = vector.multi_reduction <add>, %52, %cst_26 [1] : vector<128x128xf32> to vector<128xf32>
    %54 = vector.shape_cast %53 : vector<128xf32> to vector<128x1xf32>
    %55 = tpu.reciprocal %54 {approx = true} : vector<128x1xf32> -> vector<128x1xf32>
    %56 = vector.broadcast %55 : vector<128x1xf32> to vector<128x128xf32>
    %57 = arith.mulf %52, %56 : vector<128x128xf32>
    %58 = arith.truncf %57 : vector<128x128xf32> to vector<128x128xbf16>
    %cst_27 = arith.constant dense<0.000000e+00> : vector<128x32xf32>
    %59 = tpu.matmul %58, %38, %cst_27 {dimension_numbers = #tpu.dot_dimension_numbers<[1], [0], [0], [1], [0, 0, 1, 1], [], []>} : vector<128x128xbf16>, vector<128x32xbf16>, vector<128x32xf32> -> vector<128x32xf32>
    %60 = arith.truncf %57 : vector<128x128xf32> to vector<128x128xbf16>
    %c0_28 = arith.constant 0 : index
    %c1 = arith.constant 1 : index
    %c0_29 = arith.constant 0 : index
    %c0_30 = arith.constant 0 : index
    %61 = vector.load %arg6[%c0_28, %c1, %c0_29, %c0_30] : memref<1x4x128x128xbf16, #tpu.memory_space<vmem>>, vector<1x1x128x128xbf16>
    %62 = vector.shape_cast %61 : vector<1x1x128x128xbf16> to vector<128x128xbf16>
    %63 = vector.shape_cast %60 : vector<128x128xbf16> to vector<1x1x128x128xbf16>
    tpu.vector_store %arg6[%c0_28, %c1, %c0_29, %c0_30], %63 {strides = array<i32>} : memref<1x4x128x128xbf16, #tpu.memory_space<vmem>>, vector<1x1x128x128xbf16>,
    %64 = vector.extract_strided_slice %1 {offsets = [0, 64], sizes = [128, 32], strides = [1, 1]} : vector<128x128xbf16> to vector<128x32xbf16>
    %65 = vector.extract_strided_slice %3 {offsets = [0, 64], sizes = [128, 32], strides = [1, 1]} : vector<128x128xbf16> to vector<128x32xbf16>
    %66 = vector.extract_strided_slice %5 {offsets = [0, 64], sizes = [128, 32], strides = [1, 1]} : vector<128x128xbf16> to vector<128x32xbf16>
    %cst_31 = arith.constant dense<0.000000e+00> : vector<128x128xf32>
    %67 = tpu.matmul %64, %65, %cst_31 {dimension_numbers = #tpu.dot_dimension_numbers<[1], [1], [0], [0], [0, 0, 1, 0], [], []>} : vector<128x32xbf16>, vector<128x32xbf16>, vector<128x128xf32> -> vector<128x128xf32>
    %cst_32 = arith.constant 9.765625E-4 : f32
    %68 = vector.broadcast %cst_32 : f32 to vector<128x128xf32>
    %69 = arith.mulf %67, %68 : vector<128x128xf32>
    %cst_33 = arith.constant 5.000000e-01 : f32
    %70 = vector.broadcast %cst_33 : f32 to vector<1x128xf32>
    %71 = arith.cmpf ogt, %7, %70 : vector<1x128xf32>
    %cst_34 = arith.constant -1.000000e+09 : f32
    %72 = vector.shape_cast %71 : vector<1x128xi1> to vector<1x128xi1>
    %73 = vector.broadcast %72 : vector<1x128xi1> to vector<128x128xi1>
    %74 = vector.broadcast %cst_34 : f32 to vector<128x128xf32>
    %75 = arith.select %73, %74, %69 : vector<128x128xi1>, vector<128x128xf32>
    %cst_35 = arith.constant dense<0xFF800000> : vector<128xf32>
    %76 = vector.multi_reduction <maximumf>, %75, %cst_35 [1] : vector<128x128xf32> to vector<128xf32>
    %77 = vector.shape_cast %76 : vector<128xf32> to vector<128x1xf32>
    %78 = vector.broadcast %77 : vector<128x1xf32> to vector<128x128xf32>
    %79 = arith.subf %75, %78 : vector<128x128xf32>
    %80 = math.exp %79 : vector<128x128xf32>
    %cst_36 = arith.constant dense<0.000000e+00> : vector<128xf32>
    %81 = vector.multi_reduction <add>, %80, %cst_36 [1] : vector<128x128xf32> to vector<128xf32>
    %82 = vector.shape_cast %81 : vector<128xf32> to vector<128x1xf32>
    %83 = tpu.reciprocal %82 {approx = true} : vector<128x1xf32> -> vector<128x1xf32>
    %84 = vector.broadcast %83 : vector<128x1xf32> to vector<128x128xf32>
    %85 = arith.mulf %80, %84 : vector<128x128xf32>
    %86 = arith.truncf %85 : vector<128x128xf32> to vector<128x128xbf16>
    %cst_37 = arith.constant dense<0.000000e+00> : vector<128x32xf32>
    %87 = tpu.matmul %86, %66, %cst_37 {dimension_numbers = #tpu.dot_dimension_numbers<[1], [0], [0], [1], [0, 0, 1, 1], [], []>} : vector<128x128xbf16>, vector<128x32xbf16>, vector<128x32xf32> -> vector<128x32xf32>
    %88 = arith.truncf %85 : vector<128x128xf32> to vector<128x128xbf16>
    %c0_38 = arith.constant 0 : index
    %c2 = arith.constant 2 : index
    %c0_39 = arith.constant 0 : index
    %c0_40 = arith.constant 0 : index
    %89 = vector.load %arg6[%c0_38, %c2, %c0_39, %c0_40] : memref<1x4x128x128xbf16, #tpu.memory_space<vmem>>, vector<1x1x128x128xbf16>
    %90 = vector.shape_cast %89 : vector<1x1x128x128xbf16> to vector<128x128xbf16>
    %91 = vector.shape_cast %88 : vector<128x128xbf16> to vector<1x1x128x128xbf16>
    tpu.vector_store %arg6[%c0_38, %c2, %c0_39, %c0_40], %91 {strides = array<i32>} : memref<1x4x128x128xbf16, #tpu.memory_space<vmem>>, vector<1x1x128x128xbf16>,
    %92 = vector.extract_strided_slice %1 {offsets = [0, 96], sizes = [128, 32], strides = [1, 1]} : vector<128x128xbf16> to vector<128x32xbf16>
    %93 = vector.extract_strided_slice %3 {offsets = [0, 96], sizes = [128, 32], strides = [1, 1]} : vector<128x128xbf16> to vector<128x32xbf16>
    %94 = vector.extract_strided_slice %5 {offsets = [0, 96], sizes = [128, 32], strides = [1, 1]} : vector<128x128xbf16> to vector<128x32xbf16>
    %cst_41 = arith.constant dense<0.000000e+00> : vector<128x128xf32>
    %95 = tpu.matmul %92, %93, %cst_41 {dimension_numbers = #tpu.dot_dimension_numbers<[1], [1], [0], [0], [0, 0, 1, 0], [], []>} : vector<128x32xbf16>, vector<128x32xbf16>, vector<128x128xf32> -> vector<128x128xf32>
    %cst_42 = arith.constant 9.765625E-4 : f32
    %96 = vector.broadcast %cst_42 : f32 to vector<128x128xf32>
    %97 = arith.mulf %95, %96 : vector<128x128xf32>
    %cst_43 = arith.constant 5.000000e-01 : f32
    %98 = vector.broadcast %cst_43 : f32 to vector<1x128xf32>
    %99 = arith.cmpf ogt, %7, %98 : vector<1x128xf32>
    %cst_44 = arith.constant -1.000000e+09 : f32
    %100 = vector.shape_cast %99 : vector<1x128xi1> to vector<1x128xi1>
    %101 = vector.broadcast %100 : vector<1x128xi1> to vector<128x128xi1>
    %102 = vector.broadcast %cst_44 : f32 to vector<128x128xf32>
    %103 = arith.select %101, %102, %97 : vector<128x128xi1>, vector<128x128xf32>
    %cst_45 = arith.constant dense<0xFF800000> : vector<128xf32>
    %104 = vector.multi_reduction <maximumf>, %103, %cst_45 [1] : vector<128x128xf32> to vector<128xf32>
    %105 = vector.shape_cast %104 : vector<128xf32> to vector<128x1xf32>
    %106 = vector.broadcast %105 : vector<128x1xf32> to vector<128x128xf32>
    %107 = arith.subf %103, %106 : vector<128x128xf32>
    %108 = math.exp %107 : vector<128x128xf32>
    %cst_46 = arith.constant dense<0.000000e+00> : vector<128xf32>
    %109 = vector.multi_reduction <add>, %108, %cst_46 [1] : vector<128x128xf32> to vector<128xf32>
    %110 = vector.shape_cast %109 : vector<128xf32> to vector<128x1xf32>
    %111 = tpu.reciprocal %110 {approx = true} : vector<128x1xf32> -> vector<128x1xf32>
    %112 = vector.broadcast %111 : vector<128x1xf32> to vector<128x128xf32>
    %113 = arith.mulf %108, %112 : vector<128x128xf32>
    %114 = arith.truncf %113 : vector<128x128xf32> to vector<128x128xbf16>
    %cst_47 = arith.constant dense<0.000000e+00> : vector<128x32xf32>
    %115 = tpu.matmul %114, %94, %cst_47 {dimension_numbers = #tpu.dot_dimension_numbers<[1], [0], [0], [1], [0, 0, 1, 1], [], []>} : vector<128x128xbf16>, vector<128x32xbf16>, vector<128x32xf32> -> vector<128x32xf32>
    %116 = arith.truncf %113 : vector<128x128xf32> to vector<128x128xbf16>
    %c0_48 = arith.constant 0 : index
    %c3 = arith.constant 3 : index
    %c0_49 = arith.constant 0 : index
    %c0_50 = arith.constant 0 : index
    %117 = vector.load %arg6[%c0_48, %c3, %c0_49, %c0_50] : memref<1x4x128x128xbf16, #tpu.memory_space<vmem>>, vector<1x1x128x128xbf16>
    %118 = vector.shape_cast %117 : vector<1x1x128x128xbf16> to vector<128x128xbf16>
    %119 = vector.shape_cast %116 : vector<128x128xbf16> to vector<1x1x128x128xbf16>
    tpu.vector_store %arg6[%c0_48, %c3, %c0_49, %c0_50], %119 {strides = array<i32>} : memref<1x4x128x128xbf16, #tpu.memory_space<vmem>>, vector<1x1x128x128xbf16>,
    %120 = tpu.concatenate %31, %59, %87, %115 in 1 : vector<128x32xf32>, vector<128x32xf32>, vector<128x32xf32>, vector<128x32xf32> -> vector<128x128xf32>
    %121 = arith.truncf %120 : vector<128x128xf32> to vector<128x128xbf16>
    %c0_51 = arith.constant 0 : index
    %c0_52 = arith.constant 0 : index
    %c0_53 = arith.constant 0 : index
    %122 = vector.load %arg5[%c0_51, %c0_52, %c0_53] : memref<1x128x128xbf16, #tpu.memory_space<vmem>>, vector<1x128x128xbf16>
    %123 = vector.shape_cast %122 : vector<1x128x128xbf16> to vector<128x128xbf16>
    %124 = vector.shape_cast %121 : vector<128x128xbf16> to vector<1x128x128xbf16>
    tpu.vector_store %arg5[%c0_51, %c0_52, %c0_53], %124 {strides = array<i32>} : memref<1x128x128xbf16, #tpu.memory_space<vmem>>, vector<1x128x128xbf16>,
    return
  }
  func.func @transform_0(%arg0: i32) -> (i32, i32, i32) {
    %c0_i32 = arith.constant 0 : i32
    %c0_i32_0 = arith.constant 0 : i32
    %c0_i32_1 = arith.constant 0 : i32
    return %arg0, %c0_i32, %c0_i32_0 : i32, i32, i32
  }
  func.func @transform_1(%arg0: i32) -> (i32, i32, i32) {
    %c0_i32 = arith.constant 0 : i32
    %c1_i32 = arith.constant 1 : i32
    %c0_i32_0 = arith.constant 0 : i32
    return %arg0, %c0_i32, %c1_i32 : i32, i32, i32
  }
  func.func @transform_2(%arg0: i32) -> (i32, i32, i32) {
    %c0_i32 = arith.constant 0 : i32
    %c2_i32 = arith.constant 2 : i32
    %c0_i32_0 = arith.constant 0 : i32
    return %arg0, %c0_i32, %c2_i32 : i32, i32, i32
  }
  func.func @transform_3(%arg0: i32) -> (i32, i32, i32) {
    %c0_i32 = arith.constant 0 : i32
    %c0_i32_0 = arith.constant 0 : i32
    %c0_i32_1 = arith.constant 0 : i32
    return %arg0, %c0_i32, %c0_i32_0 : i32, i32, i32
  }
  func.func @transform_4(%arg0: i32) -> (i32, i32, i32) {
    %c0_i32 = arith.constant 0 : i32
    %c0_i32_0 = arith.constant 0 : i32
    %c0_i32_1 = arith.constant 0 : i32
    return %arg0, %c0_i32, %c0_i32_0 : i32, i32, i32
  }
  func.func @transform_5(%arg0: i32) -> (i32, i32, i32, i32) {
    %c0_i32 = arith.constant 0 : i32
    %c0_i32_0 = arith.constant 0 : i32
    %c0_i32_1 = arith.constant 0 : i32
    %c0_i32_2 = arith.constant 0 : i32
    return %arg0, %c0_i32, %c0_i32_0, %c0_i32_1 : i32, i32, i32, i32
  }
}

module attributes {stable_mosaic.version = 11 : i64} {
  func.func @_linear_add_ln_kernel(%arg0: i32, %arg1: i32, %arg2: memref<256x128xbf16, #tpu.memory_space<vmem>>, %arg3: memref<128x128xbf16, #tpu.memory_space<vmem>>, %arg4: memref<1x128xf32, #tpu.memory_space<vmem>>, %arg5: memref<256x128xbf16, #tpu.memory_space<vmem>>, %arg6: memref<1x128xf32, #tpu.memory_space<vmem>>, %arg7: memref<1x128xf32, #tpu.memory_space<vmem>>, %arg8: memref<256x128xbf16, #tpu.memory_space<vmem>>, %arg9: memref<256x128xf32, #tpu.memory_space<vmem>>) attributes {dimension_semantics = [#tpu.dimension_semantics<parallel>, #tpu.dimension_semantics<arbitrary>], iteration_bounds = array<i64: 1, 1>, scalar_prefetch = 0 : i64, scratch_operands = 1 : i64, tpu.core_type = #tpu.core_type<tc>, window_params = [{transform_indices = @transform_0, window_bounds = array<i64: 256, 128>}, {transform_indices = @transform_1, window_bounds = array<i64: 128, 128>}, {pipeline_mode = #tpu.pipeline_mode<synchronous>, transform_indices = @transform_2, window_bounds = array<i64: 1, 128>}, {transform_indices = @transform_3, window_bounds = array<i64: 256, 128>}, {pipeline_mode = #tpu.pipeline_mode<synchronous>, transform_indices = @transform_4, window_bounds = array<i64: 1, 128>}, {pipeline_mode = #tpu.pipeline_mode<synchronous>, transform_indices = @transform_5, window_bounds = array<i64: 1, 128>}, {transform_indices = @transform_6, window_bounds = array<i64: 256, 128>}]} {
    %c0_i32 = arith.constant 0 : i32
    %0 = arith.cmpi eq, %arg1, %c0_i32 : i32
    %1 = arith.extui %0 : i1 to i32
    %c0_i32_0 = arith.constant 0 : i32
    %2 = arith.cmpi ne, %1, %c0_i32_0 : i32
    scf.if %2 {
      %cst_10 = arith.constant 0.000000e+00 : f32
      %12 = vector.broadcast %cst_10 : f32 to vector<256x128xf32>
      %c0_11 = arith.constant 0 : index
      %c0_12 = arith.constant 0 : index
      %13 = vector.load %arg9[%c0_11, %c0_12] : memref<256x128xf32, #tpu.memory_space<vmem>>, vector<256x128xf32>
      tpu.vector_store %arg9[%c0_11, %c0_12], %12 {strides = array<i32>} : memref<256x128xf32, #tpu.memory_space<vmem>>, vector<256x128xf32>,
    } else {
    }
    %c0 = arith.constant 0 : index
    %c0_1 = arith.constant 0 : index
    %3 = vector.load %arg9[%c0, %c0_1] : memref<256x128xf32, #tpu.memory_space<vmem>>, vector<256x128xf32>
    %c0_2 = arith.constant 0 : index
    %c0_3 = arith.constant 0 : index
    %4 = vector.load %arg2[%c0_2, %c0_3] : memref<256x128xbf16, #tpu.memory_space<vmem>>, vector<256x128xbf16>
    %c0_4 = arith.constant 0 : index
    %c0_5 = arith.constant 0 : index
    %5 = vector.load %arg3[%c0_4, %c0_5] : memref<128x128xbf16, #tpu.memory_space<vmem>>, vector<128x128xbf16>
    %cst = arith.constant dense<0.000000e+00> : vector<256x128xf32>
    %6 = tpu.matmul %4, %5, %cst {dimension_numbers = #tpu.dot_dimension_numbers<[1], [0], [0], [1], [0, 0, 1, 1], [], []>} : vector<256x128xbf16>, vector<128x128xbf16>, vector<256x128xf32> -> vector<256x128xf32>
    %7 = arith.addf %3, %6 : vector<256x128xf32>
    %c0_6 = arith.constant 0 : index
    %c0_7 = arith.constant 0 : index
    %8 = vector.load %arg9[%c0_6, %c0_7] : memref<256x128xf32, #tpu.memory_space<vmem>>, vector<256x128xf32>
    tpu.vector_store %arg9[%c0_6, %c0_7], %7 {strides = array<i32>} : memref<256x128xf32, #tpu.memory_space<vmem>>, vector<256x128xf32>,
    %c0_i32_8 = arith.constant 0 : i32
    %9 = arith.cmpi eq, %arg1, %c0_i32_8 : i32
    %10 = arith.extui %9 : i1 to i32
    %c0_i32_9 = arith.constant 0 : i32
    %11 = arith.cmpi ne, %10, %c0_i32_9 : i32
    scf.if %11 {
      %c0_10 = arith.constant 0 : index
      %c0_11 = arith.constant 0 : index
      %12 = vector.load %arg9[%c0_10, %c0_11] : memref<256x128xf32, #tpu.memory_space<vmem>>, vector<256x128xf32>
      %c0_12 = arith.constant 0 : index
      %c0_13 = arith.constant 0 : index
      %13 = vector.load %arg4[%c0_12, %c0_13] : memref<1x128xf32, #tpu.memory_space<vmem>>, vector<1x128xf32>
      %14 = vector.broadcast %13 : vector<1x128xf32> to vector<256x128xf32>
      %15 = arith.addf %12, %14 : vector<256x128xf32>
      %c0_14 = arith.constant 0 : index
      %c0_15 = arith.constant 0 : index
      %16 = vector.load %arg5[%c0_14, %c0_15] : memref<256x128xbf16, #tpu.memory_space<vmem>>, vector<256x128xbf16>
      %17 = arith.extf %16 : vector<256x128xbf16> to vector<256x128xf32>
      %18 = arith.addf %15, %17 : vector<256x128xf32>
      %cst_16 = arith.constant dense<0.000000e+00> : vector<256xf32>
      %19 = vector.multi_reduction <add>, %18, %cst_16 [1] : vector<256x128xf32> to vector<256xf32>
      %20 = vector.shape_cast %19 : vector<256xf32> to vector<256x1xf32>
      %cst_17 = arith.constant 1.280000e+02 : f32
      %21 = vector.broadcast %cst_17 : f32 to vector<256x1xf32>
      %22 = arith.divf %20, %21 : vector<256x1xf32>
      %23 = vector.broadcast %22 : vector<256x1xf32> to vector<256x128xf32>
      %24 = arith.subf %18, %23 : vector<256x128xf32>
      %25 = arith.mulf %24, %24 : vector<256x128xf32>
      %cst_18 = arith.constant dense<0.000000e+00> : vector<256xf32>
      %26 = vector.multi_reduction <add>, %25, %cst_18 [1] : vector<256x128xf32> to vector<256xf32>
      %27 = vector.shape_cast %26 : vector<256xf32> to vector<256x1xf32>
      %cst_19 = arith.constant 1.280000e+02 : f32
      %28 = vector.broadcast %cst_19 : f32 to vector<256x1xf32>
      %29 = arith.divf %27, %28 : vector<256x1xf32>
      %cst_20 = arith.constant 9.99999974E-6 : f32
      %30 = vector.broadcast %cst_20 : f32 to vector<256x1xf32>
      %31 = arith.addf %29, %30 : vector<256x1xf32>
      %32 = math.rsqrt %31 : vector<256x1xf32>
      %33 = vector.broadcast %32 : vector<256x1xf32> to vector<256x128xf32>
      %34 = arith.mulf %24, %33 : vector<256x128xf32>
      %c0_21 = arith.constant 0 : index
      %c0_22 = arith.constant 0 : index
      %35 = vector.load %arg6[%c0_21, %c0_22] : memref<1x128xf32, #tpu.memory_space<vmem>>, vector<1x128xf32>
      %36 = vector.broadcast %35 : vector<1x128xf32> to vector<256x128xf32>
      %37 = arith.mulf %34, %36 : vector<256x128xf32>
      %c0_23 = arith.constant 0 : index
      %c0_24 = arith.constant 0 : index
      %38 = vector.load %arg7[%c0_23, %c0_24] : memref<1x128xf32, #tpu.memory_space<vmem>>, vector<1x128xf32>
      %39 = vector.broadcast %38 : vector<1x128xf32> to vector<256x128xf32>
      %40 = arith.addf %37, %39 : vector<256x128xf32>
      %41 = arith.truncf %40 : vector<256x128xf32> to vector<256x128xbf16>
      %c0_25 = arith.constant 0 : index
      %c0_26 = arith.constant 0 : index
      %42 = vector.load %arg8[%c0_25, %c0_26] : memref<256x128xbf16, #tpu.memory_space<vmem>>, vector<256x128xbf16>
      tpu.vector_store %arg8[%c0_25, %c0_26], %41 {strides = array<i32>} : memref<256x128xbf16, #tpu.memory_space<vmem>>, vector<256x128xbf16>,
    } else {
    }
    return
  }
  func.func @transform_0(%arg0: i32, %arg1: i32) -> (i32, i32) {
    %c0_i32 = arith.constant 0 : i32
    return %arg0, %arg1 : i32, i32
  }
  func.func @transform_1(%arg0: i32, %arg1: i32) -> (i32, i32) {
    %c0_i32 = arith.constant 0 : i32
    %c0_i32_0 = arith.constant 0 : i32
    return %arg1, %c0_i32 : i32, i32
  }
  func.func @transform_2(%arg0: i32, %arg1: i32) -> (i32, i32) {
    %c0_i32 = arith.constant 0 : i32
    %c0_i32_0 = arith.constant 0 : i32
    %c0_i32_1 = arith.constant 0 : i32
    return %c0_i32, %c0_i32_0 : i32, i32
  }
  func.func @transform_3(%arg0: i32, %arg1: i32) -> (i32, i32) {
    %c0_i32 = arith.constant 0 : i32
    %c0_i32_0 = arith.constant 0 : i32
    return %arg0, %c0_i32 : i32, i32
  }
  func.func @transform_4(%arg0: i32, %arg1: i32) -> (i32, i32) {
    %c0_i32 = arith.constant 0 : i32
    %c0_i32_0 = arith.constant 0 : i32
    %c0_i32_1 = arith.constant 0 : i32
    return %c0_i32, %c0_i32_0 : i32, i32
  }
  func.func @transform_5(%arg0: i32, %arg1: i32) -> (i32, i32) {
    %c0_i32 = arith.constant 0 : i32
    %c0_i32_0 = arith.constant 0 : i32
    %c0_i32_1 = arith.constant 0 : i32
    return %c0_i32, %c0_i32_0 : i32, i32
  }
  func.func @transform_6(%arg0: i32, %arg1: i32) -> (i32, i32) {
    %c0_i32 = arith.constant 0 : i32
    %c0_i32_0 = arith.constant 0 : i32
    return %arg0, %c0_i32 : i32, i32
  }
}

module attributes {stable_mosaic.version = 11 : i64} {
  func.func @_linear_kernel(%arg0: i32, %arg1: i32, %arg2: i32, %arg3: memref<256x128xbf16, #tpu.memory_space<vmem>>, %arg4: memref<128x512xbf16, #tpu.memory_space<vmem>>, %arg5: memref<1x512xf32, #tpu.memory_space<vmem>>, %arg6: memref<256x512xbf16, #tpu.memory_space<vmem>>, %arg7: memref<256x512xf32, #tpu.memory_space<vmem>>) attributes {dimension_semantics = [#tpu.dimension_semantics<parallel>, #tpu.dimension_semantics<parallel>, #tpu.dimension_semantics<arbitrary>], iteration_bounds = array<i64: 1, 1, 1>, scalar_prefetch = 0 : i64, scratch_operands = 1 : i64, tpu.core_type = #tpu.core_type<tc>, window_params = [{transform_indices = @transform_0, window_bounds = array<i64: 256, 128>}, {transform_indices = @transform_1, window_bounds = array<i64: 128, 512>}, {transform_indices = @transform_2, window_bounds = array<i64: 1, 512>}, {transform_indices = @transform_3, window_bounds = array<i64: 256, 512>}]} {
    %c0_i32 = arith.constant 0 : i32
    %0 = arith.cmpi eq, %arg2, %c0_i32 : i32
    %1 = arith.extui %0 : i1 to i32
    %c0_i32_0 = arith.constant 0 : i32
    %2 = arith.cmpi ne, %1, %c0_i32_0 : i32
    scf.if %2 {
      %cst_10 = arith.constant 0.000000e+00 : f32
      %12 = vector.broadcast %cst_10 : f32 to vector<256x512xf32>
      %c0_11 = arith.constant 0 : index
      %c0_12 = arith.constant 0 : index
      %13 = vector.load %arg7[%c0_11, %c0_12] : memref<256x512xf32, #tpu.memory_space<vmem>>, vector<256x512xf32>
      tpu.vector_store %arg7[%c0_11, %c0_12], %12 {strides = array<i32>} : memref<256x512xf32, #tpu.memory_space<vmem>>, vector<256x512xf32>,
    } else {
    }
    %c0 = arith.constant 0 : index
    %c0_1 = arith.constant 0 : index
    %3 = vector.load %arg7[%c0, %c0_1] : memref<256x512xf32, #tpu.memory_space<vmem>>, vector<256x512xf32>
    %c0_2 = arith.constant 0 : index
    %c0_3 = arith.constant 0 : index
    %4 = vector.load %arg3[%c0_2, %c0_3] : memref<256x128xbf16, #tpu.memory_space<vmem>>, vector<256x128xbf16>
    %c0_4 = arith.constant 0 : index
    %c0_5 = arith.constant 0 : index
    %5 = vector.load %arg4[%c0_4, %c0_5] : memref<128x512xbf16, #tpu.memory_space<vmem>>, vector<128x512xbf16>
    %cst = arith.constant dense<0.000000e+00> : vector<256x512xf32>
    %6 = tpu.matmul %4, %5, %cst {dimension_numbers = #tpu.dot_dimension_numbers<[1], [0], [0], [1], [0, 0, 1, 1], [], []>} : vector<256x128xbf16>, vector<128x512xbf16>, vector<256x512xf32> -> vector<256x512xf32>
    %7 = arith.addf %3, %6 : vector<256x512xf32>
    %c0_6 = arith.constant 0 : index
    %c0_7 = arith.constant 0 : index
    %8 = vector.load %arg7[%c0_6, %c0_7] : memref<256x512xf32, #tpu.memory_space<vmem>>, vector<256x512xf32>
    tpu.vector_store %arg7[%c0_6, %c0_7], %7 {strides = array<i32>} : memref<256x512xf32, #tpu.memory_space<vmem>>, vector<256x512xf32>,
    %c0_i32_8 = arith.constant 0 : i32
    %9 = arith.cmpi eq, %arg2, %c0_i32_8 : i32
    %10 = arith.extui %9 : i1 to i32
    %c0_i32_9 = arith.constant 0 : i32
    %11 = arith.cmpi ne, %10, %c0_i32_9 : i32
    scf.if %11 {
      %c0_10 = arith.constant 0 : index
      %c0_11 = arith.constant 0 : index
      %12 = vector.load %arg7[%c0_10, %c0_11] : memref<256x512xf32, #tpu.memory_space<vmem>>, vector<256x512xf32>
      %c0_12 = arith.constant 0 : index
      %c0_13 = arith.constant 0 : index
      %13 = vector.load %arg5[%c0_12, %c0_13] : memref<1x512xf32, #tpu.memory_space<vmem>>, vector<1x512xf32>
      %14 = vector.broadcast %13 : vector<1x512xf32> to vector<256x512xf32>
      %15 = arith.addf %12, %14 : vector<256x512xf32>
      %cst_14 = arith.constant 5.000000e-01 : f32
      %16 = vector.broadcast %cst_14 : f32 to vector<256x512xf32>
      %17 = arith.mulf %16, %15 : vector<256x512xf32>
      %cst_15 = arith.constant 4.471500e-02 : f32
      %18 = vector.broadcast %cst_15 : f32 to vector<256x512xf32>
      %19 = arith.mulf %18, %15 : vector<256x512xf32>
      %20 = arith.mulf %19, %15 : vector<256x512xf32>
      %21 = arith.mulf %20, %15 : vector<256x512xf32>
      %22 = arith.addf %15, %21 : vector<256x512xf32>
      %cst_16 = arith.constant 0.797884583 : f32
      %23 = vector.broadcast %cst_16 : f32 to vector<256x512xf32>
      %24 = arith.mulf %23, %22 : vector<256x512xf32>
      %25 = math.tanh %24 : vector<256x512xf32>
      %cst_17 = arith.constant 1.000000e+00 : f32
      %26 = vector.broadcast %cst_17 : f32 to vector<256x512xf32>
      %27 = arith.addf %26, %25 : vector<256x512xf32>
      %28 = arith.mulf %17, %27 : vector<256x512xf32>
      %29 = arith.truncf %28 : vector<256x512xf32> to vector<256x512xbf16>
      %c0_18 = arith.constant 0 : index
      %c0_19 = arith.constant 0 : index
      %30 = vector.load %arg6[%c0_18, %c0_19] : memref<256x512xbf16, #tpu.memory_space<vmem>>, vector<256x512xbf16>
      tpu.vector_store %arg6[%c0_18, %c0_19], %29 {strides = array<i32>} : memref<256x512xbf16, #tpu.memory_space<vmem>>, vector<256x512xbf16>,
    } else {
    }
    return
  }
  func.func @transform_0(%arg0: i32, %arg1: i32, %arg2: i32) -> (i32, i32) {
    %c0_i32 = arith.constant 0 : i32
    return %arg0, %arg2 : i32, i32
  }
  func.func @transform_1(%arg0: i32, %arg1: i32, %arg2: i32) -> (i32, i32) {
    %c0_i32 = arith.constant 0 : i32
    return %arg2, %arg1 : i32, i32
  }
  func.func @transform_2(%arg0: i32, %arg1: i32, %arg2: i32) -> (i32, i32) {
    %c0_i32 = arith.constant 0 : i32
    %c0_i32_0 = arith.constant 0 : i32
    return %c0_i32, %arg1 : i32, i32
  }
  func.func @transform_3(%arg0: i32, %arg1: i32, %arg2: i32) -> (i32, i32) {
    %c0_i32 = arith.constant 0 : i32
    return %arg0, %arg1 : i32, i32
  }
}

module attributes {stable_mosaic.version = 11 : i64} {
  func.func @_linear_kernel(%arg0: i32, %arg1: i32, %arg2: i32, %arg3: memref<256x512xbf16, #tpu.memory_space<vmem>>, %arg4: memref<512x128xbf16, #tpu.memory_space<vmem>>, %arg5: memref<1x128xf32, #tpu.memory_space<vmem>>, %arg6: memref<256x128xbf16, #tpu.memory_space<vmem>>, %arg7: memref<256x128xf32, #tpu.memory_space<vmem>>) attributes {dimension_semantics = [#tpu.dimension_semantics<parallel>, #tpu.dimension_semantics<parallel>, #tpu.dimension_semantics<arbitrary>], iteration_bounds = array<i64: 1, 1, 1>, scalar_prefetch = 0 : i64, scratch_operands = 1 : i64, tpu.core_type = #tpu.core_type<tc>, window_params = [{transform_indices = @transform_0, window_bounds = array<i64: 256, 512>}, {transform_indices = @transform_1, window_bounds = array<i64: 512, 128>}, {transform_indices = @transform_2, window_bounds = array<i64: 1, 128>}, {transform_indices = @transform_3, window_bounds = array<i64: 256, 128>}]} {
    %c0_i32 = arith.constant 0 : i32
    %0 = arith.cmpi eq, %arg2, %c0_i32 : i32
    %1 = arith.extui %0 : i1 to i32
    %c0_i32_0 = arith.constant 0 : i32
    %2 = arith.cmpi ne, %1, %c0_i32_0 : i32
    scf.if %2 {
      %cst_10 = arith.constant 0.000000e+00 : f32
      %12 = vector.broadcast %cst_10 : f32 to vector<256x128xf32>
      %c0_11 = arith.constant 0 : index
      %c0_12 = arith.constant 0 : index
      %13 = vector.load %arg7[%c0_11, %c0_12] : memref<256x128xf32, #tpu.memory_space<vmem>>, vector<256x128xf32>
      tpu.vector_store %arg7[%c0_11, %c0_12], %12 {strides = array<i32>} : memref<256x128xf32, #tpu.memory_space<vmem>>, vector<256x128xf32>,
    } else {
    }
    %c0 = arith.constant 0 : index
    %c0_1 = arith.constant 0 : index
    %3 = vector.load %arg7[%c0, %c0_1] : memref<256x128xf32, #tpu.memory_space<vmem>>, vector<256x128xf32>
    %c0_2 = arith.constant 0 : index
    %c0_3 = arith.constant 0 : index
    %4 = vector.load %arg3[%c0_2, %c0_3] : memref<256x512xbf16, #tpu.memory_space<vmem>>, vector<256x512xbf16>
    %c0_4 = arith.constant 0 : index
    %c0_5 = arith.constant 0 : index
    %5 = vector.load %arg4[%c0_4, %c0_5] : memref<512x128xbf16, #tpu.memory_space<vmem>>, vector<512x128xbf16>
    %cst = arith.constant dense<0.000000e+00> : vector<256x128xf32>
    %6 = tpu.matmul %4, %5, %cst {dimension_numbers = #tpu.dot_dimension_numbers<[1], [0], [0], [1], [0, 0, 1, 1], [], []>} : vector<256x512xbf16>, vector<512x128xbf16>, vector<256x128xf32> -> vector<256x128xf32>
    %7 = arith.addf %3, %6 : vector<256x128xf32>
    %c0_6 = arith.constant 0 : index
    %c0_7 = arith.constant 0 : index
    %8 = vector.load %arg7[%c0_6, %c0_7] : memref<256x128xf32, #tpu.memory_space<vmem>>, vector<256x128xf32>
    tpu.vector_store %arg7[%c0_6, %c0_7], %7 {strides = array<i32>} : memref<256x128xf32, #tpu.memory_space<vmem>>, vector<256x128xf32>,
    %c0_i32_8 = arith.constant 0 : i32
    %9 = arith.cmpi eq, %arg2, %c0_i32_8 : i32
    %10 = arith.extui %9 : i1 to i32
    %c0_i32_9 = arith.constant 0 : i32
    %11 = arith.cmpi ne, %10, %c0_i32_9 : i32
    scf.if %11 {
      %c0_10 = arith.constant 0 : index
      %c0_11 = arith.constant 0 : index
      %12 = vector.load %arg7[%c0_10, %c0_11] : memref<256x128xf32, #tpu.memory_space<vmem>>, vector<256x128xf32>
      %c0_12 = arith.constant 0 : index
      %c0_13 = arith.constant 0 : index
      %13 = vector.load %arg5[%c0_12, %c0_13] : memref<1x128xf32, #tpu.memory_space<vmem>>, vector<1x128xf32>
      %14 = vector.broadcast %13 : vector<1x128xf32> to vector<256x128xf32>
      %15 = arith.addf %12, %14 : vector<256x128xf32>
      %16 = arith.truncf %15 : vector<256x128xf32> to vector<256x128xbf16>
      %c0_14 = arith.constant 0 : index
      %c0_15 = arith.constant 0 : index
      %17 = vector.load %arg6[%c0_14, %c0_15] : memref<256x128xbf16, #tpu.memory_space<vmem>>, vector<256x128xbf16>
      tpu.vector_store %arg6[%c0_14, %c0_15], %16 {strides = array<i32>} : memref<256x128xbf16, #tpu.memory_space<vmem>>, vector<256x128xbf16>,
    } else {
    }
    return
  }
  func.func @transform_0(%arg0: i32, %arg1: i32, %arg2: i32) -> (i32, i32) {
    %c0_i32 = arith.constant 0 : i32
    return %arg0, %arg2 : i32, i32
  }
  func.func @transform_1(%arg0: i32, %arg1: i32, %arg2: i32) -> (i32, i32) {
    %c0_i32 = arith.constant 0 : i32
    return %arg2, %arg1 : i32, i32
  }
  func.func @transform_2(%arg0: i32, %arg1: i32, %arg2: i32) -> (i32, i32) {
    %c0_i32 = arith.constant 0 : i32
    %c0_i32_0 = arith.constant 0 : i32
    return %c0_i32, %arg1 : i32, i32
  }
  func.func @transform_3(%arg0: i32, %arg1: i32, %arg2: i32) -> (i32, i32) {
    %c0_i32 = arith.constant 0 : i32
    return %arg0, %arg1 : i32, i32
  }
}

module attributes {stable_mosaic.version = 11 : i64} {
  func.func @_lm_head_kernel(%arg0: i32, %arg1: i32, %arg2: memref<256x128xbf16, #tpu.memory_space<vmem>>, %arg3: memref<128x512xbf16, #tpu.memory_space<vmem>>, %arg4: memref<256x512xbf16, #tpu.memory_space<vmem>>) attributes {dimension_semantics = [#tpu.dimension_semantics<parallel>, #tpu.dimension_semantics<parallel>], iteration_bounds = array<i64: 1, 1>, scalar_prefetch = 0 : i64, scratch_operands = 0 : i64, tpu.core_type = #tpu.core_type<tc>, window_params = [{transform_indices = @transform_0, window_bounds = array<i64: 256, 128>}, {transform_indices = @transform_1, window_bounds = array<i64: 128, 512>}, {transform_indices = @transform_2, window_bounds = array<i64: 256, 512>}]} {
    %c0 = arith.constant 0 : index
    %c0_0 = arith.constant 0 : index
    %0 = vector.load %arg2[%c0, %c0_0] : memref<256x128xbf16, #tpu.memory_space<vmem>>, vector<256x128xbf16>
    %c0_1 = arith.constant 0 : index
    %c0_2 = arith.constant 0 : index
    %1 = vector.load %arg3[%c0_1, %c0_2] : memref<128x512xbf16, #tpu.memory_space<vmem>>, vector<128x512xbf16>
    %cst = arith.constant dense<0.000000e+00> : vector<256x512xf32>
    %2 = tpu.matmul %0, %1, %cst {dimension_numbers = #tpu.dot_dimension_numbers<[1], [0], [0], [1], [0, 0, 1, 1], [], []>} : vector<256x128xbf16>, vector<128x512xbf16>, vector<256x512xf32> -> vector<256x512xf32>
    %3 = arith.truncf %2 : vector<256x512xf32> to vector<256x512xbf16>
    %c0_3 = arith.constant 0 : index
    %c0_4 = arith.constant 0 : index
    %4 = vector.load %arg4[%c0_3, %c0_4] : memref<256x512xbf16, #tpu.memory_space<vmem>>, vector<256x512xbf16>
    tpu.vector_store %arg4[%c0_3, %c0_4], %3 {strides = array<i32>} : memref<256x512xbf16, #tpu.memory_space<vmem>>, vector<256x512xbf16>,
    return
  }
  func.func @transform_0(%arg0: i32, %arg1: i32) -> (i32, i32) {
    %c0_i32 = arith.constant 0 : i32
    %c0_i32_0 = arith.constant 0 : i32
    return %arg1, %c0_i32 : i32, i32
  }
  func.func @transform_1(%arg0: i32, %arg1: i32) -> (i32, i32) {
    %c0_i32 = arith.constant 0 : i32
    %c0_i32_0 = arith.constant 0 : i32
    return %c0_i32, %arg0 : i32, i32
  }
  func.func @transform_2(%arg0: i32, %arg1: i32) -> (i32, i32) {
    %c0_i32 = arith.constant 0 : i32
    return %arg1, %arg0 : i32, i32
  }
}

</mosaic_0001>

<bundles_post_ra>
// kernel: bert_pretrain_forward.23
= control target key start
LH: loop header
LB: loop body
LE: loop exit
PB: predicated region body
PF: predicated region fallthrough
CT: control target
= control target key end

     0   :  { %s2317_s1 = inlined_call_operand.vmem [shape: bf16[128,128], index: 1, kind: input, shape index: {}]   ;;  %s2318_s0 = inlined_call_operand.vmem [shape: bf16[256,128], index: 0, kind: input, shape index: {}]   ;;  %s2319_s3 = inlined_call_operand.vmem [shape: bf16[256,128], index: 3, kind: input, shape index: {}]   ;;  %s2320_s2 = inlined_call_operand.vmem [shape: f32[1,128], index: 2, kind: input, shape index: {}]   ;;  %s2321_s4 = inlined_call_operand.vmem [shape: f32[1,128], index: 4, kind: input, shape index: {}]   ;;  %s2322_s5 = inlined_call_operand.vmem [shape: f32[1,128], index: 5, kind: input, shape index: {}]   ;;  %s2323_s6 = inlined_call_operand.vmem [shape: bf16[256,128], index: 6, kind: output, shape index: {}]  }
   0x1   :  { %v1627_v0 = vld [vmem:[%s2317_s1 + $0x38] sm:$0xff]   ;;  %v1628_v1 = vld [vmem:[%s2317_s1 + $0x30] sm:$0xff]   ;;  %v1629_v2 = vld [vmem:[%s2317_s1 + $0x28] sm:$0xff]  }
   0x2   :  { %1563 = vmatprep.subr.bf16.mxu0 %v1627_v0  ;;  %1611 = vmatprep.subr.bf16.mxu1 %v1627_v0  ;;  %v1630_v3 = vld [vmem:[%s2317_s1 + $0x20] sm:$0xff]   ;;  %v1631_v6 = vld [vmem:[%s2317_s1 + $0x18] sm:$0xff]   ;;  %v1632_v7 = vld [vmem:[%s2317_s1 + $0x10] sm:$0xff]  }
   0x3   :  { %1564 = vmatpush3.bf16.msra.mxu0 %v1627_v0  ;;  %1619 = vmatpush3.bf16.msra.mxu1 %v1627_v0  ;;  %v1635_v4 = vld [vmem:[%s2318_s0] sm:$0xff]   ;;  %v1633_v8 = vld [vmem:[%s2317_s1 + $0x8] sm:$0xff]   ;;  %v1639_v12 = vld [vmem:[%s2318_s0 + $0x10] sm:$0xff]  }
   0x4   :  { %1565 = vmatprep.subr.bf16.mxu0 %v1628_v1  ;;  %1612 = vmatprep.subr.bf16.mxu1 %v1628_v1  ;;  %v1636_v5 = vld [vmem:[%s2318_s0 + $0x40] sm:$0xff]   ;;  %v1637_v10 = vld [vmem:[%s2318_s0 + $0x8] sm:$0xff]   ;;  %v1641_v13 = vld [vmem:[%s2318_s0 + $0x50] sm:$0xff]  }
   0x5   :  { %1579 = vmatprep.mubr.bf16.mxu0 %v1635_v4  ;;  %1595 = vmatprep.mubr.bf16.mxu1 %v1636_v5  ;;  %v1634_v9 = vld [vmem:[%s2317_s1] sm:$0xff]   ;;  %v1638_v11 = vld [vmem:[%s2318_s0 + $0x48] sm:$0xff]   ;;  %v1640_v14 = vld [vmem:[%s2318_s0 + $0x18] sm:$0xff]  }
   0x6   :  { %v1642_v15 = vld [vmem:[%s2318_s0 + $0x58] sm:$0xff]   ;;  %v1643_v16 = vld [vmem:[%s2318_s0 + $0x20] sm:$0xff]   ;;  %v1644_v18 = vld [vmem:[%s2318_s0 + $0x28] sm:$0xff]  }
   0x7   :  { %1566 = vmatpush3.bf16.msra.mxu0 %v1628_v1  ;;  %1620 = vmatpush3.bf16.msra.mxu1 %v1628_v1  ;;  %v1645_v17 = vld [vmem:[%s2318_s0 + $0x60] sm:$0xff]   ;;  %v1646_v19 = vld [vmem:[%s2318_s0 + $0x68] sm:$0xff]   ;;  %v1647_v20 = vld [vmem:[%s2318_s0 + $0x30] sm:$0xff]  }
   0x8   :  { %1567 = vmatprep.subr.bf16.mxu0 %v1629_v2  ;;  %1613 = vmatprep.subr.bf16.mxu1 %v1629_v2  ;;  %v1649_v21 = vld [vmem:[%s2318_s0 + $0x70] sm:$0xff]   ;;  %v1648_v22 = vld [vmem:[%s2318_s0 + $0x38] sm:$0xff]   ;;  %v1517_v24 = vld [vmem:[%s2319_s3 + $0x48] sm:$0xff]  }
   0x9   :  { %v1650_v23 = vld [vmem:[%s2318_s0 + $0x78] sm:$0xff]   ;;  %v1509_v25 = vld [vmem:[%s2319_s3 + $0x8] sm:$0xff]   ;;  %v1831_v26 = vld [vmem:[%s2320_s2] ss:$0 sm:$0xff]  ;;  %v1403_v27 = vunpack.c.l.bf16 %v1517_v24  ;;  %v1404_v48 = vunpack.c.h.bf16 %v1517_v24 }
   0xa   :  { %v1371_v28 = vunpack.c.l.bf16 %v1509_v25  ;;  %v1366_v29 = vld [vmem:[%s2319_s3] sm:$0xff]   ;;  %v1372_v40 = vunpack.c.h.bf16 %v1509_v25  ;;  %v1511_v58 = vld [vmem:[%s2319_s3 + $0x18] sm:$0xff]   ;;  %v1518_v25 = vld [vmem:[%s2319_s3 + $0x50] sm:$0xff]  }
   0xb   :  { %1568 = vmatpush3.bf16.msra.mxu0 %v1629_v2  ;;  %1621 = vmatpush3.bf16.msra.mxu1 %v1629_v2  ;;  %v1367_v36 = vunpack.c.l.bf16 %v1366_v29  ;;  %v1516_v41 = vld [vmem:[%s2319_s3 + $0x40] sm:$0xff]   ;;  %v1368_v57 = vunpack.c.h.bf16 %v1366_v29  ;;  %v1380_v4 = vunpack.c.h.bf16 %v1511_v58  ;;  %v1519_v5 = vld [vmem:[%s2319_s3 + $0x58] sm:$0xff]   ;;  %v1407_v29 = vunpack.c.l.bf16 %v1518_v25 }
   0xc   :  { %1569 = vmatprep.subr.bf16.mxu0 %v1630_v3  ;;  %1614 = vmatprep.subr.bf16.mxu1 %v1630_v3  ;;  %v1399_v47 = vunpack.c.l.bf16 %v1516_v41  ;;  %v1400_v56 = vunpack.c.h.bf16 %v1516_v41 }
   0xf   :  { %1570 = vmatpush3.bf16.msra.mxu0 %v1630_v3  ;;  %1622 = vmatpush3.bf16.msra.mxu1 %v1630_v3  ;;  %v1379_v3 = vunpack.c.l.bf16 %v1511_v58  ;;  %v1512_v58 = vld [vmem:[%s2319_s3 + $0x20] sm:$0xff]  }
  0x10   :  { %1571 = vmatprep.subr.bf16.mxu0 %v1631_v6  ;;  %1615 = vmatprep.subr.bf16.mxu1 %v1631_v6 }
  0x13   :  { %1572 = vmatpush3.bf16.msra.mxu0 %v1631_v6  ;;  %1623 = vmatpush3.bf16.msra.mxu1 %v1631_v6 }
  0x14   :  { %1573 = vmatprep.subr.bf16.mxu0 %v1632_v7  ;;  %1616 = vmatprep.subr.bf16.mxu1 %v1632_v7 }
  0x17   :  { %1574 = vmatpush3.bf16.msra.mxu0 %v1632_v7  ;;  %1624 = vmatpush3.bf16.msra.mxu1 %v1632_v7 }
  0x18   :  { %1575 = vmatprep.subr.bf16.mxu0 %v1633_v8  ;;  %1617 = vmatprep.subr.bf16.mxu1 %v1633_v8 }
  0x1b   :  { %1576 = vmatpush3.bf16.msra.mxu0 %v1633_v8  ;;  %1625 = vmatpush3.bf16.msra.mxu1 %v1633_v8 }
  0x1c   :  { %1577 = vmatprep.subr.bf16.mxu0 %v1634_v9  ;;  %1618 = vmatprep.subr.bf16.mxu1 %v1634_v9 }
  0x1f   :  { %1578 = vmatpush3.bf16.msra.mxu0 %v1634_v9  ;;  %1626 = vmatpush3.bf16.msra.mxu1 %v1634_v9 }
  0x22   :  { %1580 = vmatmul.mubr.bf16.vlgmr.msra.gmra.mxu0 %v1637_v10  ;;  %1596 = vmatmul.mubr.bf16.vlgmr.msra.gmra.mxu1 %v1638_v11  ;;  %v1411_v10 = vunpack.c.l.bf16 %v1519_v5 }
  0x23   :  { %1583 = vmatprep.mubr.bf16.mxu0 %v1639_v12  ;;  %1599 = vmatprep.mubr.bf16.mxu1 %v1641_v13 }
  0x2a   :  { %1584 = vmatmul.mubr.bf16.gmra.mxu0 %v1640_v14  ;;  %1600 = vmatmul.mubr.bf16.gmra.mxu1 %v1642_v15  ;;  %v1412_v14 = vunpack.c.h.bf16 %v1519_v5 }
  0x2b   :  { %1587 = vmatprep.mubr.bf16.mxu0 %v1643_v16  ;;  %1603 = vmatprep.mubr.bf16.mxu1 %v1645_v17  ;;  %v1510_v17 = vld [vmem:[%s2319_s3 + $0x10] sm:$0xff]  }
  0x2c   :  { %v1376_v24 = vunpack.c.h.bf16 %v1510_v17 }
  0x32   :  { %1588 = vmatmul.mubr.bf16.gmra.mxu0 %v1644_v18  ;;  %1604 = vmatmul.mubr.bf16.gmra.mxu1 %v1646_v19 }
  0x33   :  { %1591 = vmatprep.mubr.bf16.mxu0 %v1647_v20  ;;  %1607 = vmatprep.mubr.bf16.mxu1 %v1649_v21 }
  0x3a   :  { %1592 = vmatmul.mubr.bf16.gmra.mxu0 %v1648_v22  ;;  %1608 = vmatmul.mubr.bf16.gmra.mxu1 %v1650_v23  ;;  %v1375_v23 = vunpack.c.l.bf16 %v1510_v17 }
  0xe2   :  { %v1581_v30 = vpop.f32.mrf.mxu0  ;;  %v1597_v31 = vpop.f32.mrf.mxu1 }
  0xe3   :  { %v553_v32 = vadd.f32 %v1581_v30, %v1831_v26  ;;  %v569_v33 = vadd.f32 %v1597_v31, %v1831_v26  ;;  %v1408_v30 = vunpack.c.h.bf16 %v1518_v25  ;;  %v1513_v31 = vld [vmem:[%s2319_s3 + $0x28] sm:$0xff]  }
  0xe4   :  { %v318_v34 = vpop.f32.mrf.mxu0  ;;  %v382_v35 = vpop.f32.mrf.mxu1 }
  0xe5   :  { %v551_v37 = vadd.f32 %v1831_v26, %v318_v34  ;;  %v1839_v38 = vadd.f32 %v1403_v27, %v569_v33  ;;  %v1841_v39 = vadd.f32 %v1371_v28, %v553_v32  ;;  %v567_v49 = vadd.f32 %v1831_v26, %v382_v35 }
  0xe6   :  { %v1582_v42 = vpop.f32.mrf.mxu0  ;;  %v1598_v43 = vpop.f32.mrf.mxu1 }
  0xe7   :  { %v554_v44 = vadd.f32 %v1582_v42, %v1831_v26  ;;  %715 = vadd.xlane.f32.xlu0 %v1839_v38  ;;  %683 = vadd.xlane.f32.xlu1 %v1841_v39  ;;  %v570_v50 = vadd.f32 %v1598_v43, %v1831_v26  ;;  %v1851_v51 = vadd.f32 %v1367_v36, %v551_v37  ;;  %v1387_v42 = vunpack.c.l.bf16 %v1513_v31 }
  0xe8   :  { %v321_v45 = vpop.f32.mrf.mxu0  ;;  %v385_v46 = vpop.f32.mrf.mxu1  ;;  %v1862_v61 = vadd.f32 %v1399_v47, %v567_v49  ;;  %v1388_v43 = vunpack.c.h.bf16 %v1513_v31  ;;  %v1514_v31 = vld [vmem:[%s2319_s3 + $0x30] sm:$0xff]  }
  0xe9   :  { %v1853_v52 = vadd.f32 %v1372_v40, %v554_v44  ;;  %v552_v59 = vadd.f32 %v1831_v26, %v321_v45  ;;  %v568_v60 = vadd.f32 %v1831_v26, %v385_v46  ;;  %v1864_v62 = vadd.f32 %v1404_v48, %v570_v50  ;;  %v1521_v44 = vld [vmem:[%s2319_s3 + $0x68] sm:$0xff]  }
  0xea   :  { %v1585_v53 = vpop.f32.mrf.mxu0  ;;  %v1601_v54 = vpop.f32.mrf.mxu1  ;;  %v1419_v49 = vunpack.c.l.bf16 %v1521_v44 }
  0xeb   :  { %679 = vadd.xlane.f32.xlu0 %v1851_v51  ;;  %685 = vadd.xlane.f32.xlu1 %v1853_v52  ;;  %v557_v1 = vadd.f32 %v1585_v53, %v1831_v26  ;;  %v1873_v6 = vadd.f32 %v1400_v56, %v568_v60  ;;  %v1875_v7 = vadd.f32 %v1368_v57, %v552_v59 }
  0xec   :  { %v334_v55 = vpop.f32.mrf.mxu0  ;;  %v398_v0 = vpop.f32.mrf.mxu1  ;;  %v573_v8 = vadd.f32 %v1601_v54, %v1831_v26 }
  0xed   :  { %v1881_v12 = vadd.f32 %v1379_v3, %v557_v1  ;;  %v555_v21 = vadd.f32 %v1831_v26, %v334_v55  ;;  %v571_v32 = vadd.f32 %v1831_v26, %v398_v0  ;;  %v1420_v55 = vunpack.c.h.bf16 %v1521_v44 }
  0xee   :  { %v1586_v63 = vpop.f32.mrf.mxu0  ;;  %v1602_v9 = vpop.f32.mrf.mxu1  ;;  %v1890_v18 = vadd.f32 %v1411_v10, %v573_v8  ;;  %v1384_v3 = vunpack.c.h.bf16 %v1512_v58 }
  0xef   :  { %711 = vadd.xlane.f32.xlu0 %v1862_v61  ;;  %717 = vadd.xlane.f32.xlu1 %v1864_v62  ;;  %v558_v2 = vadd.f32 %v1586_v63, %v1831_v26  ;;  %v574_v11 = vadd.f32 %v1602_v9, %v1831_v26  ;;  %v1906_v34 = vadd.f32 %v1375_v23, %v555_v21 }
  0xf0   :  { %v337_v15 = vpop.f32.mrf.mxu0  ;;  %v401_v20 = vpop.f32.mrf.mxu1  ;;  %v1917_v45 = vadd.f32 %v1407_v29, %v571_v32 }
  0xf1   :  { %v1883_v13 = vadd.f32 %v1380_v4, %v558_v2  ;;  %v1892_v19 = vadd.f32 %v1412_v14, %v574_v11  ;;  %v556_v22 = vadd.f32 %v1831_v26, %v337_v15  ;;  %v572_v33 = vadd.f32 %v1831_v26, %v401_v20  ;;  %v1520_v4 = vld [vmem:[%s2319_s3 + $0x60] sm:$0xff]   ;;  %v1515_v11 = vld [vmem:[%s2319_s3 + $0x38] sm:$0xff]  }
  0xf2   :  { %v1589_v16 = vpop.f32.mrf.mxu0  ;;  %v1605_v28 = vpop.f32.mrf.mxu1  ;;  %v1383_v2 = vunpack.c.l.bf16 %v1512_v58  ;;  %v1415_v9 = vunpack.c.l.bf16 %v1520_v4  ;;  %v1416_v10 = vunpack.c.h.bf16 %v1520_v4  ;;  %v1396_v25 = vunpack.c.h.bf16 %v1515_v11 }
  0xf3   :  { %713 = vadd.xlane.f32.xlu1 %v1873_v6  ;;  %681 = vadd.xlane.f32.xlu0 %v1875_v7  ;;  %v1908_v35 = vadd.f32 %v1376_v24, %v556_v22  ;;  %v561_v40 = vadd.f32 %v1589_v16, %v1831_v26  ;;  %v1919_v46 = vadd.f32 %v1408_v30, %v572_v33  ;;  %v1395_v24 = vunpack.c.l.bf16 %v1515_v11 }
  0xf4   :  { %v350_v27 = vpop.f32.mrf.mxu0  ;;  %v414_v37 = vpop.f32.mrf.mxu1  ;;  %v577_v47 = vadd.f32 %v1605_v28, %v1831_v26 }
  0xf5   :  { %v1925_v53 = vadd.f32 %v1387_v42, %v561_v40  ;;  %v559_v0 = vadd.f32 %v1831_v26, %v350_v27  ;;  %v575_v14 = vadd.f32 %v1831_v26, %v414_v37  ;;  %v1391_v40 = vunpack.c.l.bf16 %v1514_v31  ;;  %v1522_v42 = vld [vmem:[%s2319_s3 + $0x70] sm:$0xff]  }
  0xf6   :  { %v1590_v36 = vpop.f32.mrf.mxu0  ;;  %v1606_v48 = vpop.f32.mrf.mxu1  ;;  %v1934_v59 = vadd.f32 %v1419_v49, %v577_v47  ;;  %v1423_v44 = vunpack.c.l.bf16 %v1522_v42  ;;  %v1424_v47 = vunpack.c.h.bf16 %v1522_v42 }
  0xf7   :  { %691 = vadd.xlane.f32.xlu0 %v1881_v12  ;;  %693 = vadd.xlane.f32.xlu1 %v1883_v13  ;;  %v562_v41 = vadd.f32 %v1590_v36, %v1831_v26  ;;  %v578_v50 = vadd.f32 %v1606_v48, %v1831_v26  ;;  %v1950_v16 = vadd.f32 %v1383_v2, %v559_v0 }
  0xf8   :  { %v353_v56 = vpop.f32.mrf.mxu0  ;;  %v417_v63 = vpop.f32.mrf.mxu1  ;;  %v1958_v27 = vadd.f32 %v1415_v9, %v575_v14 }
  0xf9   :  { %v1927_v54 = vadd.f32 %v1388_v43, %v562_v41  ;;  %v1936_v60 = vadd.f32 %v1420_v55, %v578_v50  ;;  %v560_v1 = vadd.f32 %v1831_v26, %v353_v56  ;;  %v576_v15 = vadd.f32 %v1831_v26, %v417_v63  ;;  %v1523_v56 = vld [vmem:[%s2319_s3 + $0x78] sm:$0xff]  }
  0xfa   :  { %v1593_v57 = vpop.f32.mrf.mxu0  ;;  %v1609_v8 = vpop.f32.mrf.mxu1  ;;  %v1392_v41 = vunpack.c.h.bf16 %v1514_v31  ;;  %v1428_v58 = vunpack.c.h.bf16 %v1523_v56 }
  0xfb   :  { %723 = vadd.xlane.f32.xlu0 %v1890_v18  ;;  %725 = vadd.xlane.f32.xlu1 %v1892_v19  ;;  %v1952_v17 = vadd.f32 %v1384_v3, %v560_v1  ;;  %v565_v22 = vadd.f32 %v1593_v57, %v1831_v26  ;;  %v1960_v28 = vadd.f32 %v1416_v10, %v576_v15  ;;  %v1427_v57 = vunpack.c.l.bf16 %v1523_v56 }
  0xfc   :  { %v366_v5 = vpop.f32.mrf.mxu0  ;;  %v430_v21 = vpop.f32.mrf.mxu1  ;;  %v581_v63 = vadd.f32 %v1609_v8, %v1831_v26 }
  0xfd   :  { %v1967_v32 = vadd.f32 %v1395_v24, %v565_v22  ;;  %v563_v36 = vadd.f32 %v1831_v26, %v366_v5  ;;  %v579_v48 = vadd.f32 %v1831_v26, %v430_v21 }
  0xfe   :  { %v1594_v20 = vpop.f32.mrf.mxu0  ;;  %v1610_v30 = vpop.f32.mrf.mxu1  ;;  %v1997_v3 = vadd.f32 %v1427_v57, %v581_v63 }
  0xff   :  { %687 = vadd.xlane.f32.xlu0 %v1906_v34  ;;  %689 = vadd.xlane.f32.xlu1 %v1908_v35  ;;  %v566_v23 = vadd.f32 %v1594_v20, %v1831_v26  ;;  %v1980_v50 = vadd.f32 %v1391_v40, %v563_v36  ;;  %v582_v0 = vadd.f32 %v1610_v30, %v1831_v26 }
 0x100   :  { %v369_v29 = vpop.f32.mrf.mxu0  ;;  %v433_v43 = vpop.f32.mrf.mxu1  ;;  %v1991_v1 = vadd.f32 %v1423_v44, %v579_v48 }
 0x101   :  { %v1969_v33 = vadd.f32 %v1396_v25, %v566_v23  ;;  %v564_v37 = vadd.f32 %v1831_v26, %v369_v29  ;;  %v580_v49 = vadd.f32 %v1831_v26, %v433_v43  ;;  %v1999_v4 = vadd.f32 %v1428_v58, %v582_v0 }
 0x103   :  { %719 = vadd.xlane.f32.xlu0 %v1917_v45  ;;  %721 = vadd.xlane.f32.xlu1 %v1919_v46  ;;  %v1982_v55 = vadd.f32 %v1392_v41, %v564_v37  ;;  %v1993_v2 = vadd.f32 %v1424_v47, %v580_v49 }
 0x107   :  { %699 = vadd.xlane.f32.xlu0 %v1925_v53  ;;  %701 = vadd.xlane.f32.xlu1 %v1927_v54 }
 0x10b   :  { %731 = vadd.xlane.f32.xlu0 %v1934_v59  ;;  %733 = vadd.xlane.f32.xlu1 %v1936_v60 }
 0x10f   :  { %695 = vadd.xlane.f32.xlu0 %v1950_v16  ;;  %697 = vadd.xlane.f32.xlu1 %v1952_v17 }
 0x113   :  { %727 = vadd.xlane.f32.xlu0 %v1958_v27  ;;  %729 = vadd.xlane.f32.xlu1 %v1960_v28 }
 0x117   :  { %707 = vadd.xlane.f32.xlu0 %v1967_v32  ;;  %709 = vadd.xlane.f32.xlu1 %v1969_v33 }
 0x11b   :  { %703 = vadd.xlane.f32.xlu0 %v1980_v50  ;;  %705 = vadd.xlane.f32.xlu1 %v1982_v55 }
 0x11f   :  { %735 = vadd.xlane.f32.xlu0 %v1991_v1  ;;  %737 = vadd.xlane.f32.xlu1 %v1993_v2 }
 0x123   :  { %739 = vadd.xlane.f32.xlu0 %v1997_v3  ;;  %741 = vadd.xlane.f32.xlu1 %v1999_v4 }
 0x170   :  { %v716_v5 = vpop.xlane.xlu0 %715  ;;  %v684_v8 = vpop.xlane.xlu1 %683 }
 0x171   :  { %v762_v9 = vmul.f32 0.0078125, %v716_v5  ;;  %v746_v26 = vmul.f32 0.0078125, %v684_v8 }
 0x173   :  { %v2004_v10 = vsub.f32 %v1841_v39, %v746_v26  ;;  %v2007_v15 = vsub.f32 %v1839_v38, %v762_v9 }
 0x174   :  { %v680_v11 = vpop.xlane.xlu0 %679  ;;  %v686_v14 = vpop.xlane.xlu1 %685 }
 0x175   :  { %v744_v20 = vmul.f32 0.0078125, %v680_v11  ;;  %v747_v21 = vmul.f32 0.0078125, %v686_v14  ;;  %v810_v22 = vmul.f32 %v2004_v10, %v2004_v10  ;;  %v826_v38 = vmul.f32 %v2007_v15, %v2007_v15 }
 0x177   :  { %v2012_v23 = vsub.f32 %v1853_v52, %v747_v21  ;;  %844 = vadd.xlane.f32.xlu0 %v810_v22  ;;  %v2015_v24 = vsub.f32 %v1851_v51, %v744_v20 }
 0x178   :  { %v712_v25 = vpop.xlane.xlu0 %711  ;;  %v718_v39 = vpop.xlane.xlu1 %717 }
 0x179   :  { %v760_v29 = vmul.f32 0.0078125, %v712_v25  ;;  %v763_v30 = vmul.f32 0.0078125, %v718_v39  ;;  %v811_v31 = vmul.f32 %v2012_v23, %v2012_v23  ;;  %v808_v51 = vmul.f32 %v2015_v24, %v2015_v24 }
 0x17b   :  { %v2022_v36 = vsub.f32 %v1864_v62, %v763_v30  ;;  %876 = vadd.xlane.f32.xlu0 %v826_v38  ;;  %846 = vadd.xlane.f32.xlu1 %v811_v31  ;;  %v2027_v40 = vsub.f32 %v1862_v61, %v760_v29 }
 0x17c   :  { %v714_v52 = vpop.xlane.xlu1 %713  ;;  %v682_v37 = vpop.xlane.xlu0 %681 }
 0x17d   :  { %v761_v41 = vmul.f32 0.0078125, %v714_v52  ;;  %v745_v42 = vmul.f32 0.0078125, %v682_v37  ;;  %v827_v43 = vmul.f32 %v2022_v36, %v2022_v36  ;;  %v824_v61 = vmul.f32 %v2027_v40, %v2027_v40 }
 0x17f   :  { %v2032_v44 = vsub.f32 %v1875_v7, %v745_v42  ;;  %840 = vadd.xlane.f32.xlu0 %v808_v51  ;;  %878 = vadd.xlane.f32.xlu1 %v827_v43  ;;  %v2035_v62 = vsub.f32 %v1873_v6, %v761_v41 }
 0x180   :  { %v692_v47 = vpop.xlane.xlu0 %691  ;;  %v694_v48 = vpop.xlane.xlu1 %693 }
 0x181   :  { %v750_v49 = vmul.f32 0.0078125, %v692_v47  ;;  %v751_v56 = vmul.f32 0.0078125, %v694_v48  ;;  %v809_v57 = vmul.f32 %v2032_v44, %v2032_v44  ;;  %v825_v6 = vmul.f32 %v2035_v62, %v2035_v62 }
 0x183   :  { %v2042_v58 = vsub.f32 %v1881_v12, %v750_v49  ;;  %872 = vadd.xlane.f32.xlu0 %v824_v61  ;;  %842 = vadd.xlane.f32.xlu1 %v809_v57  ;;  %v2047_v0 = vsub.f32 %v1883_v13, %v751_v56 }
 0x184   :  { %v724_v7 = vpop.xlane.xlu0 %723  ;;  %v726_v63 = vpop.xlane.xlu1 %725 }
 0x185   :  { %v766_v5 = vmul.f32 0.0078125, %v724_v7  ;;  %v767_v8 = vmul.f32 0.0078125, %v726_v63  ;;  %v814_v9 = vmul.f32 %v2042_v58, %v2042_v58  ;;  %v815_v22 = vmul.f32 %v2047_v0, %v2047_v0 }
 0x187   :  { %v2052_v26 = vsub.f32 %v1890_v18, %v766_v5  ;;  %852 = vadd.xlane.f32.xlu0 %v814_v9  ;;  %874 = vadd.xlane.f32.xlu1 %v825_v6  ;;  %v2055_v12 = vsub.f32 %v1892_v19, %v767_v8 }
 0x188   :  { %v688_v11 = vpop.xlane.xlu0 %687  ;;  %v690_v14 = vpop.xlane.xlu1 %689 }
 0x189   :  { %v748_v20 = vmul.f32 0.0078125, %v688_v11  ;;  %v749_v21 = vmul.f32 0.0078125, %v690_v14  ;;  %v830_v13 = vmul.f32 %v2052_v26, %v2052_v26  ;;  %v831_v19 = vmul.f32 %v2055_v12, %v2055_v12 }
 0x18b   :  { %v2062_v25 = vsub.f32 %v1906_v34, %v748_v20  ;;  %884 = vadd.xlane.f32.xlu0 %v830_v13  ;;  %854 = vadd.xlane.f32.xlu1 %v815_v22  ;;  %v2067_v29 = vsub.f32 %v1908_v35, %v749_v21 }
 0x18c   :  { %v720_v18 = vpop.xlane.xlu0 %719  ;;  %v722_v39 = vpop.xlane.xlu1 %721 }
 0x18d   :  { %v764_v30 = vmul.f32 0.0078125, %v720_v18  ;;  %v765_v38 = vmul.f32 0.0078125, %v722_v39  ;;  %v812_v31 = vmul.f32 %v2062_v25, %v2062_v25  ;;  %v813_v43 = vmul.f32 %v2067_v29, %v2067_v29 }
 0x18f   :  { %v2072_v52 = vsub.f32 %v1917_v45, %v764_v30  ;;  %848 = vadd.xlane.f32.xlu0 %v812_v31  ;;  %886 = vadd.xlane.f32.xlu1 %v831_v19  ;;  %v2075_v34 = vsub.f32 %v1919_v46, %v765_v38 }
 0x190   :  { %v700_v37 = vpop.xlane.xlu0 %699  ;;  %v702_v51 = vpop.xlane.xlu1 %701 }
 0x191   :  { %v754_v41 = vmul.f32 0.0078125, %v700_v37  ;;  %v755_v42 = vmul.f32 0.0078125, %v702_v51  ;;  %v828_v35 = vmul.f32 %v2072_v52, %v2072_v52  ;;  %v829_v46 = vmul.f32 %v2075_v34, %v2075_v34 }
 0x193   :  { %v2082_v47 = vsub.f32 %v1925_v53, %v754_v41  ;;  %880 = vadd.xlane.f32.xlu0 %v828_v35  ;;  %850 = vadd.xlane.f32.xlu1 %v813_v43  ;;  %v2087_v49 = vsub.f32 %v1927_v54, %v755_v42 }
 0x194   :  { %v732_v45 = vpop.xlane.xlu0 %731  ;;  %v734_v48 = vpop.xlane.xlu1 %733 }
 0x195   :  { %v770_v56 = vmul.f32 0.0078125, %v732_v45  ;;  %v771_v61 = vmul.f32 0.0078125, %v734_v48  ;;  %v818_v57 = vmul.f32 %v2082_v47, %v2082_v47  ;;  %v819_v9 = vmul.f32 %v2087_v49, %v2087_v49 }
 0x197   :  { %v2092_v7 = vsub.f32 %v1934_v59, %v770_v56  ;;  %860 = vadd.xlane.f32.xlu0 %v818_v57  ;;  %882 = vadd.xlane.f32.xlu1 %v829_v46  ;;  %v2095_v53 = vsub.f32 %v1936_v60, %v771_v61 }
 0x198   :  { %v696_v63 = vpop.xlane.xlu0 %695  ;;  %v698_v6 = vpop.xlane.xlu1 %697 }
 0x199   :  { %v752_v5 = vmul.f32 0.0078125, %v696_v63  ;;  %v753_v8 = vmul.f32 0.0078125, %v698_v6  ;;  %v834_v54 = vmul.f32 %v2092_v7, %v2092_v7  ;;  %v835_v60 = vmul.f32 %v2095_v53, %v2095_v53 }
 0x19b   :  { %v2102_v11 = vsub.f32 %v1950_v16, %v752_v5  ;;  %892 = vadd.xlane.f32.xlu0 %v834_v54  ;;  %862 = vadd.xlane.f32.xlu1 %v819_v9  ;;  %v2107_v20 = vsub.f32 %v1952_v17, %v753_v8 }
 0x19c   :  { %v728_v59 = vpop.xlane.xlu0 %727  ;;  %v730_v14 = vpop.xlane.xlu1 %729 }
 0x19d   :  { %v768_v21 = vmul.f32 0.0078125, %v728_v59  ;;  %v769_v13 = vmul.f32 0.0078125, %v730_v14  ;;  %v816_v22 = vmul.f32 %v2102_v11, %v2102_v11  ;;  %v817_v31 = vmul.f32 %v2107_v20, %v2107_v20 }
 0x19f   :  { %v2112_v18 = vsub.f32 %v1958_v27, %v768_v21  ;;  %856 = vadd.xlane.f32.xlu0 %v816_v22  ;;  %894 = vadd.xlane.f32.xlu1 %v835_v60  ;;  %v2115_v16 = vsub.f32 %v1960_v28, %v769_v13 }
 0x1a0   :  { %v708_v39 = vpop.xlane.xlu0 %707  ;;  %v710_v19 = vpop.xlane.xlu1 %709 }
 0x1a1   :  { %v758_v30 = vmul.f32 0.0078125, %v708_v39  ;;  %v759_v38 = vmul.f32 0.0078125, %v710_v19  ;;  %v832_v17 = vmul.f32 %v2112_v18, %v2112_v18  ;;  %v833_v28 = vmul.f32 %v2115_v16, %v2115_v16 }
 0x1a3   :  { %v2122_v37 = vsub.f32 %v1967_v32, %v758_v30  ;;  %888 = vadd.xlane.f32.xlu0 %v832_v17  ;;  %858 = vadd.xlane.f32.xlu1 %v817_v31  ;;  %v2127_v41 = vsub.f32 %v1969_v33, %v759_v38 }
 0x1a4   :  { %v704_v27 = vpop.xlane.xlu0 %703  ;;  %v706_v51 = vpop.xlane.xlu1 %705 }
 0x1a5   :  { %v756_v42 = vmul.f32 0.0078125, %v704_v27  ;;  %v757_v35 = vmul.f32 0.0078125, %v706_v51  ;;  %v822_v43 = vmul.f32 %v2122_v37, %v2122_v37  ;;  %v823_v57 = vmul.f32 %v2127_v41, %v2127_v41 }
 0x1a7   :  { %v2132_v45 = vsub.f32 %v1980_v50, %v756_v42  ;;  %868 = vadd.xlane.f32.xlu0 %v822_v43  ;;  %890 = vadd.xlane.f32.xlu1 %v833_v28  ;;  %v2135_v32 = vsub.f32 %v1982_v55, %v757_v35 }
 0x1a8   :  { %v736_v48 = vpop.xlane.xlu0 %735  ;;  %v738_v46 = vpop.xlane.xlu1 %737 }
 0x1a9   :  { %v772_v56 = vmul.f32 0.0078125, %v736_v48  ;;  %v773_v61 = vmul.f32 0.0078125, %v738_v46  ;;  %v820_v33 = vmul.f32 %v2132_v45, %v2132_v45  ;;  %v821_v55 = vmul.f32 %v2135_v32, %v2135_v32 }
 0x1ab   :  { %v2142_v63 = vsub.f32 %v1991_v1, %v772_v56  ;;  %864 = vadd.xlane.f32.xlu0 %v820_v33  ;;  %870 = vadd.xlane.f32.xlu1 %v823_v57  ;;  %v2147_v5 = vsub.f32 %v1993_v2, %v773_v61 }
 0x1ac   :  { %v740_v50 = vpop.xlane.xlu0 %739  ;;  %v742_v6 = vpop.xlane.xlu1 %741 }
 0x1ad   :  { %v774_v8 = vmul.f32 0.0078125, %v740_v50  ;;  %v775_v54 = vmul.f32 0.0078125, %v742_v6  ;;  %v836_v9 = vmul.f32 %v2142_v63, %v2142_v63  ;;  %v837_v2 = vmul.f32 %v2147_v5, %v2147_v5 }
 0x1af   :  { %v2152_v59 = vsub.f32 %v1997_v3, %v774_v8  ;;  %896 = vadd.xlane.f32.xlu0 %v836_v9  ;;  %866 = vadd.xlane.f32.xlu1 %v821_v55  ;;  %v2155_v1 = vsub.f32 %v1999_v4, %v775_v54 }
 0x1b1   :  { %v838_v14 = vmul.f32 %v2152_v59, %v2152_v59  ;;  %v839_v60 = vmul.f32 %v2155_v1, %v2155_v1 }
 0x1b3   :  { %900 = vadd.xlane.f32.xlu0 %v838_v14  ;;  %898 = vadd.xlane.f32.xlu1 %v837_v2  ;;  %v2167_v14 = vld [vmem:[%s2321_s4] ss:$0 sm:$0xff] }
 0x1b7   :  { %902 = vadd.xlane.f32.xlu1 %v839_v60 }
 0x200   :  { %v845_v21 = vpop.xlane.xlu0 %844 }
 0x201   :  { %v906_v3 = vmul.f32 0.0078125, %v845_v21 }
 0x203   :  { %v938_v13 = vadd.f32 1e-05, %v906_v3 }
 0x204   :  { %v877_v22 = vpop.xlane.xlu0 %876  ;;  %v847_v39 = vpop.xlane.xlu1 %846 }
 0x205   :  { %1651 = vrsqrt.f32 %v938_v13  ;;  %v922_v4 = vmul.f32 0.0078125, %v877_v22  ;;  %v907_v19 = vmul.f32 0.0078125, %v847_v39 }
 0x207   :  { %v954_v30 = vadd.f32 1e-05, %v922_v4  ;;  %v939_v38 = vadd.f32 1e-05, %v907_v19 }
 0x208   :  { %v841_v17 = vpop.xlane.xlu0 %840  ;;  %v879_v31 = vpop.xlane.xlu1 %878 }
 0x209   :  { %1653 = vrsqrt.f32 %v954_v30  ;;  %v904_v27 = vmul.f32 0.0078125, %v841_v17  ;;  %v923_v51 = vmul.f32 0.0078125, %v879_v31 }
 0x20a   :  { %1655 = vrsqrt.f32 %v939_v38 }
 0x20b   :  { %v936_v28 = vadd.f32 1e-05, %v904_v27  ;;  %v955_v42 = vadd.f32 1e-05, %v923_v51 }
 0x20c   :  { %v873_v35 = vpop.xlane.xlu0 %872  ;;  %v843_v43 = vpop.xlane.xlu1 %842 }
 0x20d   :  { %1657 = vrsqrt.f32 %v936_v28  ;;  %v920_v48 = vmul.f32 0.0078125, %v873_v35  ;;  %v905_v46 = vmul.f32 0.0078125, %v843_v43 }
 0x20e   :  { %1659 = vrsqrt.f32 %v955_v42 }
 0x20f   :  { %v952_v56 = vadd.f32 1e-05, %v920_v48  ;;  %v937_v61 = vadd.f32 1e-05, %v905_v46 }
 0x210   :  { %v853_v33 = vpop.xlane.xlu0 %852  ;;  %v875_v57 = vpop.xlane.xlu1 %874 }
 0x211   :  { %1661 = vrsqrt.f32 %v952_v56  ;;  %v910_v50 = vmul.f32 0.0078125, %v853_v33  ;;  %v921_v6 = vmul.f32 0.0078125, %v875_v57 }
 0x212   :  { %v1652_v55 = vpop.eup %1651  ;;  %1663 = vrsqrt.f32 %v937_v61 }
 0x213   :  { %v1002_v8 = vmul.f32 %v1652_v55, %v2004_v10  ;;  %v942_v54 = vadd.f32 1e-05, %v910_v50  ;;  %v953_v9 = vadd.f32 1e-05, %v921_v6  ;;  %v2173_v10 = vld [vmem:[%s2322_s5] ss:$0 sm:$0xff] }
 0x214   :  { %v885_v2 = vpop.xlane.xlu0 %884  ;;  %v855_v60 = vpop.xlane.xlu1 %854 }
 0x215   :  { %1665 = vrsqrt.f32 %v942_v54  ;;  %v926_v21 = vmul.f32 0.0078125, %v885_v2  ;;  %v911_v3 = vmul.f32 0.0078125, %v855_v60  ;;  %v1041_v39 = vmul.f32 %v2167_v14, %v1002_v8 }
 0x216   :  { %v1654_v13 = vpop.eup %1653  ;;  %1667 = vrsqrt.f32 %v953_v9 }
 0x217   :  { %v1656_v22 = vpop.eup %1655  ;;  %v958_v4 = vadd.f32 1e-05, %v926_v21  ;;  %v943_v19 = vadd.f32 1e-05, %v911_v3  ;;  %v1018_v30 = vmul.f32 %v1654_v13, %v2007_v15  ;;  %v1080_v43 = vadd.f32 %v2173_v10, %v1041_v39 }
 0x218   :  { %v1003_v38 = vmul.f32 %v1656_v22, %v2012_v23  ;;  %v849_v17 = vpop.xlane.xlu0 %848  ;;  %v887_v31 = vpop.xlane.xlu1 %886 }
 0x219   :  { %1669 = vrsqrt.f32 %v958_v4  ;;  %v908_v27 = vmul.f32 0.0078125, %v849_v17  ;;  %v927_v51 = vmul.f32 0.0078125, %v887_v31  ;;  %v1057_v56 = vmul.f32 %v2167_v14, %v1018_v30 }
 0x21a   :  { %v1658_v28 = vpop.eup %1657  ;;  %v1042_v42 = vmul.f32 %v2167_v14, %v1003_v38  ;;  %1671 = vrsqrt.f32 %v943_v19 }
 0x21b   :  { %v1660_v35 = vpop.eup %1659  ;;  %v940_v48 = vadd.f32 1e-05, %v908_v27  ;;  %v959_v46 = vadd.f32 1e-05, %v927_v51  ;;  %v1000_v23 = vmul.f32 %v1658_v28, %v2015_v24  ;;  %v1096_v3 = vadd.f32 %v2173_v10, %v1057_v56 }
 0x21c   :  { %v1081_v15 = vadd.f32 %v2173_v10, %v1042_v42  ;;  %v1019_v61 = vmul.f32 %v1660_v35, %v2022_v36  ;;  %v881_v33 = vpop.xlane.xlu0 %880  ;;  %v851_v57 = vpop.xlane.xlu1 %850 }
 0x21d   :  { %1673 = vrsqrt.f32 %v940_v48  ;;  %v924_v50 = vmul.f32 0.0078125, %v881_v33  ;;  %v909_v6 = vmul.f32 0.0078125, %v851_v57  ;;  %v1039_v24 = vmul.f32 %v2167_v14, %v1000_v23 }
 0x21e   :  { %v1662_v55 = vpop.eup %1661  ;;  %v1437_v8 = vpack.c.bf16 %v1081_v15, %v1080_v43  ;;  %v1058_v54 = vmul.f32 %v2167_v14, %v1019_v61  ;;  %1675 = vrsqrt.f32 %v959_v46 }
 0x21f   :  { %v1664_v9 = vpop.eup %1663  ;;  %v1016_v2 = vmul.f32 %v1662_v55, %v2027_v40  ;;  %v956_v60 = vadd.f32 1e-05, %v924_v50  ;;  %v941_v21 = vadd.f32 1e-05, %v909_v6  ;;  %v1078_v28 = vadd.f32 %v2173_v10, %v1039_v24 }
 0x220   :  { %1524 = vst [vmem:[%s2323_s6 + $0x8] sm:$0xff] %v1437_v8   ;;  %v1097_v36 = vadd.f32 %v2173_v10, %v1058_v54  ;;  %v1001_v13 = vmul.f32 %v1664_v9, %v2032_v44  ;;  %v861_v22 = vpop.xlane.xlu0 %860  ;;  %v883_v39 = vpop.xlane.xlu1 %882 }
 0x221   :  { %1677 = vrsqrt.f32 %v956_v60  ;;  %v914_v4 = vmul.f32 0.0078125, %v861_v22  ;;  %v925_v19 = vmul.f32 0.0078125, %v883_v39  ;;  %v1055_v31 = vmul.f32 %v2167_v14, %v1016_v2 }
 0x222   :  { %v1666_v40 = vpop.eup %1665  ;;  %v1477_v30 = vpack.c.bf16 %v1097_v36, %v1096_v3  ;;  %v1040_v38 = vmul.f32 %v2167_v14, %v1001_v13  ;;  %1679 = vrsqrt.f32 %v941_v21 }
 0x223   :  { %v1668_v17 = vpop.eup %1667  ;;  %v946_v27 = vadd.f32 1e-05, %v914_v4  ;;  %v957_v51 = vadd.f32 1e-05, %v925_v19  ;;  %v1006_v42 = vmul.f32 %v1666_v40, %v2042_v58  ;;  %v1094_v57 = vadd.f32 %v2173_v10, %v1055_v31 }
 0x224   :  { %1532 = vst [vmem:[%s2323_s6 + $0x48] sm:$0xff] %v1477_v30   ;;  %v1079_v44 = vadd.f32 %v2173_v10, %v1040_v38  ;;  %v1017_v35 = vmul.f32 %v1668_v17, %v2035_v62  ;;  %v893_v43 = vpop.xlane.xlu0 %892  ;;  %v863_v48 = vpop.xlane.xlu1 %862 }
 0x225   :  { %1681 = vrsqrt.f32 %v946_v27  ;;  %v930_v46 = vmul.f32 0.0078125, %v893_v43  ;;  %v915_v56 = vmul.f32 0.0078125, %v863_v48  ;;  %v1045_v62 = vmul.f32 %v2167_v14, %v1006_v42 }
 0x226   :  { %v1670_v15 = vpop.eup %1669  ;;  %v1432_v23 = vpack.c.bf16 %v1079_v44, %v1078_v28  ;;  %v1056_v61 = vmul.f32 %v2167_v14, %v1017_v35  ;;  %1683 = vrsqrt.f32 %v957_v51 }
 0x227   :  { %v1672_v33 = vpop.eup %1671  ;;  %v962_v50 = vadd.f32 1e-05, %v930_v46  ;;  %v947_v6 = vadd.f32 1e-05, %v915_v56  ;;  %v1022_v55 = vmul.f32 %v1670_v15, %v2052_v26  ;;  %v1084_v4 = vadd.f32 %v2173_v10, %v1045_v62 }
 0x228   :  { %1433 = vst [vmem:[%s2323_s6] sm:$0xff] %v1432_v23   ;;  %v1095_v58 = vadd.f32 %v2173_v10, %v1056_v61  ;;  %v1007_v8 = vmul.f32 %v1672_v33, %v2047_v0  ;;  %v857_v54 = vpop.xlane.xlu0 %856  ;;  %v895_v9 = vpop.xlane.xlu1 %894 }
 0x229   :  { %1685 = vrsqrt.f32 %v962_v50  ;;  %v912_v2 = vmul.f32 0.0078125, %v857_v54  ;;  %v931_v60 = vmul.f32 0.0078125, %v895_v9  ;;  %v1061_v0 = vmul.f32 %v2167_v14, %v1022_v55 }
 0x22a   :  { %v1674_v21 = vpop.eup %1673  ;;  %v1472_v3 = vpack.c.bf16 %v1095_v58, %v1094_v57  ;;  %v1046_v24 = vmul.f32 %v2167_v14, %v1007_v8  ;;  %1687 = vrsqrt.f32 %v947_v6 }
 0x22b   :  { %v1676_v36 = vpop.eup %1675  ;;  %v1004_v13 = vmul.f32 %v1674_v21, %v2062_v25  ;;  %v944_v22 = vadd.f32 1e-05, %v912_v2  ;;  %v963_v39 = vadd.f32 1e-05, %v931_v60  ;;  %v1100_v35 = vadd.f32 %v2173_v10, %v1061_v0 }
 0x22c   :  { %1531 = vst [vmem:[%s2323_s6 + $0x40] sm:$0xff] %v1472_v3   ;;  %v1085_v26 = vadd.f32 %v2173_v10, %v1046_v24  ;;  %v1023_v19 = vmul.f32 %v1676_v36, %v2055_v12  ;;  %v889_v40 = vpop.xlane.xlu0 %888  ;;  %v859_v30 = vpop.xlane.xlu1 %858 }
 0x22d   :  { %1689 = vrsqrt.f32 %v944_v22  ;;  %v928_v38 = vmul.f32 0.0078125, %v889_v40  ;;  %v913_v17 = vmul.f32 0.0078125, %v859_v30  ;;  %v1043_v28 = vmul.f32 %v2167_v14, %v1004_v13 }
 0x22e   :  { %v1678_v25 = vpop.eup %1677  ;;  %v1447_v31 = vpack.c.bf16 %v1085_v26, %v1084_v4  ;;  %v1062_v27 = vmul.f32 %v2167_v14, %v1023_v19  ;;  %1691 = vrsqrt.f32 %v963_v39 }
 0x22f   :  { %v1680_v51 = vpop.eup %1679  ;;  %v960_v44 = vadd.f32 1e-05, %v928_v38  ;;  %v945_v42 = vadd.f32 1e-05, %v913_v17  ;;  %v1020_v43 = vmul.f32 %v1678_v25, %v2072_v52  ;;  %v1082_v6 = vadd.f32 %v2173_v10, %v1043_v28 }
 0x230   :  { %1526 = vst [vmem:[%s2323_s6 + $0x18] sm:$0xff] %v1447_v31   ;;  %v1101_v12 = vadd.f32 %v2173_v10, %v1062_v27  ;;  %v1005_v48 = vmul.f32 %v1680_v51, %v2067_v29  ;;  %v869_v46 = vpop.xlane.xlu0 %868  ;;  %v891_v56 = vpop.xlane.xlu1 %890 }
 0x231   :  { %1693 = vrsqrt.f32 %v960_v44  ;;  %v918_v15 = vmul.f32 0.0078125, %v869_v46  ;;  %v929_v23 = vmul.f32 0.0078125, %v891_v56  ;;  %v1059_v29 = vmul.f32 %v2167_v14, %v1020_v43 }
 0x232   :  { %v1682_v61 = vpop.eup %1681  ;;  %v1487_v33 = vpack.c.bf16 %v1101_v12, %v1100_v35  ;;  %v1044_v57 = vmul.f32 %v2167_v14, %v1005_v48  ;;  %1695 = vrsqrt.f32 %v945_v42 }
 0x233   :  { %v1684_v50 = vpop.eup %1683  ;;  %v950_v62 = vadd.f32 1e-05, %v918_v15  ;;  %v961_v58 = vadd.f32 1e-05, %v929_v23  ;;  %v1010_v55 = vmul.f32 %v1682_v61, %v2082_v47  ;;  %v1098_v4 = vadd.f32 %v2173_v10, %v1059_v29 }
 0x234   :  { %1534 = vst [vmem:[%s2323_s6 + $0x58] sm:$0xff] %v1487_v33   ;;  %v1083_v52 = vadd.f32 %v2173_v10, %v1044_v57  ;;  %v1021_v8 = vmul.f32 %v1684_v50, %v2075_v34  ;;  %v865_v54 = vpop.xlane.xlu0 %864  ;;  %v871_v9 = vpop.xlane.xlu1 %870 }
 0x235   :  { %1697 = vrsqrt.f32 %v950_v62  ;;  %v916_v2 = vmul.f32 0.0078125, %v865_v54  ;;  %v919_v60 = vmul.f32 0.0078125, %v871_v9  ;;  %v1049_v34 = vmul.f32 %v2167_v14, %v1010_v55 }
 0x236   :  { %v1686_v21 = vpop.eup %1685  ;;  %v1442_v3 = vpack.c.bf16 %v1083_v52, %v1082_v6  ;;  %v1060_v24 = vmul.f32 %v2167_v14, %v1021_v8  ;;  %1699 = vrsqrt.f32 %v961_v58 }
 0x237   :  { %v1688_v36 = vpop.eup %1687  ;;  %v1026_v13 = vmul.f32 %v1686_v21, %v2092_v7  ;;  %v948_v22 = vadd.f32 1e-05, %v916_v2  ;;  %v951_v39 = vadd.f32 1e-05, %v919_v60  ;;  %v1088_v28 = vadd.f32 %v2173_v10, %v1049_v34 }
 0x238   :  { %1525 = vst [vmem:[%s2323_s6 + $0x10] sm:$0xff] %v1442_v3   ;;  %v1099_v47 = vadd.f32 %v2173_v10, %v1060_v24  ;;  %v1011_v0 = vmul.f32 %v1688_v36, %v2087_v49  ;;  %v897_v26 = vpop.xlane.xlu0 %896  ;;  %v867_v19 = vpop.xlane.xlu1 %866 }
 0x239   :  { %1701 = vrsqrt.f32 %v948_v22  ;;  %v932_v40 = vmul.f32 0.0078125, %v897_v26  ;;  %v917_v30 = vmul.f32 0.0078125, %v867_v19  ;;  %v1065_v31 = vmul.f32 %v2167_v14, %v1026_v13 }
 0x23a   :  { %v1690_v7 = vpop.eup %1689  ;;  %v1482_v38 = vpack.c.bf16 %v1099_v47, %v1098_v4  ;;  %v1050_v17 = vmul.f32 %v2167_v14, %v1011_v0  ;;  %1703 = vrsqrt.f32 %v951_v39 }
 0x23b   :  { %v1692_v25 = vpop.eup %1691  ;;  %v964_v27 = vadd.f32 1e-05, %v932_v40  ;;  %v949_v51 = vadd.f32 1e-05, %v917_v30  ;;  %v1008_v44 = vmul.f32 %v1690_v7, %v2102_v11  ;;  %v1104_v61 = vadd.f32 %v2173_v10, %v1065_v31 }
 0x23c   :  { %1533 = vst [vmem:[%s2323_s6 + $0x50] sm:$0xff] %v1482_v38   ;;  %v1089_v49 = vadd.f32 %v2173_v10, %v1050_v17  ;;  %v1027_v42 = vmul.f32 %v1692_v25, %v2095_v53  ;;  %v901_v35 = vpop.xlane.xlu0 %900  ;;  %v899_v12 = vpop.xlane.xlu1 %898 }
 0x23d   :  { %1705 = vrsqrt.f32 %v964_v27  ;;  %v934_v43 = vmul.f32 0.0078125, %v901_v35  ;;  %v933_v48 = vmul.f32 0.0078125, %v899_v12  ;;  %v1047_v53 = vmul.f32 %v2167_v14, %v1008_v44 }
 0x23e   :  { %v1694_v46 = vpop.eup %1693  ;;  %v1457_v56 = vpack.c.bf16 %v1089_v49, %v1088_v28  ;;  %v1066_v15 = vmul.f32 %v2167_v14, %v1027_v42  ;;  %1707 = vrsqrt.f32 %v949_v51 }
 0x23f   :  { %v1696_v23 = vpop.eup %1695  ;;  %v966_v33 = vadd.f32 1e-05, %v934_v43  ;;  %v965_v57 = vadd.f32 1e-05, %v933_v48  ;;  %v1024_v50 = vmul.f32 %v1694_v46, %v2112_v18  ;;  %v1086_v2 = vadd.f32 %v2173_v10, %v1047_v53 }
 0x240   :  { %1528 = vst [vmem:[%s2323_s6 + $0x28] sm:$0xff] %v1457_v56   ;;  %v1105_v11 = vadd.f32 %v2173_v10, %v1066_v15  ;;  %v1009_v6 = vmul.f32 %v1696_v23, %v2107_v20  ;;  %v903_v62 = vpop.xlane.xlu1 %902 }
 0x241   :  { %1709 = vrsqrt.f32 %v966_v33  ;;  %v935_v58 = vmul.f32 0.0078125, %v903_v62  ;;  %v1063_v20 = vmul.f32 %v2167_v14, %v1024_v50 }
 0x242   :  { %v1698_v29 = vpop.eup %1697  ;;  %v1497_v52 = vpack.c.bf16 %v1105_v11, %v1104_v61  ;;  %v1048_v55 = vmul.f32 %v2167_v14, %v1009_v6  ;;  %1711 = vrsqrt.f32 %v965_v57 }
 0x243   :  { %v1700_v8 = vpop.eup %1699  ;;  %v1014_v54 = vmul.f32 %v1698_v29, %v2122_v37  ;;  %v967_v9 = vadd.f32 1e-05, %v935_v58  ;;  %v1102_v13 = vadd.f32 %v2173_v10, %v1063_v20 }
 0x244   :  { %1536 = vst [vmem:[%s2323_s6 + $0x68] sm:$0xff] %v1497_v52   ;;  %v1087_v18 = vadd.f32 %v2173_v10, %v1048_v55  ;;  %v1025_v60 = vmul.f32 %v1700_v8, %v2115_v16 }
 0x245   :  { %1713 = vrsqrt.f32 %v967_v9  ;;  %v1053_v37 = vmul.f32 %v2167_v14, %v1014_v54 }
 0x246   :  { %v1702_v21 = vpop.eup %1701  ;;  %v1452_v3 = vpack.c.bf16 %v1087_v18, %v1086_v2  ;;  %v1064_v24 = vmul.f32 %v2167_v14, %v1025_v60 }
 0x247   :  { %v1704_v36 = vpop.eup %1703  ;;  %v1012_v39 = vmul.f32 %v1702_v21, %v2132_v45  ;;  %v1092_v26 = vadd.f32 %v2173_v10, %v1053_v37 }
 0x248   :  { %1527 = vst [vmem:[%s2323_s6 + $0x20] sm:$0xff] %v1452_v3   ;;  %v1103_v22 = vadd.f32 %v2173_v10, %v1064_v24  ;;  %v1015_v16 = vmul.f32 %v1704_v36, %v2127_v41 }
 0x249   :  { %v1051_v19 = vmul.f32 %v2167_v14, %v1012_v39 }
 0x24a   :  { %v1706_v4 = vpop.eup %1705  ;;  %v1492_v34 = vpack.c.bf16 %v1103_v22, %v1102_v13  ;;  %v1054_v47 = vmul.f32 %v2167_v14, %v1015_v16 }
 0x24b   :  { %v1708_v0 = vpop.eup %1707  ;;  %v1028_v30 = vmul.f32 %v1706_v4, %v2142_v63  ;;  %v1090_v31 = vadd.f32 %v2173_v10, %v1051_v19 }
 0x24c   :  { %1535 = vst [vmem:[%s2323_s6 + $0x60] sm:$0xff] %v1492_v34   ;;  %v1093_v40 = vadd.f32 %v2173_v10, %v1054_v47  ;;  %v1013_v45 = vmul.f32 %v1708_v0, %v2135_v32 }
 0x24d   :  { %v1067_v27 = vmul.f32 %v2167_v14, %v1028_v30 }
 0x24e   :  { %v1710_v41 = vpop.eup %1709  ;;  %v1467_v7 = vpack.c.bf16 %v1093_v40, %v1092_v26  ;;  %v1052_v38 = vmul.f32 %v2167_v14, %v1013_v45 }
 0x24f   :  { %v1712_v17 = vpop.eup %1711  ;;  %v1030_v25 = vmul.f32 %v1710_v41, %v2152_v59  ;;  %v1106_v42 = vadd.f32 %v2173_v10, %v1067_v27 }
 0x250   :  { %1530 = vst [vmem:[%s2323_s6 + $0x38] sm:$0xff] %v1467_v7   ;;  %v1091_v51 = vadd.f32 %v2173_v10, %v1052_v38  ;;  %v1029_v63 = vmul.f32 %v1712_v17, %v2147_v5 }
 0x251   :  { %v1069_v44 = vmul.f32 %v2167_v14, %v1030_v25 }
 0x252   :  { %v1714_v32 = vpop.eup %1713  ;;  %v1462_v28 = vpack.c.bf16 %v1091_v51, %v1090_v31  ;;  %v1068_v49 = vmul.f32 %v2167_v14, %v1029_v63 }
 0x253   :  { %v1031_v59 = vmul.f32 %v1714_v32, %v2155_v1  ;;  %v1108_v5 = vadd.f32 %v2173_v10, %v1069_v44 }
 0x254   :  { %1529 = vst [vmem:[%s2323_s6 + $0x30] sm:$0xff] %v1462_v28   ;;  %v1107_v35 = vadd.f32 %v2173_v10, %v1068_v49 }
 0x255   :  { %v1070_v12 = vmul.f32 %v2167_v14, %v1031_v59 }
 0x256   :  { %v1502_v43 = vpack.c.bf16 %v1107_v35, %v1106_v42 }
 0x257   :  { %v1109_v48 = vadd.f32 %v2173_v10, %v1070_v12 }
 0x258   :  { %1537 = vst [vmem:[%s2323_s6 + $0x70] sm:$0xff] %v1502_v43  }
 0x259   :  { %v1507_v1 = vpack.c.bf16 %v1109_v48, %v1108_v5 }
 0x25b   :  { %1538 = vst [vmem:[%s2323_s6 + $0x78] sm:$0xff] %v1507_v1  }

// kernel: bert_pretrain_forward.21
= control target key start
LH: loop header
LB: loop body
LE: loop exit
PB: predicated region body
PF: predicated region fallthrough
CT: control target
= control target key end

     0   :  { %v1950_v1 = vmov 0   ;;  %v1146_v41 = vlaneseq  ;;  %s2422_s1 = inlined_call_operand.vmem [shape: bf16[128,384], index: 1, kind: input, shape index: {}]   ;;  %s2423_s0 = inlined_call_operand.vmem [shape: bf16[256,128], index: 0, kind: input, shape index: {}]   ;;  %s2424_s2 = inlined_call_operand.vmem [shape: f32[1,384], index: 2, kind: input, shape index: {}]   ;;  %s2425_s3 = inlined_call_operand.vmem [shape: bf16[256,384], index: 3, kind: output, shape index: {}]  }
   0x1   :  { %v1902_v0 = vld [vmem:[%s2422_s1 + $0xac] ss:$12 sps:$4 sm:$0xff]   ;;  %531 = vmatprep.mubr.bf16.mxu0 %v1950_v1  ;;  %651 = vmatprep.mubr.bf16.mxu1 %v1950_v1  ;;  %v1904_v2 = vld [vmem:[%s2422_s1 + $0xa8] ss:$12 sps:$4 sm:$0xff]   ;;  %v1907_v4 = vld [vmem:[%s2422_s1 + $0x90] ss:$12 sps:$4 sm:$0xff]  }
   0x2   :  { %499 = vmatprep.subr.bf16.mxu0 %v1902_v0  ;;  %1885 = vmatprep.subr.bf16.mxu1 %v1902_v0  ;;  %v1905_v3 = vld [vmem:[%s2422_s1 + $0x94] ss:$12 sps:$4 sm:$0xff]   ;;  %v1908_v5 = vld [vmem:[%s2422_s1 + $0x7c] ss:$12 sps:$4 sm:$0xff]   ;;  %v1910_v6 = vld [vmem:[%s2422_s1 + $0x78] ss:$12 sps:$4 sm:$0xff]  }
   0x3   :  { %500 = vmatpush1.bf16.msra.mxu0 %v1904_v2  ;;  %1893 = vmatpush1.bf16.msra.mxu1 %v1904_v2  ;;  %v1911_v7 = vld [vmem:[%s2422_s1 + $0x64] ss:$12 sps:$4 sm:$0xff]   ;;  %v1913_v8 = vld [vmem:[%s2422_s1 + $0x60] ss:$12 sps:$4 sm:$0xff]   ;;  %v1916_v10 = vld [vmem:[%s2422_s1 + $0x48] ss:$12 sps:$4 sm:$0xff]  }
   0x4   :  { %501 = vmatprep.subr.bf16.mxu0 %v1905_v3  ;;  %1886 = vmatprep.subr.bf16.mxu1 %v1905_v3  ;;  %v1914_v9 = vld [vmem:[%s2422_s1 + $0x4c] ss:$12 sps:$4 sm:$0xff]   ;;  %v1917_v11 = vld [vmem:[%s2422_s1 + $0x34] ss:$12 sps:$4 sm:$0xff]   ;;  %v1919_v12 = vld [vmem:[%s2422_s1 + $0x30] ss:$12 sps:$4 sm:$0xff]  }
   0x5   :  { %v1920_v13 = vld [vmem:[%s2422_s1 + $0x1c] ss:$12 sps:$4 sm:$0xff]   ;;  %v1922_v14 = vld [vmem:[%s2422_s1 + $0x18] ss:$12 sps:$4 sm:$0xff]   ;;  %v1925_v16 = vld [vmem:[%s2422_s1] ss:$12 sps:$4 sm:$0xff]  }
   0x6   :  { %v1923_v15 = vld [vmem:[%s2422_s1 + $0x4] ss:$12 sps:$4 sm:$0xff]   ;;  %v1932_v21 = vld [vmem:[%s2422_s1 + $0x80] ss:$12 sps:$4 sm:$0xff]   ;;  %v1933_v24 = vld [vmem:[%s2422_s1 + $0x68] ss:$12 sps:$4 sm:$0xff]  }
   0x7   :  { %502 = vmatpush1.bf16.msra.mxu0 %v1907_v4  ;;  %1894 = vmatpush1.bf16.msra.mxu1 %v1907_v4  ;;  %v1928_v17 = vld [vmem:[%s2422_s1 + $0xb0] ss:$12 sps:$4 sm:$0xff]   ;;  %v1926_v18 = vld [vmem:[%s2423_s0] sm:$0xff]   ;;  %v1930_v22 = vld [vmem:[%s2423_s0 + $0x8] sm:$0xff]   ;;  %v2115_v42 = vshrl.u32 %v1146_v41, 7 }
   0x8   :  { %503 = vmatprep.subr.bf16.mxu0 %v1908_v5  ;;  %1887 = vmatprep.subr.bf16.mxu1 %v1908_v5  ;;  %v2030_v19 = vld [vmem:[%s2423_s0 + $0x60] sm:$0xff]   ;;  %v2047_v23 = vld [vmem:[%s2423_s0 + $0x68] sm:$0xff]   ;;  %v1936_v25 = vld [vmem:[%s2422_s1 + $0x50] ss:$12 sps:$4 sm:$0xff]  }
   0x9   :  { %v1929_v20 = vld [vmem:[%s2422_s1 + $0x98] ss:$12 sps:$4 sm:$0xff]   ;;  %v1934_v26 = vld [vmem:[%s2423_s0 + $0x10] sm:$0xff]   ;;  %v1940_v29 = vld [vmem:[%s2422_s1 + $0x20] ss:$12 sps:$4 sm:$0xff]   ;;  %v1148_v43 = vsub.s32 0, %v2115_v42 }
   0xa   :  { %v1935_v27 = vld [vmem:[%s2423_s0 + $0x70] sm:$0xff]   ;;  %v1937_v28 = vld [vmem:[%s2422_s1 + $0x38] ss:$12 sps:$4 sm:$0xff]   ;;  %v1943_v34 = vld [vmem:[%s2423_s0 + $0x28] sm:$0xff]   ;;  %v1152_v44 = vsub.s32 1, %v2115_v42 }
   0xb   :  { %504 = vmatpush1.bf16.msra.mxu0 %v1910_v6  ;;  %1895 = vmatpush1.bf16.msra.mxu1 %v1910_v6  ;;  %v1938_v30 = vld [vmem:[%s2423_s0 + $0x18] sm:$0xff]   ;;  %v1941_v32 = vld [vmem:[%s2422_s1 + $0x8] ss:$12 sps:$4 sm:$0xff]   ;;  %v1942_v33 = vld [vmem:[%s2423_s0 + $0x20] sm:$0xff]  }
   0xc   :  { %505 = vmatprep.subr.bf16.mxu0 %v1911_v7  ;;  %1888 = vmatprep.subr.bf16.mxu1 %v1911_v7  ;;  %v1939_v31 = vld [vmem:[%s2423_s0 + $0x78] sm:$0xff]   ;;  %v1944_v35 = vld [vmem:[%s2423_s0 + $0x30] sm:$0xff]   ;;  %v1946_v37 = vld [vmem:[%s2423_s0 + $0x40] sm:$0xff]  }
   0xd   :  { %v1945_v36 = vld [vmem:[%s2423_s0 + $0x38] sm:$0xff]   ;;  %v1947_v38 = vld [vmem:[%s2423_s0 + $0x48] sm:$0xff]   ;;  %v1948_v39 = vld [vmem:[%s2423_s0 + $0x50] sm:$0xff]  }
   0xe   :  { %v1949_v40 = vld [vmem:[%s2423_s0 + $0x58] sm:$0xff]   ;;  %v2122_v45 = vld [vmem:[%s2424_s2] sm:$0x7] }
   0xf   :  { %506 = vmatpush1.bf16.msra.mxu0 %v1913_v8  ;;  %1896 = vmatpush1.bf16.msra.mxu1 %v1913_v8  ;;  %v2125_v46 = vrot.slane %v2122_v45, %v1148_v43  ;;  %v2128_v47 = vrot.slane %v2122_v45, %v1152_v44 }
  0x10   :  { %507 = vmatprep.subr.bf16.mxu0 %v1914_v9  ;;  %1889 = vmatprep.subr.bf16.mxu1 %v1914_v9 }
  0x13   :  { %508 = vmatpush1.bf16.msra.mxu0 %v1916_v10  ;;  %1897 = vmatpush1.bf16.msra.mxu1 %v1916_v10 }
  0x14   :  { %509 = vmatprep.subr.bf16.mxu0 %v1917_v11  ;;  %1890 = vmatprep.subr.bf16.mxu1 %v1917_v11 }
  0x17   :  { %510 = vmatpush1.bf16.msra.mxu0 %v1919_v12  ;;  %1898 = vmatpush1.bf16.msra.mxu1 %v1919_v12 }
  0x18   :  { %511 = vmatprep.subr.bf16.mxu0 %v1920_v13  ;;  %1891 = vmatprep.subr.bf16.mxu1 %v1920_v13 }
  0x1b   :  { %512 = vmatpush1.bf16.msra.mxu0 %v1922_v14  ;;  %1899 = vmatpush1.bf16.msra.mxu1 %v1922_v14 }
  0x1c   :  { %513 = vmatprep.subr.bf16.mxu0 %v1923_v15  ;;  %1892 = vmatprep.subr.bf16.mxu1 %v1923_v15 }
  0x1f   :  { %514 = vmatpush1.bf16.msra.mxu0 %v1925_v16  ;;  %1900 = vmatpush1.bf16.msra.mxu1 %v1925_v16 }
  0x20   :  { %1837 = vmatprep.subr.bf16.mxu1 %v1928_v17 }
  0x22   :  { %532 = vmatmul.mubr.bf16.vlgmr.msra.gmra.mxu0 %v1926_v18  ;;  %652 = vmatmul.mubr.bf16.vlgmr.msra.gmra.mxu1 %v2030_v19 }
  0x23   :  { %1838 = vmatpush3.bf16.msra.mxu1 %v1928_v17  ;;  %541 = vmatprep.mubr.bf16.mxu0 %v1950_v1 }
  0x24   :  { %1839 = vmatprep.subr.bf16.mxu1 %v1929_v20  ;;  %661 = vmatprep.mubr.bf16.mxu1 %v1950_v1 }
  0x27   :  { %1840 = vmatpush3.bf16.msra.mxu1 %v1929_v20 }
  0x28   :  { %1841 = vmatprep.subr.bf16.mxu1 %v1932_v21 }
  0x2a   :  { %542 = vmatmul.mubr.bf16.gmra.mxu0 %v1930_v22  ;;  %662 = vmatmul.mubr.bf16.gmra.mxu1 %v2047_v23 }
  0x2b   :  { %1842 = vmatpush3.bf16.msra.mxu1 %v1932_v21  ;;  %551 = vmatprep.mubr.bf16.mxu0 %v1950_v1 }
  0x2c   :  { %1843 = vmatprep.subr.bf16.mxu1 %v1933_v24  ;;  %671 = vmatprep.mubr.bf16.mxu1 %v1950_v1 }
  0x2f   :  { %1844 = vmatpush3.bf16.msra.mxu1 %v1933_v24 }
  0x30   :  { %1845 = vmatprep.subr.bf16.mxu1 %v1936_v25 }
  0x32   :  { %552 = vmatmul.mubr.bf16.gmra.mxu0 %v1934_v26  ;;  %672 = vmatmul.mubr.bf16.gmra.mxu1 %v1935_v27 }
  0x33   :  { %1846 = vmatpush3.bf16.msra.mxu1 %v1936_v25  ;;  %561 = vmatprep.mubr.bf16.mxu0 %v1950_v1 }
  0x34   :  { %1847 = vmatprep.subr.bf16.mxu1 %v1937_v28  ;;  %681 = vmatprep.mubr.bf16.mxu1 %v1950_v1 }
  0x37   :  { %1848 = vmatpush3.bf16.msra.mxu1 %v1937_v28 }
  0x38   :  { %1849 = vmatprep.subr.bf16.mxu1 %v1940_v29 }
  0x3a   :  { %562 = vmatmul.mubr.bf16.gmra.mxu0 %v1938_v30  ;;  %682 = vmatmul.mubr.bf16.gmra.mxu1 %v1939_v31 }
  0x3b   :  { %1850 = vmatpush3.bf16.msra.mxu1 %v1940_v29  ;;  %571 = vmatprep.mubr.bf16.mxu0 %v1950_v1 }
  0x3c   :  { %1851 = vmatprep.subr.bf16.mxu1 %v1941_v32  ;;  %1853 = vmatprep.mubr.bf16.mxu1 %v1926_v18 }
  0x3f   :  { %1852 = vmatpush3.bf16.msra.mxu1 %v1941_v32 }
  0x42   :  { %572 = vmatmul.mubr.bf16.gmra.mxu0 %v1942_v33  ;;  %1854 = vmatmul.mubr.bf16.vlgmr.msra.gmra.mxu1 %v1930_v22 }
  0x43   :  { %581 = vmatprep.mubr.bf16.mxu0 %v1950_v1  ;;  %1857 = vmatprep.mubr.bf16.mxu1 %v1934_v26 }
  0x4a   :  { %582 = vmatmul.mubr.bf16.gmra.mxu0 %v1943_v34  ;;  %1858 = vmatmul.mubr.bf16.gmra.mxu1 %v1938_v30 }
  0x4b   :  { %591 = vmatprep.mubr.bf16.mxu0 %v1950_v1  ;;  %1861 = vmatprep.mubr.bf16.mxu1 %v1942_v33 }
  0x52   :  { %592 = vmatmul.mubr.bf16.gmra.mxu0 %v1944_v35  ;;  %1862 = vmatmul.mubr.bf16.gmra.mxu1 %v1943_v34 }
  0x53   :  { %601 = vmatprep.mubr.bf16.mxu0 %v1950_v1  ;;  %1865 = vmatprep.mubr.bf16.mxu1 %v1944_v35 }
  0x5a   :  { %602 = vmatmul.mubr.bf16.gmra.mxu0 %v1945_v36  ;;  %1866 = vmatmul.mubr.bf16.gmra.mxu1 %v1945_v36 }
  0x5b   :  { %611 = vmatprep.mubr.bf16.mxu0 %v1950_v1  ;;  %1869 = vmatprep.mubr.bf16.mxu1 %v1946_v37 }
  0x62   :  { %612 = vmatmul.mubr.bf16.gmra.mxu0 %v1946_v37  ;;  %1870 = vmatmul.mubr.bf16.gmra.mxu1 %v1947_v38 }
  0x63   :  { %621 = vmatprep.mubr.bf16.mxu0 %v1950_v1  ;;  %1873 = vmatprep.mubr.bf16.mxu1 %v1948_v39 }
  0x6a   :  { %622 = vmatmul.mubr.bf16.gmra.mxu0 %v1947_v38  ;;  %1874 = vmatmul.mubr.bf16.gmra.mxu1 %v1949_v40 }
  0x6b   :  { %631 = vmatprep.mubr.bf16.mxu0 %v1950_v1  ;;  %1877 = vmatprep.mubr.bf16.mxu1 %v2030_v19 }
  0x72   :  { %632 = vmatmul.mubr.bf16.gmra.mxu0 %v1948_v39  ;;  %1878 = vmatmul.mubr.bf16.gmra.mxu1 %v2047_v23 }
  0x73   :  { %641 = vmatprep.mubr.bf16.mxu0 %v1950_v1  ;;  %1881 = vmatprep.mubr.bf16.mxu1 %v1935_v27 }
  0x7a   :  { %642 = vmatmul.mubr.bf16.gmra.mxu0 %v1949_v40  ;;  %1882 = vmatmul.mubr.bf16.gmra.mxu1 %v1939_v31 }
  0xe2   :  { %v533_v48 = vpop.f32.mrf.mxu0  ;;  %v653_v49 = vpop.f32.mrf.mxu1 }
  0xe3   :  { %v1161_v52 = vadd.f32 %v2125_v46, %v533_v48  ;;  %v1233_v53 = vadd.f32 %v2125_v46, %v653_v49 }
  0xe4   :  { %v535_v50 = vpop.f32.mrf.mxu0  ;;  %v655_v51 = vpop.f32.mrf.mxu1 }
  0xe5   :  { %v1162_v54 = vadd.f32 %v2128_v47, %v535_v50  ;;  %v1234_v55 = vadd.f32 %v2128_v47, %v655_v51  ;;  %v1156_v50 = vsub.s32 2, %v2115_v42 }
  0xe6   :  { %v537_v56 = vpop.f32.mrf.mxu0  ;;  %v657_v57 = vpop.f32.mrf.mxu1 }
  0xe7   :  { %v1749_v58 = vpack.c.bf16 %v1162_v54, %v1161_v52  ;;  %v1797_v59 = vpack.c.bf16 %v1234_v55, %v1233_v53  ;;  %v1164_v62 = vadd.f32 %v2125_v46, %v537_v56  ;;  %v1236_v63 = vadd.f32 %v2125_v46, %v657_v57 }
  0xe8   :  { %v539_v60 = vpop.f32.mrf.mxu0  ;;  %v659_v61 = vpop.f32.mrf.mxu1 }
  0xe9   :  { %1577 = vst [vmem:[%s2425_s3] sm:$0xff] %v1749_v58  ;;  %1625 = vst [vmem:[%s2425_s3 + $0x120] sm:$0xff] %v1797_v59  ;;  %v1165_v0 = vadd.f32 %v2128_v47, %v539_v60  ;;  %v1237_v1 = vadd.f32 %v2128_v47, %v659_v61  ;;  %v2196_v60 = vrot.slane %v2122_v45, %v1156_v50 }
  0xea   :  { %v543_v2 = vpop.f32.mrf.mxu0  ;;  %v663_v3 = vpop.f32.mrf.mxu1 }
  0xeb   :  { %v1751_v4 = vpack.c.bf16 %v1165_v0, %v1164_v62  ;;  %v1799_v5 = vpack.c.bf16 %v1237_v1, %v1236_v63  ;;  %v1167_v8 = vadd.f32 %v2125_v46, %v543_v2  ;;  %v1239_v9 = vadd.f32 %v2125_v46, %v663_v3 }
  0xec   :  { %v545_v6 = vpop.f32.mrf.mxu0  ;;  %v665_v7 = vpop.f32.mrf.mxu1 }
  0xed   :  { %1579 = vst [vmem:[%s2425_s3 + $0xc] sm:$0xff] %v1751_v4  ;;  %1627 = vst [vmem:[%s2425_s3 + $0x12c] sm:$0xff] %v1799_v5  ;;  %v1168_v10 = vadd.f32 %v2128_v47, %v545_v6  ;;  %v1240_v11 = vadd.f32 %v2128_v47, %v665_v7 }
  0xee   :  { %v547_v12 = vpop.f32.mrf.mxu0  ;;  %v667_v13 = vpop.f32.mrf.mxu1 }
  0xef   :  { %v1753_v14 = vpack.c.bf16 %v1168_v10, %v1167_v8  ;;  %v1801_v15 = vpack.c.bf16 %v1240_v11, %v1239_v9  ;;  %v1170_v18 = vadd.f32 %v2125_v46, %v547_v12  ;;  %v1242_v19 = vadd.f32 %v2125_v46, %v667_v13 }
  0xf0   :  { %v549_v16 = vpop.f32.mrf.mxu0  ;;  %v669_v17 = vpop.f32.mrf.mxu1 }
  0xf1   :  { %1581 = vst [vmem:[%s2425_s3 + $0x18] sm:$0xff] %v1753_v14  ;;  %1629 = vst [vmem:[%s2425_s3 + $0x138] sm:$0xff] %v1801_v15  ;;  %v1171_v20 = vadd.f32 %v2128_v47, %v549_v16  ;;  %v1243_v21 = vadd.f32 %v2128_v47, %v669_v17 }
  0xf2   :  { %v553_v22 = vpop.f32.mrf.mxu0  ;;  %v673_v23 = vpop.f32.mrf.mxu1 }
  0xf3   :  { %v1755_v24 = vpack.c.bf16 %v1171_v20, %v1170_v18  ;;  %v1803_v25 = vpack.c.bf16 %v1243_v21, %v1242_v19  ;;  %v1173_v28 = vadd.f32 %v2125_v46, %v553_v22  ;;  %v1245_v29 = vadd.f32 %v2125_v46, %v673_v23 }
  0xf4   :  { %v555_v26 = vpop.f32.mrf.mxu0  ;;  %v675_v27 = vpop.f32.mrf.mxu1 }
  0xf5   :  { %1583 = vst [vmem:[%s2425_s3 + $0x24] sm:$0xff] %v1755_v24  ;;  %1631 = vst [vmem:[%s2425_s3 + $0x144] sm:$0xff] %v1803_v25  ;;  %v1174_v30 = vadd.f32 %v2128_v47, %v555_v26  ;;  %v1246_v31 = vadd.f32 %v2128_v47, %v675_v27 }
  0xf6   :  { %v557_v32 = vpop.f32.mrf.mxu0  ;;  %v677_v33 = vpop.f32.mrf.mxu1 }
  0xf7   :  { %v1757_v34 = vpack.c.bf16 %v1174_v30, %v1173_v28  ;;  %v1805_v35 = vpack.c.bf16 %v1246_v31, %v1245_v29  ;;  %v1176_v38 = vadd.f32 %v2125_v46, %v557_v32  ;;  %v1248_v39 = vadd.f32 %v2125_v46, %v677_v33 }
  0xf8   :  { %v559_v36 = vpop.f32.mrf.mxu0  ;;  %v679_v37 = vpop.f32.mrf.mxu1 }
  0xf9   :  { %1585 = vst [vmem:[%s2425_s3 + $0x30] sm:$0xff] %v1757_v34  ;;  %1633 = vst [vmem:[%s2425_s3 + $0x150] sm:$0xff] %v1805_v35  ;;  %v1177_v40 = vadd.f32 %v2128_v47, %v559_v36  ;;  %v1249_v41 = vadd.f32 %v2128_v47, %v679_v37 }
  0xfa   :  { %v563_v43 = vpop.f32.mrf.mxu0  ;;  %v683_v44 = vpop.f32.mrf.mxu1 }
  0xfb   :  { %v1759_v48 = vpack.c.bf16 %v1177_v40, %v1176_v38  ;;  %v1807_v49 = vpack.c.bf16 %v1249_v41, %v1248_v39  ;;  %v1179_v53 = vadd.f32 %v2125_v46, %v563_v43  ;;  %v1251_v54 = vadd.f32 %v2125_v46, %v683_v44 }
  0xfc   :  { %v565_v51 = vpop.f32.mrf.mxu0  ;;  %v685_v52 = vpop.f32.mrf.mxu1 }
  0xfd   :  { %1587 = vst [vmem:[%s2425_s3 + $0x3c] sm:$0xff] %v1759_v48  ;;  %1635 = vst [vmem:[%s2425_s3 + $0x15c] sm:$0xff] %v1807_v49  ;;  %v1180_v55 = vadd.f32 %v2128_v47, %v565_v51  ;;  %v1252_v56 = vadd.f32 %v2128_v47, %v685_v52 }
  0xfe   :  { %v567_v57 = vpop.f32.mrf.mxu0  ;;  %v687_v42 = vpop.f32.mrf.mxu1 }
  0xff   :  { %v1761_v58 = vpack.c.bf16 %v1180_v55, %v1179_v53  ;;  %v1809_v59 = vpack.c.bf16 %v1252_v56, %v1251_v54  ;;  %v1182_v63 = vadd.f32 %v2125_v46, %v567_v57  ;;  %v1254_v0 = vadd.f32 %v2125_v46, %v687_v42 }
 0x100   :  { %v569_v61 = vpop.f32.mrf.mxu0  ;;  %v689_v62 = vpop.f32.mrf.mxu1 }
 0x101   :  { %1589 = vst [vmem:[%s2425_s3 + $0x48] sm:$0xff] %v1761_v58  ;;  %1637 = vst [vmem:[%s2425_s3 + $0x168] sm:$0xff] %v1809_v59  ;;  %v1183_v1 = vadd.f32 %v2128_v47, %v569_v61  ;;  %v1255_v2 = vadd.f32 %v2128_v47, %v689_v62 }
 0x102   :  { %v573_v45 = vpop.f32.mrf.mxu0  ;;  %v1855_v3 = vpop.f32.mrf.mxu1 }
 0x103   :  { %v1763_v4 = vpack.c.bf16 %v1183_v1, %v1182_v63  ;;  %v1811_v5 = vpack.c.bf16 %v1255_v2, %v1254_v0  ;;  %v1169_v6 = vadd.f32 %v1855_v3, %v2196_v60  ;;  %v1185_v9 = vadd.f32 %v2125_v46, %v573_v45 }
 0x104   :  { %v575_v7 = vpop.f32.mrf.mxu0  ;;  %v726_v8 = vpop.f32.mrf.mxu1 }
 0x105   :  { %1591 = vst [vmem:[%s2425_s3 + $0x54] sm:$0xff] %v1763_v4  ;;  %1639 = vst [vmem:[%s2425_s3 + $0x174] sm:$0xff] %v1811_v5  ;;  %v1754_v10 = vpack.c.bf16 %v1169_v6, %v1169_v6  ;;  %v1186_v11 = vadd.f32 %v2128_v47, %v575_v7  ;;  %v1163_v12 = vadd.f32 %v2196_v60, %v726_v8 }
 0x106   :  { %v577_v13 = vpop.f32.mrf.mxu0  ;;  %v1856_v14 = vpop.f32.mrf.mxu1 }
 0x107   :  { %1582 = vst [vmem:[%s2425_s3 + $0x20] sm:$0xf] %v1754_v10  ;;  %v1765_v15 = vpack.c.bf16 %v1186_v11, %v1185_v9  ;;  %v1750_v16 = vpack.c.bf16 %v1163_v12, %v1163_v12  ;;  %v1172_v17 = vadd.f32 %v1856_v14, %v2196_v60  ;;  %v1188_v20 = vadd.f32 %v2125_v46, %v577_v13 }
 0x108   :  { %v579_v18 = vpop.f32.mrf.mxu0  ;;  %v729_v19 = vpop.f32.mrf.mxu1 }
 0x109   :  { %1593 = vst [vmem:[%s2425_s3 + $0x60] sm:$0xff] %v1765_v15  ;;  %1578 = vst [vmem:[%s2425_s3 + $0x8] sm:$0xf] %v1750_v16  ;;  %v1756_v21 = vpack.c.bf16 %v1172_v17, %v1172_v17  ;;  %v1189_v22 = vadd.f32 %v2128_v47, %v579_v18  ;;  %v1166_v23 = vadd.f32 %v2196_v60, %v729_v19 }
 0x10a   :  { %v583_v24 = vpop.f32.mrf.mxu0  ;;  %v1859_v25 = vpop.f32.mrf.mxu1 }
 0x10b   :  { %1584 = vst [vmem:[%s2425_s3 + $0x2c] sm:$0xf] %v1756_v21  ;;  %v1767_v26 = vpack.c.bf16 %v1189_v22, %v1188_v20  ;;  %v1752_v27 = vpack.c.bf16 %v1166_v23, %v1166_v23  ;;  %v1181_v28 = vadd.f32 %v1859_v25, %v2196_v60  ;;  %v1191_v31 = vadd.f32 %v2125_v46, %v583_v24 }
 0x10c   :  { %v585_v29 = vpop.f32.mrf.mxu0  ;;  %v742_v30 = vpop.f32.mrf.mxu1 }
 0x10d   :  { %1595 = vst [vmem:[%s2425_s3 + $0x6c] sm:$0xff] %v1767_v26  ;;  %1580 = vst [vmem:[%s2425_s3 + $0x14] sm:$0xf] %v1752_v27  ;;  %v1762_v32 = vpack.c.bf16 %v1181_v28, %v1181_v28  ;;  %v1192_v33 = vadd.f32 %v2128_v47, %v585_v29  ;;  %v1175_v34 = vadd.f32 %v2196_v60, %v742_v30 }
 0x10e   :  { %v587_v35 = vpop.f32.mrf.mxu0  ;;  %v1860_v36 = vpop.f32.mrf.mxu1 }
 0x10f   :  { %1590 = vst [vmem:[%s2425_s3 + $0x50] sm:$0xf] %v1762_v32  ;;  %v1769_v37 = vpack.c.bf16 %v1192_v33, %v1191_v31  ;;  %v1758_v38 = vpack.c.bf16 %v1175_v34, %v1175_v34  ;;  %v1184_v39 = vadd.f32 %v1860_v36, %v2196_v60  ;;  %v1194_v43 = vadd.f32 %v2125_v46, %v587_v35 }
 0x110   :  { %v589_v40 = vpop.f32.mrf.mxu0  ;;  %v745_v41 = vpop.f32.mrf.mxu1 }
 0x111   :  { %1597 = vst [vmem:[%s2425_s3 + $0x78] sm:$0xff] %v1769_v37  ;;  %1586 = vst [vmem:[%s2425_s3 + $0x38] sm:$0xf] %v1758_v38  ;;  %v1764_v44 = vpack.c.bf16 %v1184_v39, %v1184_v39  ;;  %v1195_v48 = vadd.f32 %v2128_v47, %v589_v40  ;;  %v1178_v49 = vadd.f32 %v2196_v60, %v745_v41 }
 0x112   :  { %v593_v50 = vpop.f32.mrf.mxu0  ;;  %v1863_v51 = vpop.f32.mrf.mxu1 }
 0x113   :  { %1592 = vst [vmem:[%s2425_s3 + $0x5c] sm:$0xf] %v1764_v44  ;;  %v1771_v52 = vpack.c.bf16 %v1195_v48, %v1194_v43  ;;  %v1760_v53 = vpack.c.bf16 %v1178_v49, %v1178_v49  ;;  %v1193_v54 = vadd.f32 %v1863_v51, %v2196_v60  ;;  %v1197_v57 = vadd.f32 %v2125_v46, %v593_v50 }
 0x114   :  { %v595_v55 = vpop.f32.mrf.mxu0  ;;  %v758_v56 = vpop.f32.mrf.mxu1 }
 0x115   :  { %1599 = vst [vmem:[%s2425_s3 + $0x84] sm:$0xff] %v1771_v52  ;;  %1588 = vst [vmem:[%s2425_s3 + $0x44] sm:$0xf] %v1760_v53  ;;  %v1770_v42 = vpack.c.bf16 %v1193_v54, %v1193_v54  ;;  %v1198_v58 = vadd.f32 %v2128_v47, %v595_v55  ;;  %v1187_v59 = vadd.f32 %v2196_v60, %v758_v56 }
 0x116   :  { %v597_v61 = vpop.f32.mrf.mxu0  ;;  %v1864_v62 = vpop.f32.mrf.mxu1 }
 0x117   :  { %1598 = vst [vmem:[%s2425_s3 + $0x80] sm:$0xf] %v1770_v42  ;;  %v1773_v63 = vpack.c.bf16 %v1198_v58, %v1197_v57  ;;  %v1766_v0 = vpack.c.bf16 %v1187_v59, %v1187_v59  ;;  %v1196_v1 = vadd.f32 %v1864_v62, %v2196_v60  ;;  %v1200_v3 = vadd.f32 %v2125_v46, %v597_v61 }
 0x118   :  { %v599_v2 = vpop.f32.mrf.mxu0  ;;  %v761_v45 = vpop.f32.mrf.mxu1 }
 0x119   :  { %1601 = vst [vmem:[%s2425_s3 + $0x90] sm:$0xff] %v1773_v63  ;;  %1594 = vst [vmem:[%s2425_s3 + $0x68] sm:$0xf] %v1766_v0  ;;  %v1772_v4 = vpack.c.bf16 %v1196_v1, %v1196_v1  ;;  %v1201_v5 = vadd.f32 %v2128_v47, %v599_v2  ;;  %v1190_v6 = vadd.f32 %v2196_v60, %v761_v45 }
 0x11a   :  { %v603_v7 = vpop.f32.mrf.mxu0  ;;  %v1867_v8 = vpop.f32.mrf.mxu1 }
 0x11b   :  { %1600 = vst [vmem:[%s2425_s3 + $0x8c] sm:$0xf] %v1772_v4  ;;  %v1775_v9 = vpack.c.bf16 %v1201_v5, %v1200_v3  ;;  %v1768_v10 = vpack.c.bf16 %v1190_v6, %v1190_v6  ;;  %v1205_v11 = vadd.f32 %v1867_v8, %v2196_v60  ;;  %v1203_v14 = vadd.f32 %v2125_v46, %v603_v7 }
 0x11c   :  { %v605_v12 = vpop.f32.mrf.mxu0  ;;  %v774_v13 = vpop.f32.mrf.mxu1 }
 0x11d   :  { %1603 = vst [vmem:[%s2425_s3 + $0x9c] sm:$0xff] %v1775_v9  ;;  %1596 = vst [vmem:[%s2425_s3 + $0x74] sm:$0xf] %v1768_v10  ;;  %v1778_v15 = vpack.c.bf16 %v1205_v11, %v1205_v11  ;;  %v1204_v16 = vadd.f32 %v2128_v47, %v605_v12  ;;  %v1199_v17 = vadd.f32 %v2196_v60, %v774_v13 }
 0x11e   :  { %v607_v18 = vpop.f32.mrf.mxu0  ;;  %v1868_v19 = vpop.f32.mrf.mxu1 }
 0x11f   :  { %1606 = vst [vmem:[%s2425_s3 + $0xb0] sm:$0xf] %v1778_v15  ;;  %v1777_v20 = vpack.c.bf16 %v1204_v16, %v1203_v14  ;;  %v1774_v21 = vpack.c.bf16 %v1199_v17, %v1199_v17  ;;  %v1208_v22 = vadd.f32 %v1868_v19, %v2196_v60  ;;  %v1206_v25 = vadd.f32 %v2125_v46, %v607_v18 }
 0x120   :  { %v609_v23 = vpop.f32.mrf.mxu0  ;;  %v777_v24 = vpop.f32.mrf.mxu1 }
 0x121   :  { %1605 = vst [vmem:[%s2425_s3 + $0xa8] sm:$0xff] %v1777_v20  ;;  %1602 = vst [vmem:[%s2425_s3 + $0x98] sm:$0xf] %v1774_v21  ;;  %v1780_v26 = vpack.c.bf16 %v1208_v22, %v1208_v22  ;;  %v1207_v27 = vadd.f32 %v2128_v47, %v609_v23  ;;  %v1202_v28 = vadd.f32 %v2196_v60, %v777_v24 }
 0x122   :  { %v613_v29 = vpop.f32.mrf.mxu0  ;;  %v1871_v30 = vpop.f32.mrf.mxu1 }
 0x123   :  { %1608 = vst [vmem:[%s2425_s3 + $0xbc] sm:$0xf] %v1780_v26  ;;  %v1779_v31 = vpack.c.bf16 %v1207_v27, %v1206_v25  ;;  %v1776_v32 = vpack.c.bf16 %v1202_v28, %v1202_v28  ;;  %v1217_v33 = vadd.f32 %v1871_v30, %v2196_v60  ;;  %v1209_v36 = vadd.f32 %v2125_v46, %v613_v29 }
 0x124   :  { %v615_v34 = vpop.f32.mrf.mxu0  ;;  %v790_v35 = vpop.f32.mrf.mxu1 }
 0x125   :  { %1607 = vst [vmem:[%s2425_s3 + $0xb4] sm:$0xff] %v1779_v31  ;;  %1604 = vst [vmem:[%s2425_s3 + $0xa4] sm:$0xf] %v1776_v32  ;;  %v1786_v37 = vpack.c.bf16 %v1217_v33, %v1217_v33  ;;  %v1210_v38 = vadd.f32 %v2128_v47, %v615_v34  ;;  %v1211_v39 = vadd.f32 %v2196_v60, %v790_v35 }
 0x126   :  { %v617_v40 = vpop.f32.mrf.mxu0  ;;  %v1872_v41 = vpop.f32.mrf.mxu1 }
 0x127   :  { %1614 = vst [vmem:[%s2425_s3 + $0xe0] sm:$0xf] %v1786_v37  ;;  %v1781_v43 = vpack.c.bf16 %v1210_v38, %v1209_v36  ;;  %v1782_v44 = vpack.c.bf16 %v1211_v39, %v1211_v39  ;;  %v1220_v48 = vadd.f32 %v1872_v41, %v2196_v60  ;;  %v1212_v51 = vadd.f32 %v2125_v46, %v617_v40 }
 0x128   :  { %v619_v49 = vpop.f32.mrf.mxu0  ;;  %v793_v50 = vpop.f32.mrf.mxu1 }
 0x129   :  { %1609 = vst [vmem:[%s2425_s3 + $0xc0] sm:$0xff] %v1781_v43  ;;  %1610 = vst [vmem:[%s2425_s3 + $0xc8] sm:$0xf] %v1782_v44  ;;  %v1788_v52 = vpack.c.bf16 %v1220_v48, %v1220_v48  ;;  %v1213_v53 = vadd.f32 %v2128_v47, %v619_v49  ;;  %v1214_v54 = vadd.f32 %v2196_v60, %v793_v50 }
 0x12a   :  { %v623_v55 = vpop.f32.mrf.mxu0  ;;  %v1875_v56 = vpop.f32.mrf.mxu1 }
 0x12b   :  { %1616 = vst [vmem:[%s2425_s3 + $0xec] sm:$0xf] %v1788_v52  ;;  %v1783_v57 = vpack.c.bf16 %v1213_v53, %v1212_v51  ;;  %v1784_v42 = vpack.c.bf16 %v1214_v54, %v1214_v54  ;;  %v1229_v58 = vadd.f32 %v1875_v56, %v2196_v60  ;;  %v1215_v62 = vadd.f32 %v2125_v46, %v623_v55 }
 0x12c   :  { %v625_v59 = vpop.f32.mrf.mxu0  ;;  %v806_v61 = vpop.f32.mrf.mxu1 }
 0x12d   :  { %1611 = vst [vmem:[%s2425_s3 + $0xcc] sm:$0xff] %v1783_v57  ;;  %1612 = vst [vmem:[%s2425_s3 + $0xd4] sm:$0xf] %v1784_v42  ;;  %v1794_v63 = vpack.c.bf16 %v1229_v58, %v1229_v58  ;;  %v1216_v0 = vadd.f32 %v2128_v47, %v625_v59  ;;  %v1223_v1 = vadd.f32 %v2196_v60, %v806_v61 }
 0x12e   :  { %v627_v2 = vpop.f32.mrf.mxu0  ;;  %v1876_v45 = vpop.f32.mrf.mxu1 }
 0x12f   :  { %1622 = vst [vmem:[%s2425_s3 + $0x110] sm:$0xf] %v1794_v63  ;;  %v1785_v3 = vpack.c.bf16 %v1216_v0, %v1215_v62  ;;  %v1790_v4 = vpack.c.bf16 %v1223_v1, %v1223_v1  ;;  %v1232_v5 = vadd.f32 %v1876_v45, %v2196_v60  ;;  %v1218_v8 = vadd.f32 %v2125_v46, %v627_v2 }
 0x130   :  { %v629_v6 = vpop.f32.mrf.mxu0  ;;  %v809_v7 = vpop.f32.mrf.mxu1 }
 0x131   :  { %1613 = vst [vmem:[%s2425_s3 + $0xd8] sm:$0xff] %v1785_v3  ;;  %1618 = vst [vmem:[%s2425_s3 + $0xf8] sm:$0xf] %v1790_v4  ;;  %v1796_v9 = vpack.c.bf16 %v1232_v5, %v1232_v5  ;;  %v1219_v10 = vadd.f32 %v2128_v47, %v629_v6  ;;  %v1226_v11 = vadd.f32 %v2196_v60, %v809_v7 }
 0x132   :  { %v633_v12 = vpop.f32.mrf.mxu0  ;;  %v1879_v13 = vpop.f32.mrf.mxu1 }
 0x133   :  { %1624 = vst [vmem:[%s2425_s3 + $0x11c] sm:$0xf] %v1796_v9  ;;  %v1787_v14 = vpack.c.bf16 %v1219_v10, %v1218_v8  ;;  %v1792_v15 = vpack.c.bf16 %v1226_v11, %v1226_v11  ;;  %v1241_v16 = vadd.f32 %v1879_v13, %v2196_v60  ;;  %v1221_v19 = vadd.f32 %v2125_v46, %v633_v12 }
 0x134   :  { %v635_v17 = vpop.f32.mrf.mxu0  ;;  %v822_v18 = vpop.f32.mrf.mxu1 }
 0x135   :  { %1615 = vst [vmem:[%s2425_s3 + $0xe4] sm:$0xff] %v1787_v14  ;;  %1620 = vst [vmem:[%s2425_s3 + $0x104] sm:$0xf] %v1792_v15  ;;  %v1802_v20 = vpack.c.bf16 %v1241_v16, %v1241_v16  ;;  %v1222_v21 = vadd.f32 %v2128_v47, %v635_v17  ;;  %v1235_v22 = vadd.f32 %v2196_v60, %v822_v18 }
 0x136   :  { %v637_v23 = vpop.f32.mrf.mxu0  ;;  %v1880_v24 = vpop.f32.mrf.mxu1 }
 0x137   :  { %1630 = vst [vmem:[%s2425_s3 + $0x140] sm:$0xf] %v1802_v20  ;;  %v1789_v25 = vpack.c.bf16 %v1222_v21, %v1221_v19  ;;  %v1798_v26 = vpack.c.bf16 %v1235_v22, %v1235_v22  ;;  %v1244_v27 = vadd.f32 %v1880_v24, %v2196_v60  ;;  %v1224_v30 = vadd.f32 %v2125_v46, %v637_v23 }
 0x138   :  { %v639_v28 = vpop.f32.mrf.mxu0  ;;  %v825_v29 = vpop.f32.mrf.mxu1 }
 0x139   :  { %1617 = vst [vmem:[%s2425_s3 + $0xf0] sm:$0xff] %v1789_v25  ;;  %1626 = vst [vmem:[%s2425_s3 + $0x128] sm:$0xf] %v1798_v26  ;;  %v1804_v31 = vpack.c.bf16 %v1244_v27, %v1244_v27  ;;  %v1225_v32 = vadd.f32 %v2128_v47, %v639_v28  ;;  %v1238_v33 = vadd.f32 %v2196_v60, %v825_v29 }
 0x13a   :  { %v643_v34 = vpop.f32.mrf.mxu0  ;;  %v1883_v35 = vpop.f32.mrf.mxu1 }
 0x13b   :  { %1632 = vst [vmem:[%s2425_s3 + $0x14c] sm:$0xf] %v1804_v31  ;;  %v1791_v36 = vpack.c.bf16 %v1225_v32, %v1224_v30  ;;  %v1800_v37 = vpack.c.bf16 %v1238_v33, %v1238_v33  ;;  %v1253_v38 = vadd.f32 %v1883_v35, %v2196_v60  ;;  %v1227_v41 = vadd.f32 %v2125_v46, %v643_v34 }
 0x13c   :  { %v645_v39 = vpop.f32.mrf.mxu0  ;;  %v838_v40 = vpop.f32.mrf.mxu1 }
 0x13d   :  { %1619 = vst [vmem:[%s2425_s3 + $0xfc] sm:$0xff] %v1791_v36  ;;  %1628 = vst [vmem:[%s2425_s3 + $0x134] sm:$0xf] %v1800_v37  ;;  %v1810_v43 = vpack.c.bf16 %v1253_v38, %v1253_v38  ;;  %v1228_v44 = vadd.f32 %v2128_v47, %v645_v39  ;;  %v1247_v48 = vadd.f32 %v2196_v60, %v838_v40 }
 0x13e   :  { %v647_v49 = vpop.f32.mrf.mxu0  ;;  %v1884_v50 = vpop.f32.mrf.mxu1 }
 0x13f   :  { %1638 = vst [vmem:[%s2425_s3 + $0x170] sm:$0xf] %v1810_v43  ;;  %v1793_v51 = vpack.c.bf16 %v1228_v44, %v1227_v41  ;;  %v1806_v52 = vpack.c.bf16 %v1247_v48, %v1247_v48  ;;  %v1256_v53 = vadd.f32 %v1884_v50, %v2196_v60  ;;  %v1230_v56 = vadd.f32 %v2125_v46, %v647_v49 }
 0x140   :  { %v649_v54 = vpop.f32.mrf.mxu0  ;;  %v841_v55 = vpop.f32.mrf.mxu1 }
 0x141   :  { %1621 = vst [vmem:[%s2425_s3 + $0x108] sm:$0xff] %v1793_v51  ;;  %1634 = vst [vmem:[%s2425_s3 + $0x158] sm:$0xf] %v1806_v52  ;;  %v1812_v57 = vpack.c.bf16 %v1256_v53, %v1256_v53  ;;  %v1231_v42 = vadd.f32 %v2128_v47, %v649_v54  ;;  %v1250_v58 = vadd.f32 %v2196_v60, %v841_v55 }
 0x143   :  { %1640 = vst [vmem:[%s2425_s3 + $0x17c] sm:$0xf] %v1812_v57  ;;  %v1795_v59 = vpack.c.bf16 %v1231_v42, %v1230_v56  ;;  %v1808_v61 = vpack.c.bf16 %v1250_v58, %v1250_v58 }
 0x145   :  { %1623 = vst [vmem:[%s2425_s3 + $0x114] sm:$0xff] %v1795_v59  ;;  %1636 = vst [vmem:[%s2425_s3 + $0x164] sm:$0xf] %v1808_v61 }

// kernel: bert_pretrain_forward.22
= control target key start
LH: loop header
LB: loop body
LE: loop exit
PB: predicated region body
PF: predicated region fallthrough
CT: control target
= control target key end

     0   :  { %11 = vsyncpa [#allocation6], 0  ;;  %s6636_s0 = inlined_call_operand.vmem [shape: bf16[2,128,384], index: 0, kind: input, shape index: {}, may-alias: {0,1,2}]   ;;  %s6637_s1 = inlined_call_operand.vmem [shape: bf16[2,128,384], index: 1, kind: input, shape index: {}, may-alias: {0,1,2}]   ;;  %s6638_s2 = inlined_call_operand.vmem [shape: bf16[2,128,384], index: 2, kind: input, shape index: {}, may-alias: {0,1,2}]   ;;  %s6639_s3 = inlined_call_operand.vmem [shape: f32[2,1,128], index: 3, kind: input, shape index: {}]   ;;  %s6640_s4 = inlined_call_operand.vmem [shape: bf16[2,128,128], index: 4, kind: output, shape index: {0}]   ;;  %s6641_s5 = inlined_call_operand.hbm [shape: bf16[2,4,128,128], index: 5, kind: output, shape index: {1}]  }
   0x1   :  { %13 = vsyncpa [#allocation6 + $0x1], 0  ;;  %s4983_s18 = smov 0   ;;  %s4985_s19 = smov 0  }
   0x2   :  { %s4987_s20 = smov 0   ;;  %s4989_s21 = smov 0  }
   0x3 LB: > { %s5004_s22 = sadd.s32 4294967295, %s4945_s21   ;;  %s3439_s23 = sadd.s32 4294967294, %s4945_s21   ;;  %s4945_s21 = sphi %s4989_s21, %s6694_s21   ;;  %s4941_s20 = sphi %s4987_s20, %s6693_s20   ;;  %s4937_s19 = sphi %s4985_s19, %s6692_s19   ;;  %s4933_s18 = sphi %s4983_s18, %s6691_s18  }
   0x4   : > { %s5008_s24 = sadd.s32 1, %s4945_s21   ;;  %s26_s25 = sadd.s32 1, %s4941_s20 }
   0x5   : > { %s23_s26 = ssub.s32 %s4945_s21, %s5008_s24  ;;  %p33_p0 = scmp.ne.s32.totalorder %s4941_s20, %s4937_s19 }
   0x6   : > { %p24_p1 = scmp.eq.s32.totalorder %s23_s26, 0  ;;  %p34_p2 = scmp.eq.s32.totalorder %s4945_s21, 0 }
   0x7   : > { %p167_p3 = scmp.eq.s32.totalorder %s5004_s22, 1  ;;  %p172_p4 = scmp.ne.s32.totalorder %s4937_s19, %s4933_s18 }
   0x8   : > { %s5020_s27 = scalar_select %p24_p1, %s4941_s20, %s26_s25  }
   0x9   : > { %p5022_p5 = por %p34_p2, %p33_p0  ;;  %p5026_p6 = por %p167_p3, %p33_p0 }
   0xa   : > { %p173_p7 = scmp.eq.s32.totalorder %s3439_s23, 1  ;;  %p3441_p9 = scmp.ge.s32.totalorder %s4945_s21, 2 }
   0xc   : > { %p5030_p8 = por %p173_p7, %p172_p4  ;;  %189 = sbr.rel (%p3441_p9) target bundleno = 62 (0x3e), region = 16 }
  0x11   : > { %192 = sbr.rel (!%p5022_p5) target bundleno = 32 (0x20), region = 20  ;;  %s194_s6 = sand.u32 (%p5022_p5), 1, %s4941_s20  }
  0x12   : > { %s4412_s7 = smul.u32 (%p5022_p5), 192, %s4945_s21  ;;  %s3442_s8 = sshll.u32 (%p5022_p5), %s194_s6, 6 }
  0x13   : > { %s196_s12 = scalar_lea.vmem (%p5022_p5), [#allocation2], %s3442_s8 }
  0x14   : > { %s5044_s11 = scalar_lea.vmem (%p5022_p5), %s6636_s0, %s4412_s7 }
  0x15   : > { %v216_v0 = vld [vmem:[%s5044_s11] sm:$0xf] (%p5022_p5)  ;;  %v218_v1 = vld [vmem:[%s5044_s11 + $0xc] sm:$0xf] (%p5022_p5)  ;;  %v220_v2 = vld [vmem:[%s5044_s11 + $0x18] sm:$0xf] (%p5022_p5) }
  0x16   : > { %217 = vst [vmem:[%s196_s12] sm:$0xf] %v216_v0  ;;  %219 = vst [vmem:[%s196_s12 + $0x4] sm:$0xf] %v218_v1  ;;  %v222_v3 = vld [vmem:[%s5044_s11 + $0x24] sm:$0xf] }
  0x17   : > { %221 = vst [vmem:[%s196_s12 + $0x8] sm:$0xf] %v220_v2  ;;  %v224_v4 = vld [vmem:[%s5044_s11 + $0x30] sm:$0xf]  ;;  %v226_v5 = vld [vmem:[%s5044_s11 + $0x3c] sm:$0xf] }
  0x18   : > { %223 = vst [vmem:[%s196_s12 + $0xc] sm:$0xf] %v222_v3  ;;  %225 = vst [vmem:[%s196_s12 + $0x10] sm:$0xf] %v224_v4  ;;  %v228_v6 = vld [vmem:[%s5044_s11 + $0x48] sm:$0xf] }
  0x19   : > { %227 = vst [vmem:[%s196_s12 + $0x14] sm:$0xf] %v226_v5  ;;  %v230_v7 = vld [vmem:[%s5044_s11 + $0x54] sm:$0xf]  ;;  %v232_v8 = vld [vmem:[%s5044_s11 + $0x60] sm:$0xf] }
  0x1a   : > { %229 = vst [vmem:[%s196_s12 + $0x18] sm:$0xf] %v228_v6  ;;  %231 = vst [vmem:[%s196_s12 + $0x1c] sm:$0xf] %v230_v7  ;;  %v234_v9 = vld [vmem:[%s5044_s11 + $0x6c] sm:$0xf] }
  0x1b   : > { %233 = vst [vmem:[%s196_s12 + $0x20] sm:$0xf] %v232_v8  ;;  %v236_v10 = vld [vmem:[%s5044_s11 + $0x78] sm:$0xf]  ;;  %v238_v11 = vld [vmem:[%s5044_s11 + $0x84] sm:$0xf] }
  0x1c   : > { %235 = vst [vmem:[%s196_s12 + $0x24] sm:$0xf] %v234_v9  ;;  %237 = vst [vmem:[%s196_s12 + $0x28] sm:$0xf] %v236_v10  ;;  %v240_v12 = vld [vmem:[%s5044_s11 + $0x90] sm:$0xf] }
  0x1d   : > { %239 = vst [vmem:[%s196_s12 + $0x2c] sm:$0xf] %v238_v11  ;;  %v242_v13 = vld [vmem:[%s5044_s11 + $0x9c] sm:$0xf]  ;;  %v244_v14 = vld [vmem:[%s5044_s11 + $0xa8] sm:$0xf] }
  0x1e   : > { %241 = vst [vmem:[%s196_s12 + $0x30] sm:$0xf] %v240_v12  ;;  %243 = vst [vmem:[%s196_s12 + $0x34] sm:$0xf] %v242_v13  ;;  %v246_v15 = vld [vmem:[%s5044_s11 + $0xb4] sm:$0xf] }
  0x1f   : > { %245 = vst [vmem:[%s196_s12 + $0x38] sm:$0xf] %v244_v14  ;;  %247 = vst [vmem:[%s196_s12 + $0x3c] sm:$0xf] %v246_v15 }
  0x20 PF: > { %303 = sbr.rel (!%p5022_p5) target bundleno = 47 (0x2f), region = 61  ;;  %s305_s13 = sand.u32 (%p5022_p5), 1, %s4941_s20  }
  0x21   : > { %s3445_s14 = smul.u32 (%p5022_p5), 192, %s4945_s21  ;;  %s3444_s15 = sshll.u32 (%p5022_p5), %s305_s13, 6 }
  0x22   : > { %s307_s25 = scalar_lea.vmem (%p5022_p5), [#allocation3], %s3444_s15 }
  0x23   : > { %s5069_s23 = scalar_lea.vmem (%p5022_p5), %s6637_s1, %s3445_s14 }
  0x24   : > { %v3446_v16 = vld [vmem:[%s5069_s23 + $0x4] sm:$0xf] (%p5022_p5)  ;;  %v3447_v17 = vld [vmem:[%s5069_s23 + $0x10] sm:$0xf] (%p5022_p5)  ;;  %v3448_v18 = vld [vmem:[%s5069_s23 + $0x1c] sm:$0xf] (%p5022_p5) }
  0x25   : > { %329 = vst [vmem:[%s307_s25] sm:$0xf] %v3446_v16  ;;  %331 = vst [vmem:[%s307_s25 + $0x4] sm:$0xf] %v3447_v17  ;;  %v3449_v19 = vld [vmem:[%s5069_s23 + $0x28] sm:$0xf] }
  0x26   : > { %333 = vst [vmem:[%s307_s25 + $0x8] sm:$0xf] %v3448_v18  ;;  %v3450_v20 = vld [vmem:[%s5069_s23 + $0x34] sm:$0xf]  ;;  %v3451_v21 = vld [vmem:[%s5069_s23 + $0x40] sm:$0xf] }
  0x27   : > { %335 = vst [vmem:[%s307_s25 + $0xc] sm:$0xf] %v3449_v19  ;;  %337 = vst [vmem:[%s307_s25 + $0x10] sm:$0xf] %v3450_v20  ;;  %v3452_v22 = vld [vmem:[%s5069_s23 + $0x4c] sm:$0xf] }
  0x28   : > { %339 = vst [vmem:[%s307_s25 + $0x14] sm:$0xf] %v3451_v21  ;;  %v3453_v23 = vld [vmem:[%s5069_s23 + $0x58] sm:$0xf]  ;;  %v3454_v24 = vld [vmem:[%s5069_s23 + $0x64] sm:$0xf] }
  0x29   : > { %341 = vst [vmem:[%s307_s25 + $0x18] sm:$0xf] %v3452_v22  ;;  %343 = vst [vmem:[%s307_s25 + $0x1c] sm:$0xf] %v3453_v23  ;;  %v3455_v25 = vld [vmem:[%s5069_s23 + $0x70] sm:$0xf] }
  0x2a   : > { %345 = vst [vmem:[%s307_s25 + $0x20] sm:$0xf] %v3454_v24  ;;  %v3456_v26 = vld [vmem:[%s5069_s23 + $0x7c] sm:$0xf]  ;;  %v3457_v27 = vld [vmem:[%s5069_s23 + $0x88] sm:$0xf] }
  0x2b   : > { %347 = vst [vmem:[%s307_s25 + $0x24] sm:$0xf] %v3455_v25  ;;  %349 = vst [vmem:[%s307_s25 + $0x28] sm:$0xf] %v3456_v26  ;;  %v3458_v28 = vld [vmem:[%s5069_s23 + $0x94] sm:$0xf] }
  0x2c   : > { %351 = vst [vmem:[%s307_s25 + $0x2c] sm:$0xf] %v3457_v27  ;;  %v3459_v29 = vld [vmem:[%s5069_s23 + $0xa0] sm:$0xf]  ;;  %v3460_v30 = vld [vmem:[%s5069_s23 + $0xac] sm:$0xf] }
  0x2d   : > { %353 = vst [vmem:[%s307_s25 + $0x30] sm:$0xf] %v3458_v28  ;;  %355 = vst [vmem:[%s307_s25 + $0x34] sm:$0xf] %v3459_v29  ;;  %v3461_v31 = vld [vmem:[%s5069_s23 + $0xb8] sm:$0xf] }
  0x2e   : > { %357 = vst [vmem:[%s307_s25 + $0x38] sm:$0xf] %v3460_v30  ;;  %359 = vst [vmem:[%s307_s25 + $0x3c] sm:$0xf] %v3461_v31 }
  0x2f PF: > { %415 = sbr.rel (!%p5022_p5) target bundleno = 62 (0x3e), region = 102  ;;  %s417_s26 = sand.u32 (%p5022_p5), 1, %s4941_s20  }
  0x30   : > { %s3463_s6 = smul.u32 (%p5022_p5), 192, %s4945_s21  ;;  %s3462_s7 = sshll.u32 (%p5022_p5), %s417_s26, 6 }
  0x31   : > { %s419_s28 = scalar_lea.vmem (%p5022_p5), [#allocation4], %s3462_s7 }
  0x32   : > { %s5094_s10 = scalar_lea.vmem (%p5022_p5), %s6638_s2, %s3463_s6 }
  0x33   : > { %v3464_v32 = vld [vmem:[%s5094_s10 + $0x8] sm:$0xf] (%p5022_p5)  ;;  %v3465_v33 = vld [vmem:[%s5094_s10 + $0x14] sm:$0xf] (%p5022_p5)  ;;  %v3466_v34 = vld [vmem:[%s5094_s10 + $0x20] sm:$0xf] (%p5022_p5) }
  0x34   : > { %441 = vst [vmem:[%s419_s28] sm:$0xf] %v3464_v32  ;;  %443 = vst [vmem:[%s419_s28 + $0x4] sm:$0xf] %v3465_v33  ;;  %v3467_v35 = vld [vmem:[%s5094_s10 + $0x2c] sm:$0xf] }
  0x35   : > { %445 = vst [vmem:[%s419_s28 + $0x8] sm:$0xf] %v3466_v34  ;;  %v3468_v36 = vld [vmem:[%s5094_s10 + $0x38] sm:$0xf]  ;;  %v3469_v37 = vld [vmem:[%s5094_s10 + $0x44] sm:$0xf] }
  0x36   : > { %447 = vst [vmem:[%s419_s28 + $0xc] sm:$0xf] %v3467_v35  ;;  %449 = vst [vmem:[%s419_s28 + $0x10] sm:$0xf] %v3468_v36  ;;  %v3470_v38 = vld [vmem:[%s5094_s10 + $0x50] sm:$0xf] }
  0x37   : > { %451 = vst [vmem:[%s419_s28 + $0x14] sm:$0xf] %v3469_v37  ;;  %v3471_v39 = vld [vmem:[%s5094_s10 + $0x5c] sm:$0xf]  ;;  %v3472_v40 = vld [vmem:[%s5094_s10 + $0x68] sm:$0xf] }
  0x38   : > { %453 = vst [vmem:[%s419_s28 + $0x18] sm:$0xf] %v3470_v38  ;;  %455 = vst [vmem:[%s419_s28 + $0x1c] sm:$0xf] %v3471_v39  ;;  %v3473_v41 = vld [vmem:[%s5094_s10 + $0x74] sm:$0xf] }
  0x39   : > { %457 = vst [vmem:[%s419_s28 + $0x20] sm:$0xf] %v3472_v40  ;;  %v3474_v42 = vld [vmem:[%s5094_s10 + $0x80] sm:$0xf]  ;;  %v3475_v43 = vld [vmem:[%s5094_s10 + $0x8c] sm:$0xf] }
  0x3a   : > { %459 = vst [vmem:[%s419_s28 + $0x24] sm:$0xf] %v3473_v41  ;;  %461 = vst [vmem:[%s419_s28 + $0x28] sm:$0xf] %v3474_v42  ;;  %v3476_v44 = vld [vmem:[%s5094_s10 + $0x98] sm:$0xf] }
  0x3b   : > { %463 = vst [vmem:[%s419_s28 + $0x2c] sm:$0xf] %v3475_v43  ;;  %v3477_v45 = vld [vmem:[%s5094_s10 + $0xa4] sm:$0xf]  ;;  %v3478_v46 = vld [vmem:[%s5094_s10 + $0xb0] sm:$0xf] }
  0x3c   : > { %465 = vst [vmem:[%s419_s28 + $0x30] sm:$0xf] %v3476_v44  ;;  %467 = vst [vmem:[%s419_s28 + $0x34] sm:$0xf] %v3477_v45  ;;  %v3479_v47 = vld [vmem:[%s5094_s10 + $0xbc] sm:$0xf] }
  0x3d   : > { %469 = vst [vmem:[%s419_s28 + $0x38] sm:$0xf] %v3478_v46  ;;  %471 = vst [vmem:[%s419_s28 + $0x3c] sm:$0xf] %v3479_v47 }
  0x3e PF: > { %p3480_p10 = scmp.ge.s32.totalorder %s4945_s21, 1  ;;  %p532_p11 = scmp.lt.s32.totalorder %s4945_s21, 3 }
  0x40   : > { %p533_p12 = pnand %p3480_p10, %p532_p11 }
  0x42   : > { %536 = sbr.rel (%p533_p12) target bundleno = 2888 (0xb48), region = 147 }
  0x47   : > { %s5115_s11 = sand.u32 1, %s4937_s19   ;;  %vm734_vm0 = vcmask 261120   ;;  %s4947_s14 = smov 96   ;;  %v898_v17 = vlaneseq  ;;  %v4948_v21 = vmov 0   ;;  %vm3161_vm3 = vcmask 523264  }
  0x48   : > { %s5118_s12 = sshll.u32 %s5115_s11, 6  ;;  %p596_p13 = scmp.lt.s32.totalorder %s5004_s22, 1 }
  0x49   : > { %s5121_s13 = scalar_lea.vmem [#allocation3], %s5118_s12  ;;  %s5135_s15 = scalar_lea.vmem [#allocation2], %s5118_s12  ;;  %v899_v19 = vshrl.u32 %v898_v17, 7 }
  0x4a   : > { %v4577_v48 = vld [vmem:[%s5121_s13 + $0x38] sm:$0xff]   ;;  %v4578_v49 = vld [vmem:[%s5121_s13 + $0x30] sm:$0xff]   ;;  %v5131_v51 = vld [vmem:[%s5121_s13 + $0x28] sm:$0xff]   ;;  %s5217_s16 = scalar_lea.vmem [#allocation4], %s5118_s12  ;;  %s3484_s6 = sshll.u32 %s5115_s11, 8 }
  0x4b   : > { %4380 = vmatprep.subr.msk.bf16.mxu0 %vm734_vm0, %v4577_v48  ;;  %v781_v50 = vsel %vm734_vm0, %v4577_v48, 0  ;;  %1318 = vrot.lane.b32.xlu0 %v4577_v48, %s4947_s14  ;;  %v778_v52 = vsel %vm734_vm0, %v4578_v49, 0  ;;  %v5138_v53 = vld [vmem:[%s5135_s15] sm:$0xff]   ;;  %v775_v54 = vsel %vm734_vm0, %v5131_v51, 0  ;;  %v5154_v57 = vld [vmem:[%s5121_s13 + $0x18] sm:$0xff]   ;;  %v5161_v59 = vld [vmem:[%s5121_s13 + $0x10] sm:$0xff]  }
  0x4c   : > { %4125 = vmatpush3.bf16.xpose.msra.mxu0 %v781_v50  ;;  %1316 = vrot.lane.b32.xlu1 %v4578_v49, %s4947_s14  ;;  %v5147_v55 = vld [vmem:[%s5121_s13 + $0x20] sm:$0xff]   ;;  %v769_v58 = vsel %vm734_vm0, %v5154_v57, 0  ;;  %v766_v60 = vsel %vm734_vm0, %v5161_v59, 0  ;;  %v5168_v61 = vld [vmem:[%s5121_s13 + $0x8] sm:$0xff]   ;;  %v5185_v2 = vld [vmem:[%s5135_s15 + $0x10] sm:$0xff]   ;;  %s5265_s17 = scalar_select %p596_p13, %s5004_s22, 1 }
  0x4d   : > { %4381 = vmatprep.subr.msk.bf16.mxu0 %vm734_vm0, %v4578_v49  ;;  %4140 = vmatprep.mubr.msk.bf16.mxu0 %vm734_vm0, %v5138_v53  ;;  %v772_v56 = vsel %vm734_vm0, %v5147_v55, 0  ;;  %v763_v62 = vsel %vm734_vm0, %v5168_v61, 0  ;;  %v5175_v63 = vld [vmem:[%s5121_s13] sm:$0xff]   ;;  %v5182_v1 = vld [vmem:[%s5135_s15 + $0x8] sm:$0xff]   ;;  %v5192_v3 = vld [vmem:[%s5135_s15 + $0x18] sm:$0xff]   ;;  %v900_v20 = vsub.s32 0, %v899_v19 }
  0x4e   : > { %v760_v0 = vsel %vm734_vm0, %v5175_v63, 0  ;;  %v5195_v4 = vld [vmem:[%s5135_s15 + $0x20] sm:$0xff]   ;;  %v5202_v5 = vld [vmem:[%s5135_s15 + $0x28] sm:$0xff]   ;;  %v5205_v6 = vld [vmem:[%s5135_s15 + $0x30] sm:$0xff]   ;;  %s598_s26 = scalar_lea.vmem %s6639_s3, %s5265_s17  ;;  %s5469_s7 = scalar_lea.vmem [#allocation5], %s3484_s6 }
  0x4f   : > { %v5212_v7 = vld [vmem:[%s5135_s15 + $0x38] sm:$0xff]   ;;  %v5223_v9 = vld [vmem:[%s5217_s16 + $0x30] sm:$0xff]   ;;  %v5229_v10 = vld [vmem:[%s5217_s16 + $0x28] sm:$0xff]   ;;  %s4949_s8 = smov 64   ;;  %s4950_s9 = smov 32  }
  0x50   : > { %v5220_v8 = vld [vmem:[%s5217_s16 + $0x38] sm:$0xff]   ;;  %v5234_v11 = vld [vmem:[%s5217_s16 + $0x20] sm:$0xff]   ;;  %v5245_v13 = vld [vmem:[%s5217_s16 + $0x10] sm:$0xff]   ;;  %s3757_s10 = sshll.u32 %s5004_s22, 12  ;;  %s3297_s28 = sshll.u32 %s5469_s7, 4  ;;  %s6495_s28 = int_to_ptr.vmem [resolvable:$true] %s3297_s28 }
  0x51   : > { %4156 = vmatprep.subr.bf16.mxu1 %v5220_v8  ;;  %v5239_v12 = vld [vmem:[%s5217_s16 + $0x18] sm:$0xff]   ;;  %v5250_v14 = vld [vmem:[%s5217_s16 + $0x8] sm:$0xff]   ;;  %v5253_v15 = vld [vmem:[%s5217_s16] sm:$0xff]   ;;  %s4885_s23 = scalar_lea.vmem %s6495_s28, 4096  ;;  %s4951_s25 = smov [#allocation5]  }
  0x52   : > { %4157 = vmatpush3.bf16.msra.mxu1 %v5220_v8  ;;  %v653_v18 = vld [vmem:[%s598_s26] sm:$0x1]  ;;  %p4886_p0 = scmp.ne.s32.totalorder %s6495_s28, %s4885_s23  ;;  %s4889_s22 = sshll.u32 %s4951_s25, 4  ;;  %s4890_s22 = int_to_ptr.vmem [resolvable:$false] %s4889_s22 }
  0x53   : > { %4158 = vmatprep.subr.bf16.mxu1 %v5223_v9  ;;  %vm896_vm1 = vcmp.gt.f32.partialorder %v653_v18, 0.5  ;;  %s4891_s26 = scalar_lea.vmem %s4890_s22, 8192  ;;  %p4892_p3 = scmp.lt.s32.totalorder %s6495_s28, %s4890_s22 }
  0x54   : > { %4127 = vmatpush3.bf16.xpose.msra.mxu0 %v778_v52  ;;  %v897_v22 = vsel %vm896_vm1, 1, %v4948_v21  ;;  %p4887_p1 = pnand %p4886_p0, %p5026_p6  ;;  %p4893_p4 = scmp.lt.s32.totalorder %s4891_s26, %s4885_s23 }
  0x55   : > { %4382 = vmatprep.subr.msk.bf16.mxu0 %vm734_vm0, %v5131_v51  ;;  %v5271_v23 = vrot.slane %v897_v22, %v900_v20 }
  0x56   : > { %4159 = vmatpush3.bf16.msra.mxu1 %v5223_v9  ;;  %p4888_p2 = pneg %p4887_p1  ;;  %p4894_p5 = por %p4893_p4, %p4892_p3 }
  0x57   : > { %4160 = vmatprep.subr.bf16.mxu1 %v5229_v10  ;;  %vm902_vm2 = vcmp.eq.s32.totalorder %v5271_v23, 1 }
  0x58   : > { %p4895_p7 = pnand %p4894_p5, %p4888_p2 }
  0x5a   : > { %4161 = vmatpush3.bf16.msra.mxu1 %v5229_v10 }
  0x5b   : > { %4162 = vmatprep.subr.bf16.mxu1 %v5234_v11 }
  0x5c   : > { %4129 = vmatpush3.bf16.xpose.msra.mxu0 %v775_v54 }
  0x5d   : > { %4383 = vmatprep.subr.msk.bf16.mxu0 %vm734_vm0, %v5147_v55 }
  0x5e   : > { %4163 = vmatpush3.bf16.msra.mxu1 %v5234_v11 }
  0x5f   : > { %4164 = vmatprep.subr.bf16.mxu1 %v5239_v12 }
  0x62   : > { %4165 = vmatpush3.bf16.msra.mxu1 %v5239_v12 }
  0x63   : > { %4166 = vmatprep.subr.bf16.mxu1 %v5245_v13 }
  0x64   : > { %4131 = vmatpush3.bf16.xpose.msra.mxu0 %v772_v56 }
  0x65   : > { %4384 = vmatprep.subr.msk.bf16.mxu0 %vm734_vm0, %v5154_v57 }
  0x66   : > { %4167 = vmatpush3.bf16.msra.mxu1 %v5245_v13 }
  0x67   : > { %4168 = vmatprep.subr.bf16.mxu1 %v5250_v14 }
  0x6a   : > { %4169 = vmatpush3.bf16.msra.mxu1 %v5250_v14 }
  0x6b   : > { %4170 = vmatprep.subr.bf16.mxu1 %v5253_v15 }
  0x6c   : > { %4133 = vmatpush3.bf16.xpose.msra.mxu0 %v769_v58 }
  0x6d   : > { %4385 = vmatprep.subr.msk.bf16.mxu0 %vm734_vm0, %v5161_v59 }
  0x6e   : > { %4171 = vmatpush3.bf16.msra.mxu1 %v5253_v15 }
  0x74   : > { %4135 = vmatpush3.bf16.xpose.msra.mxu0 %v766_v60 }
  0x75   : > { %4386 = vmatprep.subr.msk.bf16.mxu0 %vm734_vm0, %v5168_v61 }
  0x7c   : > { %4137 = vmatpush3.bf16.xpose.msra.mxu0 %v763_v62 }
  0x7d   : > { %4387 = vmatprep.subr.msk.bf16.mxu0 %vm734_vm0, %v5175_v63 }
  0x84   : > { %4139 = vmatpush3.bf16.xpose.msra.mxu0 %v760_v0 }
  0x8b   : > { %4141 = vmatmul.mubr.msk.bf16.vlgmr.msra.gmra.mxu0 %vm734_vm0, %v5182_v1 }
  0x8c   : > { %4144 = vmatprep.mubr.msk.bf16.mxu0 %vm734_vm0, %v5185_v2 }
  0x93   : > { %4145 = vmatmul.mubr.msk.bf16.gmra.mxu0 %vm734_vm0, %v5192_v3 }
  0x94   : > { %4148 = vmatprep.mubr.msk.bf16.mxu0 %vm734_vm0, %v5195_v4 }
  0x9b   : > { %4149 = vmatmul.mubr.msk.bf16.gmra.mxu0 %vm734_vm0, %v5202_v5 }
  0x9c   : > { %4152 = vmatprep.mubr.msk.bf16.mxu0 %vm734_vm0, %v5205_v6 }
  0xa3   : > { %4153 = vmatmul.mubr.msk.bf16.gmra.mxu0 %vm734_vm0, %v5212_v7 }
  0xbd   : > { %v5258_v16 = vpop.permute.xlu0 %1318 }
  0xbe   : > { %4388 = vmatprep.subr.msk.bf16.mxu1 %vm734_vm0, %v5258_v16 }
 0x14b   : > { %v4142_v24 = vpop.f32.mrf.mxu0 }
 0x14c   : > { %v882_v25 = vmul.f32 0.0009765625, %v4142_v24 }
 0x14d   : > { %v817_v26 = vpop.f32.mrf.mxu0 }
 0x14e   : > { %v880_v27 = vmul.f32 0.0009765625, %v817_v26  ;;  %v5276_v28 = vsel %vm902_vm2, -1e+09, %v882_v25 }
 0x14f   : > { %923 = vmax.xlane.f32.xlu1 %v5276_v28  ;;  %v4143_v29 = vpop.f32.mrf.mxu0 }
 0x150   : > { %v883_v30 = vmul.f32 0.0009765625, %v4143_v29  ;;  %v5281_v31 = vsel %vm902_vm2, -1e+09, %v880_v27 }
 0x151   : > { %919 = vmax.xlane.f32.xlu0 %v5281_v31  ;;  %v820_v32 = vpop.f32.mrf.mxu0 }
 0x152   : > { %v881_v33 = vmul.f32 0.0009765625, %v820_v32  ;;  %v5286_v34 = vsel %vm902_vm2, -1e+09, %v883_v30 }
 0x153   : > { %925 = vmax.xlane.f32.xlu1 %v5286_v34  ;;  %v4146_v35 = vpop.f32.mrf.mxu0 }
 0x154   : > { %v886_v36 = vmul.f32 0.0009765625, %v4146_v35  ;;  %v5291_v37 = vsel %vm902_vm2, -1e+09, %v881_v33  ;;  %v5358_v35 = vpop.permute.xlu1 %1316 }
 0x155   : > { %921 = vmax.xlane.f32.xlu0 %v5291_v37  ;;  %v833_v38 = vpop.f32.mrf.mxu0 }
 0x156   : > { %v884_v39 = vmul.f32 0.0009765625, %v833_v38  ;;  %v5296_v40 = vsel %vm902_vm2, -1e+09, %v886_v36 }
 0x157   : > { %v4147_v41 = vpop.f32.mrf.mxu0 }
 0x158   : > { %v887_v42 = vmul.f32 0.0009765625, %v4147_v41  ;;  %v5305_v46 = vsel %vm902_vm2, -1e+09, %v884_v39 }
 0x159   : > { %931 = vmax.xlane.f32.xlu0 %v5296_v40  ;;  %v836_v43 = vpop.f32.mrf.mxu0 }
 0x15a   : > { %v885_v44 = vmul.f32 0.0009765625, %v836_v43  ;;  %v5301_v45 = vsel %vm902_vm2, -1e+09, %v887_v42 }
 0x15b   : > { %933 = vmax.xlane.f32.xlu1 %v5301_v45  ;;  %v4150_v47 = vpop.f32.mrf.mxu0 }
 0x15c   : > { %v890_v48 = vmul.f32 0.0009765625, %v4150_v47  ;;  %v5310_v49 = vsel %vm902_vm2, -1e+09, %v885_v44 }
 0x15d   : > { %927 = vmax.xlane.f32.xlu0 %v5305_v46  ;;  %v849_v50 = vpop.f32.mrf.mxu0 }
 0x15e   : > { %v888_v52 = vmul.f32 0.0009765625, %v849_v50  ;;  %v5315_v54 = vsel %vm902_vm2, -1e+09, %v890_v48 }
 0x15f   : > { %929 = vmax.xlane.f32.xlu1 %v5310_v49  ;;  %v4151_v56 = vpop.f32.mrf.mxu0 }
 0x160   : > { %v891_v58 = vmul.f32 0.0009765625, %v4151_v56  ;;  %v5325_v17 = vsel %vm902_vm2, -1e+09, %v888_v52 }
 0x161   : > { %939 = vmax.xlane.f32.xlu0 %v5315_v54  ;;  %v852_v60 = vpop.f32.mrf.mxu0 }
 0x162   : > { %v5321_v62 = vsel %vm902_vm2, -1e+09, %v891_v58  ;;  %v889_v0 = vmul.f32 0.0009765625, %v852_v60 }
 0x163   : > { %941 = vmax.xlane.f32.xlu1 %v5321_v62  ;;  %v4154_v18 = vpop.f32.mrf.mxu0 }
 0x164   : > { %v894_v19 = vmul.f32 0.0009765625, %v4154_v18  ;;  %v5330_v20 = vsel %vm902_vm2, -1e+09, %v889_v0 }
 0x165   : > { %935 = vmax.xlane.f32.xlu0 %v5325_v17  ;;  %v865_v21 = vpop.f32.mrf.mxu0 }
 0x166   : > { %v5335_v22 = vsel %vm902_vm2, -1e+09, %v894_v19  ;;  %v892_v24 = vmul.f32 0.0009765625, %v865_v21 }
 0x167   : > { %937 = vmax.xlane.f32.xlu1 %v5330_v20  ;;  %v4155_v26 = vpop.f32.mrf.mxu0 }
 0x168   : > { %v5341_v25 = vsel %vm902_vm2, -1e+09, %v892_v24  ;;  %v895_v27 = vmul.f32 0.0009765625, %v4155_v26 }
 0x169   : > { %947 = vmax.xlane.f32.xlu0 %v5335_v22  ;;  %v868_v29 = vpop.f32.mrf.mxu0 }
 0x16a   : > { %v5350_v30 = vsel %vm902_vm2, -1e+09, %v895_v27  ;;  %v893_v32 = vmul.f32 0.0009765625, %v868_v29 }
 0x16c   : > { %v5355_v33 = vsel %vm902_vm2, -1e+09, %v893_v32 }
 0x16d   : > { %943 = vmax.xlane.f32.xlu0 %v5341_v25 }
 0x178   : > { %1312 = vrot.lane.b32.xlu1 %v5147_v55, %s4947_s14 }
 0x183   : > { %1314 = vrot.lane.b32.xlu0 %v5131_v51, %s4947_s14 }
 0x19c   : > { %949 = vmax.xlane.f32.xlu1 %v5350_v30 }
 0x1a0   : > { %945 = vmax.xlane.f32.xlu1 %v5355_v33 }
 0x1d8   : > { %v924_v36 = vpop.xlane.xlu1 %923 }
 0x1d9   : > { %v953_v51 = vsub.f32 %v5276_v28, %v924_v36 }
 0x1da   : > { %v920_v38 = vpop.xlane.xlu0 %919 }
 0x1db   : > { %v971_v39 = vmul.f32 1.442695, %v953_v51  ;;  %v951_v41 = vsub.f32 %v5281_v31, %v920_v38 }
 0x1dc   : > { %v926_v42 = vpop.xlane.xlu1 %925 }
 0x1dd   : > { %4601 = vpow2.f32 %v971_v39  ;;  %v967_v43 = vmul.f32 1.442695, %v951_v41  ;;  %v954_v44 = vsub.f32 %v5286_v34, %v926_v42 }
 0x1de   : > { %v922_v47 = vpop.xlane.xlu0 %921 }
 0x1df   : > { %v973_v48 = vmul.f32 1.442695, %v954_v44  ;;  %v952_v50 = vsub.f32 %v5291_v37, %v922_v47  ;;  %4603 = vpow2.f32 %v967_v43 }
 0x1e1   : > { %4605 = vpow2.f32 %v973_v48  ;;  %v969_v52 = vmul.f32 1.442695, %v952_v50 }
 0x1e2   : > { %v932_v37 = vpop.xlane.xlu0 %931 }
 0x1e3   : > { %4607 = vpow2.f32 %v969_v52  ;;  %v957_v19 = vsub.f32 %v5296_v40, %v932_v37 }
 0x1e4   : > { %v934_v0 = vpop.xlane.xlu1 %933 }
 0x1e5   : > { %v979_v27 = vmul.f32 1.442695, %v957_v19  ;;  %v958_v32 = vsub.f32 %v5301_v45, %v934_v0 }
 0x1e6   : > { %v928_v58 = vpop.xlane.xlu0 %927 }
 0x1e7   : > { %v955_v24 = vsub.f32 %v5305_v46, %v928_v58  ;;  %4609 = vpow2.f32 %v979_v27  ;;  %v981_v41 = vmul.f32 1.442695, %v958_v32 }
 0x1e8   : > { %v930_v21 = vpop.xlane.xlu1 %929 }
 0x1e9   : > { %v956_v29 = vsub.f32 %v5310_v49, %v930_v21  ;;  %v975_v36 = vmul.f32 1.442695, %v955_v24 }
 0x1ea   : > { %v5364_v56 = vpop.eup %4601  ;;  %v940_v60 = vpop.xlane.xlu0 %939 }
 0x1eb   : > { %1003 = vadd.xlane.f32.xlu0 %v5364_v56  ;;  %4611 = vpow2.f32 %v975_v36  ;;  %v961_v40 = vsub.f32 %v5315_v54, %v940_v60 }
 0x1ec   : > { %v5367_v28 = vpop.eup %4603  ;;  %v942_v51 = vpop.xlane.xlu1 %941 }
 0x1ed   : > { %v987_v49 = vmul.f32 1.442695, %v961_v40  ;;  %v962_v47 = vsub.f32 %v5321_v62, %v942_v51 }
 0x1ee   : > { %v5369_v31 = vpop.eup %4605  ;;  %v936_v18 = vpop.xlane.xlu0 %935 }
 0x1ef   : > { %999 = vadd.xlane.f32.xlu0 %v5367_v28  ;;  %1005 = vadd.xlane.f32.xlu1 %v5369_v31  ;;  %v959_v45 = vsub.f32 %v5325_v17, %v936_v18  ;;  %v989_v54 = vmul.f32 1.442695, %v962_v47 }
 0x1f0   : > { %v5373_v34 = vpop.eup %4607  ;;  %v938_v43 = vpop.xlane.xlu1 %937 }
 0x1f1   : > { %v983_v48 = vmul.f32 1.442695, %v959_v45  ;;  %v960_v17 = vsub.f32 %v5330_v20, %v938_v43 }
 0x1f2   : > { %v948_v26 = vpop.xlane.xlu0 %947 }
 0x1f3   : > { %1001 = vadd.xlane.f32.xlu1 %v5373_v34  ;;  %v965_v38 = vsub.f32 %v5335_v22, %v948_v26  ;;  %v985_v18 = vmul.f32 1.442695, %v960_v17 }
 0x1f4   : > { %v5389_v22 = vpop.permute.xlu1 %1312  ;;  %v5391_v50 = vpop.eup %4609 }
 0x1f5   : > { %v995_v42 = vmul.f32 1.442695, %v965_v38 }
 0x1f6   : > { %v944_v39 = vpop.xlane.xlu0 %943 }
 0x1f7   : > { %v963_v46 = vsub.f32 %v5341_v25, %v944_v39 }
 0x1f8   : > { %v5394_v52 = vpop.eup %4611 }
 0x1f9   : > { %v991_v44 = vmul.f32 1.442695, %v963_v46 }
 0x204   : > { %1308 = vrot.lane.b32.xlu1 %v5161_v59, %s4947_s14  ;;  %v977_v59 = vmul.f32 1.442695, %v956_v29 }
 0x205   : > { %1310 = vrot.lane.b32.xlu0 %v5154_v57, %s4947_s14 }
 0x206   : > { %4613 = vpow2.f32 %v977_v59 }
 0x207   : > { %4615 = vpow2.f32 %v981_v41 }
 0x208   : > { %4617 = vpow2.f32 %v995_v42 }
 0x209   : > { %4619 = vpow2.f32 %v987_v49 }
 0x20a   : > { %4621 = vpow2.f32 %v991_v44 }
 0x20b   : > { %4623 = vpow2.f32 %v983_v48 }
 0x20c   : > { %4625 = vpow2.f32 %v989_v54 }
 0x213   : > { %v5398_v58 = vpop.eup %4613 }
 0x214   : > { %v5402_v0 = vpop.eup %4615 }
 0x215   : > { %v5405_v21 = vpop.eup %4617 }
 0x216   : > { %v5409_v20 = vpop.eup %4619 }
 0x217   : > { %v5411_v24 = vpop.eup %4621 }
 0x218   : > { %v5415_v26 = vpop.eup %4623 }
 0x224   : > { %1011 = vadd.xlane.f32.xlu0 %v5391_v50 }
 0x225   : > { %v950_v25 = vpop.xlane.xlu1 %949 }
 0x226   : > { %v966_v37 = vsub.f32 %v5350_v30, %v950_v25 }
 0x228   : > { %v997_v62 = vmul.f32 1.442695, %v966_v37  ;;  %1009 = vadd.xlane.f32.xlu0 %v5398_v58  ;;  %1007 = vadd.xlane.f32.xlu1 %v5394_v52 }
 0x229   : > { %v946_v60 = vpop.xlane.xlu1 %945 }
 0x22a   : > { %4627 = vpow2.f32 %v997_v62  ;;  %v964_v19 = vsub.f32 %v5355_v33, %v946_v60  ;;  %v5418_v33 = vpop.eup %4625 }
 0x22b   : > { %4629 = vpow2.f32 %v985_v18 }
 0x22c   : > { %1027 = vadd.xlane.f32.xlu0 %v5405_v21  ;;  %1013 = vadd.xlane.f32.xlu1 %v5402_v0  ;;  %v993_v30 = vmul.f32 1.442695, %v964_v19 }
 0x22e   : > { %4631 = vpow2.f32 %v993_v30 }
 0x230   : > { %1023 = vadd.xlane.f32.xlu0 %v5411_v24  ;;  %1019 = vadd.xlane.f32.xlu1 %v5409_v20 }
 0x234   : > { %1015 = vadd.xlane.f32.xlu1 %v5415_v26 }
 0x237   : > { %v5420_v27 = vpop.eup %4627 }
 0x238   : > { %1029 = vadd.xlane.f32.xlu0 %v5420_v27  ;;  %1021 = vadd.xlane.f32.xlu1 %v5418_v33  ;;  %v5424_v29 = vpop.eup %4629 }
 0x23b   : > { %v5427_v32 = vpop.eup %4631 }
 0x23c   : > { %1017 = vadd.xlane.f32.xlu1 %v5424_v29 }
 0x240   : > { %1025 = vadd.xlane.f32.xlu1 %v5427_v32 }
 0x24e   : > { %1306 = vrot.lane.b32.xlu0 %v5168_v61, %s4947_s14 }
 0x251   : > { %1304 = vrot.lane.b32.xlu1 %v5175_v63, %s4947_s14 }
 0x252   : > { %1288 = vrot.lane.b32.xlu0 %v5138_v53, %s4947_s14  ;;  %v1315_v53 = vpop.permute.xlu0 %1314 }
 0x255   : > { %1290 = vrot.lane.b32.xlu1 %v5182_v1, %s4947_s14 }
 0x256   : > { %1292 = vrot.lane.b32.xlu0 %v5185_v2, %s4947_s14 }
 0x259   : > { %1294 = vrot.lane.b32.xlu1 %v5192_v3, %s4947_s14 }
 0x25a   : > { %1296 = vrot.lane.b32.xlu0 %v5195_v4, %s4947_s14 }
 0x25d   : > { %1298 = vrot.lane.b32.xlu1 %v5202_v5, %s4947_s14 }
 0x25e   : > { %1300 = vrot.lane.b32.xlu0 %v5205_v6, %s4947_s14 }
 0x261   : > { %1302 = vrot.lane.b32.xlu1 %v5212_v7, %s4947_s14 }
 0x262   : > { %1663 = vrot.lane.b32.xlu0 %v5220_v8, %s4947_s14 }
 0x265   : > { %1661 = vrot.lane.b32.xlu1 %v5223_v9, %s4947_s14 }
 0x266   : > { %1659 = vrot.lane.b32.xlu0 %v5229_v10, %s4947_s14 }
 0x269   : > { %1653 = vrot.lane.b32.xlu1 %v5245_v13, %s4947_s14  ;;  %v1366_v13 = vsel %vm734_vm0, %v5258_v16, 0 }
 0x26a   : > { %1657 = vrot.lane.b32.xlu0 %v5234_v11, %s4947_s14 }
 0x26d   : > { %1649 = vrot.lane.b32.xlu1 %v5253_v15, %s4947_s14  ;;  %v1363_v15 = vsel %vm734_vm0, %v5358_v35, 0 }
 0x26e   : > { %1655 = vrot.lane.b32.xlu0 %v5239_v12, %s4947_s14 }
 0x274   : > { %v1004_v61 = vpop.xlane.xlu0 %1003 }
 0x275   : > { %4633 = vrcp.f32 %v1004_v61 }
 0x278   : > { %v1000_v63 = vpop.xlane.xlu0 %999  ;;  %v1006_v1 = vpop.xlane.xlu1 %1005 }
 0x279   : > { %4635 = vrcp.f32 %v1006_v1 }
 0x27a   : > { %4637 = vrcp.f32 %v1000_v63 }
 0x27c   : > { %v1002_v2 = vpop.xlane.xlu1 %1001  ;;  %v1311_v16 = vpop.permute.xlu0 %1310 }
 0x27d   : > { %4639 = vrcp.f32 %v1002_v2 }
 0x282   : > { %v4634_v3 = vpop.eup %4633 }
 0x283   : > { %v1049_v6 = vmul.f32 %v4634_v3, %v5364_v56  ;;  %v1360_v56 = vsel %vm734_vm0, %v1315_v53, 0 }
 0x286   : > { %v4636_v4 = vpop.eup %4635 }
 0x287   : > { %v4638_v5 = vpop.eup %4637  ;;  %v1050_v7 = vmul.f32 %v4636_v4, %v5369_v31  ;;  %v1309_v31 = vpop.permute.xlu1 %1308 }
 0x288   : > { %v1047_v10 = vmul.f32 %v4638_v5, %v5367_v28  ;;  %v1357_v28 = vsel %vm734_vm0, %v5389_v22, 0  ;;  %v1351_v39 = vsel %vm734_vm0, %v1309_v31, 0 }
 0x289   : > { %v1064_v9 = vpack.c.bf16 %v1050_v7, %v1049_v6 }
 0x28a   : > { %v4640_v8 = vpop.eup %4639 }
 0x28b   : > { %v1048_v11 = vmul.f32 %v4640_v8, %v5373_v34  ;;  %3958 = vst [vmem:[%s5469_s7 + $0x8] sm:$0xff] %v1064_v9  }
 0x28d   : > { %v1063_v12 = vpack.c.bf16 %v1048_v11, %v1047_v10 }
 0x28f   : > { %4172 = vmatprep.mubr.bf16.mxu1 %v1063_v12  ;;  %3762 = vst [vmem:[%s5469_s7] sm:$0xff] %v1063_v12  }
 0x290   : > { %4173 = vmatmul.mubr.bf16.vlgmr.msra.gmra.mxu1 %v1064_v9 }
 0x291   : > { %4189 = vmatpush3.bf16.xpose.msra.mxu1 %v1366_v13 }
 0x292   : > { %4389 = vmatprep.subr.msk.bf16.mxu1 %vm734_vm0, %v5358_v35  ;;  %v1354_v35 = vsel %vm734_vm0, %v1311_v16, 0 }
 0x299   : > { %4191 = vmatpush3.bf16.xpose.msra.mxu1 %v1363_v15 }
 0x29a   : > { %4390 = vmatprep.subr.msk.bf16.mxu1 %vm734_vm0, %v1315_v53 }
 0x2a1   : > { %4193 = vmatpush3.bf16.xpose.msra.mxu1 %v1360_v56 }
 0x2a2   : > { %4391 = vmatprep.subr.msk.bf16.mxu1 %vm734_vm0, %v5389_v22 }
 0x2a9   : > { %4195 = vmatpush3.bf16.xpose.msra.mxu1 %v1357_v28 }
 0x2aa   : > { %4392 = vmatprep.subr.msk.bf16.mxu1 %vm734_vm0, %v1311_v16 }
 0x2ad   : > { %v1012_v34 = vpop.xlane.xlu0 %1011 }
 0x2b1   : > { %4197 = vmatpush3.bf16.xpose.msra.mxu1 %v1354_v35  ;;  %v1010_v36 = vpop.xlane.xlu0 %1009  ;;  %v1008_v51 = vpop.xlane.xlu1 %1007 }
 0x2b2   : > { %4641 = vrcp.f32 %v1010_v36  ;;  %4393 = vmatprep.subr.msk.bf16.mxu1 %vm734_vm0, %v1309_v31 }
 0x2b3   : > { %4643 = vrcp.f32 %v1008_v51 }
 0x2b4   : > { %4645 = vrcp.f32 %v1012_v34 }
 0x2b5   : > { %v1014_v59 = vpop.xlane.xlu1 %1013  ;;  %v1028_v38 = vpop.xlane.xlu0 %1027 }
 0x2b6   : > { %4647 = vrcp.f32 %v1014_v59 }
 0x2b7   : > { %4649 = vrcp.f32 %v1028_v38 }
 0x2b9   : > { %4199 = vmatpush3.bf16.xpose.msra.mxu1 %v1351_v39  ;;  %v1020_v41 = vpop.xlane.xlu1 %1019  ;;  %v1024_v40 = vpop.xlane.xlu0 %1023 }
 0x2ba   : > { %4651 = vrcp.f32 %v1020_v41 }
 0x2bd   : > { %v1016_v42 = vpop.xlane.xlu1 %1015 }
 0x2bf   : > { %v4642_v46 = vpop.eup %4641 }
 0x2c0   : > { %v4644_v43 = vpop.eup %4643  ;;  %v1052_v49 = vmul.f32 %v4642_v46, %v5398_v58 }
 0x2c1   : > { %v1030_v45 = vpop.xlane.xlu0 %1029  ;;  %v1022_v44 = vpop.xlane.xlu1 %1021  ;;  %v1051_v47 = vmul.f32 %v4644_v43, %v5394_v52 }
 0x2c2   : > { %v4646_v22 = vpop.eup %4645  ;;  %4653 = vrcp.f32 %v1030_v45 }
 0x2c3   : > { %4655 = vrcp.f32 %v1022_v44  ;;  %v1065_v48 = vpack.c.bf16 %v1052_v49, %v1051_v47  ;;  %v4648_v54 = vpop.eup %4647  ;;  %v1053_v17 = vmul.f32 %v4646_v22, %v5391_v50 }
 0x2c4   : > { %4657 = vrcp.f32 %v1016_v42  ;;  %v1054_v37 = vmul.f32 %v4648_v54, %v5402_v0  ;;  %v4650_v18 = vpop.eup %4649 }
 0x2c5   : > { %4176 = vmatprep.mubr.bf16.mxu1 %v1065_v48  ;;  %3959 = vst [vmem:[%s5469_s7 + $0x10] sm:$0xff] %v1065_v48   ;;  %v1018_v25 = vpop.xlane.xlu1 %1017  ;;  %v1307_v58 = vpop.permute.xlu0 %1306  ;;  %v1061_v61 = vmul.f32 %v4650_v18, %v5405_v21 }
 0x2c6   : > { %4659 = vrcp.f32 %v1018_v25  ;;  %4394 = vmatprep.subr.msk.bf16.mxu1 %vm734_vm0, %v1307_v58  ;;  %v1348_v52 = vsel %vm734_vm0, %v1307_v58, 0  ;;  %v1066_v62 = vpack.c.bf16 %v1054_v37, %v1053_v17 }
 0x2c7   : > { %4201 = vmatpush3.bf16.xpose.msra.mxu1 %v1348_v52  ;;  %4661 = vrcp.f32 %v1024_v40  ;;  %v4652_v30 = vpop.eup %4651 }
 0x2c8   : > { %4177 = vmatmul.mubr.bf16.gmra.mxu1 %v1066_v62  ;;  %3960 = vst [vmem:[%s5469_s7 + $0x18] sm:$0xff] %v1066_v62   ;;  %v1057_v2 = vmul.f32 %v4652_v30, %v5409_v20 }
 0x2c9   : > { %v1026_v60 = vpop.xlane.xlu1 %1025  ;;  %v1289_v11 = vpop.permute.xlu0 %1288 }
 0x2ca   : > { %4663 = vrcp.f32 %v1026_v60 }
 0x2cd   : > { %v1305_v19 = vpop.permute.xlu1 %1304 }
 0x2ce   : > { %4395 = vmatprep.subr.msk.bf16.mxu1 %vm734_vm0, %v1305_v19  ;;  %v1345_v50 = vsel %vm734_vm0, %v1305_v19, 0 }
 0x2cf   : > { %v4654_v0 = vpop.eup %4653  ;;  %4203 = vmatpush3.bf16.xpose.msra.mxu1 %v1345_v50 }
 0x2d0   : > { %v4656_v53 = vpop.eup %4655  ;;  %v1062_v63 = vmul.f32 %v4654_v0, %v5420_v27 }
 0x2d1   : > { %v4658_v1 = vpop.eup %4657  ;;  %v1058_v3 = vmul.f32 %v4656_v53, %v5418_v33 }
 0x2d2   : > { %v1070_v4 = vpack.c.bf16 %v1062_v63, %v1061_v61  ;;  %v1055_v7 = vmul.f32 %v4658_v1, %v5415_v26  ;;  %v1291_v26 = vpop.permute.xlu1 %1290 }
 0x2d3   : > { %v4660_v5 = vpop.eup %4659  ;;  %v1068_v6 = vpack.c.bf16 %v1058_v3, %v1057_v2 }
 0x2d4   : > { %v1056_v8 = vmul.f32 %v4660_v5, %v5424_v29  ;;  %3964 = vst [vmem:[%s5469_s7 + $0x38] sm:$0xff] %v1070_v4   ;;  %v4662_v9 = vpop.eup %4661  ;;  %v1293_v29 = vpop.permute.xlu0 %1292 }
 0x2d5   : > { %3962 = vst [vmem:[%s5469_s7 + $0x28] sm:$0xff] %v1068_v6   ;;  %v1059_v27 = vmul.f32 %v4662_v9, %v5411_v24 }
 0x2d6   : > { %v1067_v21 = vpack.c.bf16 %v1056_v8, %v1055_v7  ;;  %v1295_v12 = vpop.permute.xlu1 %1294 }
 0x2d7   : > { %v4664_v10 = vpop.eup %4663 }
 0x2d8   : > { %4180 = vmatprep.mubr.bf16.mxu1 %v1067_v21  ;;  %3961 = vst [vmem:[%s5469_s7 + $0x20] sm:$0xff] %v1067_v21   ;;  %v1060_v20 = vmul.f32 %v4664_v10, %v5427_v32  ;;  %v1297_v13 = vpop.permute.xlu0 %1296 }
 0x2d9   : > { %4181 = vmatmul.mubr.bf16.gmra.mxu1 %v1068_v6 }
 0x2da   : > { %v1069_v33 = vpack.c.bf16 %v1060_v20, %v1059_v27  ;;  %v1299_v24 = vpop.permute.xlu1 %1298  ;;  %v5594_v20 = vld [vmem:[%s5121_s13 + $0x30] sm:$0xff]  }
 0x2dc   : > { %4184 = vmatprep.mubr.bf16.mxu1 %v1069_v33  ;;  %3963 = vst [vmem:[%s5469_s7 + $0x30] sm:$0xff] %v1069_v33   ;;  %v1301_v32 = vpop.permute.xlu0 %1300 }
 0x2de   : > { %v1303_v15 = vpop.permute.xlu1 %1302 }
 0x2e0   : > { %v1664_v56 = vpop.permute.xlu0 %1663 }
 0x2e1   : > { %4185 = vmatmul.mubr.bf16.gmra.mxu1 %v1070_v4  ;;  %4220 = vmatprep.subr.bf16.mxu0 %v1664_v56 }
 0x2e2   : > { %4204 = vmatprep.mubr.msk.bf16.mxu1 %vm734_vm0, %v1289_v11  ;;  %4221 = vmatpush3.bf16.msra.mxu0 %v1664_v56  ;;  %v1662_v28 = vpop.permute.xlu1 %1661 }
 0x2e3   : > { %4222 = vmatprep.subr.bf16.mxu0 %v1662_v28 }
 0x2e4   : > { %v1660_v16 = vpop.permute.xlu0 %1659 }
 0x2e6   : > { %4223 = vmatpush3.bf16.msra.mxu0 %v1662_v28  ;;  %v1654_v51 = vpop.permute.xlu1 %1653 }
 0x2e7   : > { %4224 = vmatprep.subr.bf16.mxu0 %v1660_v16 }
 0x2e8   : > { %v1658_v31 = vpop.permute.xlu0 %1657 }
 0x2e9   : > { %4205 = vmatmul.mubr.msk.bf16.vlgmr.msra.gmra.mxu1 %vm734_vm0, %v1291_v26 }
 0x2ea   : > { %4208 = vmatprep.mubr.msk.bf16.mxu1 %vm734_vm0, %v1293_v29  ;;  %4225 = vmatpush3.bf16.msra.mxu0 %v1660_v16 }
 0x2eb   : > { %4226 = vmatprep.subr.bf16.mxu0 %v1658_v31 }
 0x2ec   : > { %v1656_v34 = vpop.permute.xlu0 %1655 }
 0x2ee   : > { %4227 = vmatpush3.bf16.msra.mxu0 %v1658_v31 }
 0x2ef   : > { %4228 = vmatprep.subr.bf16.mxu0 %v1656_v34 }
 0x2f1   : > { %4209 = vmatmul.mubr.msk.bf16.gmra.mxu1 %vm734_vm0, %v1295_v12 }
 0x2f2   : > { %4212 = vmatprep.mubr.msk.bf16.mxu1 %vm734_vm0, %v1297_v13  ;;  %4229 = vmatpush3.bf16.msra.mxu0 %v1656_v34 }
 0x2f3   : > { %4230 = vmatprep.subr.bf16.mxu0 %v1654_v51 }
 0x2f6   : > { %4231 = vmatpush3.bf16.msra.mxu0 %v1654_v51 }
 0x2f9   : > { %4213 = vmatmul.mubr.msk.bf16.gmra.mxu1 %vm734_vm0, %v1299_v24 }
 0x2fa   : > { %4216 = vmatprep.mubr.msk.bf16.mxu1 %vm734_vm0, %v1301_v32 }
 0x301   : > { %4217 = vmatmul.mubr.msk.bf16.gmra.mxu1 %vm734_vm0, %v1303_v15 }
 0x350   : > { %v5519_v35 = vpop.f32.mrf.mxu1 }
 0x351   : > { %6645 = vst [vmem:[#allocation8_spill] sm:$0xff] %v5519_v35 }
 0x352   : > { %v5521_v36 = vpop.f32.mrf.mxu1 }
 0x353   : > { %6646 = vst [vmem:[#allocation9_spill] sm:$0xff] %v5521_v36 }
 0x354   : > { %v5523_v59 = vpop.f32.mrf.mxu1 }
 0x355   : > { %6647 = vst [vmem:[#allocation10_spill] sm:$0xff] %v5523_v59 }
 0x356   : > { %v5525_v38 = vpop.f32.mrf.mxu1 }
 0x357   : > { %6648 = vst [vmem:[#allocation11_spill] sm:$0xff] %v5525_v38 }
 0x388   : > { %v5527_v39 = vpop.f32.mrf.mxu1 }
 0x389   : > { %6649 = vst [vmem:[#allocation12_spill] sm:$0xff] %v5527_v39 }
 0x38a   : > { %v5529_v41 = vpop.f32.mrf.mxu1 }
 0x38b   : > { %6650 = vst [vmem:[#allocation13_spill] sm:$0xff] %v5529_v41 }
 0x38c   : > { %v5531_v40 = vpop.f32.mrf.mxu1 }
 0x38d   : > { %6651 = vst [vmem:[#allocation14_spill] sm:$0xff] %v5531_v40 }
 0x38e   : > { %v5533_v42 = vpop.f32.mrf.mxu1 }
 0x38f   : > { %6652 = vst [vmem:[#allocation15_spill] sm:$0xff] %v5533_v42 }
 0x399   : > { %v5535_v46 = vpop.f32.mrf.mxu1 }
 0x39a   : > { %6653 = vst [vmem:[#allocation16_spill] sm:$0xff] %v5535_v46 }
 0x39b   : > { %v5537_v43 = vpop.f32.mrf.mxu1 }
 0x39c   : > { %6654 = vst [vmem:[#allocation17_spill] sm:$0xff] %v5537_v43 }
 0x39d   : > { %v5539_v49 = vpop.f32.mrf.mxu1 }
 0x39e   : > { %6655 = vst [vmem:[#allocation18_spill] sm:$0xff] %v5539_v49 }
 0x39f   : > { %v5541_v45 = vpop.f32.mrf.mxu1 }
 0x3a0   : > { %6656 = vst [vmem:[#allocation19_spill] sm:$0xff] %v5541_v45 }
 0x3a1   : > { %v5543_v44 = vpop.f32.mrf.mxu1 }
 0x3a2   : > { %6657 = vst [vmem:[#allocation20_spill] sm:$0xff] %v5543_v44 }
 0x3a3   : > { %v5545_v47 = vpop.f32.mrf.mxu1 }
 0x3a4   : > { %6658 = vst [vmem:[#allocation21_spill] sm:$0xff] %v5545_v47 }
 0x3a5   : > { %v5547_v22 = vpop.f32.mrf.mxu1 }
 0x3a7   : > { %v5549_v48 = vpop.f32.mrf.mxu1 }
 0x3a8   : > { %6659 = vst [vmem:[#allocation22_spill] sm:$0xff] %v5549_v48 }
 0x3a9   : > { %v4206_v54 = vpop.f32.mrf.mxu1 }
 0x3aa   : > { %v1467_v25 = vmul.f32 0.0009765625, %v4206_v54 }
 0x3ab   : > { %v1402_v17 = vpop.f32.mrf.mxu1 }
 0x3ac   : > { %v1465_v37 = vmul.f32 0.0009765625, %v1402_v17  ;;  %v5553_v58 = vsel %vm902_vm2, -1e+09, %v1467_v25 }
 0x3ad   : > { %1501 = vmax.xlane.f32.xlu0 %v5553_v58  ;;  %v4207_v52 = vpop.f32.mrf.mxu1 }
 0x3ae   : > { %v1468_v60 = vmul.f32 0.0009765625, %v4207_v52  ;;  %v5558_v19 = vsel %vm902_vm2, -1e+09, %v1465_v37  ;;  %v5641_v37 = vld [vmem:[%s5121_s13 + $0x38] sm:$0xff]   ;;  %v5646_v52 = vld [vmem:[%s5121_s13 + $0x28] sm:$0xff]  }
 0x3af   : > { %v1405_v62 = vpop.f32.mrf.mxu1 }
 0x3b0   : > { %v1466_v18 = vmul.f32 0.0009765625, %v1405_v62  ;;  %v5568_v53 = vsel %vm902_vm2, -1e+09, %v1468_v60 }
 0x3b1   : > { %1497 = vmax.xlane.f32.xlu0 %v5558_v19  ;;  %v4210_v30 = vpop.f32.mrf.mxu1 }
 0x3b2   : > { %v5563_v50 = vsel %vm902_vm2, -1e+09, %v1466_v18  ;;  %v1471_v33 = vmul.f32 0.0009765625, %v4210_v30  ;;  %v1650_v18 = vpop.permute.xlu1 %1649 }
 0x3b3   : > { %1499 = vmax.xlane.f32.xlu1 %v5563_v50  ;;  %v1418_v0 = vpop.f32.mrf.mxu1 }
 0x3b4   : > { %v1469_v11 = vmul.f32 0.0009765625, %v1418_v0  ;;  %v5602_v26 = vsel %vm902_vm2, -1e+09, %v1471_v33 }
 0x3b5   : > { %1503 = vmax.xlane.f32.xlu0 %v5568_v53  ;;  %v4211_v61 = vpop.f32.mrf.mxu1 }
 0x3b6   : > { %v1472_v63 = vmul.f32 0.0009765625, %v4211_v61 }
 0x3b7   : > { %v1421_v1 = vpop.f32.mrf.mxu1 }
 0x3b8   : > { %v1470_v2 = vmul.f32 0.0009765625, %v1421_v1  ;;  %v5573_v3 = vsel %vm902_vm2, -1e+09, %v1472_v63 }
 0x3b9   : > { %1511 = vmax.xlane.f32.xlu1 %v5573_v3  ;;  %v4214_v4 = vpop.f32.mrf.mxu1 }
 0x3ba   : > { %v5578_v6 = vsel %vm902_vm2, -1e+09, %v1470_v2  ;;  %v1475_v29 = vmul.f32 0.0009765625, %v4214_v4 }
 0x3bb   : > { %v1434_v5 = vpop.f32.mrf.mxu1 }
 0x3bc   : > { %v1473_v13 = vmul.f32 0.0009765625, %v1434_v5 }
 0x3bd   : > { %1507 = vmax.xlane.f32.xlu1 %v5578_v6  ;;  %v4215_v7 = vpop.f32.mrf.mxu1 }
 0x3be   : > { %v1476_v8 = vmul.f32 0.0009765625, %v4215_v7  ;;  %v5617_v15 = vsel %vm902_vm2, -1e+09, %v1473_v13 }
 0x3bf   : > { %v1437_v9 = vpop.f32.mrf.mxu1 }
 0x3c0   : > { %v1474_v21 = vmul.f32 0.0009765625, %v1437_v9  ;;  %v5583_v10 = vsel %vm902_vm2, -1e+09, %v1476_v8 }
 0x3c1   : > { %1519 = vmax.xlane.f32.xlu1 %v5583_v10  ;;  %v4218_v12 = vpop.f32.mrf.mxu1 }
 0x3c2   : > { %v5588_v27 = vsel %vm902_vm2, -1e+09, %v1474_v21  ;;  %v1479_v32 = vmul.f32 0.0009765625, %v4218_v12  ;;  %v5669_v21 = vld [vmem:[%s5121_s13 + $0x10] sm:$0xff]  }
 0x3c3   : > { %v1450_v24 = vpop.f32.mrf.mxu1 }
 0x3c4   : > { %v1477_v28 = vmul.f32 0.0009765625, %v1450_v24  ;;  %v5622_v31 = vsel %vm902_vm2, -1e+09, %v1479_v32 }
 0x3c5   : > { %1515 = vmax.xlane.f32.xlu1 %v5588_v27  ;;  %v4219_v56 = vpop.f32.mrf.mxu1 }
 0x3c6   : > { %v1480_v16 = vmul.f32 0.0009765625, %v4219_v56  ;;  %v5627_v51 = vsel %vm902_vm2, -1e+09, %v1477_v28 }
 0x3c7   : > { %v1453_v34 = vpop.f32.mrf.mxu1 }
 0x3c8   : > { %v5631_v54 = vsel %vm902_vm2, -1e+09, %v1480_v16  ;;  %v1478_v25 = vmul.f32 0.0009765625, %v1453_v34 }
 0x3ca   : > { %v5637_v17 = vsel %vm902_vm2, -1e+09, %v1478_v25 }
 0x3cb   : > { %1651 = vrot.lane.b32.xlu0 %v5250_v14, %s4947_s14  ;;  %v5607_v14 = vsel %vm902_vm2, -1e+09, %v1469_v11 }
 0x3d6   : > { %1871 = vrot.lane.b32.xlu1 %v5594_v20, %s4949_s8 }
 0x3da   : > { %1867 = vrot.lane.b32.xlu1 %v5147_v55, %s4949_s8  ;;  %v5612_v55 = vsel %vm902_vm2, -1e+09, %v1475_v29 }
 0x3ea   : > { %1509 = vmax.xlane.f32.xlu0 %v5602_v26 }
 0x3ee   : > { %1505 = vmax.xlane.f32.xlu0 %v5607_v14 }
 0x3f2   : > { %1517 = vmax.xlane.f32.xlu0 %v5612_v55 }
 0x3f6   : > { %1513 = vmax.xlane.f32.xlu0 %v5617_v15 }
 0x3fa   : > { %1525 = vmax.xlane.f32.xlu0 %v5622_v31 }
 0x3fe   : > { %1521 = vmax.xlane.f32.xlu0 %v5627_v51  ;;  %1527 = vmax.xlane.f32.xlu1 %v5631_v54 }
 0x402   : > { %1523 = vmax.xlane.f32.xlu1 %v5637_v17 }
 0x414   : > { %1873 = vrot.lane.b32.xlu0 %v5641_v37, %s4949_s8 }
 0x418   : > { %1869 = vrot.lane.b32.xlu0 %v5646_v52, %s4949_s8 }
 0x41c   : > { %1865 = vrot.lane.b32.xlu0 %v5154_v57, %s4949_s8 }
 0x436   : > { %v1502_v62 = vpop.xlane.xlu0 %1501 }
 0x437   : > { %v1531_v60 = vsub.f32 %v5553_v58, %v1502_v62 }
 0x439   : > { %v1549_v30 = vmul.f32 1.442695, %v1531_v60 }
 0x43a   : > { %v1498_v0 = vpop.xlane.xlu0 %1497 }
 0x43b   : > { %4665 = vpow2.f32 %v1549_v30  ;;  %v1529_v61 = vsub.f32 %v5558_v19, %v1498_v0 }
 0x43c   : > { %v1500_v63 = vpop.xlane.xlu1 %1499 }
 0x43d   : > { %v1545_v1 = vmul.f32 1.442695, %v1529_v61  ;;  %v1530_v4 = vsub.f32 %v5563_v50, %v1500_v63 }
 0x43e   : > { %v1504_v2 = vpop.xlane.xlu0 %1503 }
 0x43f   : > { %4667 = vpow2.f32 %v1545_v1  ;;  %v1532_v5 = vsub.f32 %v5568_v53, %v1504_v2  ;;  %v1547_v57 = vmul.f32 1.442695, %v1530_v4 }
 0x441   : > { %v1551_v7 = vmul.f32 1.442695, %v1532_v5 }
 0x442   : > { %v1652_v8 = vpop.permute.xlu0 %1651  ;;  %v1512_v9 = vpop.xlane.xlu1 %1511 }
 0x443   : > { %4669 = vpow2.f32 %v1551_v7  ;;  %4232 = vmatprep.subr.bf16.mxu0 %v1652_v8  ;;  %v1536_v32 = vsub.f32 %v5573_v3, %v1512_v9 }
 0x444   : > { %4233 = vmatpush3.bf16.msra.mxu0 %v1652_v8  ;;  %4671 = vpow2.f32 %v1547_v57 }
 0x445   : > { %4234 = vmatprep.subr.bf16.mxu0 %v1650_v18  ;;  %v1559_v62 = vmul.f32 1.442695, %v1536_v32 }
 0x446   : > { %v1508_v33 = vpop.xlane.xlu1 %1507 }
 0x447   : > { %v1534_v29 = vsub.f32 %v5578_v6, %v1508_v33 }
 0x448   : > { %v5656_v58 = vpop.eup %4665  ;;  %4235 = vmatpush3.bf16.msra.mxu0 %v1650_v18 }
 0x449   : > { %1581 = vadd.xlane.f32.xlu1 %v5656_v58  ;;  %v1555_v56 = vmul.f32 1.442695, %v1534_v29 }
 0x44a   : > { %v1520_v11 = vpop.xlane.xlu1 %1519 }
 0x44c   : > { %v5659_v19 = vpop.eup %4667 }
 0x44d   : > { %1577 = vadd.xlane.f32.xlu1 %v5659_v19 }
 0x44e   : > { %v1516_v28 = vpop.xlane.xlu1 %1515 }
 0x450   : > { %v5662_v50 = vpop.eup %4669 }
 0x451   : > { %1583 = vadd.xlane.f32.xlu1 %v5662_v50  ;;  %v5665_v53 = vpop.eup %4671 }
 0x452   : > { %v5678_v6 = vpop.permute.xlu1 %1871 }
 0x455   : > { %1579 = vadd.xlane.f32.xlu1 %v5665_v53 }
 0x456   : > { %v5683_v1 = vpop.permute.xlu1 %1867 }
 0x466   : > { %1863 = vrot.lane.b32.xlu1 %v5669_v21, %s4949_s8 }
 0x473   : > { %v1510_v12 = vpop.xlane.xlu0 %1509 }
 0x474   : > { %v1535_v13 = vsub.f32 %v5602_v26, %v1510_v12  ;;  %v1540_v26 = vsub.f32 %v5583_v10, %v1520_v11 }
 0x476   : > { %v1557_v24 = vmul.f32 1.442695, %v1535_v13  ;;  %v1567_v63 = vmul.f32 1.442695, %v1540_v26  ;;  %v5755_v26 = vld [vmem:[%s5135_s15 + $0x28] sm:$0xff]  }
 0x477   : > { %v1506_v16 = vpop.xlane.xlu0 %1505 }
 0x478   : > { %4673 = vpow2.f32 %v1557_v24  ;;  %v1533_v34 = vsub.f32 %v5607_v14, %v1506_v16  ;;  %v1538_v14 = vsub.f32 %v5588_v27, %v1516_v28 }
 0x479   : > { %4675 = vpow2.f32 %v1555_v56 }
 0x47a   : > { %v1553_v25 = vmul.f32 1.442695, %v1533_v34  ;;  %v1563_v10 = vmul.f32 1.442695, %v1538_v14  ;;  %v5780_v14 = vld [vmem:[%s5135_s15 + $0x30] sm:$0xff]  }
 0x47b   : > { %v1518_v60 = vpop.xlane.xlu0 %1517 }
 0x47c   : > { %4677 = vpow2.f32 %v1553_v25  ;;  %v1539_v18 = vsub.f32 %v5612_v55, %v1518_v60  ;;  %v5730_v25 = vld [vmem:[%s5121_s13] sm:$0xff]   ;;  %v5740_v60 = vld [vmem:[%s5121_s13 + $0x8] sm:$0xff]  }
 0x47d   : > { %4679 = vpow2.f32 %v1559_v62  ;;  %v5735_v62 = vld [vmem:[%s5135_s15 + $0x8] sm:$0xff]  }
 0x47e   : > { %v1565_v30 = vmul.f32 1.442695, %v1539_v18  ;;  %v5745_v18 = vld [vmem:[%s5135_s15 + $0x18] sm:$0xff]  }
 0x47f   : > { %v1514_v3 = vpop.xlane.xlu0 %1513 }
 0x480   : > { %4681 = vpow2.f32 %v1565_v30  ;;  %v1537_v0 = vsub.f32 %v5617_v15, %v1514_v3  ;;  %v5750_v30 = vld [vmem:[%s5135_s15] sm:$0xff]   ;;  %v5760_v3 = vld [vmem:[%s5135_s15 + $0x10] sm:$0xff]  }
 0x482   : > { %v1561_v61 = vmul.f32 1.442695, %v1537_v0  ;;  %v5765_v0 = vld [vmem:[%s5135_s15 + $0x38] sm:$0xff]  }
 0x483   : > { %v1526_v2 = vpop.xlane.xlu0 %1525 }
 0x484   : > { %4683 = vpow2.f32 %v1561_v61  ;;  %v1543_v55 = vsub.f32 %v5622_v31, %v1526_v2  ;;  %v5770_v61 = vld [vmem:[%s5135_s15 + $0x20] sm:$0xff]   ;;  %v4872_v2 = vld [vmem:[%s5217_s16 + $0x10] sm:$0xff]   ;;  %s6493_s15 = scalar_lea.hbm %s6641_s5, %s3757_s10 }
 0x485   : > { %v5686_v4 = vpop.eup %4673  ;;  %4685 = vpow2.f32 %v1567_v63  ;;  %v5775_v63 = vld [vmem:[%s5217_s16 + $0x30] sm:$0xff]  }
 0x486   : > { %v1573_v5 = vmul.f32 1.442695, %v1543_v55  ;;  %1589 = vadd.xlane.f32.xlu0 %v5686_v4  ;;  %v5689_v15 = vpop.eup %4675  ;;  %v5787_v55 = vld [vmem:[%s5217_s16 + $0x38] sm:$0xff]  }
 0x487   : > { %v1522_v7 = vpop.xlane.xlu0 %1521  ;;  %v1528_v8 = vpop.xlane.xlu1 %1527 }
 0x488   : > { %4687 = vpow2.f32 %v1573_v5  ;;  %v1541_v27 = vsub.f32 %v5627_v51, %v1522_v7  ;;  %v1544_v57 = vsub.f32 %v5631_v54, %v1528_v8  ;;  %v4874_v5 = vld [vmem:[%s5217_s16] sm:$0xff]  }
 0x489   : > { %v5693_v9 = vpop.eup %4677  ;;  %4689 = vpow2.f32 %v1563_v10  ;;  %v5794_v10 = vld [vmem:[%s5217_s16 + $0x28] sm:$0xff]   ;;  %v4876_v7 = vld [vmem:[%s5217_s16 + $0x20] sm:$0xff]  }
 0x48a   : > { %v1569_v33 = vmul.f32 1.442695, %v1541_v27  ;;  %1585 = vadd.xlane.f32.xlu0 %v5693_v9  ;;  %1587 = vadd.xlane.f32.xlu1 %v5689_v15  ;;  %v1575_v31 = vmul.f32 1.442695, %v1544_v57  ;;  %v5699_v12 = vpop.eup %4679  ;;  %v4877_v27 = vld [vmem:[%s5217_s16 + $0x18] sm:$0xff]  }
 0x48b   : > { %v1524_v11 = vpop.xlane.xlu1 %1523  ;;  %v5697_v29 = vpop.permute.xlu0 %1873 }
 0x48c   : > { %4691 = vpow2.f32 %v1569_v33  ;;  %v1542_v13 = vsub.f32 %v5637_v17, %v1524_v11  ;;  %4396 = vmatprep.subr.msk.bf16.mxu0 %vm734_vm0, %v5697_v29 }
 0x48d   : > { %v5704_v51 = vpop.eup %4681  ;;  %4693 = vpow2.f32 %v1575_v31 }
 0x48e   : > { %v1571_v54 = vmul.f32 1.442695, %v1542_v13  ;;  %1591 = vadd.xlane.f32.xlu0 %v5699_v12  ;;  %1597 = vadd.xlane.f32.xlu1 %v5704_v51 }
 0x490   : > { %4695 = vpow2.f32 %v1571_v54 }
 0x491   : > { %v5708_v24 = vpop.eup %4683 }
 0x492   : > { %1593 = vadd.xlane.f32.xlu1 %v5708_v24  ;;  %v5711_v32 = vpop.eup %4685 }
 0x495   : > { %v5713_v17 = vpop.eup %4687 }
 0x496   : > { %1605 = vadd.xlane.f32.xlu0 %v5713_v17  ;;  %1599 = vadd.xlane.f32.xlu1 %v5711_v32  ;;  %v5717_v56 = vpop.eup %4689 }
 0x499   : > { %v5719_v28 = vpop.eup %4691 }
 0x49a   : > { %1601 = vadd.xlane.f32.xlu0 %v5719_v28  ;;  %1595 = vadd.xlane.f32.xlu1 %v5717_v56  ;;  %v5723_v16 = vpop.eup %4693 }
 0x49d   : > { %v5725_v34 = vpop.eup %4695 }
 0x49e   : > { %1607 = vadd.xlane.f32.xlu0 %v5723_v16  ;;  %1603 = vadd.xlane.f32.xlu1 %v5725_v34 }
 0x4af   : > { %1859 = vrot.lane.b32.xlu1 %v5730_v25, %s4949_s8 }
 0x4b3   : > { %1845 = vrot.lane.b32.xlu1 %v5735_v62, %s4949_s8 }
 0x4b4   : > { %1861 = vrot.lane.b32.xlu0 %v5740_v60, %s4949_s8 }
 0x4b7   : > { %1849 = vrot.lane.b32.xlu1 %v5745_v18, %s4949_s8 }
 0x4b8   : > { %1843 = vrot.lane.b32.xlu0 %v5750_v30, %s4949_s8 }
 0x4bb   : > { %1853 = vrot.lane.b32.xlu1 %v5755_v26, %s4949_s8 }
 0x4bc   : > { %1847 = vrot.lane.b32.xlu0 %v5760_v3, %s4949_s8 }
 0x4bf   : > { %1857 = vrot.lane.b32.xlu1 %v5765_v0, %s4949_s8 }
 0x4c0   : > { %1851 = vrot.lane.b32.xlu0 %v5770_v61, %s4949_s8 }
 0x4c3   : > { %2216 = vrot.lane.b32.xlu1 %v5775_v63, %s4949_s8 }
 0x4c4   : > { %1855 = vrot.lane.b32.xlu0 %v5780_v14, %s4949_s8 }
 0x4c7   : > { %2208 = vrot.lane.b32.xlu1 %v4872_v2, %s4949_s8 }
 0x4c8   : > { %2218 = vrot.lane.b32.xlu0 %v5787_v55, %s4949_s8 }
 0x4cb   : > { %2204 = vrot.lane.b32.xlu1 %v4874_v5, %s4949_s8 }
 0x4cc   : > { %2214 = vrot.lane.b32.xlu0 %v5794_v10, %s4949_s8 }
 0x4d0   : > { %2212 = vrot.lane.b32.xlu0 %v4876_v7, %s4949_s8 }
 0x4d2   : > { %v1582_v8 = vpop.xlane.xlu1 %1581 }
 0x4d3   : > { %4697 = vrcp.f32 %v1582_v8 }
 0x4d4   : > { %2210 = vrot.lane.b32.xlu0 %v4877_v27, %s4949_s8 }
 0x4d6   : > { %v1578_v57 = vpop.xlane.xlu1 %1577 }
 0x4da   : > { %v1584_v33 = vpop.xlane.xlu1 %1583 }
 0x4db   : > { %4699 = vrcp.f32 %v1584_v33 }
 0x4dc   : > { %4701 = vrcp.f32 %v1578_v57  ;;  %v1921_v57 = vsel %vm734_vm0, %v5697_v29, 0 }
 0x4de   : > { %v1580_v31 = vpop.xlane.xlu1 %1579 }
 0x4df   : > { %4703 = vrcp.f32 %v1580_v31 }
 0x4e0   : > { %v4698_v11 = vpop.eup %4697 }
 0x4e1   : > { %v1627_v54 = vmul.f32 %v4698_v11, %v5656_v58  ;;  %v1918_v58 = vsel %vm734_vm0, %v5678_v6, 0 }
 0x4e8   : > { %v4700_v13 = vpop.eup %4699 }
 0x4e9   : > { %v1628_v2 = vmul.f32 %v4700_v13, %v5662_v50  ;;  %v4702_v5 = vpop.eup %4701  ;;  %v1870_v50 = vpop.permute.xlu0 %1869 }
 0x4ea   : > { %v1625_v27 = vmul.f32 %v4702_v5, %v5659_v19 }
 0x4eb   : > { %v1642_v7 = vpack.c.bf16 %v1628_v2, %v1627_v54 }
 0x4ec   : > { %v4704_v43 = vpop.eup %4703 }
 0x4ed   : > { %v1626_v45 = vmul.f32 %v4704_v43, %v5665_v53  ;;  %3966 = vst [vmem:[%s5469_s7 + $0x48] sm:$0xff] %v1642_v7   ;;  %v1915_v43 = vsel %vm734_vm0, %v1870_v50, 0  ;;  %v1866_v19 = vpop.permute.xlu0 %1865  ;;  %v1864_v53 = vpop.permute.xlu1 %1863 }
 0x4ef   : > { %v1641_v8 = vpack.c.bf16 %v1626_v45, %v1625_v27  ;;  %v1912_v45 = vsel %vm734_vm0, %v5683_v1, 0 }
 0x4f1   : > { %4236 = vmatprep.mubr.bf16.mxu0 %v1641_v8  ;;  %3965 = vst [vmem:[%s5469_s7 + $0x40] sm:$0xff] %v1641_v8  }
 0x4f2   : > { %4237 = vmatmul.mubr.bf16.vlgmr.msra.gmra.mxu0 %v1642_v7 }
 0x4f3   : > { %4253 = vmatpush3.bf16.xpose.msra.mxu0 %v1921_v57 }
 0x4f4   : > { %4397 = vmatprep.subr.msk.bf16.mxu0 %vm734_vm0, %v5678_v6  ;;  %v1909_v6 = vsel %vm734_vm0, %v1866_v19, 0 }
 0x4fb   : > { %4255 = vmatpush3.bf16.xpose.msra.mxu0 %v1918_v58 }
 0x4fc   : > { %4398 = vmatprep.subr.msk.bf16.mxu0 %vm734_vm0, %v1870_v50 }
 0x503   : > { %4257 = vmatpush3.bf16.xpose.msra.mxu0 %v1915_v43 }
 0x504   : > { %4399 = vmatprep.subr.msk.bf16.mxu0 %vm734_vm0, %v5683_v1  ;;  %v1906_v1 = vsel %vm734_vm0, %v1864_v53, 0 }
 0x50b   : > { %4259 = vmatpush3.bf16.xpose.msra.mxu0 %v1912_v45 }
 0x50c   : > { %4400 = vmatprep.subr.msk.bf16.mxu0 %vm734_vm0, %v1866_v19 }
 0x50f   : > { %v1590_v29 = vpop.xlane.xlu0 %1589 }
 0x513   : > { %4261 = vmatpush3.bf16.xpose.msra.mxu0 %v1909_v6  ;;  %v1586_v33 = vpop.xlane.xlu0 %1585  ;;  %v1588_v31 = vpop.xlane.xlu1 %1587 }
 0x514   : > { %4705 = vrcp.f32 %v1586_v33  ;;  %4401 = vmatprep.subr.msk.bf16.mxu0 %vm734_vm0, %v1864_v53 }
 0x515   : > { %4707 = vrcp.f32 %v1588_v31 }
 0x516   : > { %4709 = vrcp.f32 %v1590_v29 }
 0x517   : > { %v1592_v11 = vpop.xlane.xlu0 %1591  ;;  %v1598_v13 = vpop.xlane.xlu1 %1597 }
 0x518   : > { %4711 = vrcp.f32 %v1592_v11 }
 0x519   : > { %4713 = vrcp.f32 %v1598_v13 }
 0x51b   : > { %4263 = vmatpush3.bf16.xpose.msra.mxu0 %v1906_v1  ;;  %v1594_v54 = vpop.xlane.xlu1 %1593 }
 0x51f   : > { %v1606_v2 = vpop.xlane.xlu0 %1605  ;;  %v1600_v5 = vpop.xlane.xlu1 %1599 }
 0x520   : > { %4715 = vrcp.f32 %v1600_v5 }
 0x521   : > { %v4706_v7 = vpop.eup %4705  ;;  %4717 = vrcp.f32 %v1594_v54 }
 0x522   : > { %v4708_v27 = vpop.eup %4707  ;;  %v1629_v8 = vmul.f32 %v4706_v7, %v5693_v9 }
 0x523   : > { %v4710_v57 = vpop.eup %4709  ;;  %v1602_v58 = vpop.xlane.xlu0 %1601  ;;  %v1630_v43 = vmul.f32 %v4708_v27, %v5689_v15 }
 0x524   : > { %v1596_v50 = vpop.xlane.xlu1 %1595  ;;  %v1631_v53 = vmul.f32 %v4710_v57, %v5686_v4 }
 0x525   : > { %v4712_v45 = vpop.eup %4711  ;;  %4719 = vrcp.f32 %v1596_v50  ;;  %v1643_v19 = vpack.c.bf16 %v1630_v43, %v1629_v8 }
 0x526   : > { %4721 = vrcp.f32 %v1606_v2  ;;  %v1632_v29 = vmul.f32 %v4712_v45, %v5699_v12  ;;  %v4714_v11 = vpop.eup %4713 }
 0x527   : > { %4723 = vrcp.f32 %v1602_v58  ;;  %4240 = vmatprep.mubr.bf16.mxu0 %v1643_v19  ;;  %3967 = vst [vmem:[%s5469_s7 + $0x50] sm:$0xff] %v1643_v19   ;;  %v1608_v6 = vpop.xlane.xlu0 %1607  ;;  %v1635_v13 = vmul.f32 %v4714_v11, %v5704_v51 }
 0x528   : > { %v1604_v9 = vpop.xlane.xlu1 %1603  ;;  %4725 = vrcp.f32 %v1608_v6  ;;  %v1644_v33 = vpack.c.bf16 %v1632_v29, %v1631_v53 }
 0x529   : > { %4727 = vrcp.f32 %v1604_v9 }
 0x52a   : > { %4241 = vmatmul.mubr.bf16.gmra.mxu0 %v1644_v33  ;;  %3968 = vst [vmem:[%s5469_s7 + $0x58] sm:$0xff] %v1644_v33  }
 0x52b   : > { %v1862_v15 = vpop.permute.xlu0 %1861 }
 0x52c   : > { %v1860_v31 = vpop.permute.xlu1 %1859  ;;  %4402 = vmatprep.subr.msk.bf16.mxu0 %vm734_vm0, %v1862_v15  ;;  %v1903_v4 = vsel %vm734_vm0, %v1862_v15, 0 }
 0x52d   : > { %4265 = vmatpush3.bf16.xpose.msra.mxu0 %v1903_v4  ;;  %v4716_v12 = vpop.eup %4715  ;;  %v1900_v7 = vsel %vm734_vm0, %v1860_v31, 0 }
 0x52e   : > { %4403 = vmatprep.subr.msk.bf16.mxu0 %vm734_vm0, %v1860_v31  ;;  %v1636_v1 = vmul.f32 %v4716_v12, %v5711_v32  ;;  %v4718_v54 = vpop.eup %4717 }
 0x52f   : > { %v1633_v8 = vmul.f32 %v4718_v54, %v5708_v24  ;;  %v1844_v29 = vpop.permute.xlu0 %1843 }
 0x530   : > { %v1646_v2 = vpack.c.bf16 %v1636_v1, %v1635_v13  ;;  %v1846_v6 = vpop.permute.xlu1 %1845 }
 0x532   : > { %v4720_v5 = vpop.eup %4719  ;;  %3970 = vst [vmem:[%s5469_s7 + $0x68] sm:$0xff] %v1646_v2  }
 0x533   : > { %v4722_v27 = vpop.eup %4721  ;;  %v1634_v57 = vmul.f32 %v4720_v5, %v5717_v56 }
 0x534   : > { %v4724_v58 = vpop.eup %4723  ;;  %v1639_v32 = vmul.f32 %v4722_v27, %v5713_v17  ;;  %v1848_v17 = vpop.permute.xlu0 %1847 }
 0x535   : > { %v4726_v50 = vpop.eup %4725  ;;  %v1645_v43 = vpack.c.bf16 %v1634_v57, %v1633_v8  ;;  %4267 = vmatpush3.bf16.xpose.msra.mxu0 %v1900_v7  ;;  %v1637_v19 = vmul.f32 %v4724_v58, %v5719_v28 }
 0x536   : > { %v4728_v51 = vpop.eup %4727  ;;  %v1640_v45 = vmul.f32 %v4726_v50, %v5723_v16  ;;  %v1850_v16 = vpop.permute.xlu1 %1849 }
 0x537   : > { %4244 = vmatprep.mubr.bf16.mxu0 %v1645_v43  ;;  %3969 = vst [vmem:[%s5469_s7 + $0x60] sm:$0xff] %v1645_v43   ;;  %v1638_v24 = vmul.f32 %v4728_v51, %v5725_v34 }
 0x538   : > { %4245 = vmatmul.mubr.bf16.gmra.mxu0 %v1646_v2  ;;  %v1648_v56 = vpack.c.bf16 %v1640_v45, %v1639_v32  ;;  %v1852_v28 = vpop.permute.xlu0 %1851 }
 0x539   : > { %v1647_v53 = vpack.c.bf16 %v1638_v24, %v1637_v19 }
 0x53a   : > { %3972 = vst [vmem:[%s5469_s7 + $0x78] sm:$0xff] %v1648_v56   ;;  %v1854_v34 = vpop.permute.xlu1 %1853 }
 0x53b   : > { %4248 = vmatprep.mubr.bf16.mxu0 %v1647_v53  ;;  %3971 = vst [vmem:[%s5469_s7 + $0x70] sm:$0xff] %v1647_v53  }
 0x53c   : > { %v1856_v9 = vpop.permute.xlu0 %1855 }
 0x53e   : > { %v1858_v33 = vpop.permute.xlu1 %1857 }
 0x540   : > { %4249 = vmatmul.mubr.bf16.gmra.mxu0 %v1648_v56  ;;  %v2219_v1 = vpop.permute.xlu0 %2218 }
 0x541   : > { %4268 = vmatprep.mubr.msk.bf16.mxu0 %vm734_vm0, %v1844_v29  ;;  %4284 = vmatprep.subr.bf16.mxu1 %v2219_v1 }
 0x542   : > { %4285 = vmatpush3.bf16.msra.mxu1 %v2219_v1  ;;  %v2217_v54 = vpop.permute.xlu1 %2216 }
 0x543   : > { %4286 = vmatprep.subr.bf16.mxu1 %v2217_v54 }
 0x544   : > { %v2215_v2 = vpop.permute.xlu0 %2214 }
 0x546   : > { %4287 = vmatpush3.bf16.msra.mxu1 %v2217_v54  ;;  %v2209_v27 = vpop.permute.xlu1 %2208 }
 0x547   : > { %4288 = vmatprep.subr.bf16.mxu1 %v2215_v2 }
 0x548   : > { %4269 = vmatmul.mubr.msk.bf16.vlgmr.msra.gmra.mxu0 %vm734_vm0, %v1846_v6  ;;  %v2213_v5 = vpop.permute.xlu0 %2212 }
 0x549   : > { %4272 = vmatprep.mubr.msk.bf16.mxu0 %vm734_vm0, %v1848_v17 }
 0x54a   : > { %4289 = vmatpush3.bf16.msra.mxu1 %v2215_v2 }
 0x54b   : > { %4290 = vmatprep.subr.bf16.mxu1 %v2213_v5 }
 0x54c   : > { %v2211_v7 = vpop.permute.xlu0 %2210 }
 0x54e   : > { %4291 = vmatpush3.bf16.msra.mxu1 %v2213_v5 }
 0x54f   : > { %4292 = vmatprep.subr.bf16.mxu1 %v2211_v7 }
 0x550   : > { %4273 = vmatmul.mubr.msk.bf16.gmra.mxu0 %vm734_vm0, %v1850_v16 }
 0x551   : > { %4276 = vmatprep.mubr.msk.bf16.mxu0 %vm734_vm0, %v1852_v28 }
 0x552   : > { %4293 = vmatpush3.bf16.msra.mxu1 %v2211_v7 }
 0x553   : > { %4294 = vmatprep.subr.bf16.mxu1 %v2209_v27 }
 0x556   : > { %4295 = vmatpush3.bf16.msra.mxu1 %v2209_v27 }
 0x558   : > { %4277 = vmatmul.mubr.msk.bf16.gmra.mxu0 %vm734_vm0, %v1854_v34 }
 0x559   : > { %4280 = vmatprep.mubr.msk.bf16.mxu0 %vm734_vm0, %v1856_v9 }
 0x560   : > { %4281 = vmatmul.mubr.msk.bf16.gmra.mxu0 %vm734_vm0, %v1858_v33 }
 0x5b2   : > { %v5854_v15 = vpop.f32.mrf.mxu0 }
 0x5b4   : > { %v5856_v31 = vpop.f32.mrf.mxu0 }
 0x5b6   : > { %v5858_v11 = vpop.f32.mrf.mxu0 }
 0x5b8   : > { %v5862_v12 = vpop.f32.mrf.mxu0 }
 0x5ea   : > { %v5866_v8 = vpop.f32.mrf.mxu0 }
 0x5ec   : > { %v5868_v57 = vpop.f32.mrf.mxu0 }
 0x5ee   : > { %v5870_v58 = vpop.f32.mrf.mxu0 }
 0x5f0   : > { %v5874_v43 = vpop.f32.mrf.mxu0 }
 0x5f8   : > { %v5878_v32 = vpop.f32.mrf.mxu0 }
 0x5fa   : > { %v5880_v45 = vpop.f32.mrf.mxu0 }
 0x5fc   : > { %v5882_v19 = vpop.f32.mrf.mxu0 }
 0x5fe   : > { %v5886_v56 = vpop.f32.mrf.mxu0 }
 0x600   : > { %v5890_v29 = vpop.f32.mrf.mxu0 }
 0x602   : > { %v5892_v6 = vpop.f32.mrf.mxu0 }
 0x604   : > { %v5894_v17 = vpop.f32.mrf.mxu0 }
 0x606   : > { %v5898_v28 = vpop.f32.mrf.mxu0 }
 0x608   : > { %v4270_v9 = vpop.f32.mrf.mxu0 }
 0x609   : > { %v2022_v33 = vmul.f32 0.0009765625, %v4270_v9 }
 0x60a   : > { %v1957_v1 = vpop.f32.mrf.mxu0 }
 0x60b   : > { %v2020_v54 = vmul.f32 0.0009765625, %v1957_v1  ;;  %v5904_v2 = vsel %vm902_vm2, -1e+09, %v2022_v33 }
 0x60c   : > { %2056 = vmax.xlane.f32.xlu0 %v5904_v2  ;;  %v4271_v5 = vpop.f32.mrf.mxu0 }
 0x60d   : > { %v2023_v27 = vmul.f32 0.0009765625, %v4271_v5  ;;  %v5909_v13 = vsel %vm902_vm2, -1e+09, %v2020_v54 }
 0x60e   : > { %v1960_v7 = vpop.f32.mrf.mxu0 }
 0x60f   : > { %v2021_v53 = vmul.f32 0.0009765625, %v1960_v7  ;;  %v5919_v1 = vsel %vm902_vm2, -1e+09, %v2023_v27 }
 0x610   : > { %2052 = vmax.xlane.f32.xlu0 %v5909_v13  ;;  %v4274_v34 = vpop.f32.mrf.mxu0 }
 0x611   : > { %v5914_v9 = vsel %vm902_vm2, -1e+09, %v2021_v53 }
 0x612   : > { %2054 = vmax.xlane.f32.xlu1 %v5914_v9  ;;  %v1973_v33 = vpop.f32.mrf.mxu0 }
 0x614   : > { %2058 = vmax.xlane.f32.xlu0 %v5919_v1  ;;  %v4275_v5 = vpop.f32.mrf.mxu0 }
 0x615   : > { %v2027_v7 = vmul.f32 0.0009765625, %v4275_v5 }
 0x616   : > { %v1976_v54 = vpop.f32.mrf.mxu0 }
 0x617   : > { %v2025_v16 = vmul.f32 0.0009765625, %v1976_v54  ;;  %v5924_v24 = vsel %vm902_vm2, -1e+09, %v2027_v7 }
 0x618   : > { %2066 = vmax.xlane.f32.xlu1 %v5924_v24  ;;  %v4278_v53 = vpop.f32.mrf.mxu0 }
 0x619   : > { %v5929_v27 = vsel %vm902_vm2, -1e+09, %v2025_v16  ;;  %v5943_v16 = vld [vmem:[%s5217_s16 + $0x8] sm:$0xff]   ;;  %v2030_v49 = vmul.f32 0.0009765625, %v4278_v53 }
 0x61a   : > { %v1989_v50 = vpop.f32.mrf.mxu0 }
 0x61c   : > { %2062 = vmax.xlane.f32.xlu1 %v5929_v27  ;;  %v4279_v51 = vpop.f32.mrf.mxu0 }
 0x61d   : > { %v2031_v5 = vmul.f32 0.0009765625, %v4279_v51  ;;  %v2026_v51 = vmul.f32 0.0009765625, %v4274_v34 }
 0x61e   : > { %v1992_v4 = vpop.f32.mrf.mxu0 }
 0x61f   : > { %v2029_v46 = vmul.f32 0.0009765625, %v1992_v4  ;;  %v5934_v54 = vsel %vm902_vm2, -1e+09, %v2031_v5  ;;  %v4879_v4 = vld [vmem:[%s5121_s13 + $0x20] sm:$0xff]   ;;  %v2024_v5 = vmul.f32 0.0009765625, %v1973_v33 }
 0x620   : > { %2074 = vmax.xlane.f32.xlu1 %v5934_v54  ;;  %v4282_v42 = vpop.f32.mrf.mxu0 }
 0x621   : > { %v5939_v7 = vsel %vm902_vm2, -1e+09, %v2029_v46  ;;  %v5953_v46 = vsel %vm902_vm2, -1e+09, %v2026_v51  ;;  %v5958_v41 = vsel %vm902_vm2, -1e+09, %v2024_v5 }
 0x622   : > { %v2005_v34 = vpop.f32.mrf.mxu0  ;;  %v2034_v33 = vmul.f32 0.0009765625, %v4282_v42 }
 0x623   : > { %v2032_v5 = vmul.f32 0.0009765625, %v2005_v34 }
 0x624   : > { %2070 = vmax.xlane.f32.xlu1 %v5939_v7  ;;  %v4283_v53 = vpop.f32.mrf.mxu0 }
 0x625   : > { %v2035_v39 = vmul.f32 0.0009765625, %v4283_v53  ;;  %v5978_v42 = vsel %vm902_vm2, -1e+09, %v2032_v5  ;;  %v2205_v5 = vpop.permute.xlu1 %2204 }
 0x62a   : > { %2206 = vrot.lane.b32.xlu0 %v5943_v16, %s4949_s8 }
 0x635   : > { %2426 = vrot.lane.b32.xlu1 %v5594_v20, %s4950_s9  ;;  %v2028_v20 = vmul.f32 0.0009765625, %v1989_v50  ;;  %v5973_v50 = vsel %vm902_vm2, -1e+09, %v2034_v33  ;;  %v4880_v33 = vld [vmem:[%s5121_s13 + $0x18] sm:$0xff]  }
 0x637   : > { %v5968_v51 = vsel %vm902_vm2, -1e+09, %v2028_v20  ;;  %v5982_v20 = vsel %vm902_vm2, -1e+09, %v2035_v39 }
 0x639   : > { %2422 = vrot.lane.b32.xlu1 %v4879_v4, %s4950_s9  ;;  %v5963_v4 = vsel %vm902_vm2, -1e+09, %v2030_v49  ;;  %v2008_v49 = vpop.f32.mrf.mxu0 }
 0x63a   : > { %v2033_v40 = vmul.f32 0.0009765625, %v2008_v49 }
 0x63c   : > { %v5988_v34 = vsel %vm902_vm2, -1e+09, %v2033_v40 }
 0x649   : > { %2064 = vmax.xlane.f32.xlu0 %v5953_v46 }
 0x64d   : > { %2060 = vmax.xlane.f32.xlu0 %v5958_v41 }
 0x651   : > { %2072 = vmax.xlane.f32.xlu0 %v5963_v4 }
 0x655   : > { %2068 = vmax.xlane.f32.xlu0 %v5968_v51 }
 0x659   : > { %2080 = vmax.xlane.f32.xlu0 %v5973_v50 }
 0x65d   : > { %2076 = vmax.xlane.f32.xlu0 %v5978_v42  ;;  %2082 = vmax.xlane.f32.xlu1 %v5982_v20 }
 0x661   : > { %2078 = vmax.xlane.f32.xlu1 %v5988_v34 }
 0x673   : > { %2428 = vrot.lane.b32.xlu0 %v5641_v37, %s4950_s9 }
 0x677   : > { %2424 = vrot.lane.b32.xlu0 %v5646_v52, %s4950_s9 }
 0x67b   : > { %2420 = vrot.lane.b32.xlu0 %v4880_v33, %s4950_s9 }
 0x695   : > { %v2057_v39 = vpop.xlane.xlu0 %2056 }
 0x696   : > { %v2086_v53 = vsub.f32 %v5904_v2, %v2057_v39 }
 0x698   : > { %v2104_v49 = vmul.f32 1.442695, %v2086_v53 }
 0x699   : > { %v2053_v36 = vpop.xlane.xlu0 %2052 }
 0x69a   : > { %4729 = vpow2.f32 %v2104_v49  ;;  %v2084_v40 = vsub.f32 %v5909_v13, %v2053_v36 }
 0x69b   : > { %v2055_v38 = vpop.xlane.xlu1 %2054 }
 0x69c   : > { %v2100_v35 = vmul.f32 1.442695, %v2084_v40  ;;  %v2085_v37 = vsub.f32 %v5914_v9, %v2055_v38 }
 0x69d   : > { %v2059_v59 = vpop.xlane.xlu0 %2058 }
 0x69e   : > { %4731 = vpow2.f32 %v2100_v35  ;;  %v2087_v52 = vsub.f32 %v5919_v1, %v2059_v59  ;;  %v2102_v33 = vmul.f32 1.442695, %v2085_v37 }
 0x6a0   : > { %v2106_v47 = vmul.f32 1.442695, %v2087_v52 }
 0x6a1   : > { %v2207_v48 = vpop.permute.xlu0 %2206  ;;  %v2067_v38 = vpop.xlane.xlu1 %2066 }
 0x6a2   : > { %4733 = vpow2.f32 %v2106_v47  ;;  %4296 = vmatprep.subr.bf16.mxu1 %v2207_v48  ;;  %v2091_v53 = vsub.f32 %v5924_v24, %v2067_v38 }
 0x6a3   : > { %4297 = vmatpush3.bf16.msra.mxu1 %v2207_v48  ;;  %4735 = vpow2.f32 %v2102_v33 }
 0x6a4   : > { %4298 = vmatprep.subr.bf16.mxu1 %v2205_v5  ;;  %v2114_v33 = vmul.f32 1.442695, %v2091_v53 }
 0x6a5   : > { %v2063_v47 = vpop.xlane.xlu1 %2062 }
 0x6a6   : > { %v2089_v13 = vsub.f32 %v5929_v27, %v2063_v47 }
 0x6a7   : > { %v6001_v2 = vpop.eup %4729  ;;  %4299 = vmatpush3.bf16.msra.mxu1 %v2205_v5 }
 0x6a8   : > { %2136 = vadd.xlane.f32.xlu1 %v6001_v2  ;;  %v2110_v5 = vmul.f32 1.442695, %v2089_v13 }
 0x6a9   : > { %v2075_v48 = vpop.xlane.xlu1 %2074 }
 0x6ab   : > { %v6004_v36 = vpop.eup %4731 }
 0x6ac   : > { %2132 = vadd.xlane.f32.xlu1 %v6004_v36 }
 0x6ad   : > { %v2071_v49 = vpop.xlane.xlu1 %2070 }
 0x6af   : > { %v6007_v35 = vpop.eup %4733 }
 0x6b0   : > { %2138 = vadd.xlane.f32.xlu1 %v6007_v35  ;;  %v6010_v59 = vpop.eup %4735 }
 0x6b1   : > { %v6020_v27 = vpop.permute.xlu1 %2426 }
 0x6b4   : > { %2134 = vadd.xlane.f32.xlu1 %v6010_v59 }
 0x6c5   : > { %2418 = vrot.lane.b32.xlu1 %v5669_v21, %s4950_s9 }
 0x6d2   : > { %v2065_v9 = vpop.xlane.xlu0 %2064 }
 0x6d3   : > { %v2090_v1 = vsub.f32 %v5953_v46, %v2065_v9  ;;  %v2095_v46 = vsub.f32 %v5934_v54, %v2075_v48 }
 0x6d5   : > { %v2112_v39 = vmul.f32 1.442695, %v2090_v1  ;;  %v2122_v9 = vmul.f32 1.442695, %v2095_v46  ;;  %v6025_v1 = vpop.permute.xlu1 %2422 }
 0x6d6   : > { %v2061_v40 = vpop.xlane.xlu0 %2060 }
 0x6d7   : > { %4737 = vpow2.f32 %v2112_v39  ;;  %v2088_v37 = vsub.f32 %v5958_v41, %v2061_v40  ;;  %v2093_v41 = vsub.f32 %v5939_v7, %v2071_v49 }
 0x6d8   : > { %4739 = vpow2.f32 %v2110_v5 }
 0x6d9   : > { %v2108_v52 = vmul.f32 1.442695, %v2088_v37  ;;  %v2118_v54 = vmul.f32 1.442695, %v2093_v41 }
 0x6da   : > { %v2073_v21 = vpop.xlane.xlu0 %2072 }
 0x6db   : > { %4741 = vpow2.f32 %v2108_v52  ;;  %v2094_v44 = vsub.f32 %v5963_v4, %v2073_v21 }
 0x6dc   : > { %4743 = vpow2.f32 %v2114_v33 }
 0x6dd   : > { %v2120_v47 = vmul.f32 1.442695, %v2094_v44 }
 0x6de   : > { %v2069_v24 = vpop.xlane.xlu0 %2068 }
 0x6df   : > { %4745 = vpow2.f32 %v2120_v47  ;;  %v2092_v38 = vsub.f32 %v5968_v51, %v2069_v24 }
 0x6e1   : > { %v2116_v13 = vmul.f32 1.442695, %v2092_v38 }
 0x6e2   : > { %v2081_v39 = vpop.xlane.xlu0 %2080 }
 0x6e3   : > { %4747 = vpow2.f32 %v2116_v13  ;;  %v2098_v4 = vsub.f32 %v5973_v50, %v2081_v39 }
 0x6e4   : > { %v6028_v53 = vpop.eup %4737  ;;  %4749 = vpow2.f32 %v2122_v9 }
 0x6e5   : > { %v2128_v44 = vmul.f32 1.442695, %v2098_v4  ;;  %2144 = vadd.xlane.f32.xlu0 %v6028_v53  ;;  %v6031_v51 = vpop.eup %4739 }
 0x6e6   : > { %v2077_v48 = vpop.xlane.xlu0 %2076  ;;  %v2083_v5 = vpop.xlane.xlu1 %2082 }
 0x6e7   : > { %4751 = vpow2.f32 %v2128_v44  ;;  %v2096_v7 = vsub.f32 %v5978_v42, %v2077_v48  ;;  %v2099_v49 = vsub.f32 %v5982_v20, %v2083_v5 }
 0x6e8   : > { %v6035_v40 = vpop.eup %4741  ;;  %4753 = vpow2.f32 %v2118_v54 }
 0x6e9   : > { %v2124_v37 = vmul.f32 1.442695, %v2096_v7  ;;  %2140 = vadd.xlane.f32.xlu0 %v6035_v40  ;;  %2142 = vadd.xlane.f32.xlu1 %v6031_v51  ;;  %v2130_v50 = vmul.f32 1.442695, %v2099_v49  ;;  %v6039_v21 = vpop.eup %4743 }
 0x6ea   : > { %v2079_v52 = vpop.xlane.xlu1 %2078  ;;  %v2429_v33 = vpop.permute.xlu0 %2428 }
 0x6eb   : > { %4755 = vpow2.f32 %v2124_v37  ;;  %v2097_v47 = vsub.f32 %v5988_v34, %v2079_v52  ;;  %4404 = vmatprep.subr.msk.bf16.mxu1 %vm734_vm0, %v2429_v33  ;;  %v2476_v4 = vsel %vm734_vm0, %v2429_v33, 0 }
 0x6ec   : > { %v6043_v42 = vpop.eup %4745  ;;  %4757 = vpow2.f32 %v2130_v50 }
 0x6ed   : > { %v2126_v20 = vmul.f32 1.442695, %v2097_v47  ;;  %2146 = vadd.xlane.f32.xlu0 %v6039_v21  ;;  %2152 = vadd.xlane.f32.xlu1 %v6043_v42 }
 0x6ef   : > { %4759 = vpow2.f32 %v2126_v20 }
 0x6f0   : > { %v6047_v46 = vpop.eup %4747 }
 0x6f1   : > { %2148 = vadd.xlane.f32.xlu1 %v6047_v46  ;;  %v6050_v24 = vpop.eup %4749 }
 0x6f4   : > { %v6052_v38 = vpop.eup %4751 }
 0x6f5   : > { %2160 = vadd.xlane.f32.xlu0 %v6052_v38  ;;  %2154 = vadd.xlane.f32.xlu1 %v6050_v24  ;;  %v6056_v34 = vpop.eup %4753 }
 0x6f8   : > { %v6058_v13 = vpop.eup %4755 }
 0x6f9   : > { %2156 = vadd.xlane.f32.xlu0 %v6058_v13  ;;  %2150 = vadd.xlane.f32.xlu1 %v6056_v34  ;;  %v6062_v9 = vpop.eup %4757 }
 0x6fc   : > { %v6064_v41 = vpop.eup %4759 }
 0x6fd   : > { %2162 = vadd.xlane.f32.xlu0 %v6062_v9  ;;  %2158 = vadd.xlane.f32.xlu1 %v6064_v41 }
 0x70e   : > { %2414 = vrot.lane.b32.xlu1 %v5730_v25, %s4950_s9 }
 0x712   : > { %2400 = vrot.lane.b32.xlu1 %v5735_v62, %s4950_s9 }
 0x713   : > { %2416 = vrot.lane.b32.xlu0 %v5740_v60, %s4950_s9 }
 0x716   : > { %2404 = vrot.lane.b32.xlu1 %v5745_v18, %s4950_s9 }
 0x717   : > { %2398 = vrot.lane.b32.xlu0 %v5750_v30, %s4950_s9 }
 0x71a   : > { %2408 = vrot.lane.b32.xlu1 %v5755_v26, %s4950_s9 }
 0x71b   : > { %2402 = vrot.lane.b32.xlu0 %v5760_v3, %s4950_s9 }
 0x71e   : > { %2412 = vrot.lane.b32.xlu1 %v5765_v0, %s4950_s9 }
 0x71f   : > { %2406 = vrot.lane.b32.xlu0 %v5770_v61, %s4950_s9 }
 0x722   : > { %2771 = vrot.lane.b32.xlu1 %v5775_v63, %s4950_s9 }
 0x723   : > { %2410 = vrot.lane.b32.xlu0 %v5780_v14, %s4950_s9 }
 0x727   : > { %2773 = vrot.lane.b32.xlu0 %v5787_v55, %s4950_s9 }
 0x72b   : > { %2769 = vrot.lane.b32.xlu0 %v5794_v10, %s4950_s9 }
 0x731   : > { %v2137_v25 = vpop.xlane.xlu1 %2136 }
 0x732   : > { %4761 = vrcp.f32 %v2137_v25 }
 0x735   : > { %v2133_v62 = vpop.xlane.xlu1 %2132 }
 0x739   : > { %v2139_v60 = vpop.xlane.xlu1 %2138 }
 0x73a   : > { %4763 = vrcp.f32 %v2139_v60 }
 0x73b   : > { %4765 = vrcp.f32 %v2133_v62 }
 0x73d   : > { %v2135_v18 = vpop.xlane.xlu1 %2134 }
 0x73e   : > { %4767 = vrcp.f32 %v2135_v18 }
 0x73f   : > { %v4762_v30 = vpop.eup %4761 }
 0x740   : > { %v2182_v3 = vmul.f32 %v4762_v30, %v6001_v2  ;;  %v2473_v2 = vsel %vm734_vm0, %v6020_v27, 0 }
 0x741   : > { %v2419_v54 = vpop.permute.xlu1 %2418 }
 0x747   : > { %v4764_v26 = vpop.eup %4763 }
 0x748   : > { %v2183_v0 = vmul.f32 %v4764_v26, %v6007_v35  ;;  %v4766_v61 = vpop.eup %4765  ;;  %v2425_v35 = vpop.permute.xlu0 %2424 }
 0x749   : > { %v2180_v55 = vmul.f32 %v4766_v61, %v6004_v36  ;;  %v2470_v36 = vsel %vm734_vm0, %v2425_v35, 0 }
 0x74a   : > { %v2197_v63 = vpack.c.bf16 %v2183_v0, %v2182_v3 }
 0x74b   : > { %v4768_v14 = vpop.eup %4767 }
 0x74c   : > { %v2181_v10 = vmul.f32 %v4768_v14, %v6010_v59  ;;  %3974 = vst [vmem:[%s5469_s7 + $0x88] sm:$0xff] %v2197_v63   ;;  %v2467_v59 = vsel %vm734_vm0, %v6025_v1, 0  ;;  %v2421_v44 = vpop.permute.xlu0 %2420 }
 0x74e   : > { %v2196_v39 = vpack.c.bf16 %v2181_v10, %v2180_v55 }
 0x750   : > { %4300 = vmatprep.mubr.bf16.mxu1 %v2196_v39  ;;  %3973 = vst [vmem:[%s5469_s7 + $0x80] sm:$0xff] %v2196_v39  }
 0x751   : > { %4301 = vmatmul.mubr.bf16.vlgmr.msra.gmra.mxu1 %v2197_v63 }
 0x752   : > { %4317 = vmatpush3.bf16.xpose.msra.mxu1 %v2476_v4 }
 0x753   : > { %4405 = vmatprep.subr.msk.bf16.mxu1 %vm734_vm0, %v6020_v27  ;;  %v2464_v27 = vsel %vm734_vm0, %v2421_v44, 0 }
 0x75a   : > { %4319 = vmatpush3.bf16.xpose.msra.mxu1 %v2473_v2 }
 0x75b   : > { %4406 = vmatprep.subr.msk.bf16.mxu1 %vm734_vm0, %v2425_v35 }
 0x762   : > { %4321 = vmatpush3.bf16.xpose.msra.mxu1 %v2470_v36 }
 0x763   : > { %4407 = vmatprep.subr.msk.bf16.mxu1 %vm734_vm0, %v6025_v1  ;;  %v2461_v1 = vsel %vm734_vm0, %v2419_v54, 0 }
 0x76a   : > { %4323 = vmatpush3.bf16.xpose.msra.mxu1 %v2467_v59 }
 0x76b   : > { %4408 = vmatprep.subr.msk.bf16.mxu1 %vm734_vm0, %v2421_v44 }
 0x76e   : > { %v2145_v48 = vpop.xlane.xlu0 %2144 }
 0x772   : > { %4325 = vmatpush3.bf16.xpose.msra.mxu1 %v2464_v27  ;;  %v2141_v5 = vpop.xlane.xlu0 %2140  ;;  %v2143_v7 = vpop.xlane.xlu1 %2142 }
 0x773   : > { %4769 = vrcp.f32 %v2141_v5  ;;  %4409 = vmatprep.subr.msk.bf16.mxu1 %vm734_vm0, %v2419_v54 }
 0x774   : > { %4771 = vrcp.f32 %v2143_v7 }
 0x775   : > { %4773 = vrcp.f32 %v2145_v48 }
 0x776   : > { %v2147_v49 = vpop.xlane.xlu0 %2146  ;;  %v2153_v37 = vpop.xlane.xlu1 %2152 }
 0x777   : > { %4775 = vrcp.f32 %v2147_v49 }
 0x778   : > { %4777 = vrcp.f32 %v2153_v37 }
 0x77a   : > { %4327 = vmatpush3.bf16.xpose.msra.mxu1 %v2461_v1  ;;  %v2149_v50 = vpop.xlane.xlu1 %2148 }
 0x77e   : > { %v2161_v52 = vpop.xlane.xlu0 %2160  ;;  %v2155_v33 = vpop.xlane.xlu1 %2154 }
 0x77f   : > { %4779 = vrcp.f32 %v2155_v33 }
 0x780   : > { %v4770_v47 = vpop.eup %4769  ;;  %4781 = vrcp.f32 %v2149_v50 }
 0x781   : > { %v4772_v20 = vpop.eup %4771  ;;  %v2184_v25 = vmul.f32 %v4770_v47, %v6035_v40 }
 0x782   : > { %v4774_v62 = vpop.eup %4773  ;;  %v2157_v60 = vpop.xlane.xlu0 %2156  ;;  %v2185_v30 = vmul.f32 %v4772_v20, %v6031_v51 }
 0x783   : > { %v2151_v18 = vpop.xlane.xlu1 %2150  ;;  %v2186_v0 = vmul.f32 %v4774_v62, %v6028_v53 }
 0x784   : > { %v4776_v26 = vpop.eup %4775  ;;  %4783 = vrcp.f32 %v2151_v18  ;;  %v2198_v3 = vpack.c.bf16 %v2185_v30, %v2184_v25 }
 0x785   : > { %4785 = vrcp.f32 %v2161_v52  ;;  %v2187_v61 = vmul.f32 %v4776_v26, %v6039_v21  ;;  %v4778_v10 = vpop.eup %4777 }
 0x786   : > { %4787 = vrcp.f32 %v2157_v60  ;;  %4304 = vmatprep.mubr.bf16.mxu1 %v2198_v3  ;;  %3975 = vst [vmem:[%s5469_s7 + $0x90] sm:$0xff] %v2198_v3   ;;  %v2163_v63 = vpop.xlane.xlu0 %2162  ;;  %v2190_v21 = vmul.f32 %v4778_v10, %v6043_v42 }
 0x787   : > { %v2159_v40 = vpop.xlane.xlu1 %2158  ;;  %4789 = vrcp.f32 %v2163_v63  ;;  %v2199_v14 = vpack.c.bf16 %v2187_v61, %v2186_v0 }
 0x788   : > { %4791 = vrcp.f32 %v2159_v40 }
 0x789   : > { %4305 = vmatmul.mubr.bf16.gmra.mxu1 %v2199_v14  ;;  %3976 = vst [vmem:[%s5469_s7 + $0x98] sm:$0xff] %v2199_v14  }
 0x78a   : > { %v2417_v51 = vpop.permute.xlu0 %2416 }
 0x78b   : > { %v2415_v55 = vpop.permute.xlu1 %2414  ;;  %v2458_v39 = vsel %vm734_vm0, %v2417_v51, 0  ;;  %4410 = vmatprep.subr.msk.bf16.mxu1 %vm734_vm0, %v2417_v51 }
 0x78c   : > { %4329 = vmatpush3.bf16.xpose.msra.mxu1 %v2458_v39  ;;  %v4780_v53 = vpop.eup %4779  ;;  %v2455_v59 = vsel %vm734_vm0, %v2415_v55, 0 }
 0x78d   : > { %4411 = vmatprep.subr.msk.bf16.mxu1 %vm734_vm0, %v2415_v55  ;;  %v2191_v4 = vmul.f32 %v4780_v53, %v6050_v24  ;;  %v4782_v2 = vpop.eup %4781 }
 0x78e   : > { %v2188_v54 = vmul.f32 %v4782_v2, %v6047_v46  ;;  %v2399_v50 = vpop.permute.xlu0 %2398 }
 0x78f   : > { %v2201_v35 = vpack.c.bf16 %v2191_v4, %v2190_v21  ;;  %v2401_v52 = vpop.permute.xlu1 %2400 }
 0x791   : > { %v4784_v36 = vpop.eup %4783  ;;  %3978 = vst [vmem:[%s5469_s7 + $0xa8] sm:$0xff] %v2201_v35  }
 0x792   : > { %v4786_v44 = vpop.eup %4785  ;;  %v2189_v48 = vmul.f32 %v4784_v36, %v6056_v34 }
 0x793   : > { %v4788_v27 = vpop.eup %4787  ;;  %v2194_v24 = vmul.f32 %v4786_v44, %v6052_v38  ;;  %v2403_v38 = vpop.permute.xlu0 %2402 }
 0x794   : > { %v4790_v5 = vpop.eup %4789  ;;  %v2200_v7 = vpack.c.bf16 %v2189_v48, %v2188_v54  ;;  %4331 = vmatpush3.bf16.xpose.msra.mxu1 %v2455_v59  ;;  %v2192_v37 = vmul.f32 %v4788_v27, %v6058_v13 }
 0x795   : > { %v4792_v42 = vpop.eup %4791  ;;  %v2195_v49 = vmul.f32 %v4790_v5, %v6062_v9  ;;  %v2405_v9 = vpop.permute.xlu1 %2404 }
 0x796   : > { %4308 = vmatprep.mubr.bf16.mxu1 %v2200_v7  ;;  %3977 = vst [vmem:[%s5469_s7 + $0xa0] sm:$0xff] %v2200_v7   ;;  %v2193_v46 = vmul.f32 %v4792_v42, %v6064_v41 }
 0x797   : > { %4309 = vmatmul.mubr.bf16.gmra.mxu1 %v2201_v35  ;;  %v2203_v34 = vpack.c.bf16 %v2195_v49, %v2194_v24  ;;  %v2407_v13 = vpop.permute.xlu0 %2406 }
 0x798   : > { %v2202_v1 = vpack.c.bf16 %v2193_v46, %v2192_v37 }
 0x799   : > { %3980 = vst [vmem:[%s5469_s7 + $0xb8] sm:$0xff] %v2203_v34   ;;  %v2409_v41 = vpop.permute.xlu1 %2408 }
 0x79a   : > { %4312 = vmatprep.mubr.bf16.mxu1 %v2202_v1  ;;  %3979 = vst [vmem:[%s5469_s7 + $0xb0] sm:$0xff] %v2202_v1  }
 0x79b   : > { %v2411_v33 = vpop.permute.xlu0 %2410 }
 0x79d   : > { %v2413_v47 = vpop.permute.xlu1 %2412 }
 0x79f   : > { %4313 = vmatmul.mubr.bf16.gmra.mxu1 %v2203_v34  ;;  %v2774_v26 = vpop.permute.xlu0 %2773 }
 0x7a0   : > { %4332 = vmatprep.mubr.msk.bf16.mxu1 %vm734_vm0, %v2399_v50  ;;  %4348 = vmatprep.subr.bf16.mxu0 %v2774_v26 }
 0x7a1   : > { %4349 = vmatpush3.bf16.msra.mxu0 %v2774_v26  ;;  %v2772_v3 = vpop.permute.xlu1 %2771 }
 0x7a2   : > { %4350 = vmatprep.subr.bf16.mxu0 %v2772_v3 }
 0x7a3   : > { %v2770_v0 = vpop.permute.xlu0 %2769 }
 0x7a5   : > { %4351 = vmatpush3.bf16.msra.mxu0 %v2772_v3 }
 0x7a6   : > { %4352 = vmatprep.subr.bf16.mxu0 %v2770_v0 }
 0x7a7   : > { %4333 = vmatmul.mubr.msk.bf16.vlgmr.msra.gmra.mxu1 %vm734_vm0, %v2401_v52 }
 0x7a8   : > { %4336 = vmatprep.mubr.msk.bf16.mxu1 %vm734_vm0, %v2403_v38 }
 0x7a9   : > { %4353 = vmatpush3.bf16.msra.mxu0 %v2770_v0 }
 0x7af   : > { %4337 = vmatmul.mubr.msk.bf16.gmra.mxu1 %vm734_vm0, %v2405_v9 }
 0x7b0   : > { %4340 = vmatprep.mubr.msk.bf16.mxu1 %vm734_vm0, %v2407_v13 }
 0x7b7   : > { %4341 = vmatmul.mubr.msk.bf16.gmra.mxu1 %vm734_vm0, %v2409_v41 }
 0x7b8   : > { %4344 = vmatprep.mubr.msk.bf16.mxu1 %vm734_vm0, %v2411_v33 }
 0x7bf   : > { %4345 = vmatmul.mubr.msk.bf16.gmra.mxu1 %vm734_vm0, %v2413_v47 }
 0x811   : > { %v6145_v20 = vpop.f32.mrf.mxu1 }
 0x813   : > { %v6147_v25 = vpop.f32.mrf.mxu1 }
 0x815   : > { %v6149_v62 = vpop.f32.mrf.mxu1 }
 0x817   : > { %v6153_v18 = vpop.f32.mrf.mxu1 }
 0x849   : > { %v6157_v61 = vpop.f32.mrf.mxu1 }
 0x84b   : > { %v6159_v63 = vpop.f32.mrf.mxu1 }
 0x84d   : > { %v6161_v40 = vpop.f32.mrf.mxu1 }
 0x84f   : > { %v6165_v51 = vpop.f32.mrf.mxu1 }
 0x857   : > { %v6169_v10 = vpop.f32.mrf.mxu1 }
 0x859   : > { %v6171_v39 = vpop.f32.mrf.mxu1 }
 0x85b   : > { %v6173_v53 = vpop.f32.mrf.mxu1 }
 0x85d   : > { %v6177_v4 = vpop.f32.mrf.mxu1 }
 0x85f   : > { %v6181_v35 = vpop.f32.mrf.mxu1 }
 0x861   : > { %v6183_v36 = vpop.f32.mrf.mxu1 }
 0x863   : > { %v6185_v59 = vpop.f32.mrf.mxu1 }
 0x865   : > { %v6189_v54 = vpop.f32.mrf.mxu1 }
 0x867   : > { %v4334_v27 = vpop.f32.mrf.mxu1 }
 0x868   : > { %v2577_v5 = vmul.f32 0.0009765625, %v4334_v27 }
 0x869   : > { %v2512_v7 = vpop.f32.mrf.mxu1 }
 0x86a   : > { %v2575_v42 = vmul.f32 0.0009765625, %v2512_v7  ;;  %v6195_v24 = vsel %vm902_vm2, -1e+09, %v2577_v5 }
 0x86b   : > { %2611 = vmax.xlane.f32.xlu0 %v6195_v24  ;;  %v4335_v49 = vpop.f32.mrf.mxu1 }
 0x86c   : > { %v2578_v46 = vmul.f32 0.0009765625, %v4335_v49  ;;  %v6200_v1 = vsel %vm902_vm2, -1e+09, %v2575_v42 }
 0x86d   : > { %v2515_v37 = vpop.f32.mrf.mxu1 }
 0x86e   : > { %v2576_v34 = vmul.f32 0.0009765625, %v2515_v37  ;;  %v6210_v13 = vsel %vm902_vm2, -1e+09, %v2578_v46 }
 0x86f   : > { %2607 = vmax.xlane.f32.xlu0 %v6200_v1  ;;  %v4338_v50 = vpop.f32.mrf.mxu1 }
 0x870   : > { %v2581_v52 = vmul.f32 0.0009765625, %v4338_v50  ;;  %v6205_v38 = vsel %vm902_vm2, -1e+09, %v2576_v34 }
 0x871   : > { %2609 = vmax.xlane.f32.xlu1 %v6205_v38  ;;  %v2528_v9 = vpop.f32.mrf.mxu1 }
 0x872   : > { %v6215_v47 = vsel %vm902_vm2, -1e+09, %v2581_v52  ;;  %v2579_v3 = vmul.f32 0.0009765625, %v2528_v9 }
 0x873   : > { %2613 = vmax.xlane.f32.xlu0 %v6210_v13  ;;  %v4339_v41 = vpop.f32.mrf.mxu1 }
 0x874   : > { %v2582_v33 = vmul.f32 0.0009765625, %v4339_v41  ;;  %v6225_v49 = vsel %vm902_vm2, -1e+09, %v2579_v3 }
 0x875   : > { %v2531_v26 = vpop.f32.mrf.mxu1 }
 0x876   : > { %v2580_v0 = vmul.f32 0.0009765625, %v2531_v26  ;;  %v6219_v27 = vsel %vm902_vm2, -1e+09, %v2582_v33 }
 0x877   : > { %2619 = vmax.xlane.f32.xlu0 %v6215_v47  ;;  %2621 = vmax.xlane.f32.xlu1 %v6219_v27  ;;  %v4342_v5 = vpop.f32.mrf.mxu1 }
 0x878   : > { %v2585_v7 = vmul.f32 0.0009765625, %v4342_v5  ;;  %v6229_v37 = vsel %vm902_vm2, -1e+09, %v2580_v0 }
 0x879   : > { %v2544_v42 = vpop.f32.mrf.mxu1 }
 0x87a   : > { %v6235_v50 = vsel %vm902_vm2, -1e+09, %v2585_v7  ;;  %v2583_v9 = vmul.f32 0.0009765625, %v2544_v42 }
 0x87b   : > { %2615 = vmax.xlane.f32.xlu0 %v6225_v49  ;;  %2617 = vmax.xlane.f32.xlu1 %v6229_v37  ;;  %v4343_v46 = vpop.f32.mrf.mxu1 }
 0x87c   : > { %v2586_v34 = vmul.f32 0.0009765625, %v4343_v46  ;;  %v6245_v5 = vsel %vm902_vm2, -1e+09, %v2583_v9  ;;  %v4882_v9 = vld [vmem:[%s5217_s16 + $0x20] sm:$0xff]  }
 0x87d   : > { %v2547_v52 = vpop.f32.mrf.mxu1 }
 0x87e   : > { %v2584_v41 = vmul.f32 0.0009765625, %v2547_v52  ;;  %v6239_v33 = vsel %vm902_vm2, -1e+09, %v2586_v34  ;;  %v4881_v52 = vld [vmem:[%s5217_s16 + $0x18] sm:$0xff]  }
 0x87f   : > { %2627 = vmax.xlane.f32.xlu0 %v6235_v50  ;;  %2629 = vmax.xlane.f32.xlu1 %v6239_v33  ;;  %v4346_v26 = vpop.f32.mrf.mxu1 }
 0x880   : > { %v2589_v3 = vmul.f32 0.0009765625, %v4346_v26  ;;  %v6249_v7 = vsel %vm902_vm2, -1e+09, %v2584_v41 }
 0x881   : > { %v2560_v0 = vpop.f32.mrf.mxu1 }
 0x882   : > { %v6255_v42 = vsel %vm902_vm2, -1e+09, %v2589_v3  ;;  %v2587_v46 = vmul.f32 0.0009765625, %v2560_v0 }
 0x883   : > { %2623 = vmax.xlane.f32.xlu0 %v6245_v5  ;;  %2625 = vmax.xlane.f32.xlu1 %v6249_v7  ;;  %v4347_v41 = vpop.f32.mrf.mxu1 }
 0x884   : > { %v6260_v34 = vsel %vm902_vm2, -1e+09, %v2587_v46  ;;  %v2590_v26 = vmul.f32 0.0009765625, %v4347_v41 }
 0x885   : > { %v2563_v3 = vpop.f32.mrf.mxu1 }
 0x886   : > { %v2588_v48 = vmul.f32 0.0009765625, %v2563_v3  ;;  %v6269_v0 = vsel %vm902_vm2, -1e+09, %v2590_v26 }
 0x887   : > { %2635 = vmax.xlane.f32.xlu0 %v6255_v42 }
 0x888   : > { %v6274_v46 = vsel %vm902_vm2, -1e+09, %v2588_v48 }
 0x88b   : > { %2631 = vmax.xlane.f32.xlu0 %v6260_v34 }
 0x894   : > { %2765 = vrot.lane.b32.xlu1 %v4881_v52, %s4950_s9  ;;  %v4883_v52 = vld [vmem:[%s5217_s16 + $0x10] sm:$0xff]  }
 0x8a1   : > { %2767 = vrot.lane.b32.xlu0 %v4882_v9, %s4950_s9 }
 0x8b8   : > { %2637 = vmax.xlane.f32.xlu1 %v6269_v0 }
 0x8bc   : > { %2633 = vmax.xlane.f32.xlu1 %v6274_v46 }
 0x8cd   : > { %2763 = vrot.lane.b32.xlu1 %v4883_v52, %s4950_s9 }
 0x8f4   : > { %v2612_v9 = vpop.xlane.xlu0 %2611 }
 0x8f5   : > { %v2641_v41 = vsub.f32 %v6195_v24, %v2612_v9 }
 0x8f7   : > { %v2659_v2 = vmul.f32 1.442695, %v2641_v41 }
 0x8f8   : > { %v2608_v3 = vpop.xlane.xlu0 %2607 }
 0x8f9   : > { %4793 = vpow2.f32 %v2659_v2  ;;  %v2639_v26 = vsub.f32 %v6200_v1, %v2608_v3 }
 0x8fa   : > { %v2610_v55 = vpop.xlane.xlu1 %2609 }
 0x8fb   : > { %v2655_v30 = vmul.f32 1.442695, %v2639_v26  ;;  %v2640_v44 = vsub.f32 %v6205_v38, %v2610_v55 }
 0x8fc   : > { %v2614_v23 = vpop.xlane.xlu0 %2613 }
 0x8fd   : > { %4795 = vpow2.f32 %v2655_v30  ;;  %v2642_v48 = vsub.f32 %v6210_v13, %v2614_v23  ;;  %v2657_v14 = vmul.f32 1.442695, %v2640_v44 }
 0x8ff   : > { %v2661_v21 = vmul.f32 1.442695, %v2642_v48 }
 0x900   : > { %v2620_v60 = vpop.xlane.xlu0 %2619  ;;  %v2622_v52 = vpop.xlane.xlu1 %2621 }
 0x901   : > { %4797 = vpow2.f32 %v2661_v21  ;;  %v2645_v24 = vsub.f32 %v6215_v47, %v2620_v60  ;;  %v2646_v1 = vsub.f32 %v6219_v27, %v2622_v52 }
 0x902   : > { %4799 = vpow2.f32 %v2657_v14 }
 0x903   : > { %v2667_v9 = vmul.f32 1.442695, %v2645_v24  ;;  %v2669_v60 = vmul.f32 1.442695, %v2646_v1 }
 0x904   : > { %v2616_v2 = vpop.xlane.xlu0 %2615  ;;  %v2618_v41 = vpop.xlane.xlu1 %2617 }
 0x905   : > { %4801 = vpow2.f32 %v2667_v9  ;;  %v2643_v55 = vsub.f32 %v6225_v49, %v2616_v2  ;;  %v2644_v30 = vsub.f32 %v6229_v37, %v2618_v41 }
 0x906   : > { %v6287_v38 = vpop.eup %4793 }
 0x907   : > { %v2663_v13 = vmul.f32 1.442695, %v2643_v55  ;;  %v2665_v44 = vmul.f32 1.442695, %v2644_v30  ;;  %2691 = vadd.xlane.f32.xlu1 %v6287_v38 }
 0x908   : > { %v2628_v21 = vpop.xlane.xlu0 %2627  ;;  %v2630_v3 = vpop.xlane.xlu1 %2629 }
 0x909   : > { %4803 = vpow2.f32 %v2663_v13  ;;  %v2649_v14 = vsub.f32 %v6235_v50, %v2628_v21  ;;  %v2650_v49 = vsub.f32 %v6239_v33, %v2630_v3 }
 0x90a   : > { %v6291_v47 = vpop.eup %4795  ;;  %4805 = vpow2.f32 %v2665_v44 }
 0x90b   : > { %2687 = vadd.xlane.f32.xlu1 %v6291_v47  ;;  %v2675_v27 = vmul.f32 1.442695, %v2649_v14  ;;  %4807 = vpow2.f32 %v2669_v60  ;;  %v2677_v50 = vmul.f32 1.442695, %v2650_v49 }
 0x90c   : > { %v2624_v37 = vpop.xlane.xlu0 %2623  ;;  %v2626_v23 = vpop.xlane.xlu1 %2625 }
 0x90d   : > { %v2647_v26 = vsub.f32 %v6245_v5, %v2624_v37  ;;  %4809 = vpow2.f32 %v2675_v27  ;;  %v2648_v24 = vsub.f32 %v6249_v7, %v2626_v23  ;;  %v6660_v23 = vpack.i.bf16 %v5858_v11, %v5854_v15 }
 0x90e   : > { %v6296_v48 = vpop.eup %4797  ;;  %v6663_v15 = vpack.i.bf16 %v5882_v19, %v5878_v32  ;;  %v6667_v32 = vpack.i.bf16 %v6173_v53, %v6169_v10 }
 0x90f   : > { %v2671_v52 = vmul.f32 1.442695, %v2647_v26  ;;  %2693 = vadd.xlane.f32.xlu1 %v6296_v48  ;;  %v6300_v2 = vpop.eup %4799  ;;  %v2673_v5 = vmul.f32 1.442695, %v2648_v24  ;;  %v4884_v26 = vld [vmem:[%s5217_s16] sm:$0xff]   ;;  %v6662_v24 = vpack.i.bf16 %v5870_v58, %v5866_v8  ;;  %v6665_v58 = vpack.i.bf16 %v6149_v62, %v6145_v20  ;;  %s3281_s16 = scalar_lea.sflag [#allocation6], %s5115_s11 }
 0x910   : > { %v2636_v9 = vpop.xlane.xlu0 %2635  ;;  %v2766_v3 = vpop.permute.xlu1 %2765  ;;  %v6669_v20 = vpack.i.bf16 %v5862_v12, %v5856_v31  ;;  %v6670_v62 = vpack.i.bf16 %v5886_v56, %v5880_v45  ;;  %v6673_v31 = vpack.i.bf16 %v6165_v51, %v6159_v63  ;;  %v6674_v12 = vpack.i.bf16 %v6177_v4, %v6171_v39 }
 0x911   : > { %4811 = vpow2.f32 %v2671_v52  ;;  %v2653_v33 = vsub.f32 %v6255_v42, %v2636_v9  ;;  %v6661_v52 = vpack.i.bf16 %v5874_v43, %v5868_v57  ;;  %v6664_v57 = vpack.i.bf16 %v5894_v17, %v5890_v29 }
 0x912   : > { %v6303_v41 = vpop.eup %4801  ;;  %4813 = vpow2.f32 %v2677_v50  ;;  %v6666_v43 = vpack.i.bf16 %v6161_v40, %v6157_v61  ;;  %v6668_v29 = vpack.i.bf16 %v6185_v59, %v6181_v35  ;;  %v6671_v61 = vpack.i.bf16 %v5898_v28, %v5892_v6 }
 0x913   : > { %v2683_v1 = vmul.f32 1.442695, %v2653_v33  ;;  %2699 = vadd.xlane.f32.xlu0 %v6303_v41  ;;  %2689 = vadd.xlane.f32.xlu1 %v6300_v2  ;;  %v6672_v40 = vpack.i.bf16 %v6153_v18, %v6147_v25  ;;  %v6675_v45 = vpack.i.bf16 %v6189_v54, %v6183_v36 }
 0x914   : > { %v2632_v55 = vpop.xlane.xlu0 %2631 }
 0x915   : > { %4815 = vpow2.f32 %v2683_v1  ;;  %v2651_v30 = vsub.f32 %v6260_v34, %v2632_v55 }
 0x916   : > { %v6308_v7 = vpop.eup %4803  ;;  %4817 = vpow2.f32 %v2673_v5 }
 0x917   : > { %v6310_v13 = vpop.eup %4805  ;;  %v2679_v44 = vmul.f32 1.442695, %v2651_v30  ;;  %2695 = vadd.xlane.f32.xlu0 %v6308_v7 }
 0x918   : > { %2697 = vadd.xlane.f32.xlu1 %v6310_v13  ;;  %v2768_v42 = vpop.permute.xlu0 %2767  ;;  %v6314_v21 = vpop.eup %4807 }
 0x919   : > { %4819 = vpow2.f32 %v2679_v44  ;;  %4354 = vmatprep.subr.bf16.mxu0 %v2768_v42 }
 0x91a   : > { %4355 = vmatpush3.bf16.msra.mxu0 %v2768_v42  ;;  %v6317_v34 = vpop.eup %4809 }
 0x91b   : > { %2701 = vadd.xlane.f32.xlu0 %v6314_v21  ;;  %4356 = vmatprep.subr.bf16.mxu0 %v2766_v3 }
 0x91e   : > { %v6319_v60 = vpop.eup %4811  ;;  %4357 = vmatpush3.bf16.msra.mxu0 %v2766_v3 }
 0x91f   : > { %2707 = vadd.xlane.f32.xlu0 %v6317_v34  ;;  %2703 = vadd.xlane.f32.xlu1 %v6319_v60  ;;  %v6323_v14 = vpop.eup %4813 }
 0x922   : > { %v6325_v27 = vpop.eup %4815 }
 0x923   : > { %2715 = vadd.xlane.f32.xlu1 %v6325_v27  ;;  %2709 = vadd.xlane.f32.xlu0 %v6323_v14  ;;  %v6329_v49 = vpop.eup %4817 }
 0x926   : > { %v6331_v37 = vpop.eup %4819 }
 0x927   : > { %2711 = vadd.xlane.f32.xlu1 %v6331_v37  ;;  %2705 = vadd.xlane.f32.xlu0 %v6329_v49 }
 0x938   : > { %2759 = vrot.lane.b32.xlu1 %v4884_v26, %s4950_s9 }
 0x93c   : > { %4463 = vrot.lane.b32.xlu1 %v6660_v23, %s4950_s9 }
 0x93d   : > { %2761 = vrot.lane.b32.xlu0 %v5943_v16, %s4950_s9 }
 0x940   : > { %4468 = vrot.lane.b32.xlu1 %v6661_v52, %s4950_s9 }
 0x941   : > { %v2638_v50 = vpop.xlane.xlu1 %2637 }
 0x942   : > { %v2654_v16 = vsub.f32 %v6269_v0, %v2638_v50 }
 0x944   : > { %4473 = vrot.lane.b32.xlu1 %v6662_v24, %s4950_s9  ;;  %v2685_v8 = vmul.f32 1.442695, %v2654_v16 }
 0x945   : > { %v2634_v9 = vpop.xlane.xlu1 %2633 }
 0x946   : > { %v2652_v33 = vsub.f32 %v6274_v46, %v2634_v9 }
 0x948   : > { %4483 = vrot.lane.b32.xlu1 %v6663_v15, %s4950_s9  ;;  %v2681_v1 = vmul.f32 1.442695, %v2652_v33 }
 0x949   : > { %v2764_v11 = vpop.permute.xlu1 %2763 }
 0x94a   : > { %4358 = vmatprep.subr.bf16.mxu0 %v2764_v11  ;;  %4821 = vpow2.f32 %v2681_v1 }
 0x94b   : > { %4359 = vmatpush3.bf16.msra.mxu0 %v2764_v11  ;;  %4823 = vpow2.f32 %v2685_v8 }
 0x94c   : > { %4493 = vrot.lane.b32.xlu1 %v6664_v57, %s4950_s9 }
 0x950   : > { %4503 = vrot.lane.b32.xlu1 %v6665_v58, %s4949_s8 }
 0x954   : > { %4513 = vrot.lane.b32.xlu1 %v6666_v43, %s4949_s8 }
 0x957   : > { %v6373_v19 = vpop.eup %4821 }
 0x958   : > { %4523 = vrot.lane.b32.xlu1 %v6667_v32, %s4949_s8  ;;  %v6380_v17 = vpop.eup %4823 }
 0x95c   : > { %4533 = vrot.lane.b32.xlu1 %v6668_v29, %s4949_s8  ;;  %2713 = vadd.xlane.f32.xlu0 %v6373_v19 }
 0x960   : > { %2717 = vadd.xlane.f32.xlu0 %v6380_v17 }
 0x976   : > { %4458 = vrot.lane.b32.xlu0 %v6669_v20, %s4950_s9 }
 0x97a   : > { %4478 = vrot.lane.b32.xlu0 %v6670_v62, %s4950_s9 }
 0x97e   : > { %4488 = vrot.lane.b32.xlu0 %v6671_v61, %s4950_s9 }
 0x982   : > { %4498 = vrot.lane.b32.xlu0 %v6672_v40, %s4949_s8 }
 0x986   : > { %4508 = vrot.lane.b32.xlu0 %v6673_v31, %s4949_s8 }
 0x98a   : > { %4518 = vrot.lane.b32.xlu0 %v6674_v12, %s4949_s8 }
 0x98e   : > { %4528 = vrot.lane.b32.xlu0 %v6675_v45, %s4949_s8 }
 0x990   : > { %v2692_v56 = vpop.xlane.xlu1 %2691 }
 0x991   : > { %4825 = vrcp.f32 %v2692_v56 }
 0x994   : > { %v2688_v6 = vpop.xlane.xlu1 %2687 }
 0x998   : > { %v2694_v28 = vpop.xlane.xlu1 %2693 }
 0x999   : > { %4827 = vrcp.f32 %v2694_v28 }
 0x99a   : > { %4829 = vrcp.f32 %v2688_v6  ;;  %v6676_v6 = vld [vmem:[#allocation20_spill] sm:$0xff] }
 0x99c   : > { %v2700_v25 = vpop.xlane.xlu0 %2699  ;;  %v2690_v18 = vpop.xlane.xlu1 %2689 }
 0x99d   : > { %4831 = vrcp.f32 %v2690_v18 }
 0x99e   : > { %v4826_v10 = vpop.eup %4825 }
 0x99f   : > { %v2737_v4 = vmul.f32 %v4826_v10, %v6287_v38 }
 0x9a0   : > { %v2696_v63 = vpop.xlane.xlu0 %2695 }
 0x9a1   : > { %4833 = vrcp.f32 %v2696_v63  ;;  %v2698_v51 = vpop.xlane.xlu1 %2697 }
 0x9a2   : > { %4835 = vrcp.f32 %v2698_v51 }
 0x9a3   : > { %4837 = vrcp.f32 %v2700_v25 }
 0x9a4   : > { %v2702_v39 = vpop.xlane.xlu0 %2701 }
 0x9a5   : > { %4839 = vrcp.f32 %v2702_v39 }
 0x9a6   : > { %v4828_v53 = vpop.eup %4827 }
 0x9a7   : > { %v2738_v35 = vmul.f32 %v4828_v53, %v6296_v48  ;;  %v4830_v54 = vpop.eup %4829 }
 0x9a8   : > { %v2708_v36 = vpop.xlane.xlu0 %2707  ;;  %v2704_v59 = vpop.xlane.xlu1 %2703  ;;  %v2735_v30 = vmul.f32 %v4830_v54, %v6291_v47 }
 0x9a9   : > { %v2752_v0 = vpack.c.bf16 %v2738_v35, %v2737_v4  ;;  %4841 = vrcp.f32 %v2708_v36 }
 0x9aa   : > { %v4832_v46 = vpop.eup %4831 }
 0x9ab   : > { %3982 = vst [vmem:[%s5469_s7 + $0xc8] sm:$0xff] %v2752_v0   ;;  %v2736_v44 = vmul.f32 %v4832_v46, %v6300_v2 }
 0x9ac   : > { %v2710_v5 = vpop.xlane.xlu0 %2709  ;;  %v6414_v55 = vpop.xlane.xlu1 %2715 }
 0x9ad   : > { %4843 = vrcp.f32 %v2710_v5  ;;  %v2751_v38 = vpack.c.bf16 %v2736_v44, %v2735_v30 }
 0x9ae   : > { %v4834_v42 = vpop.eup %4833  ;;  %4845 = vrcp.f32 %v2704_v59 }
 0x9af   : > { %v4836_v3 = vpop.eup %4835  ;;  %v2739_v48 = vmul.f32 %v4834_v42, %v6308_v7  ;;  %4364 = vmatprep.mubr.bf16.mxu0 %v2751_v38  ;;  %3981 = vst [vmem:[%s5469_s7 + $0xc0] sm:$0xff] %v2751_v38  }
 0x9b0   : > { %v4838_v26 = vpop.eup %4837  ;;  %v2706_v23 = vpop.xlane.xlu0 %2705  ;;  %v2740_v50 = vmul.f32 %v4836_v3, %v6310_v13 }
 0x9b1   : > { %v2712_v52 = vpop.xlane.xlu1 %2711  ;;  %4847 = vrcp.f32 %v2706_v23  ;;  %v2741_v2 = vmul.f32 %v4838_v26, %v6303_v41  ;;  %v6677_v26 = vld [vmem:[#allocation22_spill] sm:$0xff] }
 0x9b2   : > { %v4840_v47 = vpop.eup %4839  ;;  %v2753_v24 = vpack.c.bf16 %v2740_v50, %v2739_v48  ;;  %4849 = vrcp.f32 %v2712_v52 }
 0x9b3   : > { %v2742_v9 = vmul.f32 %v4840_v47, %v6314_v21 }
 0x9b4   : > { %v2762_v33 = vpop.permute.xlu0 %2761  ;;  %3983 = vst [vmem:[%s5469_s7 + $0xd0] sm:$0xff] %v2753_v24  }
 0x9b5   : > { %v2760_v15 = vpop.permute.xlu1 %2759  ;;  %4360 = vmatprep.subr.bf16.mxu0 %v2762_v33  ;;  %v2754_v7 = vpack.c.bf16 %v2742_v9, %v2741_v2 }
 0x9b6   : > { %4361 = vmatpush3.bf16.msra.mxu0 %v2762_v33  ;;  %v4842_v11 = vpop.eup %4841 }
 0x9b7   : > { %4362 = vmatprep.subr.bf16.mxu0 %v2760_v15  ;;  %3984 = vst [vmem:[%s5469_s7 + $0xd8] sm:$0xff] %v2754_v7   ;;  %v2745_v1 = vmul.f32 %v4842_v11, %v6317_v34 }
 0x9b9   : > { %v6425_v16 = vpop.permute.xlu1 %4463 }
 0x9ba   : > { %v4844_v13 = vpop.eup %4843  ;;  %4363 = vmatpush3.bf16.msra.mxu0 %v2760_v15 }
 0x9bb   : > { %v2746_v41 = vmul.f32 %v4844_v13, %v6323_v14  ;;  %v4846_v21 = vpop.eup %4845 }
 0x9bc   : > { %v2743_v43 = vmul.f32 %v4846_v21, %v6319_v60 }
 0x9bd   : > { %v6429_v57 = vpop.permute.xlu1 %4468  ;;  %4365 = vmatmul.mubr.bf16.vlgmr.msra.gmra.mxu0 %v2752_v0  ;;  %v2756_v8 = vpack.c.bf16 %v2746_v41, %v2745_v1 }
 0x9be   : > { %v4848_v58 = vpop.eup %4847  ;;  %4368 = vmatprep.mubr.bf16.mxu0 %v2753_v24 }
 0x9bf   : > { %v2744_v32 = vmul.f32 %v4848_v58, %v6329_v49  ;;  %3986 = vst [vmem:[%s5469_s7 + $0xe8] sm:$0xff] %v2756_v8  }
 0x9c1   : > { %v6434_v29 = vpop.permute.xlu1 %4473  ;;  %v2755_v20 = vpack.c.bf16 %v2744_v32, %v2743_v43 }
 0x9c3   : > { %3985 = vst [vmem:[%s5469_s7 + $0xe0] sm:$0xff] %v2755_v20  }
 0x9c5   : > { %v6437_v62 = vpop.permute.xlu1 %4483  ;;  %4369 = vmatmul.mubr.bf16.gmra.mxu0 %v2754_v7 }
 0x9c6   : > { %4372 = vmatprep.mubr.bf16.mxu0 %v2755_v20 }
 0x9c9   : > { %v4494_v34 = vpop.permute.xlu1 %4493 }
 0x9ca   : > { %v4496_v60 = vunpack.i.h.bf16 %v4494_v34  ;;  %v4495_v31 = vunpack.i.l.bf16 %v4494_v34 }
 0x9cc   : > { %v3160_v56 = vsel %vm734_vm0, %v5547_v22, %v4496_v60  ;;  %v3159_v28 = vsel %vm734_vm0, %v6676_v6, %v4495_v31  ;;  %v4850_v22 = vpop.eup %4849 }
 0x9cd   : > { %v6439_v14 = vpop.permute.xlu1 %4503  ;;  %4373 = vmatmul.mubr.bf16.gmra.mxu0 %v2756_v8  ;;  %v2747_v4 = vmul.f32 %v4850_v22, %v6331_v37 }
 0x9d1   : > { %v6441_v61 = vpop.permute.xlu1 %4513 }
 0x9d5   : > { %v6443_v40 = vpop.permute.xlu1 %4523 }
 0x9d9   : > { %v4534_v49 = vpop.permute.xlu1 %4533 }
 0x9da   : > { %v4536_v12 = vunpack.i.h.bf16 %v4534_v49  ;;  %v4535_v45 = vunpack.i.l.bf16 %v4534_v49 }
 0x9dc   : > { %v6450_v25 = vsel %vm3161_vm3, %v3159_v28, %v4535_v45  ;;  %v6453_v18 = vsel %vm3161_vm3, %v3160_v56, %v4536_v12 }
 0x9e5   : > { %v2714_v63 = vpop.xlane.xlu0 %2713 }
 0x9e6   : > { %4851 = vrcp.f32 %v2714_v63 }
 0x9e7   : > { %4853 = vrcp.f32 %v6414_v55 }
 0x9e9   : > { %v2718_v51 = vpop.xlane.xlu0 %2717 }
 0x9ea   : > { %4855 = vrcp.f32 %v2718_v51 }
 0x9ed   : > { %v6456_v10 = vpop.permute.xlu0 %4458 }
 0x9f1   : > { %v6458_v39 = vpop.permute.xlu0 %4478 }
 0x9f3   : > { %v4852_v53 = vpop.eup %4851 }
 0x9f4   : > { %v2748_v35 = vmul.f32 %v4852_v53, %v6373_v19  ;;  %v4854_v36 = vpop.eup %4853 }
 0x9f5   : > { %v4489_v59 = vpop.permute.xlu0 %4488  ;;  %v2749_v46 = vmul.f32 %v4854_v36, %v6325_v27  ;;  %v6678_v27 = vld [vmem:[#allocation21_spill] sm:$0xff] }
 0x9f6   : > { %v2757_v54 = vpack.c.bf16 %v2748_v35, %v2747_v4  ;;  %v4491_v19 = vunpack.i.h.bf16 %v4489_v59  ;;  %v4490_v42 = vunpack.i.l.bf16 %v4489_v59 }
 0x9f7   : > { %v4856_v0 = vpop.eup %4855 }
 0x9f8   : > { %4376 = vmatprep.mubr.bf16.mxu0 %v2757_v54  ;;  %3987 = vst [vmem:[%s5469_s7 + $0xf0] sm:$0xff] %v2757_v54   ;;  %v2750_v5 = vmul.f32 %v4856_v0, %v6380_v17  ;;  %v3158_v23 = vsel %vm734_vm0, %v6677_v26, %v4491_v19  ;;  %v3157_v17 = vsel %vm734_vm0, %v6678_v27, %v4490_v42 }
 0x9f9   : > { %v6465_v55 = vpop.permute.xlu0 %4498 }
 0x9fa   : > { %v2758_v30 = vpack.c.bf16 %v2750_v5, %v2749_v46 }
 0x9fc   : > { %4377 = vmatmul.mubr.bf16.gmra.mxu0 %v2758_v30  ;;  %3988 = vst [vmem:[%s5469_s7 + $0xf8] sm:$0xff] %v2758_v30  }
 0x9fd   : > { %v6468_v44 = vpop.permute.xlu0 %4508 }
 0xa01   : > { %v6470_v37 = vpop.permute.xlu0 %4518 }
 0xa05   : > { %v4529_v38 = vpop.permute.xlu0 %4528 }
 0xa06   : > { %v4531_v3 = vunpack.i.h.bf16 %v4529_v38  ;;  %v4530_v48 = vunpack.i.l.bf16 %v4529_v38 }
 0xa08   : > { %v6477_v52 = vsel %vm3161_vm3, %v3157_v17, %v4530_v48  ;;  %v6480_v50 = vsel %vm3161_vm3, %v3158_v23, %v4531_v3 }
 0xa7d   : > { %v4366_v47 = vpop.f32.mrf.mxu0 }
 0xa7f   : > { %v2817_v24 = vpop.f32.mrf.mxu0 }
 0xa81   : > { %v4367_v2 = vpop.f32.mrf.mxu0 }
 0xa82   : > { %v4537_v9 = vpack.i.bf16 %v4367_v2, %v4366_v47 }
 0xa83   : > { %v2820_v33 = vpop.f32.mrf.mxu0 }
 0xa84   : > { %v4542_v15 = vpack.i.bf16 %v2820_v33, %v2817_v24  ;;  %4538 = vrot.lane.b32.xlu1 %v4537_v9, %s4947_s14 }
 0xa85   : > { %v4370_v7 = vpop.f32.mrf.mxu0 }
 0xa86   : > { %4543 = vrot.lane.b32.xlu0 %v4542_v15, %s4947_s14 }
 0xa87   : > { %v2833_v11 = vpop.f32.mrf.mxu0 }
 0xa89   : > { %v4371_v13 = vpop.f32.mrf.mxu0 }
 0xa8a   : > { %v4547_v1 = vpack.i.bf16 %v4371_v13, %v4370_v7 }
 0xa8b   : > { %v2836_v41 = vpop.f32.mrf.mxu0 }
 0xa8c   : > { %v4552_v21 = vpack.i.bf16 %v2836_v41, %v2833_v11  ;;  %4548 = vrot.lane.b32.xlu1 %v4547_v1, %s4947_s14 }
 0xa8d   : > { %v4374_v8 = vpop.f32.mrf.mxu0 }
 0xa8e   : > { %4553 = vrot.lane.b32.xlu0 %v4552_v21, %s4947_s14 }
 0xa8f   : > { %v2849_v58 = vpop.f32.mrf.mxu0 }
 0xa91   : > { %v4375_v43 = vpop.f32.mrf.mxu0 }
 0xa92   : > { %v4557_v32 = vpack.i.bf16 %v4375_v43, %v4374_v8 }
 0xa93   : > { %v2852_v20 = vpop.f32.mrf.mxu0 }
 0xa94   : > { %v4562_v34 = vpack.i.bf16 %v2852_v20, %v2849_v58  ;;  %4558 = vrot.lane.b32.xlu1 %v4557_v32, %s4947_s14 }
 0xa96   : > { %4563 = vrot.lane.b32.xlu0 %v4562_v34, %s4947_s14 }
 0xabc   : > { %v4378_v60 = vpop.f32.mrf.mxu0 }
 0xabe   : > { %v2865_v31 = vpop.f32.mrf.mxu0 }
 0xabf   : > { %4898 = shalt.err (!%p4895_p7)
}
 0xac0   : > { %s4899_s6 = scalar_lea.hbm %s6493_s15, 4096  ;;  %s4903_s10 = scalar_lea.hbm %s6641_s5, 8192 }
 0xac1   : > { %p4900_p10 = scmp.ne.s32.totalorder %s6493_s15, %s4899_s6  ;;  %p4904_p13 = scmp.lt.s32.totalorder %s6493_s15, %s6641_s5 }
 0xac2   : > { %p4905_p0 = scmp.lt.s32.totalorder %s4903_s10, %s4899_s6 }
 0xac3   : > { %p4901_p11 = pnand %p4900_p10, %p5026_p6 }
 0xac4   : > { %p4906_p1 = por %p4905_p0, %p4904_p13 }
 0xac5   : > { %p4902_p12 = pneg %p4901_p11 }
 0xac7   : > { %p4907_p2 = pnand %p4906_p1, %p4902_p12 }
 0xac9   : > { %4910 = shalt.err (!%p4907_p2)
}
 0xaca   : > { %s4952_s23 = smov 4   ;;  %v4379_v49 = vpop.f32.mrf.mxu0  ;;  %v4466_v6 = vunpack.i.h.bf16 %v6425_v16  ;;  %v4465_v28 = vunpack.i.l.bf16 %v6425_v16  ;;  %v4506_v63 = vunpack.i.h.bf16 %v6439_v14  ;;  %v4505_v51 = vunpack.i.l.bf16 %v6439_v14  ;;  %s3676_s29 = sshll.u32 %s5265_s17, 6  ;;  %v6679_v59 = vld [vmem:[#allocation10_spill] sm:$0xff]  ;;  %v6680_v0 = vld [vmem:[#allocation8_spill] sm:$0xff]  ;;  %v6682_v42 = vld [vmem:[#allocation9_spill] sm:$0xff] }
 0xacb   : > { %4413 = dma.vmem_to_hbm [thread:$0]  (%p5026_p6), %s6495_s28, 4096, %s6493_s15, %s3281_s16, %s4949_s8, %s4949_s8, %s4952_s23   ;;  %v4572_v12 = vpack.i.bf16 %v4379_v49, %v4378_v60  ;;  %v4461_v22 = vunpack.i.h.bf16 %v6456_v10  ;;  %v4460_v53 = vunpack.i.l.bf16 %v6456_v10  ;;  %v4501_v4 = vunpack.i.h.bf16 %v6465_v55  ;;  %v6681_v10 = vld [vmem:[#allocation11_spill] sm:$0xff]  ;;  %v6683_v58 = vld [vmem:[#allocation14_spill] sm:$0xff]  ;;  %v6684_v43 = vld [vmem:[#allocation12_spill] sm:$0xff] }
 0xacc   : > { %v2868_v45 = vpop.f32.mrf.mxu0  ;;  %v4500_v35 = vunpack.i.l.bf16 %v6465_v55  ;;  %vm3178_vm4 = vcmask 785408   ;;  %v3148_v54 = vsel %vm734_vm0, %v6679_v59, %v4466_v6  ;;  %v3147_v16 = vsel %vm734_vm0, %v6680_v0, %v4465_v28  ;;  %s6546_s17 = scalar_lea.vmem %s6640_s4, %s3676_s29  ;;  %v6685_v34 = vld [vmem:[#allocation15_spill] sm:$0xff] }
 0xacd   : > { %v4567_v56 = vpack.i.bf16 %v2868_v45, %v2865_v31  ;;  %4573 = vrot.lane.b32.xlu1 %v4572_v12, %s4947_s14  ;;  %v3164_v14 = vsel %vm3161_vm3, %v3147_v16, %v4505_v51  ;;  %v3165_v30 = vsel %vm3161_vm3, %v3148_v54, %v4506_v63  ;;  %v3146_v19 = vsel %vm734_vm0, %v6681_v10, %v4461_v22 }
 0xace   : > { %v3145_v55 = vsel %vm734_vm0, %v6682_v42, %v4460_v53  ;;  %v4471_v27 = vunpack.i.h.bf16 %v6429_v57  ;;  %v3163_v47 = vsel %vm3161_vm3, %v3146_v19, %v4501_v4  ;;  %v4476_v2 = vunpack.i.h.bf16 %v6434_v29  ;;  %v6688_v19 = vld [vmem:[#allocation16_spill] sm:$0xff] }
 0xacf   : > { %4568 = vrot.lane.b32.xlu0 %v4567_v56, %s4947_s14  ;;  %v3162_v17 = vsel %vm3161_vm3, %v3145_v55, %v4500_v35  ;;  %v4475_v9 = vunpack.i.l.bf16 %v6434_v29  ;;  %v4470_v7 = vunpack.i.l.bf16 %v6429_v57  ;;  %v4516_v11 = vunpack.i.h.bf16 %v6441_v61 }
 0xad0   : > { %v4515_v13 = vunpack.i.l.bf16 %v6441_v61  ;;  %v4511_v41 = vunpack.i.h.bf16 %v6468_v44  ;;  %v4510_v21 = vunpack.i.l.bf16 %v6468_v44  ;;  %v3152_v29 = vsel %vm734_vm0, %v6683_v58, %v4476_v2  ;;  %v6686_v61 = vld [vmem:[#allocation13_spill] sm:$0xff] }
 0xad1   : > { %v3151_v32 = vsel %vm734_vm0, %v6684_v43, %v4475_v9  ;;  %v3150_v60 = vsel %vm734_vm0, %v6685_v34, %v4471_v27  ;;  %v3149_v31 = vsel %vm734_vm0, %v6686_v61, %v4470_v7  ;;  %v3169_v44 = vsel %vm3161_vm3, %v3152_v29, %v4516_v11 }
 0xad2   : > { %v3168_v49 = vsel %vm3161_vm3, %v3151_v32, %v4515_v13  ;;  %v4486_v63 = vunpack.i.h.bf16 %v6437_v62  ;;  %v3166_v51 = vsel %vm3161_vm3, %v3149_v31, %v4510_v21  ;;  %v3167_v22 = vsel %vm3161_vm3, %v3150_v60, %v4511_v41 }
 0xad3   : > { %v4485_v4 = vunpack.i.l.bf16 %v6437_v62  ;;  %v4526_v35 = vunpack.i.h.bf16 %v6443_v40  ;;  %v4525_v54 = vunpack.i.l.bf16 %v6443_v40  ;;  %v4481_v0 = vunpack.i.h.bf16 %v6458_v39 }
 0xad4   : > { %v4480_v16 = vunpack.i.l.bf16 %v6458_v39 }
 0xad5   : > { %v3155_v42 = vsel %vm734_vm0, %v6688_v19, %v4485_v4 }
 0xaf6   : > { %v4539_v36 = vpop.permute.xlu1 %4538 }
 0xaf7   : > { %v4541_v46 = vunpack.i.h.bf16 %v4539_v36  ;;  %v4540_v5 = vunpack.i.l.bf16 %v4539_v36 }
 0xaf8   : > { %v4544_v38 = vpop.permute.xlu0 %4543 }
 0xaf9   : > { %v3181_v3 = vsel %vm3178_vm4, %v3164_v14, %v4540_v5  ;;  %v3182_v48 = vsel %vm3178_vm4, %v3165_v30, %v4541_v46  ;;  %v4546_v26 = vunpack.i.h.bf16 %v4544_v38  ;;  %v4545_v23 = vunpack.i.l.bf16 %v4544_v38  ;;  %v6687_v30 = vld [vmem:[#allocation18_spill] sm:$0xff] }
 0xafa   : > { %v3926_v24 = vpack.c.bf16 %v3182_v48, %v3181_v3  ;;  %v4521_v5 = vunpack.i.h.bf16 %v6470_v37  ;;  %v4520_v14 = vunpack.i.l.bf16 %v6470_v37  ;;  %v3156_v10 = vsel %vm734_vm0, %v6687_v30, %v4486_v63  ;;  %v6689_v3 = vld [vmem:[#allocation19_spill] sm:$0xff]  ;;  %v6690_v37 = vld [vmem:[#allocation17_spill] sm:$0xff] }
 0xafb   : > { %v3180_v33 = vsel %vm3178_vm4, %v3163_v47, %v4546_v26  ;;  %v3179_v15 = vsel %vm3178_vm4, %v3162_v17, %v4545_v23  ;;  %v3172_v38 = vsel %vm3161_vm3, %v3155_v42, %v4525_v54  ;;  %v3173_v39 = vsel %vm3161_vm3, %v3156_v10, %v4526_v35 }
 0xafc   : > { %3989 = vst [vmem:[%s6546_s17 + $0x8] sm:$0xff] %v3926_v24   ;;  %v3921_v1 = vpack.c.bf16 %v3180_v33, %v3179_v15  ;;  %v3154_v48 = vsel %vm734_vm0, %v6689_v3, %v4481_v0  ;;  %v3153_v26 = vsel %vm734_vm0, %v6690_v37, %v4480_v16 }
 0xafd   : > { %v3170_v2 = vsel %vm3161_vm3, %v3153_v26, %v4520_v14  ;;  %v3171_v9 = vsel %vm3161_vm3, %v3154_v48, %v4521_v5 }
 0xafe   : > { %3922 = vst [vmem:[%s6546_s17] sm:$0xff] %v3921_v1   ;;  %v4549_v8 = vpop.permute.xlu1 %4548 }
 0xaff   : > { %v4551_v20 = vunpack.i.h.bf16 %v4549_v8  ;;  %v4550_v57 = vunpack.i.l.bf16 %v4549_v8 }
 0xb00   : > { %v4554_v12 = vpop.permute.xlu0 %4553 }
 0xb01   : > { %v3185_v45 = vsel %vm3178_vm4, %v3168_v49, %v4550_v57  ;;  %v3186_v56 = vsel %vm3178_vm4, %v3169_v44, %v4551_v20  ;;  %v4556_v6 = vunpack.i.h.bf16 %v4554_v12  ;;  %v4555_v28 = vunpack.i.l.bf16 %v4554_v12 }
 0xb02   : > { %v3936_v53 = vpack.c.bf16 %v3186_v56, %v3185_v45 }
 0xb03   : > { %v3183_v36 = vsel %vm3178_vm4, %v3166_v51, %v4555_v28  ;;  %v3184_v59 = vsel %vm3178_vm4, %v3167_v22, %v4556_v6 }
 0xb04   : > { %3991 = vst [vmem:[%s6546_s17 + $0x18] sm:$0xff] %v3936_v53   ;;  %v3931_v46 = vpack.c.bf16 %v3184_v59, %v3183_v36 }
 0xb06   : > { %3990 = vst [vmem:[%s6546_s17 + $0x10] sm:$0xff] %v3931_v46   ;;  %v4559_v62 = vpop.permute.xlu1 %4558 }
 0xb07   : > { %v4561_v55 = vunpack.i.h.bf16 %v4559_v62  ;;  %v4560_v40 = vunpack.i.l.bf16 %v4559_v62 }
 0xb08   : > { %v4564_v23 = vpop.permute.xlu0 %4563 }
 0xb09   : > { %v3189_v27 = vsel %vm3178_vm4, %v3172_v38, %v4560_v40  ;;  %v3190_v17 = vsel %vm3178_vm4, %v3173_v39, %v4561_v55  ;;  %v4566_v47 = vunpack.i.h.bf16 %v4564_v23  ;;  %v4565_v24 = vunpack.i.l.bf16 %v4564_v23 }
 0xb0a   : > { %v3946_v33 = vpack.c.bf16 %v3190_v17, %v3189_v27 }
 0xb0b   : > { %v3188_v15 = vsel %vm3178_vm4, %v3171_v9, %v4566_v47  ;;  %v3187_v7 = vsel %vm3178_vm4, %v3170_v2, %v4565_v24 }
 0xb0c   : > { %3993 = vst [vmem:[%s6546_s17 + $0x28] sm:$0xff] %v3946_v33   ;;  %v3941_v11 = vpack.c.bf16 %v3188_v15, %v3187_v7 }
 0xb0e   : > { %3992 = vst [vmem:[%s6546_s17 + $0x20] sm:$0xff] %v3941_v11  }
 0xb3f   : > { %v4574_v13 = vpop.permute.xlu1 %4573 }
 0xb40   : > { %v4576_v1 = vunpack.i.h.bf16 %v4574_v13  ;;  %v4575_v41 = vunpack.i.l.bf16 %v4574_v13 }
 0xb41   : > { %v4569_v21 = vpop.permute.xlu0 %4568 }
 0xb42   : > { %v3193_v8 = vsel %vm3178_vm4, %v6450_v25, %v4575_v41  ;;  %v3194_v58 = vsel %vm3178_vm4, %v6453_v18, %v4576_v1  ;;  %v4571_v29 = vunpack.i.h.bf16 %v4569_v21  ;;  %v4570_v43 = vunpack.i.l.bf16 %v4569_v21 }
 0xb43   : > { %v3956_v32 = vpack.c.bf16 %v3194_v58, %v3193_v8 }
 0xb44   : > { %v3192_v20 = vsel %vm3178_vm4, %v6480_v50, %v4571_v29  ;;  %v3191_v57 = vsel %vm3178_vm4, %v6477_v52, %v4570_v43 }
 0xb45   : > { %3995 = vst [vmem:[%s6546_s17 + $0x38] sm:$0xff] %v3956_v32   ;;  %v3951_v34 = vpack.c.bf16 %v3192_v20, %v3191_v57 }
 0xb47   : > { %3994 = vst [vmem:[%s6546_s17 + $0x30] sm:$0xff] %v3951_v34  }
 0xb48 PF: > { %s3320_s8 = sand.u32 1, %s4933_s18   ;;  %p4416_p6 = pnand %p3441_p9, %p5030_p8 }
 0xb49   : > { %s3321_s28 = scalar_lea.sflag [#allocation6], %s3320_s8 }
 0xb4a   : > { %p4417_p3 = pneg %p4416_p6 }
 0xb4c   : > { %4928 = dma.done.wait (%p4417_p3), %s3321_s28, 4096  }
 0xb4d   : > { %4930 = vsyncadd (%p4417_p3), %s3321_s28, 4294963200  ;;  %p16_p4 = scmp.ge.s32.totalorder %s5008_s24, 4   ;;  %s6691_s18 = smov %s4937_s19 }
 0xb4e   : > { %s6692_s19 = smov %s4941_s20  ;;  %s6693_s20 = smov %s5020_s27 }
 0xb4f   : > { %s6694_s21 = smov %s5008_s24  ;;  %18 = sbr.rel (!%p16_p4) target bundleno = 3 (0x3), region = 233 }
 0xb54   :  { %3326 = vsyncpa [#allocation6], 1 }
 0xb55   :  { %3328 = vsyncpa [#allocation6 + $0x1], 1 }

// kernel: bert_pretrain_forward.24
= control target key start
LH: loop header
LB: loop body
LE: loop exit
PB: predicated region body
PF: predicated region fallthrough
CT: control target
= control target key end

     0   :  { %v3619_v1 = vmov 0   ;;  %v1370_v49 = vlaneseq  ;;  %s5157_s1 = inlined_call_operand.vmem [shape: bf16[128,512], index: 1, kind: input, shape index: {}]   ;;  %s5158_s0 = inlined_call_operand.vmem [shape: bf16[256,128], index: 0, kind: input, shape index: {}]   ;;  %s5159_s2 = inlined_call_operand.vmem [shape: f32[1,512], index: 2, kind: input, shape index: {}]   ;;  %s5160_s3 = inlined_call_operand.vmem [shape: bf16[256,512], index: 3, kind: output, shape index: {}]  }
   0x1   :  { %v3299_v0 = vld [vmem:[%s5157_s1 + $0xe4] ss:$16 sps:$4 sm:$0xff]   ;;  %627 = vmatprep.mubr.bf16.mxu0 %v3619_v1  ;;  %820 = vmatprep.mubr.bf16.mxu1 %v3619_v1  ;;  %v3301_v2 = vld [vmem:[%s5157_s1 + $0xec] ss:$16 sps:$4 sm:$0xff]   ;;  %v3303_v3 = vld [vmem:[%s5157_s1 + $0xe0] ss:$16 sps:$4 sm:$0xff]  }
   0x2   :  { %595 = vmatprep.subr.bf16.mxu0 %v3299_v0  ;;  %v3304_v4 = vld [vmem:[%s5157_s1 + $0xe8] ss:$16 sps:$4 sm:$0xff]   ;;  %788 = vmatprep.subr.bf16.mxu1 %v3301_v2  ;;  %v3305_v5 = vld [vmem:[%s5157_s1 + $0xc4] ss:$16 sps:$4 sm:$0xff]   ;;  %v3307_v6 = vld [vmem:[%s5157_s1 + $0xcc] ss:$16 sps:$4 sm:$0xff]  }
   0x3   :  { %596 = vmatpush1.bf16.msra.mxu0 %v3303_v3  ;;  %789 = vmatpush1.bf16.msra.mxu1 %v3304_v4  ;;  %v3309_v7 = vld [vmem:[%s5157_s1 + $0xc0] ss:$16 sps:$4 sm:$0xff]   ;;  %v3310_v8 = vld [vmem:[%s5157_s1 + $0xc8] ss:$16 sps:$4 sm:$0xff]   ;;  %v3311_v9 = vld [vmem:[%s5157_s1 + $0xa4] ss:$16 sps:$4 sm:$0xff]  }
   0x4   :  { %597 = vmatprep.subr.bf16.mxu0 %v3305_v5  ;;  %790 = vmatprep.subr.bf16.mxu1 %v3307_v6  ;;  %v3313_v10 = vld [vmem:[%s5157_s1 + $0xac] ss:$16 sps:$4 sm:$0xff]   ;;  %v3315_v11 = vld [vmem:[%s5157_s1 + $0xa0] ss:$16 sps:$4 sm:$0xff]   ;;  %v3316_v12 = vld [vmem:[%s5157_s1 + $0xa8] ss:$16 sps:$4 sm:$0xff]  }
   0x5   :  { %v3317_v13 = vld [vmem:[%s5157_s1 + $0x84] ss:$16 sps:$4 sm:$0xff]   ;;  %v3319_v14 = vld [vmem:[%s5157_s1 + $0x8c] ss:$16 sps:$4 sm:$0xff]   ;;  %v3321_v15 = vld [vmem:[%s5157_s1 + $0x80] ss:$16 sps:$4 sm:$0xff]  }
   0x6   :  { %v3322_v16 = vld [vmem:[%s5157_s1 + $0x88] ss:$16 sps:$4 sm:$0xff]   ;;  %v3323_v17 = vld [vmem:[%s5157_s1 + $0x64] ss:$16 sps:$4 sm:$0xff]   ;;  %v3325_v18 = vld [vmem:[%s5157_s1 + $0x6c] ss:$16 sps:$4 sm:$0xff]  }
   0x7   :  { %598 = vmatpush1.bf16.msra.mxu0 %v3309_v7  ;;  %791 = vmatpush1.bf16.msra.mxu1 %v3310_v8  ;;  %v3327_v19 = vld [vmem:[%s5157_s1 + $0x60] ss:$16 sps:$4 sm:$0xff]   ;;  %v3328_v20 = vld [vmem:[%s5157_s1 + $0x68] ss:$16 sps:$4 sm:$0xff]   ;;  %v3329_v21 = vld [vmem:[%s5157_s1 + $0x44] ss:$16 sps:$4 sm:$0xff]  }
   0x8   :  { %599 = vmatprep.subr.bf16.mxu0 %v3311_v9  ;;  %792 = vmatprep.subr.bf16.mxu1 %v3313_v10  ;;  %v3331_v22 = vld [vmem:[%s5157_s1 + $0x4c] ss:$16 sps:$4 sm:$0xff]   ;;  %v3333_v23 = vld [vmem:[%s5157_s1 + $0x40] ss:$16 sps:$4 sm:$0xff]   ;;  %v3334_v24 = vld [vmem:[%s5157_s1 + $0x48] ss:$16 sps:$4 sm:$0xff]  }
   0x9   :  { %v3335_v25 = vld [vmem:[%s5157_s1 + $0x24] ss:$16 sps:$4 sm:$0xff]   ;;  %v3337_v26 = vld [vmem:[%s5157_s1 + $0x2c] ss:$16 sps:$4 sm:$0xff]   ;;  %v3339_v27 = vld [vmem:[%s5157_s1 + $0x20] ss:$16 sps:$4 sm:$0xff]  }
   0xa   :  { %v3340_v28 = vld [vmem:[%s5157_s1 + $0x28] ss:$16 sps:$4 sm:$0xff]   ;;  %v3341_v29 = vld [vmem:[%s5157_s1 + $0x4] ss:$16 sps:$4 sm:$0xff]   ;;  %v3343_v30 = vld [vmem:[%s5157_s1 + $0xc] ss:$16 sps:$4 sm:$0xff]  }
   0xb   :  { %600 = vmatpush1.bf16.msra.mxu0 %v3315_v11  ;;  %793 = vmatpush1.bf16.msra.mxu1 %v3316_v12  ;;  %v3345_v31 = vld [vmem:[%s5157_s1] ss:$16 sps:$4 sm:$0xff]   ;;  %v3346_v32 = vld [vmem:[%s5157_s1 + $0x8] ss:$16 sps:$4 sm:$0xff]   ;;  %v1371_v50 = vshrl.u32 %v1370_v49, 7 }
   0xc   :  { %601 = vmatprep.subr.bf16.mxu0 %v3317_v13  ;;  %794 = vmatprep.subr.bf16.mxu1 %v3319_v14  ;;  %v3347_v33 = vld [vmem:[%s5158_s0] sm:$0xff]   ;;  %v3348_v34 = vld [vmem:[%s5158_s0 + $0x8] sm:$0xff]   ;;  %v3349_v35 = vld [vmem:[%s5158_s0 + $0x10] sm:$0xff]  }
   0xd   :  { %v3350_v36 = vld [vmem:[%s5158_s0 + $0x18] sm:$0xff]   ;;  %v3351_v37 = vld [vmem:[%s5158_s0 + $0x20] sm:$0xff]   ;;  %v3352_v38 = vld [vmem:[%s5158_s0 + $0x28] sm:$0xff]   ;;  %v1372_v51 = vsub.s32 0, %v1371_v50  ;;  %v1380_v52 = vsub.s32 2, %v1371_v50  ;;  %v1376_v54 = vsub.s32 1, %v1371_v50 }
   0xe   :  { %v3353_v39 = vld [vmem:[%s5158_s0 + $0x30] sm:$0xff]   ;;  %v3354_v40 = vld [vmem:[%s5158_s0 + $0x38] sm:$0xff]   ;;  %v3355_v41 = vld [vmem:[%s5158_s0 + $0x40] sm:$0xff]   ;;  %v1384_v55 = vsub.s32 3, %v1371_v50 }
   0xf   :  { %602 = vmatpush1.bf16.msra.mxu0 %v3321_v15  ;;  %795 = vmatpush1.bf16.msra.mxu1 %v3322_v16  ;;  %v3356_v42 = vld [vmem:[%s5158_s0 + $0x48] sm:$0xff]   ;;  %v3357_v43 = vld [vmem:[%s5158_s0 + $0x50] sm:$0xff]   ;;  %v3358_v44 = vld [vmem:[%s5158_s0 + $0x58] sm:$0xff]  }
  0x10   :  { %603 = vmatprep.subr.bf16.mxu0 %v3323_v17  ;;  %796 = vmatprep.subr.bf16.mxu1 %v3325_v18  ;;  %v3359_v45 = vld [vmem:[%s5158_s0 + $0x60] sm:$0xff]   ;;  %v3360_v46 = vld [vmem:[%s5158_s0 + $0x68] sm:$0xff]   ;;  %v3361_v47 = vld [vmem:[%s5158_s0 + $0x70] sm:$0xff]  }
  0x11   :  { %v3362_v48 = vld [vmem:[%s5158_s0 + $0x78] sm:$0xff]   ;;  %v1368_v53 = vld [vmem:[%s5159_s2] sm:$0xf] }
  0x12   :  { %v3819_v56 = vrot.slane %v1368_v53, %v1372_v51  ;;  %v3821_v57 = vrot.slane %v1368_v53, %v1380_v52  ;;  %v3823_v60 = vrot.slane %v1368_v53, %v1376_v54  ;;  %v3825_v61 = vrot.slane %v1368_v53, %v1384_v55 }
  0x13   :  { %604 = vmatpush1.bf16.msra.mxu0 %v3327_v19  ;;  %797 = vmatpush1.bf16.msra.mxu1 %v3328_v20 }
  0x14   :  { %605 = vmatprep.subr.bf16.mxu0 %v3329_v21  ;;  %798 = vmatprep.subr.bf16.mxu1 %v3331_v22 }
  0x17   :  { %606 = vmatpush1.bf16.msra.mxu0 %v3333_v23  ;;  %799 = vmatpush1.bf16.msra.mxu1 %v3334_v24 }
  0x18   :  { %607 = vmatprep.subr.bf16.mxu0 %v3335_v25  ;;  %800 = vmatprep.subr.bf16.mxu1 %v3337_v26 }
  0x1b   :  { %608 = vmatpush1.bf16.msra.mxu0 %v3339_v27  ;;  %801 = vmatpush1.bf16.msra.mxu1 %v3340_v28 }
  0x1c   :  { %609 = vmatprep.subr.bf16.mxu0 %v3341_v29  ;;  %802 = vmatprep.subr.bf16.mxu1 %v3343_v30 }
  0x1f   :  { %610 = vmatpush1.bf16.msra.mxu0 %v3345_v31  ;;  %803 = vmatpush1.bf16.msra.mxu1 %v3346_v32 }
  0x22   :  { %628 = vmatmul.mubr.bf16.vlgmr.msra.gmra.mxu0 %v3347_v33  ;;  %821 = vmatmul.mubr.bf16.vlgmr.msra.gmra.mxu1 %v3347_v33 }
  0x23   :  { %637 = vmatprep.mubr.bf16.mxu0 %v3619_v1  ;;  %830 = vmatprep.mubr.bf16.mxu1 %v3619_v1 }
  0x2a   :  { %638 = vmatmul.mubr.bf16.gmra.mxu0 %v3348_v34  ;;  %831 = vmatmul.mubr.bf16.gmra.mxu1 %v3348_v34 }
  0x2b   :  { %647 = vmatprep.mubr.bf16.mxu0 %v3619_v1  ;;  %840 = vmatprep.mubr.bf16.mxu1 %v3619_v1 }
  0x32   :  { %648 = vmatmul.mubr.bf16.gmra.mxu0 %v3349_v35  ;;  %841 = vmatmul.mubr.bf16.gmra.mxu1 %v3349_v35 }
  0x33   :  { %657 = vmatprep.mubr.bf16.mxu0 %v3619_v1  ;;  %850 = vmatprep.mubr.bf16.mxu1 %v3619_v1 }
  0x3a   :  { %658 = vmatmul.mubr.bf16.gmra.mxu0 %v3350_v36  ;;  %851 = vmatmul.mubr.bf16.gmra.mxu1 %v3350_v36 }
  0x3b   :  { %667 = vmatprep.mubr.bf16.mxu0 %v3619_v1  ;;  %860 = vmatprep.mubr.bf16.mxu1 %v3619_v1 }
  0x42   :  { %668 = vmatmul.mubr.bf16.gmra.mxu0 %v3351_v37  ;;  %861 = vmatmul.mubr.bf16.gmra.mxu1 %v3351_v37 }
  0x43   :  { %677 = vmatprep.mubr.bf16.mxu0 %v3619_v1  ;;  %870 = vmatprep.mubr.bf16.mxu1 %v3619_v1 }
  0x4a   :  { %678 = vmatmul.mubr.bf16.gmra.mxu0 %v3352_v38  ;;  %871 = vmatmul.mubr.bf16.gmra.mxu1 %v3352_v38 }
  0x4b   :  { %687 = vmatprep.mubr.bf16.mxu0 %v3619_v1  ;;  %880 = vmatprep.mubr.bf16.mxu1 %v3619_v1 }
  0x52   :  { %688 = vmatmul.mubr.bf16.gmra.mxu0 %v3353_v39  ;;  %881 = vmatmul.mubr.bf16.gmra.mxu1 %v3353_v39 }
  0x53   :  { %697 = vmatprep.mubr.bf16.mxu0 %v3619_v1  ;;  %890 = vmatprep.mubr.bf16.mxu1 %v3619_v1 }
  0x5a   :  { %698 = vmatmul.mubr.bf16.gmra.mxu0 %v3354_v40  ;;  %891 = vmatmul.mubr.bf16.gmra.mxu1 %v3354_v40 }
  0x5b   :  { %707 = vmatprep.mubr.bf16.mxu0 %v3619_v1  ;;  %900 = vmatprep.mubr.bf16.mxu1 %v3619_v1 }
  0x62   :  { %708 = vmatmul.mubr.bf16.gmra.mxu0 %v3355_v41  ;;  %901 = vmatmul.mubr.bf16.gmra.mxu1 %v3355_v41 }
  0x63   :  { %717 = vmatprep.mubr.bf16.mxu0 %v3619_v1  ;;  %910 = vmatprep.mubr.bf16.mxu1 %v3619_v1 }
  0x6a   :  { %718 = vmatmul.mubr.bf16.gmra.mxu0 %v3356_v42  ;;  %911 = vmatmul.mubr.bf16.gmra.mxu1 %v3356_v42 }
  0x6b   :  { %727 = vmatprep.mubr.bf16.mxu0 %v3619_v1  ;;  %920 = vmatprep.mubr.bf16.mxu1 %v3619_v1 }
  0x72   :  { %728 = vmatmul.mubr.bf16.gmra.mxu0 %v3357_v43  ;;  %921 = vmatmul.mubr.bf16.gmra.mxu1 %v3357_v43 }
  0x73   :  { %737 = vmatprep.mubr.bf16.mxu0 %v3619_v1  ;;  %930 = vmatprep.mubr.bf16.mxu1 %v3619_v1 }
  0x7a   :  { %738 = vmatmul.mubr.bf16.gmra.mxu0 %v3358_v44  ;;  %931 = vmatmul.mubr.bf16.gmra.mxu1 %v3358_v44 }
  0x7b   :  { %747 = vmatprep.mubr.bf16.mxu0 %v3619_v1  ;;  %940 = vmatprep.mubr.bf16.mxu1 %v3619_v1 }
  0x82   :  { %748 = vmatmul.mubr.bf16.gmra.mxu0 %v3359_v45  ;;  %941 = vmatmul.mubr.bf16.gmra.mxu1 %v3359_v45 }
  0x83   :  { %757 = vmatprep.mubr.bf16.mxu0 %v3619_v1  ;;  %950 = vmatprep.mubr.bf16.mxu1 %v3619_v1 }
  0x8a   :  { %758 = vmatmul.mubr.bf16.gmra.mxu0 %v3360_v46  ;;  %951 = vmatmul.mubr.bf16.gmra.mxu1 %v3360_v46 }
  0x8b   :  { %767 = vmatprep.mubr.bf16.mxu0 %v3619_v1  ;;  %960 = vmatprep.mubr.bf16.mxu1 %v3619_v1 }
  0x92   :  { %768 = vmatmul.mubr.bf16.gmra.mxu0 %v3361_v47  ;;  %961 = vmatmul.mubr.bf16.gmra.mxu1 %v3361_v47 }
  0x93   :  { %777 = vmatprep.mubr.bf16.mxu0 %v3619_v1  ;;  %970 = vmatprep.mubr.bf16.mxu1 %v3619_v1 }
  0x9a   :  { %778 = vmatmul.mubr.bf16.gmra.mxu0 %v3362_v48  ;;  %971 = vmatmul.mubr.bf16.gmra.mxu1 %v3362_v48 }
  0xe2   :  { %v629_v58 = vpop.f32.mrf.mxu0  ;;  %v822_v59 = vpop.f32.mrf.mxu1 }
  0xe3   :  { %v1390_v62 = vadd.f32 %v3819_v56, %v629_v58  ;;  %v1392_v63 = vadd.f32 %v3821_v57, %v822_v59 }
  0xe4   :  { %v631_v0 = vpop.f32.mrf.mxu0  ;;  %v824_v1 = vpop.f32.mrf.mxu1 }
  0xe5   :  { %v1646_v2 = vmul.f32 0.044715, %v1390_v62  ;;  %v1648_v3 = vmul.f32 0.044715, %v1392_v63  ;;  %v1391_v4 = vadd.f32 %v3823_v60, %v631_v0  ;;  %v3831_v5 = vadd.f32 %v3825_v61, %v824_v1 }
  0xe6   :  { %v633_v6 = vpop.f32.mrf.mxu0  ;;  %v826_v7 = vpop.f32.mrf.mxu1  ;;  %v3870_v53 = vmul.f32 0.5, %v1390_v62  ;;  %v3874_v58 = vmul.f32 0.5, %v1392_v63 }
  0xe7   :  { %v1774_v8 = vmul.f32 %v1646_v2, %v1390_v62  ;;  %v1776_v9 = vmul.f32 %v1648_v3, %v1392_v63  ;;  %v3834_v10 = vadd.f32 %v3819_v56, %v633_v6  ;;  %v3837_v11 = vadd.f32 %v3821_v57, %v826_v7 }
  0xe8   :  { %v1647_v12 = vmul.f32 0.044715, %v1391_v4  ;;  %v1649_v13 = vmul.f32 0.044715, %v3831_v5  ;;  %v635_v14 = vpop.f32.mrf.mxu0  ;;  %v828_v15 = vpop.f32.mrf.mxu1  ;;  %v1519_v3 = vmul.f32 0.5, %v1391_v4 }
  0xe9   :  { %v1902_v16 = vmul.f32 %v1774_v8, %v1390_v62  ;;  %v1904_v17 = vmul.f32 %v1776_v9, %v1392_v63  ;;  %v1650_v18 = vmul.f32 0.044715, %v3834_v10  ;;  %v1652_v21 = vmul.f32 0.044715, %v3837_v11 }
  0xea   :  { %v1775_v19 = vmul.f32 %v1647_v12, %v1391_v4  ;;  %v1777_v20 = vmul.f32 %v1649_v13, %v3831_v5  ;;  %v3845_v25 = vadd.f32 %v3823_v60, %v635_v14  ;;  %v639_v26 = vpop.f32.mrf.mxu0  ;;  %v3850_v30 = vadd.f32 %v3825_v61, %v828_v15  ;;  %v832_v31 = vpop.f32.mrf.mxu1 }
  0xeb   :  { %v2030_v22 = vadd.f32 %v1902_v16, %v1390_v62  ;;  %v2032_v23 = vadd.f32 %v1904_v17, %v1392_v63  ;;  %v1778_v24 = vmul.f32 %v1650_v18, %v3834_v10  ;;  %v1780_v29 = vmul.f32 %v1652_v21, %v3837_v11 }
  0xec   :  { %v1903_v27 = vmul.f32 %v1775_v19, %v1391_v4  ;;  %v1905_v28 = vmul.f32 %v1777_v20, %v3831_v5  ;;  %v1651_v38 = vmul.f32 0.044715, %v3845_v25  ;;  %v1653_v40 = vmul.f32 0.044715, %v3850_v30  ;;  %v641_v41 = vpop.f32.mrf.mxu0  ;;  %v834_v45 = vpop.f32.mrf.mxu1 }
  0xed   :  { %v2158_v32 = vmul.f32 0.7978846, %v2030_v22  ;;  %v2160_v33 = vmul.f32 0.7978846, %v2032_v23  ;;  %v1906_v34 = vmul.f32 %v1778_v24, %v3834_v10  ;;  %v1908_v37 = vmul.f32 %v1780_v29, %v3837_v11 }
  0xee   :  { %v2031_v35 = vadd.f32 %v1903_v27, %v1391_v4  ;;  %v2033_v36 = vadd.f32 %v1905_v28, %v3831_v5  ;;  %v1779_v47 = vmul.f32 %v1651_v38, %v3845_v25  ;;  %v1781_v48 = vmul.f32 %v1653_v40, %v3850_v30  ;;  %v643_v1 = vpop.f32.mrf.mxu0  ;;  %v836_v2 = vpop.f32.mrf.mxu1 }
  0xef   :  { %3363 = vtanh.f32 %v2158_v32  ;;  %v2034_v39 = vadd.f32 %v1906_v34, %v3834_v10  ;;  %v2036_v44 = vadd.f32 %v1908_v37, %v3837_v11  ;;  %v3862_v49 = vadd.f32 %v3819_v56, %v639_v26 }
  0xf0   :  { %3365 = vtanh.f32 %v2160_v33  ;;  %v2159_v42 = vmul.f32 0.7978846, %v2031_v35  ;;  %v2161_v43 = vmul.f32 0.7978846, %v2033_v36  ;;  %v3865_v51 = vadd.f32 %v3821_v57, %v832_v31  ;;  %v645_v28 = vpop.f32.mrf.mxu0 }
  0xf1   :  { %v2162_v46 = vmul.f32 0.7978846, %v2034_v39  ;;  %v2164_v50 = vmul.f32 0.7978846, %v2036_v44  ;;  %v3868_v52 = vadd.f32 %v3823_v60, %v641_v41  ;;  %v1907_v54 = vmul.f32 %v1779_v47, %v3845_v25  ;;  %v838_v41 = vpop.f32.mrf.mxu1 }
  0xf2   :  { %3367 = vtanh.f32 %v2159_v42  ;;  %v1909_v55 = vmul.f32 %v1781_v48, %v3850_v30  ;;  %v1654_v59 = vmul.f32 0.044715, %v3862_v49  ;;  %v1656_v0 = vmul.f32 0.044715, %v3865_v51 }
  0xf3   :  { %3369 = vtanh.f32 %v2161_v43  ;;  %v2035_v6 = vadd.f32 %v1907_v54, %v3845_v25  ;;  %v1655_v63 = vmul.f32 0.044715, %v3868_v52  ;;  %v3884_v9 = vadd.f32 %v3825_v61, %v834_v45  ;;  %v649_v45 = vpop.f32.mrf.mxu0 }
  0xf4   :  { %3371 = vtanh.f32 %v2162_v46  ;;  %v2037_v62 = vadd.f32 %v1909_v55, %v3850_v30  ;;  %v1782_v7 = vmul.f32 %v1654_v59, %v3862_v49  ;;  %v1784_v8 = vmul.f32 %v1656_v0, %v3865_v51 }
  0xf5   :  { %3373 = vtanh.f32 %v2164_v50  ;;  %v2163_v12 = vmul.f32 0.7978846, %v2035_v6  ;;  %v3887_v14 = vadd.f32 %v3819_v56, %v643_v1  ;;  %v3890_v4 = vadd.f32 %v3821_v57, %v836_v2 }
  0xf6   :  { %v2165_v13 = vmul.f32 0.7978846, %v2037_v62  ;;  %v1521_v15 = vmul.f32 0.5, %v3831_v5  ;;  %v1910_v16 = vmul.f32 %v1782_v7, %v3862_v49  ;;  %v1912_v17 = vmul.f32 %v1784_v8, %v3865_v51 }
  0xf7   :  { %v1783_v18 = vmul.f32 %v1655_v63, %v3868_v52  ;;  %v3897_v19 = vmul.f32 0.5, %v3834_v10  ;;  %3375 = vtanh.f32 %v2163_v12  ;;  %v1657_v20 = vmul.f32 0.044715, %v3884_v9 }
  0xf8   :  { %v1658_v21 = vmul.f32 0.044715, %v3887_v14  ;;  %3377 = vtanh.f32 %v2165_v13  ;;  %v2038_v22 = vadd.f32 %v1910_v16, %v3862_v49  ;;  %v2040_v23 = vadd.f32 %v1912_v17, %v3865_v51  ;;  %v842_v13 = vpop.f32.mrf.mxu1  ;;  %v651_v16 = vpop.f32.mrf.mxu0 }
  0xf9   :  { %v1911_v5 = vmul.f32 %v1783_v18, %v3868_v52  ;;  %v3905_v24 = vmul.f32 0.5, %v3837_v11  ;;  %v1785_v26 = vmul.f32 %v1657_v20, %v3884_v9  ;;  %v1660_v27 = vmul.f32 0.044715, %v3890_v4 }
  0xfa   :  { %v1786_v10 = vmul.f32 %v1658_v21, %v3887_v14  ;;  %v3911_v31 = vmul.f32 0.5, %v3845_v25  ;;  %v2166_v32 = vmul.f32 0.7978846, %v2038_v22  ;;  %v2168_v33 = vmul.f32 0.7978846, %v2040_v23 }
  0xfb   :  { %v2039_v34 = vadd.f32 %v1911_v5, %v3868_v52  ;;  %v3915_v36 = vmul.f32 0.5, %v3850_v30  ;;  %v1913_v11 = vmul.f32 %v1785_v26, %v3884_v9  ;;  %v1788_v38 = vmul.f32 %v1660_v27, %v3890_v4 }
  0xfc   :  { %v3364_v29 = vpop.eup %3363  ;;  %v1914_v37 = vmul.f32 %v1786_v10, %v3887_v14  ;;  %3379 = vtanh.f32 %v2166_v32  ;;  %v3921_v25 = vadd.f32 %v3823_v60, %v645_v28  ;;  %v3926_v48 = vmul.f32 0.5, %v3862_v49 }
  0xfd   :  { %v3366_v35 = vpop.eup %3365  ;;  %v2414_v39 = vadd.f32 1.0, %v3364_v29  ;;  %v2167_v40 = vmul.f32 0.7978846, %v2039_v34  ;;  %3381 = vtanh.f32 %v2168_v33  ;;  %v2041_v44 = vadd.f32 %v1913_v11, %v3884_v9  ;;  %v844_v29 = vpop.f32.mrf.mxu1 }
  0xfe   :  { %v2416_v43 = vadd.f32 1.0, %v3366_v35  ;;  %v2042_v30 = vadd.f32 %v1914_v37, %v3887_v14  ;;  %v1916_v50 = vmul.f32 %v1788_v38, %v3890_v4  ;;  %v3930_v1 = vadd.f32 %v3825_v61, %v838_v41 }
  0xff   :  { %v3368_v42 = vpop.eup %3367  ;;  %3383 = vtanh.f32 %v2167_v40  ;;  %v2169_v59 = vmul.f32 0.7978846, %v2041_v44  ;;  %v2542_v6 = vmul.f32 %v2414_v39, %v3870_v53  ;;  %v1659_v8 = vmul.f32 0.044715, %v3921_v25 }
 0x100   :  { %v3370_v46 = vpop.eup %3369  ;;  %v2415_v47 = vadd.f32 1.0, %v3368_v42  ;;  %v2170_v0 = vmul.f32 0.7978846, %v2042_v30  ;;  %v2044_v7 = vadd.f32 %v1916_v50, %v3890_v4  ;;  %v2544_v49 = vmul.f32 %v2416_v43, %v3874_v58  ;;  %v653_v50 = vpop.f32.mrf.mxu0 }
 0x101   :  { %v3372_v54 = vpop.eup %3371  ;;  %v2417_v55 = vadd.f32 1.0, %v3370_v46  ;;  %3385 = vtanh.f32 %v2169_v59  ;;  %v3937_v22 = vmul.f32 0.5, %v3865_v51  ;;  %v1787_v53 = vmul.f32 %v1659_v8, %v3921_v25 }
 0x102   :  { %v3374_v2 = vpop.eup %3373  ;;  %v2543_v62 = vmul.f32 %v2415_v47, %v1519_v3  ;;  %v2418_v12 = vadd.f32 1.0, %v3372_v54  ;;  %3387 = vtanh.f32 %v2170_v0  ;;  %v2172_v20 = vmul.f32 0.7978846, %v2044_v7 }
 0x103   :  { %v2545_v63 = vmul.f32 %v2417_v55, %v1521_v15  ;;  %v2420_v18 = vadd.f32 1.0, %v3374_v2  ;;  %v1661_v3 = vmul.f32 0.044715, %v3930_v1  ;;  %v3945_v58 = vadd.f32 %v3819_v56, %v649_v45  ;;  %v846_v2 = vpop.f32.mrf.mxu1 }
 0x104   :  { %v3234_v17 = vpack.c.bf16 %v2543_v62, %v2542_v6  ;;  %v3376_v23 = vpop.eup %3375  ;;  %3389 = vtanh.f32 %v2172_v20  ;;  %v3948_v15 = vadd.f32 %v3821_v57, %v842_v13  ;;  %v3951_v5 = vadd.f32 %v3823_v60, %v651_v16  ;;  %v655_v20 = vpop.f32.mrf.mxu0 }
 0x105   :  { %v3235_v21 = vpack.c.bf16 %v2545_v63, %v2544_v49  ;;  %v3378_v51 = vpop.eup %3377  ;;  %v2419_v26 = vadd.f32 1.0, %v3376_v23  ;;  %v1527_v10 = vmul.f32 0.5, %v3868_v52  ;;  %v1915_v27 = vmul.f32 %v1787_v53, %v3921_v25  ;;  %v848_v23 = vpop.f32.mrf.mxu1 }
 0x106   :  { %3054 = vst [vmem:[%s5160_s3] sm:$0xff] %v3234_v17  ;;  %v1789_v28 = vmul.f32 %v1661_v3, %v3930_v1  ;;  %v2546_v32 = vmul.f32 %v2418_v12, %v3897_v19  ;;  %v2548_v33 = vmul.f32 %v2420_v18, %v3905_v24  ;;  %v2421_v34 = vadd.f32 1.0, %v3378_v51 }
 0x107   :  { %3055 = vst [vmem:[%s5160_s3 + $0x8] sm:$0xff] %v3235_v21  ;;  %v1662_v35 = vmul.f32 0.044715, %v3945_v58  ;;  %v2547_v11 = vmul.f32 %v2419_v26, %v3911_v31  ;;  %v2043_v37 = vadd.f32 %v1915_v27, %v3921_v25  ;;  %v1664_v52 = vmul.f32 0.044715, %v3948_v15 }
 0x108   :  { %v1917_v38 = vmul.f32 %v1789_v28, %v3930_v1  ;;  %v2549_v39 = vmul.f32 %v2421_v34, %v3915_v36  ;;  %v1663_v41 = vmul.f32 0.044715, %v3951_v5  ;;  %v3970_v19 = vadd.f32 %v3825_v61, %v844_v29 }
 0x109   :  { %v1790_v40 = vmul.f32 %v1662_v35, %v3945_v58  ;;  %v3380_v24 = vpop.eup %3379  ;;  %v3236_v42 = vpack.c.bf16 %v2547_v11, %v2546_v32  ;;  %v2171_v43 = vmul.f32 0.7978846, %v2043_v37  ;;  %v1792_v44 = vmul.f32 %v1664_v52, %v3948_v15  ;;  %v659_v11 = vpop.f32.mrf.mxu0 }
 0x10a   :  { %v2045_v31 = vadd.f32 %v1917_v38, %v3930_v1  ;;  %v3382_v30 = vpop.eup %3381  ;;  %v3237_v45 = vpack.c.bf16 %v2549_v39, %v2548_v33  ;;  %v2422_v46 = vadd.f32 1.0, %v3380_v24  ;;  %v1791_v36 = vmul.f32 %v1663_v41, %v3951_v5 }
 0x10b   :  { %v1918_v47 = vmul.f32 %v1790_v40, %v3945_v58  ;;  %3056 = vst [vmem:[%s5160_s3 + $0x10] sm:$0xff] %v3236_v42  ;;  %v1529_v55 = vmul.f32 0.5, %v3884_v9  ;;  %3391 = vtanh.f32 %v2171_v43  ;;  %v1920_v0 = vmul.f32 %v1792_v44, %v3948_v15 }
 0x10c   :  { %v3384_v54 = vpop.eup %3383  ;;  %v2173_v59 = vmul.f32 0.7978846, %v2045_v31  ;;  %3057 = vst [vmem:[%s5160_s3 + $0x18] sm:$0xff] %v3237_v45  ;;  %v1530_v62 = vmul.f32 0.5, %v3887_v14  ;;  %v1919_v8 = vmul.f32 %v1791_v36, %v3951_v5  ;;  %v2550_v49 = vmul.f32 %v2422_v46, %v3926_v48 }
 0x10d   :  { %v2423_v6 = vadd.f32 1.0, %v3384_v54  ;;  %v2046_v7 = vadd.f32 %v1918_v47, %v3945_v58  ;;  %v2424_v63 = vadd.f32 1.0, %v3382_v30  ;;  %v2048_v9 = vadd.f32 %v1920_v0, %v3948_v15  ;;  %v661_v0 = vpop.f32.mrf.mxu0 }
 0x10e   :  { %3393 = vtanh.f32 %v2173_v59  ;;  %v3386_v12 = vpop.eup %3385  ;;  %v2047_v17 = vadd.f32 %v1919_v8, %v3951_v5  ;;  %v1665_v18 = vmul.f32 0.044715, %v3970_v19  ;;  %v3992_v3 = vadd.f32 %v3819_v56, %v653_v50 }
 0x10f   :  { %v2551_v13 = vmul.f32 %v2423_v6, %v1527_v10  ;;  %v2174_v16 = vmul.f32 0.7978846, %v2046_v7  ;;  %v3388_v21 = vpop.eup %3387  ;;  %v2425_v14 = vadd.f32 1.0, %v3386_v12  ;;  %v2176_v53 = vmul.f32 0.7978846, %v2048_v9 }
 0x110   :  { %v3995_v48 = vadd.f32 %v3821_v57, %v846_v2  ;;  %v1532_v26 = vmul.f32 0.5, %v3890_v4  ;;  %v2175_v10 = vmul.f32 0.7978846, %v2047_v17  ;;  %v2552_v28 = vmul.f32 %v2424_v63, %v3937_v22 }
 0x111   :  { %v3238_v51 = vpack.c.bf16 %v2551_v13, %v2550_v49  ;;  %3395 = vtanh.f32 %v2174_v16  ;;  %v3390_v27 = vpop.eup %3389  ;;  %v2553_v29 = vmul.f32 %v2425_v14, %v1529_v55  ;;  %v1531_v32 = vmul.f32 0.5, %v3921_v25  ;;  %v852_v25 = vpop.f32.mrf.mxu1 }
 0x112   :  { %v1793_v33 = vmul.f32 %v1665_v18, %v3970_v19  ;;  %v2426_v34 = vadd.f32 1.0, %v3388_v21  ;;  %v1533_v35 = vmul.f32 0.5, %v3930_v1  ;;  %3397 = vtanh.f32 %v2175_v10 }
 0x113   :  { %3058 = vst [vmem:[%s5160_s3 + $0x20] sm:$0xff] %v3238_v51  ;;  %v1666_v4 = vmul.f32 0.044715, %v3992_v3  ;;  %v3239_v37 = vpack.c.bf16 %v2553_v29, %v2552_v28  ;;  %3399 = vtanh.f32 %v2176_v53  ;;  %v1668_v38 = vmul.f32 0.044715, %v3995_v48  ;;  %v854_v14 = vpop.f32.mrf.mxu1  ;;  %v663_v53 = vpop.f32.mrf.mxu0 }
 0x114   :  { %v1921_v22 = vmul.f32 %v1793_v33, %v3970_v19  ;;  %v2428_v52 = vadd.f32 1.0, %v3390_v27  ;;  %v4010_v40 = vadd.f32 %v3823_v60, %v655_v20  ;;  %v4013_v41 = vadd.f32 %v3825_v61, %v848_v23 }
 0x115   :  { %v1794_v39 = vmul.f32 %v1666_v4, %v3992_v3  ;;  %3059 = vst [vmem:[%s5160_s3 + $0x28] sm:$0xff] %v3239_v37  ;;  %v4019_v1 = vmul.f32 0.5, %v3945_v58  ;;  %v1796_v42 = vmul.f32 %v1668_v38, %v3995_v48  ;;  %v4024_v43 = vadd.f32 %v3819_v56, %v659_v11 }
 0x116   :  { %v2049_v24 = vadd.f32 %v1921_v22, %v3970_v19  ;;  %v4027_v31 = vmul.f32 0.5, %v3948_v15  ;;  %v1667_v30 = vmul.f32 0.044715, %v4010_v40  ;;  %v4032_v45 = vadd.f32 %v3821_v57, %v852_v25 }
 0x117   :  { %v1922_v44 = vmul.f32 %v1794_v39, %v3992_v3  ;;  %v2554_v46 = vmul.f32 %v2426_v34, %v1530_v62  ;;  %v1924_v47 = vmul.f32 %v1796_v42, %v3995_v48  ;;  %v1669_v36 = vmul.f32 0.044715, %v4013_v41  ;;  %v665_v39 = vpop.f32.mrf.mxu0 }
 0x118   :  { %v2177_v58 = vmul.f32 0.7978846, %v2049_v24  ;;  %v3392_v50 = vpop.eup %3391  ;;  %v2556_v54 = vmul.f32 %v2428_v52, %v1532_v26  ;;  %v1795_v15 = vmul.f32 %v1667_v30, %v4010_v40  ;;  %v1670_v59 = vmul.f32 0.044715, %v4024_v43  ;;  %v856_v52 = vpop.f32.mrf.mxu1 }
 0x119   :  { %v2050_v55 = vadd.f32 %v1922_v44, %v3992_v3  ;;  %v2427_v2 = vadd.f32 1.0, %v3392_v50  ;;  %v2052_v6 = vadd.f32 %v1924_v47, %v3995_v48  ;;  %v1797_v62 = vmul.f32 %v1669_v36, %v4013_v41 }
 0x11a   :  { %3401 = vtanh.f32 %v2177_v58  ;;  %v1923_v49 = vmul.f32 %v1795_v15, %v4010_v40  ;;  %v1798_v63 = vmul.f32 %v1670_v59, %v4024_v43  ;;  %v1672_v9 = vmul.f32 0.044715, %v4032_v45 }
 0x11b   :  { %v3394_v7 = vpop.eup %3393  ;;  %v2178_v8 = vmul.f32 0.7978846, %v2050_v55  ;;  %v2555_v12 = vmul.f32 %v2427_v2, %v1531_v32  ;;  %v2180_v16 = vmul.f32 0.7978846, %v2052_v6  ;;  %v1925_v17 = vmul.f32 %v1797_v62, %v4013_v41 }
 0x11c   :  { %v2429_v13 = vadd.f32 1.0, %v3394_v7  ;;  %v2051_v18 = vadd.f32 %v1923_v49, %v4010_v40  ;;  %v1926_v20 = vmul.f32 %v1798_v63, %v4024_v43  ;;  %v1800_v21 = vmul.f32 %v1672_v9, %v4032_v45  ;;  %v669_v9 = vpop.f32.mrf.mxu0 }
 0x11d   :  { %3403 = vtanh.f32 %v2178_v8  ;;  %v3240_v51 = vpack.c.bf16 %v2555_v12, %v2554_v46  ;;  %v2053_v10 = vadd.f32 %v1925_v17, %v4013_v41  ;;  %v1535_v4 = vmul.f32 0.5, %v3951_v5 }
 0x11e   :  { %v3396_v23 = vpop.eup %3395  ;;  %v2557_v26 = vmul.f32 %v2429_v13, %v1533_v35  ;;  %3405 = vtanh.f32 %v2180_v16  ;;  %v2179_v28 = vmul.f32 0.7978846, %v2051_v18  ;;  %v2054_v29 = vadd.f32 %v1926_v20, %v4024_v43 }
 0x11f   :  { %v2430_v27 = vadd.f32 1.0, %v3396_v23  ;;  %v1928_v32 = vmul.f32 %v1800_v21, %v4032_v45  ;;  %v3398_v33 = vpop.eup %3397  ;;  %3060 = vst [vmem:[%s5160_s3 + $0x30] sm:$0xff] %v3240_v51  ;;  %v2181_v11 = vmul.f32 0.7978846, %v2053_v10  ;;  %v4056_v35 = vadd.f32 %v3823_v60, %v661_v0 }
 0x120   :  { %v3241_v34 = vpack.c.bf16 %v2557_v26, %v2556_v54  ;;  %v3400_v37 = vpop.eup %3399  ;;  %v2431_v22 = vadd.f32 1.0, %v3398_v33  ;;  %v1537_v38 = vmul.f32 0.5, %v3970_v19  ;;  %v4060_v25 = vmul.f32 0.5, %v3992_v3 }
 0x121   :  { %3407 = vtanh.f32 %v2179_v28  ;;  %v4066_v5 = vmul.f32 0.5, %v3995_v48  ;;  %v2182_v24 = vmul.f32 0.7978846, %v2054_v29  ;;  %v2056_v42 = vadd.f32 %v1928_v32, %v4032_v45 }
 0x122   :  { %3061 = vst [vmem:[%s5160_s3 + $0x38] sm:$0xff] %v3241_v34  ;;  %3409 = vtanh.f32 %v2181_v11  ;;  %v2558_v44 = vmul.f32 %v2430_v27, %v4019_v1  ;;  %v2559_v19 = vmul.f32 %v2431_v22, %v1535_v4  ;;  %v1671_v3 = vmul.f32 0.044715, %v4056_v35 }
 0x123   :  { %v4072_v30 = vadd.f32 %v3825_v61, %v854_v14  ;;  %v2432_v46 = vadd.f32 1.0, %v3400_v37  ;;  %v4075_v58 = vadd.f32 %v3819_v56, %v663_v53  ;;  %v4078_v47 = vadd.f32 %v3821_v57, %v856_v52 }
 0x124   :  { %v4081_v48 = vadd.f32 %v3823_v60, %v665_v39  ;;  %v3242_v36 = vpack.c.bf16 %v2559_v19, %v2558_v44  ;;  %v2184_v50 = vmul.f32 0.7978846, %v2056_v42  ;;  %v1799_v1 = vmul.f32 %v1671_v3, %v4056_v35  ;;  %v671_v44 = vpop.f32.mrf.mxu0 }
 0x125   :  { %v1673_v54 = vmul.f32 0.044715, %v4072_v30  ;;  %v1539_v55 = vmul.f32 0.5, %v4010_v40  ;;  %v1541_v15 = vmul.f32 0.5, %v4013_v41  ;;  %3411 = vtanh.f32 %v2182_v24  ;;  %v858_v40 = vpop.f32.mrf.mxu1 }
 0x126   :  { %v1674_v59 = vmul.f32 0.044715, %v4075_v58  ;;  %3062 = vst [vmem:[%s5160_s3 + $0x40] sm:$0xff] %v3242_v36  ;;  %v4092_v2 = vmul.f32 0.5, %v4024_v43  ;;  %v1927_v6 = vmul.f32 %v1799_v1, %v4056_v35  ;;  %v1676_v7 = vmul.f32 0.044715, %v4078_v47 }
 0x127   :  { %v3402_v0 = vpop.eup %3401  ;;  %v1801_v62 = vmul.f32 %v1673_v54, %v4072_v30  ;;  %v2560_v41 = vmul.f32 %v2432_v46, %v4027_v31  ;;  %v1675_v63 = vmul.f32 0.044715, %v4081_v48  ;;  %3413 = vtanh.f32 %v2184_v50  ;;  %v862_v29 = vpop.f32.mrf.mxu1 }
 0x128   :  { %v2433_v8 = vadd.f32 1.0, %v3402_v0  ;;  %v1802_v49 = vmul.f32 %v1674_v59, %v4075_v58  ;;  %v2055_v12 = vadd.f32 %v1927_v6, %v4056_v35  ;;  %v1804_v13 = vmul.f32 %v1676_v7, %v4078_v47 }
 0x129   :  { %v1929_v43 = vmul.f32 %v1801_v62, %v4072_v30  ;;  %v1803_v20 = vmul.f32 %v1675_v63, %v4081_v48  ;;  %v4106_v31 = vadd.f32 %v3825_v61, %v858_v40  ;;  %v4111_v51 = vadd.f32 %v3819_v56, %v669_v9 }
 0x12a   :  { %v3404_v16 = vpop.eup %3403  ;;  %v2561_v17 = vmul.f32 %v2433_v8, %v1537_v38  ;;  %v1930_v18 = vmul.f32 %v1802_v49, %v4075_v58  ;;  %v2183_v14 = vmul.f32 0.7978846, %v2055_v12  ;;  %v1932_v23 = vmul.f32 %v1804_v13, %v4078_v47 }
 0x12b   :  { %v3406_v21 = vpop.eup %3405  ;;  %v2057_v53 = vadd.f32 %v1929_v43, %v4072_v30  ;;  %v2434_v10 = vadd.f32 1.0, %v3404_v16  ;;  %v1931_v28 = vmul.f32 %v1803_v20, %v4081_v48  ;;  %v4120_v11 = vmul.f32 0.5, %v4032_v45  ;;  %v864_v45 = vpop.f32.mrf.mxu1 }
 0x12c   :  { %v3243_v26 = vpack.c.bf16 %v2561_v17, %v2560_v41  ;;  %v2058_v27 = vadd.f32 %v1930_v18, %v4075_v58  ;;  %v2436_v32 = vadd.f32 1.0, %v3406_v21  ;;  %3415 = vtanh.f32 %v2183_v14 }
 0x12d   :  { %v2185_v33 = vmul.f32 0.7978846, %v2057_v53  ;;  %v2060_v34 = vadd.f32 %v1932_v23, %v4078_v47  ;;  %v2059_v22 = vadd.f32 %v1931_v28, %v4081_v48  ;;  %v1677_v38 = vmul.f32 0.044715, %v4106_v31  ;;  %v866_v8 = vpop.f32.mrf.mxu1 }
 0x12e   :  { %v3408_v4 = vpop.eup %3407  ;;  %3063 = vst [vmem:[%s5160_s3 + $0x48] sm:$0xff] %v3243_v26  ;;  %v2186_v37 = vmul.f32 0.7978846, %v2058_v27  ;;  %v4125_v24 = vmul.f32 0.5, %v4056_v35  ;;  %v2562_v36 = vmul.f32 %v2434_v10, %v4060_v25  ;;  %v2564_v50 = vmul.f32 %v2436_v32, %v4066_v5  ;;  %v673_v25 = vpop.f32.mrf.mxu0 }
 0x12f   :  { %v3410_v52 = vpop.eup %3409  ;;  %v2435_v39 = vadd.f32 1.0, %v3408_v4  ;;  %3417 = vtanh.f32 %v2185_v33  ;;  %v2188_v42 = vmul.f32 0.7978846, %v2060_v34  ;;  %v2187_v3 = vmul.f32 0.7978846, %v2059_v22 }
 0x130   :  { %v2437_v19 = vadd.f32 1.0, %v3410_v52  ;;  %3419 = vtanh.f32 %v2186_v37  ;;  %v1805_v46 = vmul.f32 %v1677_v38, %v4106_v31  ;;  %v1678_v54 = vmul.f32 0.044715, %v4111_v51  ;;  %v675_v28 = vpop.f32.mrf.mxu0 }
 0x131   :  { %v2563_v1 = vmul.f32 %v2435_v39, %v1539_v55  ;;  %3421 = vtanh.f32 %v2187_v3  ;;  %v4133_v0 = vadd.f32 %v3821_v57, %v862_v29  ;;  %v4137_v40 = vadd.f32 %v3823_v60, %v671_v44 }
 0x132   :  { %v2565_v59 = vmul.f32 %v2437_v19, %v1541_v15  ;;  %v1933_v35 = vmul.f32 %v1805_v46, %v4106_v31  ;;  %v3412_v6 = vpop.eup %3411  ;;  %3423 = vtanh.f32 %v2188_v42  ;;  %v1806_v7 = vmul.f32 %v1678_v54, %v4111_v51  ;;  %v868_v42 = vpop.f32.mrf.mxu1 }
 0x133   :  { %v3244_v62 = vpack.c.bf16 %v2563_v1, %v2562_v36  ;;  %v1545_v55 = vmul.f32 0.5, %v4072_v30  ;;  %v4141_v15 = vmul.f32 0.5, %v4075_v58  ;;  %v4148_v49 = vmul.f32 0.5, %v4078_v47 }
 0x134   :  { %v3245_v5 = vpack.c.bf16 %v2565_v59, %v2564_v50  ;;  %v2061_v41 = vadd.f32 %v1933_v35, %v4106_v31  ;;  %v1934_v63 = vmul.f32 %v1806_v7, %v4111_v51  ;;  %v1680_v9 = vmul.f32 0.044715, %v4133_v0  ;;  %v3414_v30 = vpop.eup %3413 }
 0x135   :  { %3064 = vst [vmem:[%s5160_s3 + $0x50] sm:$0xff] %v3244_v62  ;;  %v1679_v12 = vmul.f32 0.044715, %v4137_v40  ;;  %v2438_v58 = vadd.f32 1.0, %v3412_v6  ;;  %v4157_v13 = vadd.f32 %v3825_v61, %v864_v45  ;;  %v4160_v16 = vadd.f32 %v3819_v56, %v673_v25 }
 0x136   :  { %3065 = vst [vmem:[%s5160_s3 + $0x58] sm:$0xff] %v3245_v5  ;;  %v2189_v43 = vmul.f32 0.7978846, %v2061_v41  ;;  %v2062_v47 = vadd.f32 %v1934_v63, %v4111_v51  ;;  %v1808_v17 = vmul.f32 %v1680_v9, %v4133_v0  ;;  %v4166_v20 = vadd.f32 %v3821_v57, %v866_v8  ;;  %v679_v41 = vpop.f32.mrf.mxu0  ;;  %v872_v8 = vpop.f32.mrf.mxu1 }
 0x137   :  { %v1807_v18 = vmul.f32 %v1679_v12, %v4137_v40  ;;  %v1547_v21 = vmul.f32 0.5, %v4081_v48  ;;  %v4170_v14 = vmul.f32 0.5, %v4106_v31  ;;  %v1681_v53 = vmul.f32 0.044715, %v4157_v13 }
 0x138   :  { %3425 = vtanh.f32 %v2189_v43  ;;  %v2190_v23 = vmul.f32 0.7978846, %v2062_v47  ;;  %v1936_v26 = vmul.f32 %v1808_v17, %v4133_v0  ;;  %v1682_v27 = vmul.f32 0.044715, %v4160_v16 }
 0x139   :  { %v1935_v10 = vmul.f32 %v1807_v18, %v4137_v40  ;;  %v3416_v29 = vpop.eup %3415  ;;  %v2566_v32 = vmul.f32 %v2438_v58, %v4092_v2  ;;  %v2440_v33 = vadd.f32 1.0, %v3414_v30  ;;  %v1809_v48 = vmul.f32 %v1681_v53, %v4157_v13 }
 0x13a   :  { %v1684_v31 = vmul.f32 0.044715, %v4166_v20  ;;  %v2439_v34 = vadd.f32 1.0, %v3416_v29  ;;  %3427 = vtanh.f32 %v2190_v23  ;;  %v2064_v4 = vadd.f32 %v1936_v26, %v4133_v0  ;;  %v681_v23 = vpop.f32.mrf.mxu0  ;;  %v874_v29 = vpop.f32.mrf.mxu1 }
 0x13b   :  { %v2063_v37 = vadd.f32 %v1935_v10, %v4137_v40  ;;  %v1937_v38 = vmul.f32 %v1809_v48, %v4157_v13  ;;  %v1810_v52 = vmul.f32 %v1682_v27, %v4160_v16  ;;  %v4185_v2 = vadd.f32 %v3823_v60, %v675_v28 }
 0x13c   :  { %v3418_v22 = vpop.eup %3417  ;;  %v1812_v39 = vmul.f32 %v1684_v31, %v4166_v20  ;;  %v2567_v19 = vmul.f32 %v2439_v34, %v4125_v24  ;;  %v2192_v46 = vmul.f32 0.7978846, %v2064_v4  ;;  %v2568_v35 = vmul.f32 %v2440_v33, %v4120_v11 }
 0x13d   :  { %v3420_v44 = vpop.eup %3419  ;;  %v2441_v3 = vadd.f32 1.0, %v3418_v22  ;;  %v2191_v45 = vmul.f32 0.7978846, %v2063_v37  ;;  %v2065_v50 = vadd.f32 %v1937_v38, %v4157_v13  ;;  %v1938_v1 = vmul.f32 %v1810_v52, %v4160_v16 }
 0x13e   :  { %v2442_v36 = vadd.f32 1.0, %v3420_v44  ;;  %v1940_v54 = vmul.f32 %v1812_v39, %v4166_v20  ;;  %v3422_v59 = vpop.eup %3421  ;;  %v3246_v6 = vpack.c.bf16 %v2567_v19, %v2566_v32  ;;  %3429 = vtanh.f32 %v2192_v46  ;;  %v683_v39 = vpop.f32.mrf.mxu0 }
 0x13f   :  { %v2569_v62 = vmul.f32 %v2441_v3, %v1545_v55  ;;  %v3424_v7 = vpop.eup %3423  ;;  %v2443_v25 = vadd.f32 1.0, %v3422_v59  ;;  %v4193_v24 = vmul.f32 0.5, %v4111_v51  ;;  %3431 = vtanh.f32 %v2191_v45 }
 0x140   :  { %v2193_v5 = vmul.f32 0.7978846, %v2065_v50  ;;  %3066 = vst [vmem:[%s5160_s3 + $0x60] sm:$0xff] %v3246_v6  ;;  %v2570_v9 = vmul.f32 %v2442_v36, %v4141_v15  ;;  %v2066_v11 = vadd.f32 %v1938_v1, %v4160_v16  ;;  %v2068_v55 = vadd.f32 %v1940_v54, %v4166_v20 }
 0x141   :  { %v3247_v63 = vpack.c.bf16 %v2569_v62, %v2568_v35  ;;  %v2571_v12 = vmul.f32 %v2443_v25, %v1547_v21  ;;  %v1683_v51 = vmul.f32 0.044715, %v4185_v2  ;;  %v4203_v30 = vadd.f32 %v3825_v61, %v868_v42 }
 0x142   :  { %3433 = vtanh.f32 %v2193_v5  ;;  %v2444_v58 = vadd.f32 1.0, %v3424_v7  ;;  %v2194_v43 = vmul.f32 0.7978846, %v2066_v11  ;;  %v4209_v47 = vadd.f32 %v3819_v56, %v679_v41  ;;  %v685_v11 = vpop.f32.mrf.mxu0 }
 0x143   :  { %3067 = vst [vmem:[%s5160_s3 + $0x68] sm:$0xff] %v3247_v63  ;;  %v4212_v15 = vadd.f32 %v3821_v57, %v872_v8  ;;  %v3248_v17 = vpack.c.bf16 %v2571_v12, %v2570_v9  ;;  %v1552_v18 = vmul.f32 0.5, %v4133_v0  ;;  %v1811_v21 = vmul.f32 %v1683_v51, %v4185_v2 }
 0x144   :  { %v1685_v53 = vmul.f32 0.044715, %v4203_v30  ;;  %v1551_v10 = vmul.f32 0.5, %v4137_v40  ;;  %3435 = vtanh.f32 %v2194_v43  ;;  %v2196_v27 = vmul.f32 0.7978846, %v2068_v55 }
 0x145   :  { %v3426_v26 = vpop.eup %3425  ;;  %v1686_v28 = vmul.f32 0.044715, %v4209_v47  ;;  %3068 = vst [vmem:[%s5160_s3 + $0x70] sm:$0xff] %v3248_v17  ;;  %v1553_v0 = vmul.f32 0.5, %v4157_v13  ;;  %v1939_v33 = vmul.f32 %v1811_v21, %v4185_v2  ;;  %v2572_v31 = vmul.f32 %v2444_v58, %v4148_v49 }
 0x146   :  { %v2445_v32 = vadd.f32 1.0, %v3426_v26  ;;  %v1813_v48 = vmul.f32 %v1685_v53, %v4203_v30  ;;  %v1688_v34 = vmul.f32 0.044715, %v4212_v15  ;;  %v4229_v4 = vadd.f32 %v3823_v60, %v681_v23 }
 0x147   :  { %v1814_v40 = vmul.f32 %v1686_v28, %v4209_v47  ;;  %v3428_v37 = vpop.eup %3427  ;;  %v2067_v38 = vadd.f32 %v1939_v33, %v4185_v2  ;;  %v4235_v52 = vadd.f32 %v3825_v61, %v874_v29  ;;  %3437 = vtanh.f32 %v2196_v27 }
 0x148   :  { %v2573_v22 = vmul.f32 %v2445_v32, %v4170_v14  ;;  %v1941_v13 = vmul.f32 %v1813_v48, %v4203_v30  ;;  %v2446_v42 = vadd.f32 1.0, %v3428_v37  ;;  %v1816_v44 = vmul.f32 %v1688_v34, %v4212_v15  ;;  %v689_v34 = vpop.f32.mrf.mxu0 }
 0x149   :  { %v1942_v49 = vmul.f32 %v1814_v40, %v4209_v47  ;;  %v2195_v3 = vmul.f32 0.7978846, %v2067_v38  ;;  %v1687_v14 = vmul.f32 0.044715, %v4229_v4  ;;  %v4242_v45 = vmul.f32 0.5, %v4160_v16  ;;  %v876_v16 = vpop.f32.mrf.mxu1 }
 0x14a   :  { %v3249_v19 = vpack.c.bf16 %v2573_v22, %v2572_v31  ;;  %v2069_v46 = vadd.f32 %v1941_v13, %v4203_v30  ;;  %v1944_v50 = vmul.f32 %v1816_v44, %v4212_v15  ;;  %v4247_v1 = vadd.f32 %v3819_v56, %v683_v39 }
 0x14b   :  { %v2070_v36 = vadd.f32 %v1942_v49, %v4209_v47  ;;  %v3430_v54 = vpop.eup %3429  ;;  %3439 = vtanh.f32 %v2195_v3  ;;  %v1815_v35 = vmul.f32 %v1687_v14, %v4229_v4  ;;  %v1689_v6 = vmul.f32 0.044715, %v4235_v52  ;;  %v878_v53 = vpop.f32.mrf.mxu1 }
 0x14c   :  { %3069 = vst [vmem:[%s5160_s3 + $0x78] sm:$0xff] %v3249_v19  ;;  %v2197_v59 = vmul.f32 0.7978846, %v2069_v46  ;;  %v3432_v62 = vpop.eup %3431  ;;  %v2574_v7 = vmul.f32 %v2446_v42, %v4193_v24  ;;  %v2448_v25 = vadd.f32 1.0, %v3430_v54  ;;  %v2072_v41 = vadd.f32 %v1944_v50, %v4212_v15  ;;  %v691_v14 = vpop.f32.mrf.mxu0 }
 0x14d   :  { %v2198_v5 = vmul.f32 0.7978846, %v2070_v36  ;;  %v2447_v8 = vadd.f32 1.0, %v3432_v62  ;;  %v1943_v63 = vmul.f32 %v1815_v35, %v4229_v4  ;;  %v1817_v9 = vmul.f32 %v1689_v6, %v4235_v52  ;;  %v882_v38 = vpop.f32.mrf.mxu1 }
 0x14e   :  { %3441 = vtanh.f32 %v2197_v59  ;;  %v2576_v12 = vmul.f32 %v2448_v25, %v1552_v18  ;;  %v2200_v51 = vmul.f32 0.7978846, %v2072_v41  ;;  %v1690_v58 = vmul.f32 0.044715, %v4247_v1 }
 0x14f   :  { %v3434_v55 = vpop.eup %3433  ;;  %3443 = vtanh.f32 %v2198_v5  ;;  %v2575_v43 = vmul.f32 %v2447_v8, %v1551_v10  ;;  %v2071_v24 = vadd.f32 %v1943_v63, %v4229_v4  ;;  %v1945_v21 = vmul.f32 %v1817_v9, %v4235_v52 }
 0x150   :  { %v2449_v17 = vadd.f32 1.0, %v3434_v55  ;;  %3445 = vtanh.f32 %v2200_v51  ;;  %v1818_v23 = vmul.f32 %v1690_v58, %v4247_v1  ;;  %v4263_v26 = vadd.f32 %v3821_v57, %v876_v16 }
 0x151   :  { %v4266_v27 = vadd.f32 %v3823_v60, %v685_v11  ;;  %v3436_v18 = vpop.eup %3435  ;;  %v3250_v28 = vpack.c.bf16 %v2575_v43, %v2574_v7  ;;  %v2199_v32 = vmul.f32 0.7978846, %v2071_v24  ;;  %v2073_v10 = vadd.f32 %v1945_v21, %v4235_v52 }
 0x152   :  { %v2577_v29 = vmul.f32 %v2449_v17, %v1553_v0  ;;  %v1556_v33 = vmul.f32 0.5, %v4166_v20  ;;  %v1555_v48 = vmul.f32 0.5, %v4185_v2  ;;  %v1946_v31 = vmul.f32 %v1818_v23, %v4247_v1 }
 0x153   :  { %v1692_v40 = vmul.f32 0.044715, %v4263_v26  ;;  %3070 = vst [vmem:[%s5160_s3 + $0x80] sm:$0xff] %v3250_v28  ;;  %v1557_v22 = vmul.f32 0.5, %v4203_v30  ;;  %3447 = vtanh.f32 %v2199_v32  ;;  %v2201_v0 = vmul.f32 0.7978846, %v2073_v10 }
 0x154   :  { %v3251_v37 = vpack.c.bf16 %v2577_v29, %v2576_v12  ;;  %v2450_v13 = vadd.f32 1.0, %v3436_v18  ;;  %v4278_v20 = vmul.f32 0.5, %v4209_v47  ;;  %v2074_v2 = vadd.f32 %v1946_v31, %v4247_v1  ;;  %v3438_v42 = vpop.eup %3437  ;;  %v884_v18 = vpop.f32.mrf.mxu1 }
 0x155   :  { %v1820_v39 = vmul.f32 %v1692_v40, %v4263_v26  ;;  %v4286_v49 = vmul.f32 0.5, %v4212_v15  ;;  %3449 = vtanh.f32 %v2201_v0  ;;  %v1691_v30 = vmul.f32 0.044715, %v4266_v27 }
 0x156   :  { %3071 = vst [vmem:[%s5160_s3 + $0x88] sm:$0xff] %v3251_v37  ;;  %v4290_v44 = vadd.f32 %v3825_v61, %v878_v53  ;;  %v2202_v47 = vmul.f32 0.7978846, %v2074_v2  ;;  %v4294_v3 = vadd.f32 %v3819_v56, %v689_v34  ;;  %v4297_v46 = vadd.f32 %v3821_v57, %v882_v38 }
 0x157   :  { %v1948_v19 = vmul.f32 %v1820_v39, %v4263_v26  ;;  %v1559_v36 = vmul.f32 0.5, %v4229_v4  ;;  %v4301_v15 = vmul.f32 0.5, %v4235_v52  ;;  %v1819_v50 = vmul.f32 %v1691_v30, %v4266_v27 }
 0x158   :  { %v1693_v54 = vmul.f32 0.044715, %v4290_v44  ;;  %v3440_v59 = vpop.eup %3439  ;;  %v2578_v35 = vmul.f32 %v2450_v13, %v4242_v45  ;;  %v2452_v6 = vadd.f32 1.0, %v3438_v42  ;;  %v1694_v62 = vmul.f32 0.044715, %v4294_v3  ;;  %v886_v42 = vpop.f32.mrf.mxu1 }
 0x159   :  { %v2076_v16 = vadd.f32 %v1948_v19, %v4263_v26  ;;  %v2451_v7 = vadd.f32 1.0, %v3440_v59  ;;  %v1947_v25 = vmul.f32 %v1819_v50, %v4266_v27  ;;  %v4311_v52 = vadd.f32 %v3823_v60, %v691_v14 }
 0x15a   :  { %v1821_v4 = vmul.f32 %v1693_v54, %v4290_v44  ;;  %3451 = vtanh.f32 %v2202_v47  ;;  %v1822_v8 = vmul.f32 %v1694_v62, %v4294_v3  ;;  %v1696_v45 = vmul.f32 0.044715, %v4297_v46 }
 0x15b   :  { %v3442_v5 = vpop.eup %3441  ;;  %v2204_v41 = vmul.f32 0.7978846, %v2076_v16  ;;  %v2579_v9 = vmul.f32 %v2451_v7, %v1555_v48  ;;  %v2075_v55 = vadd.f32 %v1947_v25, %v4266_v27  ;;  %v2580_v51 = vmul.f32 %v2452_v6, %v1556_v33  ;;  %v693_v48 = vpop.f32.mrf.mxu0 }
 0x15c   :  { %v3444_v63 = vpop.eup %3443  ;;  %v2453_v11 = vadd.f32 1.0, %v3442_v5  ;;  %v1949_v12 = vmul.f32 %v1821_v4, %v4290_v44  ;;  %v1950_v58 = vmul.f32 %v1822_v8, %v4294_v3  ;;  %v1824_v43 = vmul.f32 %v1696_v45, %v4297_v46  ;;  %v888_v8 = vpop.f32.mrf.mxu1 }
 0x15d   :  { %3453 = vtanh.f32 %v2204_v41  ;;  %v3446_v17 = vpop.eup %3445  ;;  %v3252_v24 = vpack.c.bf16 %v2579_v9, %v2578_v35  ;;  %v2203_v53 = vmul.f32 0.7978846, %v2075_v55  ;;  %v2454_v28 = vadd.f32 1.0, %v3444_v63  ;;  %v695_v50 = vpop.f32.mrf.mxu0 }
 0x15e   :  { %v2581_v21 = vmul.f32 %v2453_v11, %v1557_v22  ;;  %v2077_v23 = vadd.f32 %v1949_v12, %v4290_v44  ;;  %v2456_v29 = vadd.f32 1.0, %v3446_v17  ;;  %v2078_v32 = vadd.f32 %v1950_v58, %v4294_v3 }
 0x15f   :  { %v1952_v10 = vmul.f32 %v1824_v43, %v4297_v46  ;;  %3072 = vst [vmem:[%s5160_s3 + $0x90] sm:$0xff] %v3252_v24  ;;  %3455 = vtanh.f32 %v2203_v53  ;;  %v1695_v40 = vmul.f32 0.044715, %v4311_v52  ;;  %v4327_v37 = vmul.f32 0.5, %v4247_v1  ;;  %v699_v45 = vpop.f32.mrf.mxu0 }
 0x160   :  { %v3253_v33 = vpack.c.bf16 %v2581_v21, %v2580_v51  ;;  %v2205_v31 = vmul.f32 0.7978846, %v2077_v23  ;;  %v3448_v34 = vpop.eup %3447  ;;  %v2206_v22 = vmul.f32 0.7978846, %v2078_v32  ;;  %v4331_v38 = vadd.f32 %v3825_v61, %v884_v18  ;;  %v892_v23 = vpop.f32.mrf.mxu1 }
 0x161   :  { %v2080_v0 = vadd.f32 %v1952_v10, %v4297_v46  ;;  %v2455_v13 = vadd.f32 1.0, %v3448_v34  ;;  %v1823_v2 = vmul.f32 %v1695_v40, %v4311_v52  ;;  %v4338_v39 = vadd.f32 %v3819_v56, %v693_v48 }
 0x162   :  { %3073 = vst [vmem:[%s5160_s3 + $0x98] sm:$0xff] %v3253_v33  ;;  %3457 = vtanh.f32 %v2205_v31  ;;  %v3450_v1 = vpop.eup %3449  ;;  %v2582_v30 = vmul.f32 %v2454_v28, %v4278_v20  ;;  %v2584_v47 = vmul.f32 %v2456_v29, %v4286_v49  ;;  %v4343_v19 = vmul.f32 0.5, %v4263_v26 }
 0x163   :  { %v1697_v14 = vmul.f32 0.044715, %v4331_v38  ;;  %v2583_v54 = vmul.f32 %v2455_v13, %v1559_v36  ;;  %v2457_v59 = vadd.f32 1.0, %v3450_v1  ;;  %3459 = vtanh.f32 %v2206_v22  ;;  %v894_v1 = vpop.f32.mrf.mxu1 }
 0x164   :  { %v1951_v35 = vmul.f32 %v1823_v2, %v4311_v52  ;;  %v2208_v6 = vmul.f32 0.7978846, %v2080_v0  ;;  %v1698_v62 = vmul.f32 0.044715, %v4338_v39  ;;  %v4350_v20 = vadd.f32 %v3821_v57, %v886_v42  ;;  %v701_v0 = vpop.f32.mrf.mxu0 }
 0x165   :  { %v1825_v16 = vmul.f32 %v1697_v14, %v4331_v38  ;;  %v3254_v49 = vpack.c.bf16 %v2583_v54, %v2582_v30  ;;  %v2585_v26 = vmul.f32 %v2457_v59, %v4301_v15  ;;  %v4355_v25 = vadd.f32 %v3823_v60, %v695_v50 }
 0x166   :  { %v2079_v7 = vadd.f32 %v1951_v35, %v4311_v52  ;;  %v1563_v36 = vmul.f32 0.5, %v4266_v27  ;;  %v1565_v4 = vmul.f32 0.5, %v4290_v44  ;;  %v1826_v41 = vmul.f32 %v1698_v62, %v4338_v39 }
 0x167   :  { %v1953_v5 = vmul.f32 %v1825_v16, %v4331_v38  ;;  %v3452_v63 = vpop.eup %3451  ;;  %3074 = vst [vmem:[%s5160_s3 + $0xa0] sm:$0xff] %v3254_v49  ;;  %v3255_v15 = vpack.c.bf16 %v2585_v26, %v2584_v47  ;;  %v4365_v9 = vmul.f32 0.5, %v4294_v3  ;;  %v1700_v27 = vmul.f32 0.044715, %v4350_v20 }
 0x168   :  { %v2207_v11 = vmul.f32 0.7978846, %v2079_v7  ;;  %3461 = vtanh.f32 %v2208_v6  ;;  %v1954_v55 = vmul.f32 %v1826_v41, %v4338_v39  ;;  %v1699_v12 = vmul.f32 0.044715, %v4355_v25 }
 0x169   :  { %v2081_v44 = vadd.f32 %v1953_v5, %v4331_v38  ;;  %3075 = vst [vmem:[%s5160_s3 + $0xa8] sm:$0xff] %v3255_v15  ;;  %v1828_v58 = vmul.f32 %v1700_v27, %v4350_v20  ;;  %v4376_v3 = vadd.f32 %v3825_v61, %v888_v8  ;;  %v4379_v43 = vadd.f32 %v3819_v56, %v699_v45  ;;  %v896_v5 = vpop.f32.mrf.mxu1 }
 0x16a   :  { %v3454_v51 = vpop.eup %3453  ;;  %3463 = vtanh.f32 %v2207_v11  ;;  %v2458_v17 = vadd.f32 1.0, %v3452_v63  ;;  %v2082_v21 = vadd.f32 %v1954_v55, %v4338_v39  ;;  %v1827_v53 = vmul.f32 %v1699_v12, %v4355_v25 }
 0x16b   :  { %v2209_v24 = vmul.f32 0.7978846, %v2081_v44  ;;  %v4384_v18 = vmul.f32 0.5, %v4297_v46  ;;  %v4387_v28 = vmul.f32 0.5, %v4311_v52  ;;  %v1956_v29 = vmul.f32 %v1828_v58, %v4350_v20 }
 0x16c   :  { %v1701_v32 = vmul.f32 0.044715, %v4376_v3  ;;  %v3456_v10 = vpop.eup %3455  ;;  %v2460_v48 = vadd.f32 1.0, %v3454_v51  ;;  %v2210_v33 = vmul.f32 0.7978846, %v2082_v21  ;;  %v1955_v31 = vmul.f32 %v1827_v53, %v4355_v25 }
 0x16d   :  { %3465 = vtanh.f32 %v2209_v24  ;;  %v2459_v40 = vadd.f32 1.0, %v3456_v10  ;;  %v2084_v34 = vadd.f32 %v1956_v29, %v4350_v20  ;;  %v1702_v46 = vmul.f32 0.044715, %v4379_v43 }
 0x16e   :  { %v1829_v22 = vmul.f32 %v1701_v32, %v4376_v3  ;;  %v2586_v13 = vmul.f32 %v2458_v17, %v4327_v37  ;;  %3467 = vtanh.f32 %v2210_v33  ;;  %v2083_v2 = vadd.f32 %v1955_v31, %v4355_v25 }
 0x16f   :  { %v3458_v52 = vpop.eup %3457  ;;  %v4398_v42 = vadd.f32 %v3821_v57, %v892_v23  ;;  %v2587_v30 = vmul.f32 %v2459_v40, %v1563_v36  ;;  %v2212_v14 = vmul.f32 0.7978846, %v2084_v34  ;;  %v2588_v59 = vmul.f32 %v2460_v48, %v4343_v19  ;;  %v703_v19 = vpop.f32.mrf.mxu0 }
 0x170   :  { %v2461_v47 = vadd.f32 1.0, %v3458_v52  ;;  %v1957_v50 = vmul.f32 %v1829_v22, %v4376_v3  ;;  %v3460_v54 = vpop.eup %3459  ;;  %v2211_v35 = vmul.f32 0.7978846, %v2083_v2  ;;  %v1830_v6 = vmul.f32 %v1702_v46, %v4379_v43  ;;  %v898_v52 = vpop.f32.mrf.mxu1 }
 0x171   :  { %v4404_v37 = vadd.f32 %v3823_v60, %v701_v0  ;;  %v3256_v16 = vpack.c.bf16 %v2587_v30, %v2586_v13  ;;  %3469 = vtanh.f32 %v2212_v14  ;;  %v1569_v26 = vmul.f32 0.5, %v4331_v38  ;;  %v705_v29 = vpop.f32.mrf.mxu0 }
 0x172   :  { %v2589_v62 = vmul.f32 %v2461_v47, %v1565_v4  ;;  %v2085_v49 = vadd.f32 %v1957_v50, %v4376_v3  ;;  %v4409_v7 = vmul.f32 0.5, %v4338_v39  ;;  %3471 = vtanh.f32 %v2211_v35 }
 0x173   :  { %v1958_v36 = vmul.f32 %v1830_v6, %v4379_v43  ;;  %3076 = vst [vmem:[%s5160_s3 + $0xb0] sm:$0xff] %v3256_v16  ;;  %v2462_v8 = vadd.f32 1.0, %v3460_v54  ;;  %v1704_v45 = vmul.f32 0.044715, %v4398_v42  ;;  %v4417_v63 = vmul.f32 0.5, %v4350_v20  ;;  %v709_v16 = vpop.f32.mrf.mxu0 }
 0x174   :  { %v3257_v41 = vpack.c.bf16 %v2589_v62, %v2588_v59  ;;  %v2213_v4 = vmul.f32 0.7978846, %v2085_v49  ;;  %v1703_v39 = vmul.f32 0.044715, %v4404_v37  ;;  %v4422_v15 = vadd.f32 %v3825_v61, %v894_v1 }
 0x175   :  { %v2086_v38 = vadd.f32 %v1958_v36, %v4379_v43  ;;  %v3462_v11 = vpop.eup %3461  ;;  %v1832_v27 = vmul.f32 %v1704_v45, %v4398_v42  ;;  %v4429_v44 = vadd.f32 %v3819_v56, %v703_v19  ;;  %v4432_v20 = vadd.f32 %v3821_v57, %v896_v5 }
 0x176   :  { %3077 = vst [vmem:[%s5160_s3 + $0xb8] sm:$0xff] %v3257_v41  ;;  %3473 = vtanh.f32 %v2213_v4  ;;  %v1571_v12 = vmul.f32 0.5, %v4355_v25  ;;  %v1831_v58 = vmul.f32 %v1703_v39, %v4404_v37  ;;  %v1705_v17 = vmul.f32 0.044715, %v4422_v15 }
 0x177   :  { %v3464_v55 = vpop.eup %3463  ;;  %v2214_v51 = vmul.f32 0.7978846, %v2086_v38  ;;  %v2590_v24 = vmul.f32 %v2462_v8, %v4365_v9  ;;  %v1960_v53 = vmul.f32 %v1832_v27, %v4398_v42  ;;  %v1706_v23 = vmul.f32 0.044715, %v4429_v44 }
 0x178   :  { %v2463_v21 = vadd.f32 1.0, %v3464_v55  ;;  %v2464_v32 = vadd.f32 1.0, %v3462_v11  ;;  %v1959_v10 = vmul.f32 %v1831_v58, %v4404_v37  ;;  %v1833_v48 = vmul.f32 %v1705_v17, %v4422_v15  ;;  %v711_v55 = vpop.f32.mrf.mxu0 }
 0x179   :  { %3475 = vtanh.f32 %v2214_v51  ;;  %v2088_v31 = vadd.f32 %v1960_v53, %v4398_v42  ;;  %v1834_v40 = vmul.f32 %v1706_v23, %v4429_v44  ;;  %v1708_v9 = vmul.f32 0.044715, %v4432_v20 }
 0x17a   :  { %v3466_v25 = vpop.eup %3465  ;;  %v2591_v33 = vmul.f32 %v2463_v21, %v4387_v28  ;;  %v2087_v22 = vadd.f32 %v1959_v10, %v4404_v37  ;;  %v1961_v46 = vmul.f32 %v1833_v48, %v4422_v15  ;;  %v4449_v0 = vadd.f32 %v3823_v60, %v705_v29 }
 0x17b   :  { %v2465_v34 = vadd.f32 1.0, %v3466_v25  ;;  %v3468_v13 = vpop.eup %3467  ;;  %v2216_v1 = vmul.f32 0.7978846, %v2088_v31  ;;  %v1962_v28 = vmul.f32 %v1834_v40, %v4429_v44  ;;  %v1836_v30 = vmul.f32 %v1708_v9, %v4432_v20 }
 0x17c   :  { %v3258_v2 = vpack.c.bf16 %v2591_v33, %v2590_v24  ;;  %v2592_v47 = vmul.f32 %v2464_v32, %v4384_v18  ;;  %v2215_v50 = vmul.f32 0.7978846, %v2087_v22  ;;  %v2089_v54 = vadd.f32 %v1961_v46, %v4422_v15 }
 0x17d   :  { %v2593_v14 = vmul.f32 %v2465_v34, %v1569_v26  ;;  %v1573_v59 = vmul.f32 0.5, %v4376_v3  ;;  %3477 = vtanh.f32 %v2216_v1  ;;  %v2090_v35 = vadd.f32 %v1962_v28, %v4429_v44  ;;  %v902_v26 = vpop.f32.mrf.mxu1 }
 0x17e   :  { %3078 = vst [vmem:[%s5160_s3 + $0xc0] sm:$0xff] %v3258_v2  ;;  %v1964_v6 = vmul.f32 %v1836_v30, %v4432_v20  ;;  %v3470_v62 = vpop.eup %3469  ;;  %v2466_v36 = vadd.f32 1.0, %v3468_v13  ;;  %3479 = vtanh.f32 %v2215_v50  ;;  %v2217_v18 = vmul.f32 0.7978846, %v2089_v54 }
 0x17f   :  { %v3259_v49 = vpack.c.bf16 %v2593_v14, %v2592_v47  ;;  %v3472_v19 = vpop.eup %3471  ;;  %v2468_v5 = vadd.f32 1.0, %v3470_v62  ;;  %v2218_v41 = vmul.f32 0.7978846, %v2090_v35  ;;  %v1707_v4 = vmul.f32 0.044715, %v4449_v0  ;;  %v904_v53 = vpop.f32.mrf.mxu1 }
 0x180   :  { %v2092_v8 = vadd.f32 %v1964_v6, %v4432_v20  ;;  %v2467_v3 = vadd.f32 1.0, %v3472_v19  ;;  %3481 = vtanh.f32 %v2217_v18  ;;  %v4467_v45 = vadd.f32 %v3825_v61, %v898_v52 }
 0x181   :  { %3079 = vst [vmem:[%s5160_s3 + $0xc8] sm:$0xff] %v3259_v49  ;;  %v4470_v38 = vadd.f32 %v3819_v56, %v709_v16  ;;  %v1574_v39 = vmul.f32 0.5, %v4379_v43  ;;  %3483 = vtanh.f32 %v2218_v41  ;;  %v1835_v27 = vmul.f32 %v1707_v4, %v4449_v0  ;;  %v906_v6 = vpop.f32.mrf.mxu1 }
 0x182   :  { %v2220_v11 = vmul.f32 0.7978846, %v2092_v8  ;;  %v2594_v58 = vmul.f32 %v2466_v36, %v4409_v7  ;;  %v2596_v17 = vmul.f32 %v2468_v5, %v4417_v63  ;;  %v2595_v24 = vmul.f32 %v2467_v3, %v1571_v12 }
 0x183   :  { %v3474_v51 = vpop.eup %3473  ;;  %v1709_v21 = vmul.f32 0.044715, %v4467_v45  ;;  %v1963_v29 = vmul.f32 %v1835_v27, %v4449_v0  ;;  %v1710_v43 = vmul.f32 0.044715, %v4470_v38  ;;  %v4481_v48 = vadd.f32 %v3821_v57, %v902_v26 }
 0x184   :  { %v2469_v23 = vadd.f32 1.0, %v3474_v51  ;;  %3485 = vtanh.f32 %v2220_v11  ;;  %v3260_v32 = vpack.c.bf16 %v2595_v24, %v2594_v58  ;;  %v4484_v7 = vadd.f32 %v3823_v60, %v711_v55 }
 0x185   :  { %v1837_v10 = vmul.f32 %v1709_v21, %v4467_v45  ;;  %v2091_v25 = vadd.f32 %v1963_v29, %v4449_v0  ;;  %v1838_v33 = vmul.f32 %v1710_v43, %v4470_v38  ;;  %v4489_v31 = vadd.f32 %v3825_v61, %v904_v53 }
 0x186   :  { %v3476_v63 = vpop.eup %3475  ;;  %v2597_v12 = vmul.f32 %v2469_v23, %v1573_v59  ;;  %3080 = vst [vmem:[%s5160_s3 + $0xd0] sm:$0xff] %v3260_v32  ;;  %v1576_v40 = vmul.f32 0.5, %v4398_v42  ;;  %v1575_v9 = vmul.f32 0.5, %v4404_v37  ;;  %v1712_v22 = vmul.f32 0.044715, %v4481_v48  ;;  %v713_v37 = vpop.f32.mrf.mxu0 }
 0x187   :  { %v1965_v34 = vmul.f32 %v1837_v10, %v4467_v45  ;;  %v1577_v52 = vmul.f32 0.5, %v4422_v15  ;;  %v2219_v13 = vmul.f32 0.7978846, %v2091_v25  ;;  %v1966_v2 = vmul.f32 %v1838_v33, %v4470_v38 }
 0x188   :  { %v3261_v46 = vpack.c.bf16 %v2597_v12, %v2596_v17  ;;  %v4501_v1 = vmul.f32 0.5, %v4429_v44  ;;  %v1840_v30 = vmul.f32 %v1712_v22, %v4481_v48  ;;  %v1711_v42 = vmul.f32 0.044715, %v4484_v7  ;;  %v715_v3 = vpop.f32.mrf.mxu0  ;;  %v908_v17 = vpop.f32.mrf.mxu1 }
 0x189   :  { %v2093_v28 = vadd.f32 %v1965_v34, %v4467_v45  ;;  %v2470_v47 = vadd.f32 1.0, %v3476_v63  ;;  %3487 = vtanh.f32 %v2219_v13  ;;  %v2094_v15 = vadd.f32 %v1966_v2, %v4470_v38 }
 0x18a   :  { %3081 = vst [vmem:[%s5160_s3 + $0xd8] sm:$0xff] %v3261_v46  ;;  %v1713_v14 = vmul.f32 0.044715, %v4489_v31  ;;  %v3478_v50 = vpop.eup %3477  ;;  %v4512_v44 = vmul.f32 0.5, %v4432_v20  ;;  %v1968_v59 = vmul.f32 %v1840_v30, %v4481_v48  ;;  %v1839_v35 = vmul.f32 %v1711_v42, %v4484_v7  ;;  %v719_v33 = vpop.f32.mrf.mxu0 }
 0x18b   :  { %v2221_v54 = vmul.f32 0.7978846, %v2093_v28  ;;  %v3480_v16 = vpop.eup %3479  ;;  %v2472_v62 = vadd.f32 1.0, %v3478_v50  ;;  %v2222_v49 = vmul.f32 0.7978846, %v2094_v15  ;;  %v4518_v18 = vadd.f32 %v3819_v56, %v713_v37  ;;  %v912_v34 = vpop.f32.mrf.mxu1 }
 0x18c   :  { %v1841_v36 = vmul.f32 %v1713_v14, %v4489_v31  ;;  %v2471_v26 = vadd.f32 1.0, %v3480_v16  ;;  %v2096_v19 = vadd.f32 %v1968_v59, %v4481_v48  ;;  %v1967_v20 = vmul.f32 %v1839_v35, %v4484_v7  ;;  %v721_v59 = vpop.f32.mrf.mxu0 }
 0x18d   :  { %3489 = vtanh.f32 %v2221_v54  ;;  %v3482_v5 = vpop.eup %3481  ;;  %v2598_v41 = vmul.f32 %v2470_v47, %v1574_v39  ;;  %v4524_v4 = vadd.f32 %v3821_v57, %v906_v6  ;;  %v2600_v24 = vmul.f32 %v2472_v62, %v1576_v40 }
 0x18e   :  { %3491 = vtanh.f32 %v2222_v49  ;;  %v1969_v8 = vmul.f32 %v1841_v36, %v4489_v31  ;;  %v3484_v11 = vpop.eup %3483  ;;  %v2599_v27 = vmul.f32 %v2471_v26, %v1575_v9  ;;  %v2473_v55 = vadd.f32 1.0, %v3482_v5 }
 0x18f   :  { %v2224_v51 = vmul.f32 0.7978846, %v2096_v19  ;;  %v2095_v58 = vadd.f32 %v1967_v20, %v4484_v7  ;;  %v1579_v21 = vmul.f32 0.5, %v4449_v0  ;;  %v1714_v39 = vmul.f32 0.044715, %v4518_v18 }
 0x190   :  { %v2097_v53 = vadd.f32 %v1969_v8, %v4489_v31  ;;  %v3262_v29 = vpack.c.bf16 %v2599_v27, %v2598_v41  ;;  %v2601_v43 = vmul.f32 %v2473_v55, %v1577_v52  ;;  %v2474_v10 = vadd.f32 1.0, %v3484_v11 }
 0x191   :  { %v3486_v23 = vpop.eup %3485  ;;  %3493 = vtanh.f32 %v2224_v51  ;;  %v2223_v32 = vmul.f32 0.7978846, %v2095_v58  ;;  %v1581_v63 = vmul.f32 0.5, %v4467_v45  ;;  %v1842_v25 = vmul.f32 %v1714_v39, %v4518_v18 }
 0x192   :  { %v2225_v12 = vmul.f32 0.7978846, %v2097_v53  ;;  %3082 = vst [vmem:[%s5160_s3 + $0xe0] sm:$0xff] %v3262_v29  ;;  %v3263_v0 = vpack.c.bf16 %v2601_v43, %v2600_v24  ;;  %v1716_v40 = vmul.f32 0.044715, %v4524_v4  ;;  %v4537_v9 = vadd.f32 %v3823_v60, %v715_v3  ;;  %v914_v53 = vpop.f32.mrf.mxu1 }
 0x193   :  { %3495 = vtanh.f32 %v2223_v32  ;;  %v2476_v22 = vadd.f32 1.0, %v3486_v23  ;;  %v1970_v45 = vmul.f32 %v1842_v25, %v4518_v18  ;;  %v4541_v46 = vadd.f32 %v3825_v61, %v908_v17 }
 0x194   :  { %3497 = vtanh.f32 %v2225_v12  ;;  %3083 = vst [vmem:[%s5160_s3 + $0xe8] sm:$0xff] %v3263_v0  ;;  %v1582_v52 = vmul.f32 0.5, %v4470_v38  ;;  %v1844_v13 = vmul.f32 %v1716_v40, %v4524_v4  ;;  %v1715_v2 = vmul.f32 0.044715, %v4537_v9 }
 0x195   :  { %v4550_v28 = vadd.f32 %v3819_v56, %v719_v33  ;;  %v4553_v30 = vmul.f32 0.5, %v4481_v48  ;;  %v2098_v42 = vadd.f32 %v1970_v45, %v4518_v18  ;;  %v1717_v37 = vmul.f32 0.044715, %v4541_v46 }
 0x196   :  { %v4558_v47 = vadd.f32 %v3821_v57, %v912_v34  ;;  %v3488_v15 = vpop.eup %3487  ;;  %v2602_v38 = vmul.f32 %v2474_v10, %v4501_v1  ;;  %v1972_v14 = vmul.f32 %v1844_v13, %v4524_v4  ;;  %v1843_v50 = vmul.f32 %v1715_v2, %v4537_v9  ;;  %v723_v10 = vpop.f32.mrf.mxu0 }
 0x197   :  { %v1718_v54 = vmul.f32 0.044715, %v4550_v28  ;;  %v2604_v48 = vmul.f32 %v2476_v22, %v4512_v44  ;;  %v2475_v35 = vadd.f32 1.0, %v3488_v15  ;;  %v2226_v6 = vmul.f32 0.7978846, %v2098_v42  ;;  %v916_v2 = vpop.f32.mrf.mxu1 }
 0x198   :  { %v1845_v16 = vmul.f32 %v1717_v37, %v4541_v46  ;;  %v2100_v62 = vadd.f32 %v1972_v14, %v4524_v4  ;;  %v1971_v49 = vmul.f32 %v1843_v50, %v4537_v9  ;;  %v1720_v1 = vmul.f32 0.044715, %v4558_v47 }
 0x199   :  { %v1846_v36 = vmul.f32 %v1718_v54, %v4550_v28  ;;  %v2603_v19 = vmul.f32 %v2475_v35, %v1579_v21  ;;  %3499 = vtanh.f32 %v2226_v6  ;;  %v4572_v5 = vadd.f32 %v3823_v60, %v721_v59 }
 0x19a   :  { %v3490_v26 = vpop.eup %3489  ;;  %v1973_v20 = vmul.f32 %v1845_v16, %v4541_v46  ;;  %v2228_v8 = vmul.f32 0.7978846, %v2100_v62  ;;  %v2099_v3 = vadd.f32 %v1971_v49, %v4537_v9  ;;  %v1848_v58 = vmul.f32 %v1720_v1, %v4558_v47 }
 0x19b   :  { %v3492_v44 = vpop.eup %3491  ;;  %v2477_v41 = vadd.f32 1.0, %v3490_v26  ;;  %v1974_v11 = vmul.f32 %v1846_v36, %v4550_v28  ;;  %v3264_v27 = vpack.c.bf16 %v2603_v19, %v2602_v38  ;;  %v1583_v23 = vmul.f32 0.5, %v4484_v7  ;;  %v725_v38 = vpop.f32.mrf.mxu0 }
 0x19c   :  { %v2478_v55 = vadd.f32 1.0, %v3492_v44  ;;  %v2101_v51 = vadd.f32 %v1973_v20, %v4541_v46  ;;  %3501 = vtanh.f32 %v2228_v8  ;;  %v2227_v24 = vmul.f32 0.7978846, %v2099_v3 }
 0x19d   :  { %v2605_v17 = vmul.f32 %v2477_v41, %v1581_v63  ;;  %v2102_v21 = vadd.f32 %v1974_v11, %v4550_v28  ;;  %3084 = vst [vmem:[%s5160_s3 + $0xf0] sm:$0xff] %v3264_v27  ;;  %v1585_v29 = vmul.f32 0.5, %v4489_v31  ;;  %v1976_v32 = vmul.f32 %v1848_v58, %v4558_v47  ;;  %v729_v19 = vpop.f32.mrf.mxu0 }
 0x19e   :  { %v3494_v39 = vpop.eup %3493  ;;  %v2229_v43 = vmul.f32 0.7978846, %v2101_v51  ;;  %3503 = vtanh.f32 %v2227_v24  ;;  %v1719_v40 = vmul.f32 0.044715, %v4572_v5  ;;  %v4588_v34 = vadd.f32 %v3825_v61, %v914_v53 }
 0x19f   :  { %v3265_v12 = vpack.c.bf16 %v2605_v17, %v2604_v48  ;;  %v2480_v63 = vadd.f32 1.0, %v3494_v39  ;;  %v2230_v25 = vmul.f32 0.7978846, %v2102_v21  ;;  %v2104_v0 = vadd.f32 %v1976_v32, %v4558_v47 }
 0x1a0   :  { %v3496_v33 = vpop.eup %3495  ;;  %3505 = vtanh.f32 %v2229_v43  ;;  %v2606_v31 = vmul.f32 %v2478_v55, %v1582_v52  ;;  %v1586_v45 = vmul.f32 0.5, %v4518_v18  ;;  %v4595_v13 = vadd.f32 %v3819_v56, %v723_v10 }
 0x1a1   :  { %v3498_v7 = vpop.eup %3497  ;;  %3085 = vst [vmem:[%s5160_s3 + $0xf8] sm:$0xff] %v3265_v12  ;;  %v2479_v22 = vadd.f32 1.0, %v3496_v33  ;;  %3507 = vtanh.f32 %v2230_v25  ;;  %v2232_v37 = vmul.f32 0.7978846, %v2104_v0  ;;  %v1847_v15 = vmul.f32 %v1719_v40, %v4572_v5 }
 0x1a2   :  { %v2481_v42 = vadd.f32 1.0, %v3498_v7  ;;  %v2608_v14 = vmul.f32 %v2480_v63, %v4553_v30  ;;  %v1721_v54 = vmul.f32 0.044715, %v4588_v34  ;;  %v1722_v52 = vmul.f32 0.044715, %v4595_v13  ;;  %v918_v30 = vpop.f32.mrf.mxu1 }
 0x1a3   :  { %v2607_v50 = vmul.f32 %v2479_v22, %v1583_v23  ;;  %3509 = vtanh.f32 %v2232_v37  ;;  %v1975_v18 = vmul.f32 %v1847_v15, %v4572_v5  ;;  %v4603_v48 = vadd.f32 %v3821_v57, %v916_v2 }
 0x1a4   :  { %v2609_v59 = vmul.f32 %v2481_v42, %v1585_v29  ;;  %v1849_v6 = vmul.f32 %v1721_v54, %v4588_v34  ;;  %v1850_v16 = vmul.f32 %v1722_v52, %v4595_v13  ;;  %v4608_v62 = vadd.f32 %v3823_v60, %v725_v38  ;;  %v922_v24 = vpop.f32.mrf.mxu1 }
 0x1a5   :  { %v3266_v35 = vpack.c.bf16 %v2607_v50, %v2606_v31  ;;  %v1588_v36 = vmul.f32 0.5, %v4524_v4  ;;  %v2103_v1 = vadd.f32 %v1975_v18, %v4572_v5  ;;  %v1724_v26 = vmul.f32 0.044715, %v4603_v48  ;;  %v731_v31 = vpop.f32.mrf.mxu0 }
 0x1a6   :  { %v3267_v49 = vpack.c.bf16 %v2609_v59, %v2608_v14  ;;  %v3500_v20 = vpop.eup %3499  ;;  %v1587_v44 = vmul.f32 0.5, %v4537_v9  ;;  %v1977_v41 = vmul.f32 %v1849_v6, %v4588_v34  ;;  %v1978_v8 = vmul.f32 %v1850_v16, %v4595_v13  ;;  %v924_v22 = vpop.f32.mrf.mxu1 }
 0x1a7   :  { %3086 = vst [vmem:[%s5160_s3 + $0x100] sm:$0xff] %v3266_v35  ;;  %v1723_v3 = vmul.f32 0.044715, %v4608_v62  ;;  %v2482_v4 = vadd.f32 1.0, %v3500_v20  ;;  %v2231_v11 = vmul.f32 0.7978846, %v2103_v1  ;;  %v1852_v27 = vmul.f32 %v1724_v26, %v4603_v48  ;;  %v733_v16 = vpop.f32.mrf.mxu0 }
 0x1a8   :  { %3087 = vst [vmem:[%s5160_s3 + $0x108] sm:$0xff] %v3267_v49  ;;  %v4625_v55 = vadd.f32 %v3825_v61, %v918_v30  ;;  %v2105_v51 = vadd.f32 %v1977_v41, %v4588_v34  ;;  %v2106_v9 = vadd.f32 %v1978_v8, %v4595_v13  ;;  %v4631_v17 = vadd.f32 %v3819_v56, %v729_v19  ;;  %v926_v30 = vpop.f32.mrf.mxu1 }
 0x1a9   :  { %v1851_v58 = vmul.f32 %v1723_v3, %v4608_v62  ;;  %v3502_v21 = vpop.eup %3501  ;;  %v1589_v53 = vmul.f32 0.5, %v4541_v46  ;;  %v1590_v39 = vmul.f32 0.5, %v4550_v28  ;;  %3511 = vtanh.f32 %v2231_v11 }
 0x1aa   :  { %v1980_v23 = vmul.f32 %v1852_v27, %v4603_v48  ;;  %v2484_v29 = vadd.f32 1.0, %v3502_v21  ;;  %v2233_v43 = vmul.f32 0.7978846, %v2105_v51  ;;  %v2234_v32 = vmul.f32 0.7978846, %v2106_v9 }
 0x1ab   :  { %v1979_v10 = vmul.f32 %v1851_v58, %v4608_v62  ;;  %v3504_v12 = vpop.eup %3503  ;;  %v4638_v63 = vmul.f32 0.5, %v4558_v47  ;;  %v1725_v33 = vmul.f32 0.044715, %v4625_v55  ;;  %v1726_v46 = vmul.f32 0.044715, %v4631_v17 }
 0x1ac   :  { %v2108_v25 = vadd.f32 %v1980_v23, %v4603_v48  ;;  %v2610_v28 = vmul.f32 %v2482_v4, %v1586_v45  ;;  %v2483_v40 = vadd.f32 1.0, %v3504_v12  ;;  %3513 = vtanh.f32 %v2233_v43  ;;  %v735_v43 = vpop.f32.mrf.mxu0 }
 0x1ad   :  { %v3506_v0 = vpop.eup %3505  ;;  %v2107_v7 = vadd.f32 %v1979_v10, %v4608_v62  ;;  %3515 = vtanh.f32 %v2234_v32  ;;  %v1853_v47 = vmul.f32 %v1725_v33, %v4625_v55  ;;  %v2612_v15 = vmul.f32 %v2484_v29, %v1588_v36 }
 0x1ae   :  { %v2485_v2 = vadd.f32 1.0, %v3506_v0  ;;  %v2236_v42 = vmul.f32 0.7978846, %v2108_v25  ;;  %v3508_v37 = vpop.eup %3507  ;;  %v2611_v38 = vmul.f32 %v2483_v40, %v1587_v44  ;;  %v1854_v50 = vmul.f32 %v1726_v46, %v4631_v17 }
 0x1af   :  { %v2235_v14 = vmul.f32 0.7978846, %v2107_v7  ;;  %v1981_v45 = vmul.f32 %v1853_v47, %v4625_v55  ;;  %v4648_v52 = vadd.f32 %v3821_v57, %v922_v24  ;;  %v1591_v35 = vmul.f32 0.5, %v4572_v5  ;;  %v928_v7 = vpop.f32.mrf.mxu1 }
 0x1b0   :  { %v2613_v54 = vmul.f32 %v2485_v2, %v1589_v53  ;;  %3517 = vtanh.f32 %v2236_v42  ;;  %v3510_v59 = vpop.eup %3509  ;;  %v3268_v18 = vpack.c.bf16 %v2611_v38, %v2610_v28  ;;  %v1982_v6 = vmul.f32 %v1854_v50, %v4631_v17 }
 0x1b1   :  { %3519 = vtanh.f32 %v2235_v14  ;;  %v2486_v36 = vadd.f32 1.0, %v3508_v37  ;;  %v1593_v1 = vmul.f32 0.5, %v4588_v34  ;;  %v2109_v26 = vadd.f32 %v1981_v45, %v4625_v55  ;;  %v739_v14 = vpop.f32.mrf.mxu0 }
 0x1b2   :  { %v3269_v49 = vpack.c.bf16 %v2613_v54, %v2612_v15  ;;  %3088 = vst [vmem:[%s5160_s3 + $0x110] sm:$0xff] %v3268_v18  ;;  %v2110_v19 = vadd.f32 %v1982_v6, %v4631_v17  ;;  %v1728_v20 = vmul.f32 0.044715, %v4648_v52  ;;  %v4660_v5 = vadd.f32 %v3823_v60, %v731_v31 }
 0x1b3   :  { %v4663_v44 = vadd.f32 %v3825_v61, %v924_v22  ;;  %v1594_v34 = vmul.f32 0.5, %v4595_v13  ;;  %v2237_v41 = vmul.f32 0.7978846, %v2109_v26  ;;  %v4670_v8 = vadd.f32 %v3819_v56, %v733_v16 }
 0x1b4   :  { %3089 = vst [vmem:[%s5160_s3 + $0x118] sm:$0xff] %v3269_v49  ;;  %v4673_v3 = vadd.f32 %v3821_v57, %v926_v30  ;;  %v2488_v4 = vadd.f32 1.0, %v3510_v59  ;;  %v2238_v11 = vmul.f32 0.7978846, %v2110_v19  ;;  %v1856_v27 = vmul.f32 %v1728_v20, %v4648_v52  ;;  %v932_v49 = vpop.f32.mrf.mxu1 }
 0x1b5   :  { %v1727_v51 = vmul.f32 0.044715, %v4660_v5  ;;  %v4678_v9 = vmul.f32 0.5, %v4603_v48  ;;  %v1595_v58 = vmul.f32 0.5, %v4608_v62  ;;  %3521 = vtanh.f32 %v2237_v41 }
 0x1b6   :  { %v1729_v13 = vmul.f32 0.044715, %v4663_v44  ;;  %v3512_v24 = vpop.eup %3511  ;;  %v2614_v21 = vmul.f32 %v2486_v36, %v1590_v39  ;;  %v1984_v53 = vmul.f32 %v1856_v27, %v4648_v52  ;;  %v1730_v29 = vmul.f32 0.044715, %v4670_v8 }
 0x1b7   :  { %v1855_v23 = vmul.f32 %v1727_v51, %v4660_v5  ;;  %v2487_v32 = vadd.f32 1.0, %v3512_v24  ;;  %3523 = vtanh.f32 %v2238_v11  ;;  %v1732_v48 = vmul.f32 0.044715, %v4673_v3 }
 0x1b8   :  { %v1857_v10 = vmul.f32 %v1729_v13, %v4663_v44  ;;  %v2616_v62 = vmul.f32 %v2488_v4, %v4638_v63  ;;  %v2112_v12 = vadd.f32 %v1984_v53, %v4648_v52  ;;  %v1858_v39 = vmul.f32 %v1730_v29, %v4670_v8  ;;  %v741_v4 = vpop.f32.mrf.mxu0  ;;  %v934_v13 = vpop.f32.mrf.mxu1 }
 0x1b9   :  { %v1983_v25 = vmul.f32 %v1855_v23, %v4660_v5  ;;  %v3514_v33 = vpop.eup %3513  ;;  %v2615_v46 = vmul.f32 %v2487_v32, %v1591_v35  ;;  %v1860_v28 = vmul.f32 %v1732_v48, %v4673_v3  ;;  %v4694_v40 = vadd.f32 %v3823_v60, %v735_v43 }
 0x1ba   :  { %v1985_v0 = vmul.f32 %v1857_v10, %v4663_v44  ;;  %v3516_v31 = vpop.eup %3515  ;;  %v2489_v22 = vadd.f32 1.0, %v3514_v33  ;;  %v2240_v2 = vmul.f32 0.7978846, %v2112_v12  ;;  %v1986_v42 = vmul.f32 %v1858_v39, %v4670_v8  ;;  %v743_v39 = vpop.f32.mrf.mxu0 }
 0x1bb   :  { %v2111_v63 = vadd.f32 %v1983_v25, %v4660_v5  ;;  %v3270_v47 = vpack.c.bf16 %v2615_v46, %v2614_v21  ;;  %v2490_v37 = vadd.f32 1.0, %v3516_v31  ;;  %v1988_v38 = vmul.f32 %v1860_v28, %v4673_v3 }
 0x1bc   :  { %v2113_v15 = vadd.f32 %v1985_v0, %v4663_v44  ;;  %v2617_v54 = vmul.f32 %v2489_v22, %v1593_v1  ;;  %3525 = vtanh.f32 %v2240_v2  ;;  %v2114_v59 = vadd.f32 %v1986_v42, %v4670_v8 }
 0x1bd   :  { %v3518_v50 = vpop.eup %3517  ;;  %v2239_v45 = vmul.f32 0.7978846, %v2111_v63  ;;  %3090 = vst [vmem:[%s5160_s3 + $0x120] sm:$0xff] %v3270_v47  ;;  %v1597_v35 = vmul.f32 0.5, %v4625_v55  ;;  %v2116_v16 = vadd.f32 %v1988_v38, %v4673_v3  ;;  %v4707_v30 = vadd.f32 %v3825_v61, %v928_v7  ;;  %v745_v38 = vpop.f32.mrf.mxu0 }
 0x1be   :  { %v3520_v18 = vpop.eup %3519  ;;  %v2241_v6 = vmul.f32 0.7978846, %v2113_v15  ;;  %v3271_v36 = vpack.c.bf16 %v2617_v54, %v2616_v62  ;;  %v2242_v26 = vmul.f32 0.7978846, %v2114_v59  ;;  %v2618_v19 = vmul.f32 %v2490_v37, %v1594_v34  ;;  %v936_v15 = vpop.f32.mrf.mxu1 }
 0x1bf   :  { %v2491_v1 = vadd.f32 1.0, %v3520_v18  ;;  %3527 = vtanh.f32 %v2239_v45  ;;  %v4710_v20 = vmul.f32 0.5, %v4631_v17  ;;  %v2244_v41 = vmul.f32 0.7978846, %v2116_v16 }
 0x1c0   :  { %3529 = vtanh.f32 %v2241_v6  ;;  %3091 = vst [vmem:[%s5160_s3 + $0x128] sm:$0xff] %v3271_v36  ;;  %v2492_v55 = vadd.f32 1.0, %v3518_v50  ;;  %v1731_v27 = vmul.f32 0.044715, %v4694_v40  ;;  %v1733_v51 = vmul.f32 0.044715, %v4707_v30 }
 0x1c1   :  { %v2619_v11 = vmul.f32 %v2491_v1, %v1595_v58  ;;  %3531 = vtanh.f32 %v2242_v26  ;;  %v4718_v34 = vadd.f32 %v3819_v56, %v739_v14  ;;  %v4721_v17 = vadd.f32 %v3821_v57, %v932_v49 }
 0x1c2   :  { %3533 = vtanh.f32 %v2244_v41  ;;  %v3522_v24 = vpop.eup %3521  ;;  %v4724_v53 = vmul.f32 0.5, %v4648_v52  ;;  %v1859_v58 = vmul.f32 %v1731_v27, %v4694_v40  ;;  %v4728_v23 = vadd.f32 %v3823_v60, %v741_v4 }
 0x1c3   :  { %v3272_v21 = vpack.c.bf16 %v2619_v11, %v2618_v19  ;;  %v2493_v29 = vadd.f32 1.0, %v3522_v24  ;;  %v1599_v43 = vmul.f32 0.5, %v4660_v5  ;;  %v1861_v32 = vmul.f32 %v1733_v51, %v4707_v30 }
 0x1c4   :  { %v1734_v10 = vmul.f32 0.044715, %v4718_v34  ;;  %v3524_v48 = vpop.eup %3523  ;;  %v1601_v52 = vmul.f32 0.5, %v4663_v44  ;;  %v1987_v62 = vmul.f32 %v1859_v58, %v4694_v40  ;;  %v1736_v12 = vmul.f32 0.044715, %v4721_v17 }
 0x1c5   :  { %3092 = vst [vmem:[%s5160_s3 + $0x130] sm:$0xff] %v3272_v21  ;;  %v4740_v25 = vadd.f32 %v3825_v61, %v934_v13  ;;  %v2620_v5 = vmul.f32 %v2492_v55, %v4678_v9  ;;  %v2621_v33 = vmul.f32 %v2493_v29, %v1597_v35  ;;  %v1989_v46 = vmul.f32 %v1861_v32, %v4707_v30  ;;  %v749_v55 = vpop.f32.mrf.mxu0 }
 0x1c6   :  { %v1862_v0 = vmul.f32 %v1734_v10, %v4718_v34  ;;  %v4746_v28 = vmul.f32 0.5, %v4670_v8  ;;  %v2115_v44 = vadd.f32 %v1987_v62, %v4694_v40  ;;  %v1864_v7 = vmul.f32 %v1736_v12, %v4721_v17 }
 0x1c7   :  { %v1735_v31 = vmul.f32 0.044715, %v4728_v23  ;;  %v3273_v22 = vpack.c.bf16 %v2621_v33, %v2620_v5  ;;  %v2494_v2 = vadd.f32 1.0, %v3524_v48  ;;  %v2117_v63 = vadd.f32 %v1989_v46, %v4707_v30  ;;  %v751_v33 = vpop.f32.mrf.mxu0 }
 0x1c8   :  { %v1990_v9 = vmul.f32 %v1862_v0, %v4718_v34  ;;  %v2243_v42 = vmul.f32 0.7978846, %v2115_v44  ;;  %v1992_v47 = vmul.f32 %v1864_v7, %v4721_v17  ;;  %v1737_v8 = vmul.f32 0.044715, %v4740_v25 }
 0x1c9   :  { %v1863_v37 = vmul.f32 %v1735_v31, %v4728_v23  ;;  %v3526_v14 = vpop.eup %3525  ;;  %3093 = vst [vmem:[%s5160_s3 + $0x138] sm:$0xff] %v3273_v22  ;;  %v4760_v50 = vmul.f32 0.5, %v4673_v3  ;;  %v2245_v54 = vmul.f32 0.7978846, %v2117_v63  ;;  %v4764_v59 = vadd.f32 %v3819_v56, %v743_v39 }
 0x1ca   :  { %v2118_v45 = vadd.f32 %v1990_v9, %v4718_v34  ;;  %v4767_v18 = vmul.f32 0.5, %v4694_v40  ;;  %3535 = vtanh.f32 %v2243_v42  ;;  %v2120_v35 = vadd.f32 %v1992_v47, %v4721_v17  ;;  %v938_v40 = vpop.f32.mrf.mxu1 }
 0x1cb   :  { %v1991_v6 = vmul.f32 %v1863_v37, %v4728_v23  ;;  %v2496_v49 = vadd.f32 1.0, %v3526_v14  ;;  %3537 = vtanh.f32 %v2245_v54  ;;  %v1865_v3 = vmul.f32 %v1737_v8, %v4740_v25 }
 0x1cc   :  { %v3528_v16 = vpop.eup %3527  ;;  %v2246_v36 = vmul.f32 0.7978846, %v2118_v45  ;;  %v2622_v26 = vmul.f32 %v2494_v2, %v4710_v20  ;;  %v2248_v41 = vmul.f32 0.7978846, %v2120_v35  ;;  %v1738_v13 = vmul.f32 0.044715, %v4764_v59  ;;  %v942_v5 = vpop.f32.mrf.mxu1 }
 0x1cd   :  { %v3530_v1 = vpop.eup %3529  ;;  %v2495_v19 = vadd.f32 1.0, %v3528_v16  ;;  %v2119_v4 = vadd.f32 %v1991_v6, %v4728_v23  ;;  %v1993_v51 = vmul.f32 %v1865_v3, %v4740_v25  ;;  %v4777_v29 = vadd.f32 %v3821_v57, %v936_v15 }
 0x1ce   :  { %v3532_v11 = vpop.eup %3531  ;;  %v2497_v27 = vadd.f32 1.0, %v3530_v1  ;;  %3539 = vtanh.f32 %v2246_v36  ;;  %v2624_v20 = vmul.f32 %v2496_v49, %v4724_v53  ;;  %v1866_v48 = vmul.f32 %v1738_v13, %v4764_v59 }
 0x1cf   :  { %v3534_v24 = vpop.eup %3533  ;;  %v2623_v21 = vmul.f32 %v2495_v19, %v1599_v43  ;;  %3541 = vtanh.f32 %v2248_v41  ;;  %v2247_v58 = vmul.f32 0.7978846, %v2119_v4  ;;  %v2121_v10 = vadd.f32 %v1993_v51, %v4740_v25  ;;  %v944_v41 = vpop.f32.mrf.mxu1 }
 0x1d0   :  { %v2625_v32 = vmul.f32 %v2497_v27, %v1601_v52  ;;  %v2498_v12 = vadd.f32 1.0, %v3532_v11  ;;  %v1605_v39 = vmul.f32 0.5, %v4707_v30  ;;  %v2500_v46 = vadd.f32 1.0, %v3534_v24 }
 0x1d1   :  { %v3274_v62 = vpack.c.bf16 %v2623_v21, %v2622_v26  ;;  %3543 = vtanh.f32 %v2247_v58  ;;  %v2249_v0 = vmul.f32 0.7978846, %v2121_v10  ;;  %v1994_v44 = vmul.f32 %v1866_v48, %v4764_v59 }
 0x1d2   :  { %v3275_v43 = vpack.c.bf16 %v2625_v32, %v2624_v20  ;;  %v1740_v53 = vmul.f32 0.044715, %v4777_v29  ;;  %v4789_v52 = vadd.f32 %v3823_v60, %v745_v38  ;;  %v4792_v7 = vadd.f32 %v3825_v61, %v938_v40 }
 0x1d3   :  { %3094 = vst [vmem:[%s5160_s3 + $0x140] sm:$0xff] %v3274_v62  ;;  %v4795_v30 = vadd.f32 %v3819_v56, %v749_v55  ;;  %3545 = vtanh.f32 %v2249_v0  ;;  %v2122_v31 = vadd.f32 %v1994_v44, %v4764_v59  ;;  %v4802_v22 = vadd.f32 %v3821_v57, %v942_v5 }
 0x1d4   :  { %3095 = vst [vmem:[%s5160_s3 + $0x148] sm:$0xff] %v3275_v43  ;;  %v4805_v2 = vadd.f32 %v3823_v60, %v751_v33  ;;  %v1606_v63 = vmul.f32 0.5, %v4718_v34  ;;  %v4809_v9 = vmul.f32 0.5, %v4721_v17  ;;  %v1868_v42 = vmul.f32 %v1740_v53, %v4777_v29  ;;  %v753_v33 = vpop.f32.mrf.mxu0  ;;  %v946_v43 = vpop.f32.mrf.mxu1 }
 0x1d5   :  { %v1739_v47 = vmul.f32 0.044715, %v4789_v52  ;;  %v2626_v37 = vmul.f32 %v2498_v12, %v4746_v28  ;;  %v1607_v8 = vmul.f32 0.5, %v4728_v23  ;;  %v2250_v15 = vmul.f32 0.7978846, %v2122_v31 }
 0x1d6   :  { %v1741_v38 = vmul.f32 0.044715, %v4792_v7  ;;  %v1996_v14 = vmul.f32 %v1868_v42, %v4777_v29  ;;  %v1742_v34 = vmul.f32 0.044715, %v4795_v30  ;;  %v1744_v17 = vmul.f32 0.044715, %v4802_v22 }
 0x1d7   :  { %v1867_v54 = vmul.f32 %v1739_v47, %v4789_v52  ;;  %v3536_v45 = vpop.eup %3535  ;;  %v2628_v35 = vmul.f32 %v2500_v46, %v4760_v50  ;;  %3547 = vtanh.f32 %v2250_v15  ;;  %v1743_v28 = vmul.f32 0.044715, %v4805_v2 }
 0x1d8   :  { %v1869_v6 = vmul.f32 %v1741_v38, %v4792_v7  ;;  %v3538_v23 = vpop.eup %3537  ;;  %v2499_v16 = vadd.f32 1.0, %v3536_v45  ;;  %v2124_v49 = vadd.f32 %v1996_v14, %v4777_v29  ;;  %v1870_v3 = vmul.f32 %v1742_v34, %v4795_v30  ;;  %v948_v34 = vpop.f32.mrf.mxu1 }
 0x1d9   :  { %v1995_v36 = vmul.f32 %v1867_v54, %v4789_v52  ;;  %v2501_v1 = vadd.f32 1.0, %v3538_v23  ;;  %v1872_v19 = vmul.f32 %v1744_v17, %v4802_v22  ;;  %v1871_v50 = vmul.f32 %v1743_v28, %v4805_v2  ;;  %v755_v54 = vpop.f32.mrf.mxu0 }
 0x1da   :  { %v1997_v26 = vmul.f32 %v1869_v6, %v4792_v7  ;;  %v2627_v40 = vmul.f32 %v2499_v16, %v4767_v18  ;;  %v2252_v55 = vmul.f32 0.7978846, %v2124_v49  ;;  %v1998_v27 = vmul.f32 %v1870_v3, %v4795_v30 }
 0x1db   :  { %v3540_v4 = vpop.eup %3539  ;;  %v2123_v11 = vadd.f32 %v1995_v36, %v4789_v52  ;;  %v2629_v13 = vmul.f32 %v2501_v1, %v1605_v39  ;;  %v2000_v58 = vmul.f32 %v1872_v19, %v4802_v22  ;;  %v1609_v32 = vmul.f32 0.5, %v4740_v25 }
 0x1dc   :  { %v3542_v51 = vpop.eup %3541  ;;  %v2502_v24 = vadd.f32 1.0, %v3540_v4  ;;  %v2125_v21 = vadd.f32 %v1997_v26, %v4792_v7  ;;  %v3276_v20 = vpack.c.bf16 %v2627_v40, %v2626_v37  ;;  %3549 = vtanh.f32 %v2252_v55  ;;  %v759_v26 = vpop.f32.mrf.mxu0 }
 0x1dd   :  { %v2251_v10 = vmul.f32 0.7978846, %v2123_v11  ;;  %v3277_v62 = vpack.c.bf16 %v2629_v13, %v2628_v35  ;;  %v2504_v18 = vadd.f32 1.0, %v3542_v51  ;;  %v2126_v5 = vadd.f32 %v1998_v27, %v4795_v30 }
 0x1de   :  { %v3544_v48 = vpop.eup %3543  ;;  %v2253_v12 = vmul.f32 0.7978846, %v2125_v21  ;;  %3096 = vst [vmem:[%s5160_s3 + $0x150] sm:$0xff] %v3276_v20  ;;  %v2630_v39 = vmul.f32 %v2502_v24, %v1606_v63  ;;  %v2128_v0 = vadd.f32 %v2000_v58, %v4802_v22  ;;  %v1999_v44 = vmul.f32 %v1871_v50, %v4805_v2 }
 0x1df   :  { %v2503_v46 = vadd.f32 1.0, %v3544_v48  ;;  %3551 = vtanh.f32 %v2251_v10  ;;  %3097 = vst [vmem:[%s5160_s3 + $0x158] sm:$0xff] %v3277_v62  ;;  %v2254_v25 = vmul.f32 0.7978846, %v2126_v5  ;;  %v4845_v53 = vadd.f32 %v3825_v61, %v944_v41 }
 0x1e0   :  { %3553 = vtanh.f32 %v2253_v12  ;;  %v3546_v31 = vpop.eup %3545  ;;  %v2256_v47 = vmul.f32 0.7978846, %v2128_v0  ;;  %v4848_v63 = vadd.f32 %v3819_v56, %v753_v33  ;;  %v4851_v37 = vadd.f32 %v3821_v57, %v946_v43  ;;  %v761_v12 = vpop.f32.mrf.mxu0 }
 0x1e1   :  { %v2631_v42 = vmul.f32 %v2503_v46, %v1607_v8  ;;  %v2505_v15 = vadd.f32 1.0, %v3546_v31  ;;  %v1610_v38 = vmul.f32 0.5, %v4764_v59  ;;  %3555 = vtanh.f32 %v2254_v25 }
 0x1e2   :  { %v2127_v14 = vadd.f32 %v1999_v44, %v4805_v2  ;;  %v4856_v45 = vmul.f32 0.5, %v4777_v29  ;;  %3557 = vtanh.f32 %v2256_v47  ;;  %v1745_v8 = vmul.f32 0.044715, %v4845_v53 }
 0x1e3   :  { %v3278_v17 = vpack.c.bf16 %v2631_v42, %v2630_v39  ;;  %v2632_v35 = vmul.f32 %v2504_v18, %v4809_v9  ;;  %v2633_v6 = vmul.f32 %v2505_v15, %v1609_v32  ;;  %v1746_v23 = vmul.f32 0.044715, %v4848_v63  ;;  %v952_v32 = vpop.f32.mrf.mxu1 }
 0x1e4   :  { %v2255_v28 = vmul.f32 0.7978846, %v2127_v14  ;;  %v3548_v16 = vpop.eup %3547  ;;  %v1873_v59 = vmul.f32 %v1745_v8, %v4845_v53  ;;  %v1748_v49 = vmul.f32 0.044715, %v4851_v37  ;;  %v4867_v29 = vadd.f32 %v3823_v60, %v755_v54 }
 0x1e5   :  { %3098 = vst [vmem:[%s5160_s3 + $0x160] sm:$0xff] %v3278_v17  ;;  %v4870_v36 = vadd.f32 %v3825_v61, %v948_v34  ;;  %v3279_v9 = vpack.c.bf16 %v2633_v6, %v2632_v35  ;;  %v1611_v3 = vmul.f32 0.5, %v4789_v52  ;;  %v1874_v1 = vmul.f32 %v1746_v23, %v4848_v63  ;;  %v954_v47 = vpop.f32.mrf.mxu1  ;;  %v763_v34 = vpop.f32.mrf.mxu0 }
 0x1e6   :  { %3559 = vtanh.f32 %v2255_v28  ;;  %v2506_v19 = vadd.f32 1.0, %v3548_v16  ;;  %v2001_v50 = vmul.f32 %v1873_v59, %v4845_v53  ;;  %v1876_v41 = vmul.f32 %v1748_v49, %v4851_v37 }
 0x1e7   :  { %v1747_v4 = vmul.f32 0.044715, %v4867_v29  ;;  %3099 = vst [vmem:[%s5160_s3 + $0x168] sm:$0xff] %v3279_v9  ;;  %v1613_v40 = vmul.f32 0.5, %v4792_v7  ;;  %v4882_v55 = vmul.f32 0.5, %v4795_v30  ;;  %v2002_v52 = vmul.f32 %v1874_v1, %v4848_v63 }
 0x1e8   :  { %v1749_v11 = vmul.f32 0.044715, %v4870_v36  ;;  %v2129_v27 = vadd.f32 %v2001_v50, %v4845_v53  ;;  %v2004_v51 = vmul.f32 %v1876_v41, %v4851_v37  ;;  %v4890_v24 = vadd.f32 %v3819_v56, %v759_v26  ;;  %v956_v26 = vpop.f32.mrf.mxu1 }
 0x1e9   :  { %v1875_v13 = vmul.f32 %v1747_v4, %v4867_v29  ;;  %v3550_v21 = vpop.eup %3549  ;;  %v4893_v58 = vmul.f32 0.5, %v4802_v22  ;;  %v1615_v7 = vmul.f32 0.5, %v4805_v2  ;;  %v2130_v30 = vadd.f32 %v2002_v52, %v4848_v63  ;;  %v765_v4 = vpop.f32.mrf.mxu0 }
 0x1ea   :  { %v1877_v20 = vmul.f32 %v1749_v11, %v4870_v36  ;;  %v2634_v10 = vmul.f32 %v2506_v19, %v1610_v38  ;;  %v2257_v48 = vmul.f32 0.7978846, %v2129_v27  ;;  %v2132_v62 = vadd.f32 %v2004_v51, %v4851_v37 }
 0x1eb   :  { %v2003_v18 = vmul.f32 %v1875_v13, %v4867_v29  ;;  %v2508_v33 = vadd.f32 1.0, %v3550_v21  ;;  %v2258_v43 = vmul.f32 0.7978846, %v2130_v30  ;;  %v1750_v39 = vmul.f32 0.044715, %v4890_v24 }
 0x1ec   :  { %v3552_v5 = vpop.eup %3551  ;;  %v2005_v22 = vmul.f32 %v1877_v20, %v4870_v36  ;;  %3561 = vtanh.f32 %v2257_v48  ;;  %v2260_v0 = vmul.f32 0.7978846, %v2132_v62  ;;  %v4903_v25 = vadd.f32 %v3821_v57, %v952_v32  ;;  %v958_v62 = vpop.f32.mrf.mxu1 }
 0x1ed   :  { %v3554_v2 = vpop.eup %3553  ;;  %v2507_v46 = vadd.f32 1.0, %v3552_v5  ;;  %3563 = vtanh.f32 %v2258_v43  ;;  %v2131_v31 = vadd.f32 %v2003_v18, %v4867_v29  ;;  %v1878_v14 = vmul.f32 %v1750_v39, %v4890_v24 }
 0x1ee   :  { %v2509_v44 = vadd.f32 1.0, %v3554_v2  ;;  %v2133_v42 = vadd.f32 %v2005_v22, %v4870_v36  ;;  %v3556_v15 = vpop.eup %3555  ;;  %3565 = vtanh.f32 %v2260_v0  ;;  %v4909_v54 = vadd.f32 %v3823_v60, %v761_v12 }
 0x1ef   :  { %v2635_v38 = vmul.f32 %v2507_v46, %v1611_v3  ;;  %v3558_v17 = vpop.eup %3557  ;;  %v2636_v8 = vmul.f32 %v2508_v33, %v4856_v45  ;;  %v2259_v6 = vmul.f32 0.7978846, %v2131_v31  ;;  %v2510_v16 = vadd.f32 1.0, %v3556_v15 }
 0x1f0   :  { %v2637_v35 = vmul.f32 %v2509_v44, %v1613_v40  ;;  %v2261_v28 = vmul.f32 0.7978846, %v2133_v42  ;;  %v2006_v59 = vmul.f32 %v1878_v14, %v4890_v24  ;;  %v1752_v49 = vmul.f32 0.044715, %v4903_v25 }
 0x1f1   :  { %v3280_v23 = vpack.c.bf16 %v2635_v38, %v2634_v10  ;;  %v1617_v3 = vmul.f32 0.5, %v4845_v53  ;;  %v4916_v1 = vmul.f32 0.5, %v4848_v63  ;;  %3567 = vtanh.f32 %v2259_v6 }
 0x1f2   :  { %v3281_v9 = vpack.c.bf16 %v2637_v35, %v2636_v8  ;;  %v2512_v45 = vadd.f32 1.0, %v3558_v17  ;;  %3569 = vtanh.f32 %v2261_v28  ;;  %v2134_v50 = vadd.f32 %v2006_v59, %v4890_v24  ;;  %v769_v17 = vpop.f32.mrf.mxu0 }
 0x1f3   :  { %v3560_v19 = vpop.eup %3559  ;;  %3100 = vst [vmem:[%s5160_s3 + $0x170] sm:$0xff] %v3280_v23  ;;  %v1880_v41 = vmul.f32 %v1752_v49, %v4903_v25  ;;  %v1751_v63 = vmul.f32 0.044715, %v4909_v54  ;;  %v4928_v40 = vadd.f32 %v3825_v61, %v954_v47  ;;  %v4931_v52 = vadd.f32 %v3819_v56, %v763_v34  ;;  %v962_v49 = vpop.f32.mrf.mxu1 }
 0x1f4   :  { %3101 = vst [vmem:[%s5160_s3 + $0x178] sm:$0xff] %v3281_v9  ;;  %v2511_v53 = vadd.f32 1.0, %v3560_v19  ;;  %v2638_v11 = vmul.f32 %v2510_v16, %v4882_v55  ;;  %v2262_v27 = vmul.f32 0.7978846, %v2134_v50  ;;  %v4936_v13 = vadd.f32 %v3821_v57, %v956_v26 }
 0x1f5   :  { %v2008_v51 = vmul.f32 %v1880_v41, %v4903_v25  ;;  %v1879_v30 = vmul.f32 %v1751_v63, %v4909_v54  ;;  %v1753_v20 = vmul.f32 0.044715, %v4928_v40  ;;  %v4941_v32 = vadd.f32 %v3823_v60, %v765_v4  ;;  %v771_v63 = vpop.f32.mrf.mxu0 }
 0x1f6   :  { %v2639_v21 = vmul.f32 %v2511_v53, %v1615_v7  ;;  %v1620_v10 = vmul.f32 0.5, %v4851_v37  ;;  %3571 = vtanh.f32 %v2262_v27  ;;  %v1754_v55 = vmul.f32 0.044715, %v4931_v52 }
 0x1f7   :  { %v2136_v48 = vadd.f32 %v2008_v51, %v4903_v25  ;;  %v1619_v12 = vmul.f32 0.5, %v4867_v29  ;;  %v2007_v7 = vmul.f32 %v1879_v30, %v4909_v54  ;;  %v1881_v5 = vmul.f32 %v1753_v20, %v4928_v40  ;;  %v964_v20 = vpop.f32.mrf.mxu1 }
 0x1f8   :  { %v3282_v18 = vpack.c.bf16 %v2639_v21, %v2638_v11  ;;  %v2640_v33 = vmul.f32 %v2512_v45, %v4893_v58  ;;  %v1882_v22 = vmul.f32 %v1754_v55, %v4931_v52  ;;  %v1756_v37 = vmul.f32 0.044715, %v4936_v13 }
 0x1f9   :  { %v2264_v43 = vmul.f32 0.7978846, %v2136_v48  ;;  %v3562_v39 = vpop.eup %3561  ;;  %v2135_v2 = vadd.f32 %v2007_v7, %v4909_v54  ;;  %v2009_v29 = vmul.f32 %v1881_v5, %v4928_v40  ;;  %v1755_v46 = vmul.f32 0.044715, %v4941_v32  ;;  %v773_v7 = vpop.f32.mrf.mxu0 }
 0x1fa   :  { %3102 = vst [vmem:[%s5160_s3 + $0x180] sm:$0xff] %v3282_v18  ;;  %v4959_v0 = vadd.f32 %v3825_v61, %v958_v62  ;;  %v3564_v58 = vpop.eup %3563  ;;  %v2513_v44 = vadd.f32 1.0, %v3562_v39  ;;  %v2010_v31 = vmul.f32 %v1882_v22, %v4931_v52  ;;  %v1884_v42 = vmul.f32 %v1756_v37, %v4936_v13 }
 0x1fb   :  { %3573 = vtanh.f32 %v2264_v43  ;;  %v3566_v47 = vpop.eup %3565  ;;  %v2514_v15 = vadd.f32 1.0, %v3564_v58  ;;  %v2263_v38 = vmul.f32 0.7978846, %v2135_v2  ;;  %v2137_v14 = vadd.f32 %v2009_v29, %v4928_v40 }
 0x1fc   :  { %v1883_v34 = vmul.f32 %v1755_v46, %v4941_v32  ;;  %v2641_v8 = vmul.f32 %v2513_v44, %v1617_v3  ;;  %v2516_v35 = vadd.f32 1.0, %v3566_v47  ;;  %v2138_v6 = vadd.f32 %v2010_v31, %v4931_v52  ;;  %v966_v46 = vpop.f32.mrf.mxu1 }
 0x1fd   :  { %v2012_v28 = vmul.f32 %v1884_v42, %v4936_v13  ;;  %v1621_v23 = vmul.f32 0.5, %v4870_v36  ;;  %3575 = vtanh.f32 %v2263_v38  ;;  %v2265_v16 = vmul.f32 0.7978846, %v2137_v14 }
 0x1fe   :  { %v2011_v59 = vmul.f32 %v1883_v34, %v4941_v32  ;;  %v3568_v9 = vpop.eup %3567  ;;  %v3283_v26 = vpack.c.bf16 %v2641_v8, %v2640_v33  ;;  %v2642_v19 = vmul.f32 %v2514_v15, %v4916_v1  ;;  %v2266_v45 = vmul.f32 0.7978846, %v2138_v6 }
 0x1ff   :  { %v2140_v50 = vadd.f32 %v2012_v28, %v4936_v13  ;;  %v3570_v3 = vpop.eup %3569  ;;  %v2644_v41 = vmul.f32 %v2516_v35, %v1620_v10  ;;  %v2515_v4 = vadd.f32 1.0, %v3568_v9  ;;  %3577 = vtanh.f32 %v2265_v16 }
 0x200   :  { %v2139_v53 = vadd.f32 %v2011_v59, %v4941_v32  ;;  %3103 = vst [vmem:[%s5160_s3 + $0x188] sm:$0xff] %v3283_v26  ;;  %v2517_v36 = vadd.f32 1.0, %v3570_v3  ;;  %3579 = vtanh.f32 %v2266_v45  ;;  %v1757_v27 = vmul.f32 0.044715, %v4959_v0 }
 0x201   :  { %v2268_v11 = vmul.f32 0.7978846, %v2140_v50  ;;  %v2643_v1 = vmul.f32 %v2515_v4, %v1619_v12  ;;  %v4977_v21 = vadd.f32 %v3819_v56, %v769_v17  ;;  %v4980_v30 = vadd.f32 %v3821_v57, %v962_v49  ;;  %v775_v4 = vpop.f32.mrf.mxu0 }
 0x202   :  { %v2267_v51 = vmul.f32 0.7978846, %v2139_v53  ;;  %v2645_v10 = vmul.f32 %v2517_v36, %v1621_v23  ;;  %v1885_v48 = vmul.f32 %v1757_v27, %v4959_v0  ;;  %v4984_v55 = vadd.f32 %v3823_v60, %v771_v63 }
 0x203   :  { %3581 = vtanh.f32 %v2268_v11  ;;  %v3572_v62 = vpop.eup %3571  ;;  %v3284_v18 = vpack.c.bf16 %v2643_v1, %v2642_v19  ;;  %v1758_v12 = vmul.f32 0.044715, %v4977_v21  ;;  %v1622_v33 = vmul.f32 0.5, %v4890_v24 }
 0x204   :  { %3583 = vtanh.f32 %v2267_v51  ;;  %v3285_v5 = vpack.c.bf16 %v2645_v10, %v2644_v41  ;;  %v1624_v43 = vmul.f32 0.5, %v4903_v25  ;;  %v2013_v22 = vmul.f32 %v1885_v48, %v4959_v0  ;;  %v968_v10 = vpop.f32.mrf.mxu1 }
 0x205   :  { %3104 = vst [vmem:[%s5160_s3 + $0x190] sm:$0xff] %v3284_v18  ;;  %v1623_v37 = vmul.f32 0.5, %v4909_v54  ;;  %v1886_v39 = vmul.f32 %v1758_v12, %v4977_v21  ;;  %v1760_v2 = vmul.f32 0.044715, %v4980_v30  ;;  %v1759_v29 = vmul.f32 0.044715, %v4984_v55 }
 0x206   :  { %3105 = vst [vmem:[%s5160_s3 + $0x198] sm:$0xff] %v3285_v5  ;;  %v2518_v24 = vadd.f32 1.0, %v3572_v62  ;;  %v2141_v25 = vadd.f32 %v2013_v22, %v4959_v0  ;;  %v5002_v58 = vadd.f32 %v3825_v61, %v964_v20  ;;  %v5005_v44 = vadd.f32 %v3819_v56, %v773_v7  ;;  %v779_v22 = vpop.f32.mrf.mxu0 }
 0x207   :  { %v1625_v31 = vmul.f32 0.5, %v4928_v40  ;;  %v2014_v42 = vmul.f32 %v1886_v39, %v4977_v21  ;;  %v1888_v47 = vmul.f32 %v1760_v2, %v4980_v30  ;;  %v1887_v15 = vmul.f32 %v1759_v29, %v4984_v55 }
 0x208   :  { %v3574_v54 = vpop.eup %3573  ;;  %v2269_v14 = vmul.f32 0.7978846, %v2141_v25  ;;  %v1761_v34 = vmul.f32 0.044715, %v5002_v58  ;;  %v5013_v17 = vadd.f32 %v3821_v57, %v966_v46  ;;  %v1626_v8 = vmul.f32 0.5, %v4931_v52 }
 0x209   :  { %v2520_v38 = vadd.f32 1.0, %v3574_v54  ;;  %v2142_v35 = vadd.f32 %v2014_v42, %v4977_v21  ;;  %v2016_v6 = vmul.f32 %v1888_v47, %v4980_v30  ;;  %v2015_v40 = vmul.f32 %v1887_v15, %v4984_v55 }
 0x20a   :  { %v3576_v28 = vpop.eup %3575  ;;  %v2646_v23 = vmul.f32 %v2518_v24, %v1622_v33  ;;  %3585 = vtanh.f32 %v2269_v14  ;;  %v1889_v16 = vmul.f32 %v1761_v34, %v5002_v58  ;;  %v1762_v59 = vmul.f32 0.044715, %v5005_v44  ;;  %v781_v34 = vpop.f32.mrf.mxu0 }
 0x20b   :  { %v2519_v49 = vadd.f32 1.0, %v3576_v28  ;;  %v2270_v9 = vmul.f32 0.7978846, %v2142_v35  ;;  %v2144_v26 = vadd.f32 %v2016_v6, %v4980_v30  ;;  %v2143_v19 = vadd.f32 %v2015_v40, %v4984_v55 }
 0x20c   :  { %v3578_v52 = vpop.eup %3577  ;;  %v2648_v45 = vmul.f32 %v2520_v38, %v1624_v43  ;;  %v2017_v50 = vmul.f32 %v1889_v16, %v5002_v58  ;;  %v1890_v3 = vmul.f32 %v1762_v59, %v5005_v44  ;;  %v1764_v41 = vmul.f32 0.044715, %v5013_v17 }
 0x20d   :  { %v3580_v53 = vpop.eup %3579  ;;  %v2647_v63 = vmul.f32 %v2519_v49, %v1623_v37  ;;  %v2521_v36 = vadd.f32 1.0, %v3578_v52  ;;  %3587 = vtanh.f32 %v2270_v9  ;;  %v2272_v11 = vmul.f32 0.7978846, %v2144_v26 }
 0x20e   :  { %v2522_v27 = vadd.f32 1.0, %v3580_v53  ;;  %v2271_v1 = vmul.f32 0.7978846, %v2143_v19  ;;  %v2145_v51 = vadd.f32 %v2017_v50, %v5002_v58  ;;  %v2018_v20 = vmul.f32 %v1890_v3, %v5005_v44 }
 0x20f   :  { %v3286_v62 = vpack.c.bf16 %v2647_v63, %v2646_v23  ;;  %v2649_v18 = vmul.f32 %v2521_v36, %v1625_v31  ;;  %3589 = vtanh.f32 %v2272_v11  ;;  %v1892_v12 = vmul.f32 %v1764_v41, %v5013_v17  ;;  %v783_v11 = vpop.f32.mrf.mxu0 }
 0x210   :  { %v3582_v48 = vpop.eup %3581  ;;  %v1628_v5 = vmul.f32 0.5, %v4936_v13  ;;  %v1627_v33 = vmul.f32 0.5, %v4941_v32  ;;  %3591 = vtanh.f32 %v2271_v1  ;;  %v2273_v43 = vmul.f32 0.7978846, %v2145_v51  ;;  %v972_v32 = vpop.f32.mrf.mxu1 }
 0x211   :  { %v3584_v7 = vpop.eup %3583  ;;  %3106 = vst [vmem:[%s5160_s3 + $0x1a0] sm:$0xff] %v3286_v62  ;;  %v3287_v37 = vpack.c.bf16 %v2649_v18, %v2648_v45  ;;  %v2146_v2 = vadd.f32 %v2018_v20, %v5005_v44  ;;  %v2020_v29 = vmul.f32 %v1892_v12, %v5013_v17  ;;  %v2650_v46 = vmul.f32 %v2522_v27, %v1626_v8 }
 0x212   :  { %v2523_v39 = vadd.f32 1.0, %v3584_v7  ;;  %3593 = vtanh.f32 %v2273_v43  ;;  %v5037_v24 = vadd.f32 %v3823_v60, %v775_v4  ;;  %v5040_v13 = vadd.f32 %v3825_v61, %v968_v10 }
 0x213   :  { %3107 = vst [vmem:[%s5160_s3 + $0x1a8] sm:$0xff] %v3287_v37  ;;  %v2524_v25 = vadd.f32 1.0, %v3582_v48  ;;  %v2148_v31 = vadd.f32 %v2020_v29, %v5013_v17  ;;  %v5047_v42 = vadd.f32 %v3819_v56, %v779_v22  ;;  %v1629_v47 = vmul.f32 0.5, %v4959_v0 }
 0x214   :  { %v2651_v54 = vmul.f32 %v2523_v39, %v1627_v33  ;;  %v1630_v15 = vmul.f32 0.5, %v4977_v21  ;;  %v1763_v38 = vmul.f32 0.044715, %v5037_v24  ;;  %v1765_v14 = vmul.f32 0.044715, %v5040_v13  ;;  %v974_v21 = vpop.f32.mrf.mxu1 }
 0x215   :  { %v1632_v35 = vmul.f32 0.5, %v4980_v30  ;;  %v1631_v6 = vmul.f32 0.5, %v4984_v55  ;;  %v2274_v40 = vmul.f32 0.7978846, %v2146_v2  ;;  %v1766_v16 = vmul.f32 0.044715, %v5047_v42 }
 0x216   :  { %v3288_v8 = vpack.c.bf16 %v2651_v54, %v2650_v46  ;;  %v1891_v28 = vmul.f32 %v1763_v38, %v5037_v24  ;;  %v1893_v23 = vmul.f32 %v1765_v14, %v5040_v13  ;;  %v5059_v0 = vadd.f32 %v3821_v57, %v972_v32  ;;  %v976_v2 = vpop.f32.mrf.mxu1 }
 0x217   :  { %v3586_v59 = vpop.eup %3585  ;;  %v2652_v49 = vmul.f32 %v2524_v25, %v1628_v5  ;;  %v1633_v30 = vmul.f32 0.5, %v5002_v58  ;;  %v2276_v55 = vmul.f32 0.7978846, %v2148_v31  ;;  %v5066_v9 = vadd.f32 %v3823_v60, %v781_v34 }
 0x218   :  { %3108 = vst [vmem:[%s5160_s3 + $0x1b0] sm:$0xff] %v3288_v8  ;;  %v2525_v26 = vadd.f32 1.0, %v3586_v59  ;;  %v2019_v19 = vmul.f32 %v1891_v28, %v5037_v24  ;;  %v2021_v52 = vmul.f32 %v1893_v23, %v5040_v13  ;;  %v1894_v45 = vmul.f32 %v1766_v16, %v5047_v42  ;;  %v785_v23 = vpop.f32.mrf.mxu0  ;;  %v978_v16 = vpop.f32.mrf.mxu1 }
 0x219   :  { %3595 = vtanh.f32 %v2274_v40  ;;  %v1768_v50 = vmul.f32 0.044715, %v5059_v0  ;;  %v1767_v3 = vmul.f32 0.044715, %v5066_v9  ;;  %v5074_v41 = vadd.f32 %v3825_v61, %v974_v21 }
 0x21a   :  { %v3588_v58 = vpop.eup %3587  ;;  %v2653_v4 = vmul.f32 %v2525_v26, %v1629_v47  ;;  %v2147_v53 = vadd.f32 %v2019_v19, %v5037_v24  ;;  %v2149_v63 = vadd.f32 %v2021_v52, %v5040_v13  ;;  %v2022_v36 = vmul.f32 %v1894_v45, %v5047_v42 }
 0x21b   :  { %v2526_v27 = vadd.f32 1.0, %v3588_v58  ;;  %3597 = vtanh.f32 %v2276_v55  ;;  %v1896_v1 = vmul.f32 %v1768_v50, %v5059_v0  ;;  %v1895_v51 = vmul.f32 %v1767_v3, %v5066_v9 }
 0x21c   :  { %v3590_v20 = vpop.eup %3589  ;;  %v3289_v10 = vpack.c.bf16 %v2653_v4, %v2652_v49  ;;  %v2275_v48 = vmul.f32 0.7978846, %v2147_v53  ;;  %v2277_v62 = vmul.f32 0.7978846, %v2149_v63  ;;  %v2150_v18 = vadd.f32 %v2022_v36, %v5047_v42 }
 0x21d   :  { %v3592_v12 = vpop.eup %3591  ;;  %v2528_v7 = vadd.f32 1.0, %v3590_v20  ;;  %v2024_v5 = vmul.f32 %v1896_v1, %v5059_v0  ;;  %v2023_v33 = vmul.f32 %v1895_v51, %v5066_v9  ;;  %v5085_v43 = vadd.f32 %v3819_v56, %v783_v11 }
 0x21e   :  { %3109 = vst [vmem:[%s5160_s3 + $0x1b8] sm:$0xff] %v3289_v10  ;;  %v2527_v22 = vadd.f32 1.0, %v3592_v12  ;;  %3599 = vtanh.f32 %v2275_v48  ;;  %v2278_v37 = vmul.f32 0.7978846, %v2150_v18  ;;  %v1769_v39 = vmul.f32 0.044715, %v5074_v41 }
 0x21f   :  { %v3594_v29 = vpop.eup %3593  ;;  %v2654_v46 = vmul.f32 %v2526_v27, %v1630_v15  ;;  %3601 = vtanh.f32 %v2277_v62  ;;  %v2152_v32 = vadd.f32 %v2024_v5, %v5059_v0  ;;  %v2151_v25 = vadd.f32 %v2023_v33, %v5066_v9 }
 0x220   :  { %v2655_v54 = vmul.f32 %v2527_v22, %v1631_v6  ;;  %v2529_v56 = vadd.f32 1.0, %v3594_v29  ;;  %3603 = vtanh.f32 %v2278_v37  ;;  %v1897_v31 = vmul.f32 %v1769_v39, %v5074_v41 }
 0x221   :  { %v2656_v47 = vmul.f32 %v2528_v7, %v1632_v35  ;;  %v2280_v38 = vmul.f32 0.7978846, %v2152_v32  ;;  %v2279_v14 = vmul.f32 0.7978846, %v2151_v25  ;;  %v5095_v34 = vadd.f32 %v3821_v57, %v976_v2 }
 0x222   :  { %v3290_v8 = vpack.c.bf16 %v2655_v54, %v2654_v46  ;;  %v2657_v40 = vmul.f32 %v2529_v56, %v1633_v30  ;;  %v2025_v15 = vmul.f32 %v1897_v31, %v5074_v41  ;;  %v1770_v28 = vmul.f32 0.044715, %v5085_v43 }
 0x223   :  { %3605 = vtanh.f32 %v2280_v38  ;;  %v1772_v6 = vmul.f32 0.044715, %v5095_v34  ;;  %v5107_v49 = vadd.f32 %v3823_v60, %v785_v23  ;;  %v5114_v19 = vadd.f32 %v3825_v61, %v978_v16 }
 0x224   :  { %3110 = vst [vmem:[%s5160_s3 + $0x1c0] sm:$0xff] %v3290_v8  ;;  %v3291_v35 = vpack.c.bf16 %v2657_v40, %v2656_v47  ;;  %3607 = vtanh.f32 %v2279_v14  ;;  %v2153_v57 = vadd.f32 %v2025_v15, %v5074_v41  ;;  %v1898_v21 = vmul.f32 %v1770_v28, %v5085_v43 }
 0x225   :  { %v1900_v59 = vmul.f32 %v1772_v6, %v5095_v34  ;;  %v1771_v45 = vmul.f32 0.044715, %v5107_v49  ;;  %v1773_v3 = vmul.f32 0.044715, %v5114_v19  ;;  %v1634_v11 = vmul.f32 0.5, %v5005_v44 }
 0x226   :  { %v3596_v30 = vpop.eup %3595  ;;  %3111 = vst [vmem:[%s5160_s3 + $0x1c8] sm:$0xff] %v3291_v35  ;;  %v2281_v55 = vmul.f32 0.7978846, %v2153_v57  ;;  %v2026_v26 = vmul.f32 %v1898_v21, %v5085_v43  ;;  %v1636_v10 = vmul.f32 0.5, %v5013_v17  ;;  %v1635_v48 = vmul.f32 0.5, %v5037_v24 }
 0x227   :  { %v2028_v52 = vmul.f32 %v1900_v59, %v5095_v34  ;;  %v1899_v4 = vmul.f32 %v1771_v45, %v5107_v49  ;;  %v2530_v53 = vadd.f32 1.0, %v3596_v30  ;;  %v1901_v36 = vmul.f32 %v1773_v3, %v5114_v19 }
 0x228   :  { %v3598_v50 = vpop.eup %3597  ;;  %3609 = vtanh.f32 %v2281_v55  ;;  %v2154_v60 = vadd.f32 %v2026_v26, %v5085_v43  ;;  %v1637_v7 = vmul.f32 0.5, %v5040_v13  ;;  %v1638_v13 = vmul.f32 0.5, %v5047_v42 }
 0x229   :  { %v2156_v58 = vadd.f32 %v2028_v52, %v5095_v34  ;;  %v2532_v27 = vadd.f32 1.0, %v3598_v50  ;;  %v2027_v51 = vmul.f32 %v1899_v4, %v5107_v49  ;;  %v2029_v18 = vmul.f32 %v1901_v36, %v5114_v19 }
 0x22a   :  { %v2282_v63 = vmul.f32 0.7978846, %v2154_v60  ;;  %v2658_v44 = vmul.f32 %v2530_v53, %v1634_v11  ;;  %v1639_v56 = vmul.f32 0.5, %v5066_v9  ;;  %v1640_v40 = vmul.f32 0.5, %v5059_v0 }
 0x22b   :  { %v3600_v61 = vpop.eup %3599  ;;  %v2284_v1 = vmul.f32 0.7978846, %v2156_v58  ;;  %v2155_v33 = vadd.f32 %v2027_v51, %v5107_v49  ;;  %v2157_v37 = vadd.f32 %v2029_v18, %v5114_v19  ;;  %v2660_v39 = vmul.f32 %v2532_v27, %v1636_v10 }
 0x22c   :  { %v3602_v20 = vpop.eup %3601  ;;  %v2531_v62 = vadd.f32 1.0, %v3600_v61  ;;  %3611 = vtanh.f32 %v2282_v63  ;;  %v1641_v28 = vmul.f32 0.5, %v5074_v41  ;;  %v1642_v41 = vmul.f32 0.5, %v5085_v43 }
 0x22d   :  { %v3604_v12 = vpop.eup %3603  ;;  %v2533_v5 = vadd.f32 1.0, %v3602_v20  ;;  %3613 = vtanh.f32 %v2284_v1  ;;  %v2283_v17 = vmul.f32 0.7978846, %v2155_v33  ;;  %v2285_v32 = vmul.f32 0.7978846, %v2157_v37 }
 0x22e   :  { %v2659_v22 = vmul.f32 %v2531_v62, %v1635_v48  ;;  %v2534_v46 = vadd.f32 1.0, %v3604_v12  ;;  %v1643_v30 = vmul.f32 0.5, %v5107_v49  ;;  %v1644_v26 = vmul.f32 0.5, %v5095_v34 }
 0x22f   :  { %v2661_v2 = vmul.f32 %v2533_v5, %v1637_v7  ;;  %3615 = vtanh.f32 %v2283_v17  ;;  %v1645_v52 = vmul.f32 0.5, %v5114_v19 }
 0x230   :  { %v3606_v29 = vpop.eup %3605  ;;  %v3292_v24 = vpack.c.bf16 %v2659_v22, %v2658_v44  ;;  %3617 = vtanh.f32 %v2285_v32  ;;  %v2662_v47 = vmul.f32 %v2534_v46, %v1638_v13 }
 0x231   :  { %v3608_v25 = vpop.eup %3607  ;;  %v3293_v54 = vpack.c.bf16 %v2661_v2, %v2660_v39  ;;  %v2536_v38 = vadd.f32 1.0, %v3606_v29 }
 0x232   :  { %3112 = vst [vmem:[%s5160_s3 + $0x1d0] sm:$0xff] %v3292_v24  ;;  %v2535_v31 = vadd.f32 1.0, %v3608_v25 }
 0x233   :  { %3113 = vst [vmem:[%s5160_s3 + $0x1d8] sm:$0xff] %v3293_v54  ;;  %v2664_v6 = vmul.f32 %v2536_v38, %v1640_v40 }
 0x234   :  { %v2663_v14 = vmul.f32 %v2535_v31, %v1639_v56 }
 0x235   :  { %v3610_v8 = vpop.eup %3609 }
 0x236   :  { %v3294_v15 = vpack.c.bf16 %v2663_v14, %v2662_v47  ;;  %v2537_v23 = vadd.f32 1.0, %v3610_v8 }
 0x238   :  { %3114 = vst [vmem:[%s5160_s3 + $0x1e0] sm:$0xff] %v3294_v15  ;;  %v2665_v42 = vmul.f32 %v2537_v23, %v1641_v28 }
 0x239   :  { %v3612_v9 = vpop.eup %3611 }
 0x23a   :  { %v3295_v16 = vpack.c.bf16 %v2665_v42, %v2664_v6  ;;  %v3614_v35 = vpop.eup %3613  ;;  %v2538_v57 = vadd.f32 1.0, %v3612_v9 }
 0x23b   :  { %v2540_v0 = vadd.f32 1.0, %v3614_v35 }
 0x23c   :  { %3115 = vst [vmem:[%s5160_s3 + $0x1e8] sm:$0xff] %v3295_v16  ;;  %v3616_v21 = vpop.eup %3615  ;;  %v2666_v50 = vmul.f32 %v2538_v57, %v1642_v41 }
 0x23d   :  { %v3618_v59 = vpop.eup %3617  ;;  %v2539_v55 = vadd.f32 1.0, %v3616_v21  ;;  %v2668_v3 = vmul.f32 %v2540_v0, %v1644_v26 }
 0x23e   :  { %v2541_v45 = vadd.f32 1.0, %v3618_v59 }
 0x23f   :  { %v2667_v60 = vmul.f32 %v2539_v55, %v1643_v30 }
 0x240   :  { %v2669_v58 = vmul.f32 %v2541_v45, %v1645_v52 }
 0x241   :  { %v3296_v4 = vpack.c.bf16 %v2667_v60, %v2666_v50 }
 0x242   :  { %v3297_v53 = vpack.c.bf16 %v2669_v58, %v2668_v3 }
 0x243   :  { %3116 = vst [vmem:[%s5160_s3 + $0x1f0] sm:$0xff] %v3296_v4 }
 0x244   :  { %3117 = vst [vmem:[%s5160_s3 + $0x1f8] sm:$0xff] %v3297_v53 }

// kernel: bert_pretrain_forward.25
= control target key start
LH: loop header
LB: loop body
LE: loop exit
PB: predicated region body
PF: predicated region fallthrough
CT: control target
= control target key end

     0   :  { %s2348_s1 = inlined_call_operand.vmem [shape: bf16[512,128], index: 1, kind: input, shape index: {}]   ;;  %s2349_s0 = inlined_call_operand.vmem [shape: bf16[256,512], index: 0, kind: input, shape index: {}]   ;;  %s2350_s2 = inlined_call_operand.vmem [shape: f32[1,128], index: 2, kind: input, shape index: {}]   ;;  %s2351_s3 = inlined_call_operand.vmem [shape: bf16[256,128], index: 3, kind: output, shape index: {}]  }
   0x1   :  { %v1827_v0 = vld [vmem:[%s2348_s1 + $0x78] sm:$0xff]   ;;  %v1831_v4 = vld [vmem:[%s2348_s1 + $0x70] sm:$0xff]   ;;  %v1835_v8 = vld [vmem:[%s2348_s1 + $0x68] sm:$0xff]  }
   0x2   :  { %v1828_v1 = vld [vmem:[%s2348_s1 + $0xf8] sm:$0xff]   ;;  %1603 = vmatprep.subr.bf16.mxu0 %v1827_v0  ;;  %v1832_v5 = vld [vmem:[%s2348_s1 + $0xf0] sm:$0xff]   ;;  %v1836_v9 = vld [vmem:[%s2348_s1 + $0xe8] sm:$0xff]  }
   0x3   :  { %v1829_v2 = vld [vmem:[%s2348_s1 + $0x38] sm:$0xff]   ;;  %1715 = vmatprep.subr.bf16.mxu1 %v1828_v1  ;;  %v1833_v6 = vld [vmem:[%s2348_s1 + $0x30] sm:$0xff]   ;;  %v1837_v10 = vld [vmem:[%s2348_s1 + $0x28] sm:$0xff]  }
   0x4   :  { %v1830_v3 = vld [vmem:[%s2348_s1 + $0xb8] sm:$0xff]   ;;  %1604 = vmatpush3.bf16.msra.mxu0 %v1829_v2  ;;  %v1834_v7 = vld [vmem:[%s2348_s1 + $0xb0] sm:$0xff]   ;;  %v1838_v11 = vld [vmem:[%s2348_s1 + $0xa8] sm:$0xff]  }
   0x5   :  { %1716 = vmatpush3.bf16.msra.mxu1 %v1830_v3  ;;  %1605 = vmatprep.subr.bf16.mxu0 %v1831_v4  ;;  %v1839_v12 = vld [vmem:[%s2348_s1 + $0x60] sm:$0xff]   ;;  %v1843_v16 = vld [vmem:[%s2348_s1 + $0x58] sm:$0xff]   ;;  %v1847_v20 = vld [vmem:[%s2348_s1 + $0x50] sm:$0xff]  }
   0x6   :  { %1717 = vmatprep.subr.bf16.mxu1 %v1832_v5  ;;  %v1840_v13 = vld [vmem:[%s2348_s1 + $0xe0] sm:$0xff]   ;;  %v1844_v17 = vld [vmem:[%s2348_s1 + $0xd8] sm:$0xff]   ;;  %v1848_v21 = vld [vmem:[%s2348_s1 + $0xd0] sm:$0xff]  }
   0x7   :  { %v1841_v14 = vld [vmem:[%s2348_s1 + $0x20] sm:$0xff]   ;;  %v1845_v18 = vld [vmem:[%s2348_s1 + $0x18] sm:$0xff]   ;;  %v1849_v22 = vld [vmem:[%s2348_s1 + $0x10] sm:$0xff]  }
   0x8   :  { %1606 = vmatpush3.bf16.msra.mxu0 %v1833_v6  ;;  %v1842_v15 = vld [vmem:[%s2348_s1 + $0xa0] sm:$0xff]   ;;  %v1846_v19 = vld [vmem:[%s2348_s1 + $0x98] sm:$0xff]   ;;  %v1850_v23 = vld [vmem:[%s2348_s1 + $0x90] sm:$0xff]  }
   0x9   :  { %1718 = vmatpush3.bf16.msra.mxu1 %v1834_v7  ;;  %1607 = vmatprep.subr.bf16.mxu0 %v1835_v8  ;;  %v1851_v24 = vld [vmem:[%s2348_s1 + $0x48] sm:$0xff]   ;;  %v1855_v28 = vld [vmem:[%s2348_s1 + $0x40] sm:$0xff]  }
   0xa   :  { %1719 = vmatprep.subr.bf16.mxu1 %v1836_v9  ;;  %v1852_v25 = vld [vmem:[%s2348_s1 + $0xc8] sm:$0xff]   ;;  %v1856_v29 = vld [vmem:[%s2348_s1 + $0xc0] sm:$0xff]  }
   0xb   :  { %v1853_v26 = vld [vmem:[%s2348_s1 + $0x8] sm:$0xff]   ;;  %v1857_v30 = vld [vmem:[%s2348_s1] sm:$0xff]  }
   0xc   :  { %1608 = vmatpush3.bf16.msra.mxu0 %v1837_v10  ;;  %v1854_v27 = vld [vmem:[%s2348_s1 + $0x88] sm:$0xff]   ;;  %v1858_v31 = vld [vmem:[%s2348_s1 + $0x80] sm:$0xff]  }
   0xd   :  { %1720 = vmatpush3.bf16.msra.mxu1 %v1838_v11  ;;  %1609 = vmatprep.subr.bf16.mxu0 %v1839_v12  ;;  %v1859_v32 = vld [vmem:[%s2349_s0] ss:$16 sps:$4 sm:$0xff]   ;;  %v1861_v33 = vld [vmem:[%s2349_s0 + $0x4] ss:$16 sps:$4 sm:$0xff]   ;;  %v1862_v34 = vld [vmem:[%s2349_s0 + $0x8] ss:$16 sps:$4 sm:$0xff]  }
   0xe   :  { %1721 = vmatprep.subr.bf16.mxu1 %v1840_v13  ;;  %v1864_v35 = vld [vmem:[%s2349_s0 + $0xc] ss:$16 sps:$4 sm:$0xff]   ;;  %755 = vmatprep.mubr.bf16.mxu0 %v1861_v33  ;;  %v1865_v36 = vld [vmem:[%s2349_s0 + $0x24] ss:$16 sps:$4 sm:$0xff]   ;;  %v1869_v38 = vld [vmem:[%s2349_s0 + $0x20] ss:$16 sps:$4 sm:$0xff]  }
   0xf   :  { %916 = vmatprep.mubr.bf16.mxu1 %v1864_v35  ;;  %v1867_v37 = vld [vmem:[%s2349_s0 + $0x2c] ss:$16 sps:$4 sm:$0xff]   ;;  %v1870_v39 = vld [vmem:[%s2349_s0 + $0x28] ss:$16 sps:$4 sm:$0xff]   ;;  %v1871_v40 = vld [vmem:[%s2349_s0 + $0x44] ss:$16 sps:$4 sm:$0xff]  }
  0x10   :  { %1610 = vmatpush3.bf16.msra.mxu0 %v1841_v14  ;;  %v1873_v41 = vld [vmem:[%s2349_s0 + $0x4c] ss:$16 sps:$4 sm:$0xff]   ;;  %v1875_v42 = vld [vmem:[%s2349_s0 + $0x40] ss:$16 sps:$4 sm:$0xff]   ;;  %v1876_v43 = vld [vmem:[%s2349_s0 + $0x48] ss:$16 sps:$4 sm:$0xff]  }
  0x11   :  { %1722 = vmatpush3.bf16.msra.mxu1 %v1842_v15  ;;  %1611 = vmatprep.subr.bf16.mxu0 %v1843_v16  ;;  %v1877_v44 = vld [vmem:[%s2349_s0 + $0x64] ss:$16 sps:$4 sm:$0xff]   ;;  %v1879_v45 = vld [vmem:[%s2349_s0 + $0x6c] ss:$16 sps:$4 sm:$0xff]   ;;  %v1881_v46 = vld [vmem:[%s2349_s0 + $0x60] ss:$16 sps:$4 sm:$0xff]  }
  0x12   :  { %1723 = vmatprep.subr.bf16.mxu1 %v1844_v17  ;;  %v1882_v47 = vld [vmem:[%s2349_s0 + $0x68] ss:$16 sps:$4 sm:$0xff]   ;;  %v1883_v48 = vld [vmem:[%s2349_s0 + $0x84] ss:$16 sps:$4 sm:$0xff]   ;;  %v1885_v49 = vld [vmem:[%s2349_s0 + $0x8c] ss:$16 sps:$4 sm:$0xff]  }
  0x13   :  { %v1887_v50 = vld [vmem:[%s2349_s0 + $0x80] ss:$16 sps:$4 sm:$0xff]   ;;  %v1888_v51 = vld [vmem:[%s2349_s0 + $0x88] ss:$16 sps:$4 sm:$0xff]   ;;  %v1889_v52 = vld [vmem:[%s2349_s0 + $0xa4] ss:$16 sps:$4 sm:$0xff]  }
  0x14   :  { %1612 = vmatpush3.bf16.msra.mxu0 %v1845_v18  ;;  %v1891_v53 = vld [vmem:[%s2349_s0 + $0xac] ss:$16 sps:$4 sm:$0xff]   ;;  %v1893_v54 = vld [vmem:[%s2349_s0 + $0xa0] ss:$16 sps:$4 sm:$0xff]   ;;  %v1894_v55 = vld [vmem:[%s2349_s0 + $0xa8] ss:$16 sps:$4 sm:$0xff]  }
  0x15   :  { %1724 = vmatpush3.bf16.msra.mxu1 %v1846_v19  ;;  %1613 = vmatprep.subr.bf16.mxu0 %v1847_v20  ;;  %v1895_v56 = vld [vmem:[%s2349_s0 + $0xc4] ss:$16 sps:$4 sm:$0xff]   ;;  %v1897_v57 = vld [vmem:[%s2349_s0 + $0xcc] ss:$16 sps:$4 sm:$0xff]   ;;  %v1899_v58 = vld [vmem:[%s2349_s0 + $0xc0] ss:$16 sps:$4 sm:$0xff]  }
  0x16   :  { %1725 = vmatprep.subr.bf16.mxu1 %v1848_v21  ;;  %v1900_v59 = vld [vmem:[%s2349_s0 + $0xc8] ss:$16 sps:$4 sm:$0xff]   ;;  %v1901_v60 = vld [vmem:[%s2349_s0 + $0xe4] ss:$16 sps:$4 sm:$0xff]   ;;  %v1903_v61 = vld [vmem:[%s2349_s0 + $0xec] ss:$16 sps:$4 sm:$0xff]  }
  0x17   :  { %v1905_v62 = vld [vmem:[%s2349_s0 + $0xe0] ss:$16 sps:$4 sm:$0xff]   ;;  %v1906_v63 = vld [vmem:[%s2349_s0 + $0xe8] ss:$16 sps:$4 sm:$0xff]   ;;  %v1907_v0 = vld [vmem:[%s2349_s0 + $0x104] ss:$16 sps:$4 sm:$0xff]  }
  0x18   :  { %1614 = vmatpush3.bf16.msra.mxu0 %v1849_v22  ;;  %v1909_v1 = vld [vmem:[%s2349_s0 + $0x10c] ss:$16 sps:$4 sm:$0xff]   ;;  %v1911_v2 = vld [vmem:[%s2349_s0 + $0x100] ss:$16 sps:$4 sm:$0xff]   ;;  %v1912_v3 = vld [vmem:[%s2349_s0 + $0x108] ss:$16 sps:$4 sm:$0xff]  }
  0x19   :  { %1726 = vmatpush3.bf16.msra.mxu1 %v1850_v23  ;;  %1615 = vmatprep.subr.bf16.mxu0 %v1851_v24  ;;  %v1913_v4 = vld [vmem:[%s2349_s0 + $0x124] ss:$16 sps:$4 sm:$0xff]   ;;  %v1915_v5 = vld [vmem:[%s2349_s0 + $0x12c] ss:$16 sps:$4 sm:$0xff]   ;;  %v1917_v6 = vld [vmem:[%s2349_s0 + $0x120] ss:$16 sps:$4 sm:$0xff]  }
  0x1a   :  { %1727 = vmatprep.subr.bf16.mxu1 %v1852_v25  ;;  %v1918_v7 = vld [vmem:[%s2349_s0 + $0x128] ss:$16 sps:$4 sm:$0xff]   ;;  %v1919_v8 = vld [vmem:[%s2349_s0 + $0x144] ss:$16 sps:$4 sm:$0xff]   ;;  %v1921_v9 = vld [vmem:[%s2349_s0 + $0x14c] ss:$16 sps:$4 sm:$0xff]  }
  0x1b   :  { %v1923_v10 = vld [vmem:[%s2349_s0 + $0x140] ss:$16 sps:$4 sm:$0xff]   ;;  %v1924_v11 = vld [vmem:[%s2349_s0 + $0x148] ss:$16 sps:$4 sm:$0xff]   ;;  %v1925_v12 = vld [vmem:[%s2349_s0 + $0x164] ss:$16 sps:$4 sm:$0xff]  }
  0x1c   :  { %1616 = vmatpush3.bf16.msra.mxu0 %v1853_v26  ;;  %v1927_v13 = vld [vmem:[%s2349_s0 + $0x16c] ss:$16 sps:$4 sm:$0xff]   ;;  %v1929_v14 = vld [vmem:[%s2349_s0 + $0x160] ss:$16 sps:$4 sm:$0xff]   ;;  %v1930_v15 = vld [vmem:[%s2349_s0 + $0x168] ss:$16 sps:$4 sm:$0xff]  }
  0x1d   :  { %1728 = vmatpush3.bf16.msra.mxu1 %v1854_v27  ;;  %1617 = vmatprep.subr.bf16.mxu0 %v1855_v28  ;;  %v1931_v16 = vld [vmem:[%s2349_s0 + $0x184] ss:$16 sps:$4 sm:$0xff]   ;;  %v1933_v17 = vld [vmem:[%s2349_s0 + $0x18c] ss:$16 sps:$4 sm:$0xff]   ;;  %v1935_v18 = vld [vmem:[%s2349_s0 + $0x180] ss:$16 sps:$4 sm:$0xff]  }
  0x1e   :  { %1729 = vmatprep.subr.bf16.mxu1 %v1856_v29  ;;  %v1936_v19 = vld [vmem:[%s2349_s0 + $0x188] ss:$16 sps:$4 sm:$0xff]   ;;  %v1937_v20 = vld [vmem:[%s2349_s0 + $0x1a4] ss:$16 sps:$4 sm:$0xff]   ;;  %v1939_v21 = vld [vmem:[%s2349_s0 + $0x1ac] ss:$16 sps:$4 sm:$0xff]  }
  0x1f   :  { %v1941_v22 = vld [vmem:[%s2349_s0 + $0x1a0] ss:$16 sps:$4 sm:$0xff]   ;;  %v1942_v23 = vld [vmem:[%s2349_s0 + $0x1a8] ss:$16 sps:$4 sm:$0xff]   ;;  %v1943_v24 = vld [vmem:[%s2349_s0 + $0x1c4] ss:$16 sps:$4 sm:$0xff]  }
  0x20   :  { %1618 = vmatpush3.bf16.msra.mxu0 %v1857_v30  ;;  %v1945_v25 = vld [vmem:[%s2349_s0 + $0x1cc] ss:$16 sps:$4 sm:$0xff]   ;;  %v1947_v26 = vld [vmem:[%s2349_s0 + $0x1c0] ss:$16 sps:$4 sm:$0xff]   ;;  %v1948_v27 = vld [vmem:[%s2349_s0 + $0x1c8] ss:$16 sps:$4 sm:$0xff]  }
  0x21   :  { %1730 = vmatpush3.bf16.msra.mxu1 %v1858_v31  ;;  %v1949_v28 = vld [vmem:[%s2349_s0 + $0x1e4] ss:$16 sps:$4 sm:$0xff]   ;;  %v1951_v29 = vld [vmem:[%s2349_s0 + $0x1ec] ss:$16 sps:$4 sm:$0xff]   ;;  %v1953_v30 = vld [vmem:[%s2349_s0 + $0x1e0] ss:$16 sps:$4 sm:$0xff]  }
  0x22   :  { %v1954_v31 = vld [vmem:[%s2349_s0 + $0x1e8] ss:$16 sps:$4 sm:$0xff]  }
  0x23   :  { %756 = vmatmul.mubr.bf16.vlgmr.msra.gmra.mxu0 %v1859_v32 }
  0x24   :  { %917 = vmatmul.mubr.bf16.vlgmr.msra.gmra.mxu1 %v1862_v34  ;;  %763 = vmatprep.mubr.bf16.mxu0 %v1865_v36 }
  0x25   :  { %924 = vmatprep.mubr.bf16.mxu1 %v1867_v37 }
  0x2b   :  { %764 = vmatmul.mubr.bf16.gmra.mxu0 %v1869_v38 }
  0x2c   :  { %925 = vmatmul.mubr.bf16.gmra.mxu1 %v1870_v39  ;;  %771 = vmatprep.mubr.bf16.mxu0 %v1871_v40 }
  0x2d   :  { %932 = vmatprep.mubr.bf16.mxu1 %v1873_v41 }
  0x33   :  { %772 = vmatmul.mubr.bf16.gmra.mxu0 %v1875_v42 }
  0x34   :  { %933 = vmatmul.mubr.bf16.gmra.mxu1 %v1876_v43  ;;  %779 = vmatprep.mubr.bf16.mxu0 %v1877_v44 }
  0x35   :  { %940 = vmatprep.mubr.bf16.mxu1 %v1879_v45 }
  0x3b   :  { %780 = vmatmul.mubr.bf16.gmra.mxu0 %v1881_v46  ;;  %v2266_v46 = vld [vmem:[%s2350_s2] ss:$0 sm:$0xff] }
  0x3c   :  { %941 = vmatmul.mubr.bf16.gmra.mxu1 %v1882_v47  ;;  %787 = vmatprep.mubr.bf16.mxu0 %v1883_v48 }
  0x3d   :  { %948 = vmatprep.mubr.bf16.mxu1 %v1885_v49 }
  0x43   :  { %788 = vmatmul.mubr.bf16.gmra.mxu0 %v1887_v50 }
  0x44   :  { %949 = vmatmul.mubr.bf16.gmra.mxu1 %v1888_v51  ;;  %795 = vmatprep.mubr.bf16.mxu0 %v1889_v52 }
  0x45   :  { %956 = vmatprep.mubr.bf16.mxu1 %v1891_v53 }
  0x4b   :  { %796 = vmatmul.mubr.bf16.gmra.mxu0 %v1893_v54 }
  0x4c   :  { %957 = vmatmul.mubr.bf16.gmra.mxu1 %v1894_v55  ;;  %803 = vmatprep.mubr.bf16.mxu0 %v1895_v56 }
  0x4d   :  { %964 = vmatprep.mubr.bf16.mxu1 %v1897_v57 }
  0x53   :  { %804 = vmatmul.mubr.bf16.gmra.mxu0 %v1899_v58 }
  0x54   :  { %965 = vmatmul.mubr.bf16.gmra.mxu1 %v1900_v59  ;;  %811 = vmatprep.mubr.bf16.mxu0 %v1901_v60 }
  0x55   :  { %972 = vmatprep.mubr.bf16.mxu1 %v1903_v61 }
  0x5b   :  { %812 = vmatmul.mubr.bf16.gmra.mxu0 %v1905_v62 }
  0x5c   :  { %973 = vmatmul.mubr.bf16.gmra.mxu1 %v1906_v63  ;;  %819 = vmatprep.mubr.bf16.mxu0 %v1907_v0 }
  0x5d   :  { %980 = vmatprep.mubr.bf16.mxu1 %v1909_v1 }
  0x63   :  { %820 = vmatmul.mubr.bf16.gmra.mxu0 %v1911_v2 }
  0x64   :  { %981 = vmatmul.mubr.bf16.gmra.mxu1 %v1912_v3  ;;  %827 = vmatprep.mubr.bf16.mxu0 %v1913_v4 }
  0x65   :  { %988 = vmatprep.mubr.bf16.mxu1 %v1915_v5 }
  0x6b   :  { %828 = vmatmul.mubr.bf16.gmra.mxu0 %v1917_v6 }
  0x6c   :  { %989 = vmatmul.mubr.bf16.gmra.mxu1 %v1918_v7  ;;  %835 = vmatprep.mubr.bf16.mxu0 %v1919_v8 }
  0x6d   :  { %996 = vmatprep.mubr.bf16.mxu1 %v1921_v9 }
  0x73   :  { %836 = vmatmul.mubr.bf16.gmra.mxu0 %v1923_v10 }
  0x74   :  { %997 = vmatmul.mubr.bf16.gmra.mxu1 %v1924_v11  ;;  %843 = vmatprep.mubr.bf16.mxu0 %v1925_v12 }
  0x75   :  { %1004 = vmatprep.mubr.bf16.mxu1 %v1927_v13 }
  0x7b   :  { %844 = vmatmul.mubr.bf16.gmra.mxu0 %v1929_v14 }
  0x7c   :  { %1005 = vmatmul.mubr.bf16.gmra.mxu1 %v1930_v15  ;;  %851 = vmatprep.mubr.bf16.mxu0 %v1931_v16 }
  0x7d   :  { %1012 = vmatprep.mubr.bf16.mxu1 %v1933_v17 }
  0x83   :  { %852 = vmatmul.mubr.bf16.gmra.mxu0 %v1935_v18 }
  0x84   :  { %1013 = vmatmul.mubr.bf16.gmra.mxu1 %v1936_v19  ;;  %859 = vmatprep.mubr.bf16.mxu0 %v1937_v20 }
  0x85   :  { %1020 = vmatprep.mubr.bf16.mxu1 %v1939_v21 }
  0x8b   :  { %860 = vmatmul.mubr.bf16.gmra.mxu0 %v1941_v22 }
  0x8c   :  { %1021 = vmatmul.mubr.bf16.gmra.mxu1 %v1942_v23  ;;  %867 = vmatprep.mubr.bf16.mxu0 %v1943_v24 }
  0x8d   :  { %1028 = vmatprep.mubr.bf16.mxu1 %v1945_v25 }
  0x93   :  { %868 = vmatmul.mubr.bf16.gmra.mxu0 %v1947_v26 }
  0x94   :  { %1029 = vmatmul.mubr.bf16.gmra.mxu1 %v1948_v27  ;;  %875 = vmatprep.mubr.bf16.mxu0 %v1949_v28 }
  0x95   :  { %1036 = vmatprep.mubr.bf16.mxu1 %v1951_v29 }
  0x9b   :  { %876 = vmatmul.mubr.bf16.gmra.mxu0 %v1953_v30 }
  0x9c   :  { %1037 = vmatmul.mubr.bf16.gmra.mxu1 %v1954_v31 }
  0xe3   :  { %v1619_v32 = vpop.f32.mrf.mxu0 }
  0xe4   :  { %v1731_v33 = vpop.f32.mrf.mxu1 }
  0xe5   :  { %v1620_v34 = vpop.f32.mrf.mxu0 }
  0xe6   :  { %v1732_v35 = vpop.f32.mrf.mxu1  ;;  %v1621_v36 = vadd.f32 %v1620_v34, %v1619_v32 }
  0xe7   :  { %v1733_v37 = vadd.f32 %v1732_v35, %v1731_v33  ;;  %v1622_v38 = vpop.f32.mrf.mxu0 }
  0xe8   :  { %v1734_v39 = vpop.f32.mrf.mxu1 }
  0xe9   :  { %v1623_v40 = vpop.f32.mrf.mxu0  ;;  %v919_v43 = vadd.f32 %v1733_v37, %v1621_v36 }
  0xea   :  { %v1624_v41 = vadd.f32 %v1623_v40, %v1622_v38  ;;  %v1735_v42 = vpop.f32.mrf.mxu1 }
  0xeb   :  { %v1736_v44 = vadd.f32 %v1735_v42, %v1734_v39  ;;  %v1625_v45 = vpop.f32.mrf.mxu0  ;;  %v1151_v51 = vadd.f32 %v2266_v46, %v919_v43 }
  0xec   :  { %v1737_v47 = vpop.f32.mrf.mxu1 }
  0xed   :  { %v922_v48 = vadd.f32 %v1736_v44, %v1624_v41  ;;  %v1626_v49 = vpop.f32.mrf.mxu0 }
  0xee   :  { %v1738_v50 = vpop.f32.mrf.mxu1  ;;  %v1627_v53 = vadd.f32 %v1626_v49, %v1625_v45 }
  0xef   :  { %v1152_v52 = vadd.f32 %v2266_v46, %v922_v48  ;;  %v1739_v54 = vadd.f32 %v1738_v50, %v1737_v47  ;;  %v1628_v55 = vpop.f32.mrf.mxu0 }
  0xf0   :  { %v1740_v56 = vpop.f32.mrf.mxu1 }
  0xf1   :  { %v1511_v57 = vpack.c.bf16 %v1152_v52, %v1151_v51  ;;  %v1629_v58 = vpop.f32.mrf.mxu0  ;;  %v927_v61 = vadd.f32 %v1739_v54, %v1627_v53 }
  0xf2   :  { %v1630_v59 = vadd.f32 %v1629_v58, %v1628_v55  ;;  %v1741_v60 = vpop.f32.mrf.mxu1 }
  0xf3   :  { %1512 = vst [vmem:[%s2351_s3] sm:$0xff] %v1511_v57   ;;  %v1742_v62 = vadd.f32 %v1741_v60, %v1740_v56  ;;  %v1631_v63 = vpop.f32.mrf.mxu0  ;;  %v1153_v4 = vadd.f32 %v2266_v46, %v927_v61 }
  0xf4   :  { %v1743_v0 = vpop.f32.mrf.mxu1 }
  0xf5   :  { %v930_v1 = vadd.f32 %v1742_v62, %v1630_v59  ;;  %v1632_v2 = vpop.f32.mrf.mxu0 }
  0xf6   :  { %v1744_v3 = vpop.f32.mrf.mxu1  ;;  %v1633_v6 = vadd.f32 %v1632_v2, %v1631_v63 }
  0xf7   :  { %v1154_v5 = vadd.f32 %v2266_v46, %v930_v1  ;;  %v1745_v7 = vadd.f32 %v1744_v3, %v1743_v0  ;;  %v1634_v8 = vpop.f32.mrf.mxu0 }
  0xf8   :  { %v1746_v9 = vpop.f32.mrf.mxu1 }
  0xf9   :  { %v1516_v10 = vpack.c.bf16 %v1154_v5, %v1153_v4  ;;  %v1635_v11 = vpop.f32.mrf.mxu0  ;;  %v935_v14 = vadd.f32 %v1745_v7, %v1633_v6 }
  0xfa   :  { %v1636_v12 = vadd.f32 %v1635_v11, %v1634_v8  ;;  %v1747_v13 = vpop.f32.mrf.mxu1 }
  0xfb   :  { %1588 = vst [vmem:[%s2351_s3 + $0x8] sm:$0xff] %v1516_v10   ;;  %v1748_v15 = vadd.f32 %v1747_v13, %v1746_v9  ;;  %v1637_v16 = vpop.f32.mrf.mxu0  ;;  %v1155_v21 = vadd.f32 %v2266_v46, %v935_v14 }
  0xfc   :  { %v1749_v17 = vpop.f32.mrf.mxu1 }
  0xfd   :  { %v938_v18 = vadd.f32 %v1748_v15, %v1636_v12  ;;  %v1638_v19 = vpop.f32.mrf.mxu0 }
  0xfe   :  { %v1750_v20 = vpop.f32.mrf.mxu1  ;;  %v1639_v23 = vadd.f32 %v1638_v19, %v1637_v16 }
  0xff   :  { %v1156_v22 = vadd.f32 %v2266_v46, %v938_v18  ;;  %v1751_v24 = vadd.f32 %v1750_v20, %v1749_v17  ;;  %v1640_v25 = vpop.f32.mrf.mxu0 }
 0x100   :  { %v1752_v26 = vpop.f32.mrf.mxu1 }
 0x101   :  { %v1521_v27 = vpack.c.bf16 %v1156_v22, %v1155_v21  ;;  %v1641_v28 = vpop.f32.mrf.mxu0  ;;  %v943_v31 = vadd.f32 %v1751_v24, %v1639_v23 }
 0x102   :  { %v1642_v29 = vadd.f32 %v1641_v28, %v1640_v25  ;;  %v1753_v30 = vpop.f32.mrf.mxu1 }
 0x103   :  { %1589 = vst [vmem:[%s2351_s3 + $0x10] sm:$0xff] %v1521_v27   ;;  %v1754_v32 = vadd.f32 %v1753_v30, %v1752_v26  ;;  %v1643_v33 = vpop.f32.mrf.mxu0  ;;  %v1157_v38 = vadd.f32 %v2266_v46, %v943_v31 }
 0x104   :  { %v1755_v34 = vpop.f32.mrf.mxu1 }
 0x105   :  { %v946_v35 = vadd.f32 %v1754_v32, %v1642_v29  ;;  %v1644_v36 = vpop.f32.mrf.mxu0 }
 0x106   :  { %v1756_v37 = vpop.f32.mrf.mxu1  ;;  %v1645_v40 = vadd.f32 %v1644_v36, %v1643_v33 }
 0x107   :  { %v1158_v39 = vadd.f32 %v2266_v46, %v946_v35  ;;  %v1757_v41 = vadd.f32 %v1756_v37, %v1755_v34  ;;  %v1646_v42 = vpop.f32.mrf.mxu0 }
 0x108   :  { %v1758_v43 = vpop.f32.mrf.mxu1 }
 0x109   :  { %v1526_v44 = vpack.c.bf16 %v1158_v39, %v1157_v38  ;;  %v1647_v45 = vpop.f32.mrf.mxu0  ;;  %v951_v49 = vadd.f32 %v1757_v41, %v1645_v40 }
 0x10a   :  { %v1648_v47 = vadd.f32 %v1647_v45, %v1646_v42  ;;  %v1759_v48 = vpop.f32.mrf.mxu1 }
 0x10b   :  { %1590 = vst [vmem:[%s2351_s3 + $0x18] sm:$0xff] %v1526_v44   ;;  %v1760_v50 = vadd.f32 %v1759_v48, %v1758_v43  ;;  %v1649_v51 = vpop.f32.mrf.mxu0  ;;  %v1159_v56 = vadd.f32 %v2266_v46, %v951_v49 }
 0x10c   :  { %v1761_v52 = vpop.f32.mrf.mxu1 }
 0x10d   :  { %v954_v53 = vadd.f32 %v1760_v50, %v1648_v47  ;;  %v1650_v54 = vpop.f32.mrf.mxu0 }
 0x10e   :  { %v1762_v55 = vpop.f32.mrf.mxu1  ;;  %v1651_v58 = vadd.f32 %v1650_v54, %v1649_v51 }
 0x10f   :  { %v1160_v57 = vadd.f32 %v2266_v46, %v954_v53  ;;  %v1763_v59 = vadd.f32 %v1762_v55, %v1761_v52  ;;  %v1652_v60 = vpop.f32.mrf.mxu0 }
 0x110   :  { %v1764_v61 = vpop.f32.mrf.mxu1 }
 0x111   :  { %v1531_v62 = vpack.c.bf16 %v1160_v57, %v1159_v56  ;;  %v1653_v63 = vpop.f32.mrf.mxu0  ;;  %v959_v2 = vadd.f32 %v1763_v59, %v1651_v58 }
 0x112   :  { %v1654_v0 = vadd.f32 %v1653_v63, %v1652_v60  ;;  %v1765_v1 = vpop.f32.mrf.mxu1 }
 0x113   :  { %1591 = vst [vmem:[%s2351_s3 + $0x20] sm:$0xff] %v1531_v62   ;;  %v1766_v3 = vadd.f32 %v1765_v1, %v1764_v61  ;;  %v1655_v4 = vpop.f32.mrf.mxu0  ;;  %v1161_v9 = vadd.f32 %v2266_v46, %v959_v2 }
 0x114   :  { %v1767_v5 = vpop.f32.mrf.mxu1 }
 0x115   :  { %v962_v6 = vadd.f32 %v1766_v3, %v1654_v0  ;;  %v1656_v7 = vpop.f32.mrf.mxu0 }
 0x116   :  { %v1768_v8 = vpop.f32.mrf.mxu1  ;;  %v1657_v11 = vadd.f32 %v1656_v7, %v1655_v4 }
 0x117   :  { %v1162_v10 = vadd.f32 %v2266_v46, %v962_v6  ;;  %v1769_v12 = vadd.f32 %v1768_v8, %v1767_v5  ;;  %v1658_v13 = vpop.f32.mrf.mxu0 }
 0x118   :  { %v1770_v14 = vpop.f32.mrf.mxu1 }
 0x119   :  { %v1536_v15 = vpack.c.bf16 %v1162_v10, %v1161_v9  ;;  %v1659_v16 = vpop.f32.mrf.mxu0  ;;  %v967_v19 = vadd.f32 %v1769_v12, %v1657_v11 }
 0x11a   :  { %v1660_v17 = vadd.f32 %v1659_v16, %v1658_v13  ;;  %v1771_v18 = vpop.f32.mrf.mxu1 }
 0x11b   :  { %1592 = vst [vmem:[%s2351_s3 + $0x28] sm:$0xff] %v1536_v15   ;;  %v1772_v20 = vadd.f32 %v1771_v18, %v1770_v14  ;;  %v1661_v21 = vpop.f32.mrf.mxu0  ;;  %v1163_v26 = vadd.f32 %v2266_v46, %v967_v19 }
 0x11c   :  { %v1773_v22 = vpop.f32.mrf.mxu1 }
 0x11d   :  { %v970_v23 = vadd.f32 %v1772_v20, %v1660_v17  ;;  %v1662_v24 = vpop.f32.mrf.mxu0 }
 0x11e   :  { %v1774_v25 = vpop.f32.mrf.mxu1  ;;  %v1663_v28 = vadd.f32 %v1662_v24, %v1661_v21 }
 0x11f   :  { %v1164_v27 = vadd.f32 %v2266_v46, %v970_v23  ;;  %v1775_v29 = vadd.f32 %v1774_v25, %v1773_v22  ;;  %v1664_v30 = vpop.f32.mrf.mxu0 }
 0x120   :  { %v1776_v31 = vpop.f32.mrf.mxu1 }
 0x121   :  { %v1541_v32 = vpack.c.bf16 %v1164_v27, %v1163_v26  ;;  %v1665_v33 = vpop.f32.mrf.mxu0  ;;  %v975_v36 = vadd.f32 %v1775_v29, %v1663_v28 }
 0x122   :  { %v1666_v34 = vadd.f32 %v1665_v33, %v1664_v30  ;;  %v1777_v35 = vpop.f32.mrf.mxu1 }
 0x123   :  { %1593 = vst [vmem:[%s2351_s3 + $0x30] sm:$0xff] %v1541_v32   ;;  %v1778_v37 = vadd.f32 %v1777_v35, %v1776_v31  ;;  %v1667_v38 = vpop.f32.mrf.mxu0  ;;  %v1165_v43 = vadd.f32 %v2266_v46, %v975_v36 }
 0x124   :  { %v1779_v39 = vpop.f32.mrf.mxu1 }
 0x125   :  { %v978_v40 = vadd.f32 %v1778_v37, %v1666_v34  ;;  %v1668_v41 = vpop.f32.mrf.mxu0 }
 0x126   :  { %v1780_v42 = vpop.f32.mrf.mxu1  ;;  %v1669_v45 = vadd.f32 %v1668_v41, %v1667_v38 }
 0x127   :  { %v1166_v44 = vadd.f32 %v2266_v46, %v978_v40  ;;  %v1781_v47 = vadd.f32 %v1780_v42, %v1779_v39  ;;  %v1670_v48 = vpop.f32.mrf.mxu0 }
 0x128   :  { %v1782_v49 = vpop.f32.mrf.mxu1 }
 0x129   :  { %v1546_v50 = vpack.c.bf16 %v1166_v44, %v1165_v43  ;;  %v1671_v51 = vpop.f32.mrf.mxu0  ;;  %v983_v54 = vadd.f32 %v1781_v47, %v1669_v45 }
 0x12a   :  { %v1672_v52 = vadd.f32 %v1671_v51, %v1670_v48  ;;  %v1783_v53 = vpop.f32.mrf.mxu1 }
 0x12b   :  { %1594 = vst [vmem:[%s2351_s3 + $0x38] sm:$0xff] %v1546_v50   ;;  %v1784_v55 = vadd.f32 %v1783_v53, %v1782_v49  ;;  %v1673_v56 = vpop.f32.mrf.mxu0  ;;  %v1167_v61 = vadd.f32 %v2266_v46, %v983_v54 }
 0x12c   :  { %v1785_v57 = vpop.f32.mrf.mxu1 }
 0x12d   :  { %v986_v58 = vadd.f32 %v1784_v55, %v1672_v52  ;;  %v1674_v59 = vpop.f32.mrf.mxu0 }
 0x12e   :  { %v1786_v60 = vpop.f32.mrf.mxu1  ;;  %v1675_v63 = vadd.f32 %v1674_v59, %v1673_v56 }
 0x12f   :  { %v1168_v62 = vadd.f32 %v2266_v46, %v986_v58  ;;  %v1787_v0 = vadd.f32 %v1786_v60, %v1785_v57  ;;  %v1676_v1 = vpop.f32.mrf.mxu0 }
 0x130   :  { %v1788_v2 = vpop.f32.mrf.mxu1 }
 0x131   :  { %v1551_v3 = vpack.c.bf16 %v1168_v62, %v1167_v61  ;;  %v1677_v4 = vpop.f32.mrf.mxu0  ;;  %v991_v7 = vadd.f32 %v1787_v0, %v1675_v63 }
 0x132   :  { %v1678_v5 = vadd.f32 %v1677_v4, %v1676_v1  ;;  %v1789_v6 = vpop.f32.mrf.mxu1 }
 0x133   :  { %1595 = vst [vmem:[%s2351_s3 + $0x40] sm:$0xff] %v1551_v3   ;;  %v1790_v8 = vadd.f32 %v1789_v6, %v1788_v2  ;;  %v1679_v9 = vpop.f32.mrf.mxu0  ;;  %v1169_v14 = vadd.f32 %v2266_v46, %v991_v7 }
 0x134   :  { %v1791_v10 = vpop.f32.mrf.mxu1 }
 0x135   :  { %v994_v11 = vadd.f32 %v1790_v8, %v1678_v5  ;;  %v1680_v12 = vpop.f32.mrf.mxu0 }
 0x136   :  { %v1792_v13 = vpop.f32.mrf.mxu1  ;;  %v1681_v16 = vadd.f32 %v1680_v12, %v1679_v9 }
 0x137   :  { %v1170_v15 = vadd.f32 %v2266_v46, %v994_v11  ;;  %v1793_v17 = vadd.f32 %v1792_v13, %v1791_v10  ;;  %v1682_v18 = vpop.f32.mrf.mxu0 }
 0x138   :  { %v1794_v19 = vpop.f32.mrf.mxu1 }
 0x139   :  { %v1556_v20 = vpack.c.bf16 %v1170_v15, %v1169_v14  ;;  %v1683_v21 = vpop.f32.mrf.mxu0  ;;  %v999_v24 = vadd.f32 %v1793_v17, %v1681_v16 }
 0x13a   :  { %v1684_v22 = vadd.f32 %v1683_v21, %v1682_v18  ;;  %v1795_v23 = vpop.f32.mrf.mxu1 }
 0x13b   :  { %1596 = vst [vmem:[%s2351_s3 + $0x48] sm:$0xff] %v1556_v20   ;;  %v1796_v25 = vadd.f32 %v1795_v23, %v1794_v19  ;;  %v1685_v26 = vpop.f32.mrf.mxu0  ;;  %v1171_v31 = vadd.f32 %v2266_v46, %v999_v24 }
 0x13c   :  { %v1797_v27 = vpop.f32.mrf.mxu1 }
 0x13d   :  { %v1002_v28 = vadd.f32 %v1796_v25, %v1684_v22  ;;  %v1686_v29 = vpop.f32.mrf.mxu0 }
 0x13e   :  { %v1798_v30 = vpop.f32.mrf.mxu1  ;;  %v1687_v33 = vadd.f32 %v1686_v29, %v1685_v26 }
 0x13f   :  { %v1172_v32 = vadd.f32 %v2266_v46, %v1002_v28  ;;  %v1799_v34 = vadd.f32 %v1798_v30, %v1797_v27  ;;  %v1688_v35 = vpop.f32.mrf.mxu0 }
 0x140   :  { %v1800_v36 = vpop.f32.mrf.mxu1 }
 0x141   :  { %v1561_v37 = vpack.c.bf16 %v1172_v32, %v1171_v31  ;;  %v1689_v38 = vpop.f32.mrf.mxu0  ;;  %v1007_v41 = vadd.f32 %v1799_v34, %v1687_v33 }
 0x142   :  { %v1690_v39 = vadd.f32 %v1689_v38, %v1688_v35  ;;  %v1801_v40 = vpop.f32.mrf.mxu1 }
 0x143   :  { %1597 = vst [vmem:[%s2351_s3 + $0x50] sm:$0xff] %v1561_v37   ;;  %v1802_v42 = vadd.f32 %v1801_v40, %v1800_v36  ;;  %v1691_v43 = vpop.f32.mrf.mxu0  ;;  %v1173_v49 = vadd.f32 %v2266_v46, %v1007_v41 }
 0x144   :  { %v1803_v44 = vpop.f32.mrf.mxu1 }
 0x145   :  { %v1010_v45 = vadd.f32 %v1802_v42, %v1690_v39  ;;  %v1692_v47 = vpop.f32.mrf.mxu0 }
 0x146   :  { %v1804_v48 = vpop.f32.mrf.mxu1  ;;  %v1693_v51 = vadd.f32 %v1692_v47, %v1691_v43 }
 0x147   :  { %v1174_v50 = vadd.f32 %v2266_v46, %v1010_v45  ;;  %v1805_v52 = vadd.f32 %v1804_v48, %v1803_v44  ;;  %v1694_v53 = vpop.f32.mrf.mxu0 }
 0x148   :  { %v1806_v54 = vpop.f32.mrf.mxu1 }
 0x149   :  { %v1566_v55 = vpack.c.bf16 %v1174_v50, %v1173_v49  ;;  %v1695_v56 = vpop.f32.mrf.mxu0  ;;  %v1015_v59 = vadd.f32 %v1805_v52, %v1693_v51 }
 0x14a   :  { %v1696_v57 = vadd.f32 %v1695_v56, %v1694_v53  ;;  %v1807_v58 = vpop.f32.mrf.mxu1 }
 0x14b   :  { %1598 = vst [vmem:[%s2351_s3 + $0x58] sm:$0xff] %v1566_v55   ;;  %v1808_v60 = vadd.f32 %v1807_v58, %v1806_v54  ;;  %v1697_v61 = vpop.f32.mrf.mxu0  ;;  %v1175_v2 = vadd.f32 %v2266_v46, %v1015_v59 }
 0x14c   :  { %v1809_v62 = vpop.f32.mrf.mxu1 }
 0x14d   :  { %v1018_v63 = vadd.f32 %v1808_v60, %v1696_v57  ;;  %v1698_v0 = vpop.f32.mrf.mxu0 }
 0x14e   :  { %v1810_v1 = vpop.f32.mrf.mxu1  ;;  %v1699_v4 = vadd.f32 %v1698_v0, %v1697_v61 }
 0x14f   :  { %v1176_v3 = vadd.f32 %v2266_v46, %v1018_v63  ;;  %v1811_v5 = vadd.f32 %v1810_v1, %v1809_v62  ;;  %v1700_v6 = vpop.f32.mrf.mxu0 }
 0x150   :  { %v1812_v7 = vpop.f32.mrf.mxu1 }
 0x151   :  { %v1571_v8 = vpack.c.bf16 %v1176_v3, %v1175_v2  ;;  %v1701_v9 = vpop.f32.mrf.mxu0  ;;  %v1023_v12 = vadd.f32 %v1811_v5, %v1699_v4 }
 0x152   :  { %v1702_v10 = vadd.f32 %v1701_v9, %v1700_v6  ;;  %v1813_v11 = vpop.f32.mrf.mxu1 }
 0x153   :  { %1599 = vst [vmem:[%s2351_s3 + $0x60] sm:$0xff] %v1571_v8   ;;  %v1814_v13 = vadd.f32 %v1813_v11, %v1812_v7  ;;  %v1703_v14 = vpop.f32.mrf.mxu0  ;;  %v1177_v19 = vadd.f32 %v2266_v46, %v1023_v12 }
 0x154   :  { %v1815_v15 = vpop.f32.mrf.mxu1 }
 0x155   :  { %v1026_v16 = vadd.f32 %v1814_v13, %v1702_v10  ;;  %v1704_v17 = vpop.f32.mrf.mxu0 }
 0x156   :  { %v1816_v18 = vpop.f32.mrf.mxu1  ;;  %v1705_v21 = vadd.f32 %v1704_v17, %v1703_v14 }
 0x157   :  { %v1178_v20 = vadd.f32 %v2266_v46, %v1026_v16  ;;  %v1817_v22 = vadd.f32 %v1816_v18, %v1815_v15  ;;  %v1706_v23 = vpop.f32.mrf.mxu0 }
 0x158   :  { %v1818_v24 = vpop.f32.mrf.mxu1 }
 0x159   :  { %v1576_v25 = vpack.c.bf16 %v1178_v20, %v1177_v19  ;;  %v1707_v26 = vpop.f32.mrf.mxu0  ;;  %v1031_v29 = vadd.f32 %v1817_v22, %v1705_v21 }
 0x15a   :  { %v1708_v27 = vadd.f32 %v1707_v26, %v1706_v23  ;;  %v1819_v28 = vpop.f32.mrf.mxu1 }
 0x15b   :  { %1600 = vst [vmem:[%s2351_s3 + $0x68] sm:$0xff] %v1576_v25   ;;  %v1820_v30 = vadd.f32 %v1819_v28, %v1818_v24  ;;  %v1709_v31 = vpop.f32.mrf.mxu0  ;;  %v1179_v36 = vadd.f32 %v2266_v46, %v1031_v29 }
 0x15c   :  { %v1821_v32 = vpop.f32.mrf.mxu1 }
 0x15d   :  { %v1034_v33 = vadd.f32 %v1820_v30, %v1708_v27  ;;  %v1710_v34 = vpop.f32.mrf.mxu0 }
 0x15e   :  { %v1822_v35 = vpop.f32.mrf.mxu1  ;;  %v1711_v38 = vadd.f32 %v1710_v34, %v1709_v31 }
 0x15f   :  { %v1180_v37 = vadd.f32 %v2266_v46, %v1034_v33  ;;  %v1823_v39 = vadd.f32 %v1822_v35, %v1821_v32  ;;  %v1712_v40 = vpop.f32.mrf.mxu0 }
 0x160   :  { %v1824_v41 = vpop.f32.mrf.mxu1 }
 0x161   :  { %v1581_v42 = vpack.c.bf16 %v1180_v37, %v1179_v36  ;;  %v1713_v43 = vpop.f32.mrf.mxu0  ;;  %v1039_v47 = vadd.f32 %v1823_v39, %v1711_v38 }
 0x162   :  { %v1714_v44 = vadd.f32 %v1713_v43, %v1712_v40  ;;  %v1825_v45 = vpop.f32.mrf.mxu1 }
 0x163   :  { %1601 = vst [vmem:[%s2351_s3 + $0x70] sm:$0xff] %v1581_v42   ;;  %v1826_v48 = vadd.f32 %v1825_v45, %v1824_v41  ;;  %v1181_v50 = vadd.f32 %v2266_v46, %v1039_v47 }
 0x165   :  { %v1042_v49 = vadd.f32 %v1826_v48, %v1714_v44 }
 0x167   :  { %v1182_v51 = vadd.f32 %v2266_v46, %v1042_v49 }
 0x169   :  { %v1586_v52 = vpack.c.bf16 %v1182_v51, %v1181_v50 }
 0x16b   :  { %1602 = vst [vmem:[%s2351_s3 + $0x78] sm:$0xff] %v1586_v52  }

// kernel: bert_pretrain_forward.41
= control target key start
LH: loop header
LB: loop body
LE: loop exit
PB: predicated region body
PF: predicated region fallthrough
CT: control target
= control target key end

     0   :  { %v1449_v2 = vmov 0   ;;  %s1647_s0 = inlined_call_operand.vmem [shape: bf16[256,128], index: 0, kind: input, shape index: {}]   ;;  %s1648_s1 = inlined_call_operand.vmem [shape: bf16[128,512], index: 1, kind: input, shape index: {}]   ;;  %s1649_s2 = inlined_call_operand.hbm [shape: bf16[256,512], index: 2, kind: output, shape index: {}]  }
   0x1   :  { %v1363_v0 = vld [vmem:[%s1648_s1 + $0xe4] ss:$16 sps:$4 sm:$0xff]   ;;  %v1365_v1 = vld [vmem:[%s1648_s1 + $0xec] ss:$16 sps:$4 sm:$0xff]   ;;  %365 = vmatprep.mubr.bf16.mxu0 %v1449_v2  ;;  %558 = vmatprep.mubr.bf16.mxu1 %v1449_v2  ;;  %v1367_v3 = vld [vmem:[%s1648_s1 + $0xe0] ss:$16 sps:$4 sm:$0xff]  }
   0x2   :  { %333 = vmatprep.subr.bf16.mxu0 %v1363_v0  ;;  %v1368_v4 = vld [vmem:[%s1648_s1 + $0xe8] ss:$16 sps:$4 sm:$0xff]   ;;  %526 = vmatprep.subr.bf16.mxu1 %v1365_v1  ;;  %v1369_v5 = vld [vmem:[%s1648_s1 + $0xc4] ss:$16 sps:$4 sm:$0xff]   ;;  %v1371_v6 = vld [vmem:[%s1648_s1 + $0xcc] ss:$16 sps:$4 sm:$0xff]  }
   0x3   :  { %334 = vmatpush1.bf16.msra.mxu0 %v1367_v3  ;;  %527 = vmatpush1.bf16.msra.mxu1 %v1368_v4  ;;  %v1373_v7 = vld [vmem:[%s1648_s1 + $0xc0] ss:$16 sps:$4 sm:$0xff]   ;;  %v1374_v8 = vld [vmem:[%s1648_s1 + $0xc8] ss:$16 sps:$4 sm:$0xff]   ;;  %v1375_v9 = vld [vmem:[%s1648_s1 + $0xa4] ss:$16 sps:$4 sm:$0xff]  }
   0x4   :  { %335 = vmatprep.subr.bf16.mxu0 %v1369_v5  ;;  %528 = vmatprep.subr.bf16.mxu1 %v1371_v6  ;;  %v1377_v10 = vld [vmem:[%s1648_s1 + $0xac] ss:$16 sps:$4 sm:$0xff]   ;;  %v1379_v11 = vld [vmem:[%s1648_s1 + $0xa0] ss:$16 sps:$4 sm:$0xff]   ;;  %v1380_v12 = vld [vmem:[%s1648_s1 + $0xa8] ss:$16 sps:$4 sm:$0xff]  }
   0x5   :  { %v1381_v13 = vld [vmem:[%s1648_s1 + $0x84] ss:$16 sps:$4 sm:$0xff]   ;;  %v1383_v14 = vld [vmem:[%s1648_s1 + $0x8c] ss:$16 sps:$4 sm:$0xff]   ;;  %v1385_v15 = vld [vmem:[%s1648_s1 + $0x80] ss:$16 sps:$4 sm:$0xff]  }
   0x6   :  { %v1386_v16 = vld [vmem:[%s1648_s1 + $0x88] ss:$16 sps:$4 sm:$0xff]   ;;  %v1387_v17 = vld [vmem:[%s1648_s1 + $0x64] ss:$16 sps:$4 sm:$0xff]   ;;  %v1389_v18 = vld [vmem:[%s1648_s1 + $0x6c] ss:$16 sps:$4 sm:$0xff]  }
   0x7   :  { %336 = vmatpush1.bf16.msra.mxu0 %v1373_v7  ;;  %529 = vmatpush1.bf16.msra.mxu1 %v1374_v8  ;;  %v1391_v19 = vld [vmem:[%s1648_s1 + $0x60] ss:$16 sps:$4 sm:$0xff]   ;;  %v1392_v20 = vld [vmem:[%s1648_s1 + $0x68] ss:$16 sps:$4 sm:$0xff]   ;;  %v1393_v21 = vld [vmem:[%s1648_s1 + $0x44] ss:$16 sps:$4 sm:$0xff]  }
   0x8   :  { %337 = vmatprep.subr.bf16.mxu0 %v1375_v9  ;;  %530 = vmatprep.subr.bf16.mxu1 %v1377_v10  ;;  %v1395_v22 = vld [vmem:[%s1648_s1 + $0x4c] ss:$16 sps:$4 sm:$0xff]   ;;  %v1397_v23 = vld [vmem:[%s1648_s1 + $0x40] ss:$16 sps:$4 sm:$0xff]   ;;  %v1398_v24 = vld [vmem:[%s1648_s1 + $0x48] ss:$16 sps:$4 sm:$0xff]  }
   0x9   :  { %v1399_v25 = vld [vmem:[%s1648_s1 + $0x24] ss:$16 sps:$4 sm:$0xff]   ;;  %v1401_v26 = vld [vmem:[%s1648_s1 + $0x2c] ss:$16 sps:$4 sm:$0xff]   ;;  %v1403_v27 = vld [vmem:[%s1648_s1 + $0x20] ss:$16 sps:$4 sm:$0xff]  }
   0xa   :  { %v1404_v28 = vld [vmem:[%s1648_s1 + $0x28] ss:$16 sps:$4 sm:$0xff]   ;;  %v1405_v29 = vld [vmem:[%s1648_s1 + $0x4] ss:$16 sps:$4 sm:$0xff]   ;;  %v1407_v30 = vld [vmem:[%s1648_s1 + $0xc] ss:$16 sps:$4 sm:$0xff]  }
   0xb   :  { %338 = vmatpush1.bf16.msra.mxu0 %v1379_v11  ;;  %531 = vmatpush1.bf16.msra.mxu1 %v1380_v12  ;;  %v1409_v31 = vld [vmem:[%s1648_s1] ss:$16 sps:$4 sm:$0xff]   ;;  %v1410_v32 = vld [vmem:[%s1648_s1 + $0x8] ss:$16 sps:$4 sm:$0xff]  }
   0xc   :  { %339 = vmatprep.subr.bf16.mxu0 %v1381_v13  ;;  %532 = vmatprep.subr.bf16.mxu1 %v1383_v14  ;;  %v1411_v33 = vld [vmem:[%s1647_s0] sm:$0xff]  }
   0xf   :  { %340 = vmatpush1.bf16.msra.mxu0 %v1385_v15  ;;  %533 = vmatpush1.bf16.msra.mxu1 %v1386_v16 }
  0x10   :  { %341 = vmatprep.subr.bf16.mxu0 %v1387_v17  ;;  %534 = vmatprep.subr.bf16.mxu1 %v1389_v18 }
  0x13   :  { %342 = vmatpush1.bf16.msra.mxu0 %v1391_v19  ;;  %535 = vmatpush1.bf16.msra.mxu1 %v1392_v20 }
  0x14   :  { %343 = vmatprep.subr.bf16.mxu0 %v1393_v21  ;;  %536 = vmatprep.subr.bf16.mxu1 %v1395_v22 }
  0x17   :  { %344 = vmatpush1.bf16.msra.mxu0 %v1397_v23  ;;  %537 = vmatpush1.bf16.msra.mxu1 %v1398_v24 }
  0x18   :  { %345 = vmatprep.subr.bf16.mxu0 %v1399_v25  ;;  %538 = vmatprep.subr.bf16.mxu1 %v1401_v26 }
  0x1b   :  { %346 = vmatpush1.bf16.msra.mxu0 %v1403_v27  ;;  %539 = vmatpush1.bf16.msra.mxu1 %v1404_v28 }
  0x1c   :  { %347 = vmatprep.subr.bf16.mxu0 %v1405_v29  ;;  %540 = vmatprep.subr.bf16.mxu1 %v1407_v30 }
  0x1f   :  { %348 = vmatpush1.bf16.msra.mxu0 %v1409_v31  ;;  %541 = vmatpush1.bf16.msra.mxu1 %v1410_v32 }
  0x22   :  { %366 = vmatmul.mubr.bf16.vlgmr.msra.gmra.mxu0 %v1411_v33  ;;  %559 = vmatmul.mubr.bf16.vlgmr.msra.gmra.mxu1 %v1411_v33 }
  0x23   :  { %375 = vmatprep.mubr.bf16.mxu0 %v1449_v2  ;;  %568 = vmatprep.mubr.bf16.mxu1 %v1449_v2 }
  0x24   :  { %7 = vsyncpa [#allocation3], 0  ;;  %v1412_v34 = vld [vmem:[%s1647_s0 + $0x8] sm:$0xff]   ;;  %v1413_v35 = vld [vmem:[%s1647_s0 + $0x10] sm:$0xff]  }
  0x25   :  { %v1414_v36 = vld [vmem:[%s1647_s0 + $0x18] sm:$0xff]   ;;  %v1415_v37 = vld [vmem:[%s1647_s0 + $0x20] sm:$0xff]   ;;  %v1416_v38 = vld [vmem:[%s1647_s0 + $0x28] sm:$0xff]  }
  0x26   :  { %v1417_v39 = vld [vmem:[%s1647_s0 + $0x30] sm:$0xff]   ;;  %v1418_v40 = vld [vmem:[%s1647_s0 + $0x38] sm:$0xff]   ;;  %v1419_v41 = vld [vmem:[%s1647_s0 + $0x40] sm:$0xff]  }
  0x27   :  { %v1420_v42 = vld [vmem:[%s1647_s0 + $0x48] sm:$0xff]   ;;  %v1421_v43 = vld [vmem:[%s1647_s0 + $0x50] sm:$0xff]   ;;  %v1422_v44 = vld [vmem:[%s1647_s0 + $0x58] sm:$0xff]  }
  0x28   :  { %v1423_v45 = vld [vmem:[%s1647_s0 + $0x60] sm:$0xff]   ;;  %v1424_v46 = vld [vmem:[%s1647_s0 + $0x68] sm:$0xff]   ;;  %v1425_v47 = vld [vmem:[%s1647_s0 + $0x70] sm:$0xff]  }
  0x29   :  { %v1426_v48 = vld [vmem:[%s1647_s0 + $0x78] sm:$0xff]   ;;  %s1450_s0 = smov [#allocation2]  }
  0x2a   :  { %376 = vmatmul.mubr.bf16.gmra.mxu0 %v1412_v34  ;;  %569 = vmatmul.mubr.bf16.gmra.mxu1 %v1412_v34  ;;  %s1172_s20 = sshll.u32 %s1450_s0, 4  ;;  %s1173_s20 = int_to_ptr.vmem [resolvable:$true] %s1172_s20 }
  0x2b   :  { %385 = vmatprep.mubr.bf16.mxu0 %v1449_v2  ;;  %578 = vmatprep.mubr.bf16.mxu1 %v1449_v2  ;;  %s1427_s1 = scalar_lea.vmem %s1173_s20, 8192  ;;  %p1432_p1 = scmp.lt.s32.totalorder %s1173_s20, %s1173_s20 }
  0x2c   :  { %p1428_p0 = scmp.ne.s32.totalorder %s1173_s20, %s1427_s1  ;;  %p1433_p2 = scmp.lt.s32.totalorder %s1427_s1, %s1427_s1 }
  0x2e   :  { %p1434_p3 = por %p1433_p2, %p1432_p1 }
  0x30   :  { %p1435_p4 = pnand %p1434_p3, %p1428_p0 }
  0x32   :  { %386 = vmatmul.mubr.bf16.gmra.mxu0 %v1413_v35  ;;  %579 = vmatmul.mubr.bf16.gmra.mxu1 %v1413_v35 }
  0x33   :  { %395 = vmatprep.mubr.bf16.mxu0 %v1449_v2  ;;  %588 = vmatprep.mubr.bf16.mxu1 %v1449_v2 }
  0x3a   :  { %396 = vmatmul.mubr.bf16.gmra.mxu0 %v1414_v36  ;;  %589 = vmatmul.mubr.bf16.gmra.mxu1 %v1414_v36 }
  0x3b   :  { %405 = vmatprep.mubr.bf16.mxu0 %v1449_v2  ;;  %598 = vmatprep.mubr.bf16.mxu1 %v1449_v2 }
  0x42   :  { %406 = vmatmul.mubr.bf16.gmra.mxu0 %v1415_v37  ;;  %599 = vmatmul.mubr.bf16.gmra.mxu1 %v1415_v37 }
  0x43   :  { %415 = vmatprep.mubr.bf16.mxu0 %v1449_v2  ;;  %608 = vmatprep.mubr.bf16.mxu1 %v1449_v2 }
  0x4a   :  { %416 = vmatmul.mubr.bf16.gmra.mxu0 %v1416_v38  ;;  %609 = vmatmul.mubr.bf16.gmra.mxu1 %v1416_v38 }
  0x4b   :  { %425 = vmatprep.mubr.bf16.mxu0 %v1449_v2  ;;  %618 = vmatprep.mubr.bf16.mxu1 %v1449_v2 }
  0x52   :  { %426 = vmatmul.mubr.bf16.gmra.mxu0 %v1417_v39  ;;  %619 = vmatmul.mubr.bf16.gmra.mxu1 %v1417_v39 }
  0x53   :  { %435 = vmatprep.mubr.bf16.mxu0 %v1449_v2  ;;  %628 = vmatprep.mubr.bf16.mxu1 %v1449_v2 }
  0x5a   :  { %436 = vmatmul.mubr.bf16.gmra.mxu0 %v1418_v40  ;;  %629 = vmatmul.mubr.bf16.gmra.mxu1 %v1418_v40 }
  0x5b   :  { %445 = vmatprep.mubr.bf16.mxu0 %v1449_v2  ;;  %638 = vmatprep.mubr.bf16.mxu1 %v1449_v2 }
  0x62   :  { %446 = vmatmul.mubr.bf16.gmra.mxu0 %v1419_v41  ;;  %639 = vmatmul.mubr.bf16.gmra.mxu1 %v1419_v41 }
  0x63   :  { %455 = vmatprep.mubr.bf16.mxu0 %v1449_v2  ;;  %648 = vmatprep.mubr.bf16.mxu1 %v1449_v2 }
  0x6a   :  { %456 = vmatmul.mubr.bf16.gmra.mxu0 %v1420_v42  ;;  %649 = vmatmul.mubr.bf16.gmra.mxu1 %v1420_v42 }
  0x6b   :  { %465 = vmatprep.mubr.bf16.mxu0 %v1449_v2  ;;  %658 = vmatprep.mubr.bf16.mxu1 %v1449_v2 }
  0x72   :  { %466 = vmatmul.mubr.bf16.gmra.mxu0 %v1421_v43  ;;  %659 = vmatmul.mubr.bf16.gmra.mxu1 %v1421_v43 }
  0x73   :  { %475 = vmatprep.mubr.bf16.mxu0 %v1449_v2  ;;  %668 = vmatprep.mubr.bf16.mxu1 %v1449_v2 }
  0x7a   :  { %476 = vmatmul.mubr.bf16.gmra.mxu0 %v1422_v44  ;;  %669 = vmatmul.mubr.bf16.gmra.mxu1 %v1422_v44 }
  0x7b   :  { %485 = vmatprep.mubr.bf16.mxu0 %v1449_v2  ;;  %678 = vmatprep.mubr.bf16.mxu1 %v1449_v2 }
  0x82   :  { %486 = vmatmul.mubr.bf16.gmra.mxu0 %v1423_v45  ;;  %679 = vmatmul.mubr.bf16.gmra.mxu1 %v1423_v45 }
  0x83   :  { %495 = vmatprep.mubr.bf16.mxu0 %v1449_v2  ;;  %688 = vmatprep.mubr.bf16.mxu1 %v1449_v2 }
  0x8a   :  { %496 = vmatmul.mubr.bf16.gmra.mxu0 %v1424_v46  ;;  %689 = vmatmul.mubr.bf16.gmra.mxu1 %v1424_v46 }
  0x8b   :  { %505 = vmatprep.mubr.bf16.mxu0 %v1449_v2  ;;  %698 = vmatprep.mubr.bf16.mxu1 %v1449_v2 }
  0x92   :  { %506 = vmatmul.mubr.bf16.gmra.mxu0 %v1425_v47  ;;  %699 = vmatmul.mubr.bf16.gmra.mxu1 %v1425_v47 }
  0x93   :  { %515 = vmatprep.mubr.bf16.mxu0 %v1449_v2  ;;  %708 = vmatprep.mubr.bf16.mxu1 %v1449_v2 }
  0x9a   :  { %516 = vmatmul.mubr.bf16.gmra.mxu0 %v1426_v48  ;;  %709 = vmatmul.mubr.bf16.gmra.mxu1 %v1426_v48 }
  0xe2   :  { %v367_v49 = vpop.f32.mrf.mxu0  ;;  %v560_v50 = vpop.f32.mrf.mxu1 }
  0xe4   :  { %v369_v51 = vpop.f32.mrf.mxu0  ;;  %v562_v52 = vpop.f32.mrf.mxu1 }
  0xe5   :  { %v1295_v53 = vpack.c.bf16 %v369_v51, %v367_v49  ;;  %v1296_v54 = vpack.c.bf16 %v562_v52, %v560_v50 }
  0xe6   :  { %v371_v55 = vpop.f32.mrf.mxu0  ;;  %v564_v56 = vpop.f32.mrf.mxu1 }
  0xe7   :  { %1103 = vst [vmem:[#allocation2] sm:$0xff] %v1295_v53  ;;  %1104 = vst [vmem:[#allocation2 + $0x8] sm:$0xff] %v1296_v54 }
  0xe8   :  { %v373_v57 = vpop.f32.mrf.mxu0  ;;  %v566_v58 = vpop.f32.mrf.mxu1 }
  0xe9   :  { %v1297_v59 = vpack.c.bf16 %v373_v57, %v371_v55  ;;  %v1298_v60 = vpack.c.bf16 %v566_v58, %v564_v56 }
  0xea   :  { %v377_v61 = vpop.f32.mrf.mxu0  ;;  %v570_v62 = vpop.f32.mrf.mxu1 }
  0xeb   :  { %1105 = vst [vmem:[#allocation2 + $0x10] sm:$0xff] %v1297_v59  ;;  %1106 = vst [vmem:[#allocation2 + $0x18] sm:$0xff] %v1298_v60 }
  0xec   :  { %v379_v63 = vpop.f32.mrf.mxu0  ;;  %v572_v0 = vpop.f32.mrf.mxu1 }
  0xed   :  { %v1299_v1 = vpack.c.bf16 %v379_v63, %v377_v61  ;;  %v1300_v2 = vpack.c.bf16 %v572_v0, %v570_v62 }
  0xee   :  { %v381_v3 = vpop.f32.mrf.mxu0  ;;  %v574_v4 = vpop.f32.mrf.mxu1 }
  0xef   :  { %1107 = vst [vmem:[#allocation2 + $0x20] sm:$0xff] %v1299_v1  ;;  %1108 = vst [vmem:[#allocation2 + $0x28] sm:$0xff] %v1300_v2 }
  0xf0   :  { %v383_v5 = vpop.f32.mrf.mxu0  ;;  %v576_v6 = vpop.f32.mrf.mxu1 }
  0xf1   :  { %v1301_v7 = vpack.c.bf16 %v383_v5, %v381_v3  ;;  %v1302_v8 = vpack.c.bf16 %v576_v6, %v574_v4 }
  0xf2   :  { %v387_v9 = vpop.f32.mrf.mxu0  ;;  %v580_v10 = vpop.f32.mrf.mxu1 }
  0xf3   :  { %1109 = vst [vmem:[#allocation2 + $0x30] sm:$0xff] %v1301_v7  ;;  %1110 = vst [vmem:[#allocation2 + $0x38] sm:$0xff] %v1302_v8 }
  0xf4   :  { %v389_v11 = vpop.f32.mrf.mxu0  ;;  %v582_v12 = vpop.f32.mrf.mxu1 }
  0xf5   :  { %v1303_v13 = vpack.c.bf16 %v389_v11, %v387_v9  ;;  %v1304_v14 = vpack.c.bf16 %v582_v12, %v580_v10 }
  0xf6   :  { %v391_v15 = vpop.f32.mrf.mxu0  ;;  %v584_v16 = vpop.f32.mrf.mxu1 }
  0xf7   :  { %1111 = vst [vmem:[#allocation2 + $0x40] sm:$0xff] %v1303_v13  ;;  %1112 = vst [vmem:[#allocation2 + $0x48] sm:$0xff] %v1304_v14 }
  0xf8   :  { %v393_v17 = vpop.f32.mrf.mxu0  ;;  %v586_v18 = vpop.f32.mrf.mxu1 }
  0xf9   :  { %v1305_v19 = vpack.c.bf16 %v393_v17, %v391_v15  ;;  %v1306_v20 = vpack.c.bf16 %v586_v18, %v584_v16 }
  0xfa   :  { %v397_v21 = vpop.f32.mrf.mxu0  ;;  %v590_v22 = vpop.f32.mrf.mxu1 }
  0xfb   :  { %1113 = vst [vmem:[#allocation2 + $0x50] sm:$0xff] %v1305_v19  ;;  %1114 = vst [vmem:[#allocation2 + $0x58] sm:$0xff] %v1306_v20 }
  0xfc   :  { %v399_v23 = vpop.f32.mrf.mxu0  ;;  %v592_v24 = vpop.f32.mrf.mxu1 }
  0xfd   :  { %v1307_v25 = vpack.c.bf16 %v399_v23, %v397_v21  ;;  %v1308_v26 = vpack.c.bf16 %v592_v24, %v590_v22 }
  0xfe   :  { %v401_v27 = vpop.f32.mrf.mxu0  ;;  %v594_v28 = vpop.f32.mrf.mxu1 }
  0xff   :  { %1115 = vst [vmem:[#allocation2 + $0x60] sm:$0xff] %v1307_v25  ;;  %1116 = vst [vmem:[#allocation2 + $0x68] sm:$0xff] %v1308_v26 }
 0x100   :  { %v403_v29 = vpop.f32.mrf.mxu0  ;;  %v596_v30 = vpop.f32.mrf.mxu1 }
 0x101   :  { %v1309_v31 = vpack.c.bf16 %v403_v29, %v401_v27  ;;  %v1310_v32 = vpack.c.bf16 %v596_v30, %v594_v28 }
 0x102   :  { %v407_v33 = vpop.f32.mrf.mxu0  ;;  %v600_v34 = vpop.f32.mrf.mxu1 }
 0x103   :  { %1117 = vst [vmem:[#allocation2 + $0x70] sm:$0xff] %v1309_v31  ;;  %1118 = vst [vmem:[#allocation2 + $0x78] sm:$0xff] %v1310_v32 }
 0x104   :  { %v409_v35 = vpop.f32.mrf.mxu0  ;;  %v602_v36 = vpop.f32.mrf.mxu1 }
 0x105   :  { %v1311_v37 = vpack.c.bf16 %v409_v35, %v407_v33  ;;  %v1312_v38 = vpack.c.bf16 %v602_v36, %v600_v34 }
 0x106   :  { %v411_v39 = vpop.f32.mrf.mxu0  ;;  %v604_v40 = vpop.f32.mrf.mxu1 }
 0x107   :  { %1119 = vst [vmem:[#allocation2 + $0x80] sm:$0xff] %v1311_v37  ;;  %1120 = vst [vmem:[#allocation2 + $0x88] sm:$0xff] %v1312_v38 }
 0x108   :  { %v413_v41 = vpop.f32.mrf.mxu0  ;;  %v606_v42 = vpop.f32.mrf.mxu1 }
 0x109   :  { %v1313_v43 = vpack.c.bf16 %v413_v41, %v411_v39  ;;  %v1314_v44 = vpack.c.bf16 %v606_v42, %v604_v40 }
 0x10a   :  { %v417_v45 = vpop.f32.mrf.mxu0  ;;  %v610_v46 = vpop.f32.mrf.mxu1 }
 0x10b   :  { %1121 = vst [vmem:[#allocation2 + $0x90] sm:$0xff] %v1313_v43  ;;  %1122 = vst [vmem:[#allocation2 + $0x98] sm:$0xff] %v1314_v44 }
 0x10c   :  { %v419_v47 = vpop.f32.mrf.mxu0  ;;  %v612_v48 = vpop.f32.mrf.mxu1 }
 0x10d   :  { %v1315_v49 = vpack.c.bf16 %v419_v47, %v417_v45  ;;  %v1316_v50 = vpack.c.bf16 %v612_v48, %v610_v46 }
 0x10e   :  { %v421_v51 = vpop.f32.mrf.mxu0  ;;  %v614_v52 = vpop.f32.mrf.mxu1 }
 0x10f   :  { %1123 = vst [vmem:[#allocation2 + $0xa0] sm:$0xff] %v1315_v49  ;;  %1124 = vst [vmem:[#allocation2 + $0xa8] sm:$0xff] %v1316_v50 }
 0x110   :  { %v423_v53 = vpop.f32.mrf.mxu0  ;;  %v616_v54 = vpop.f32.mrf.mxu1 }
 0x111   :  { %v1317_v55 = vpack.c.bf16 %v423_v53, %v421_v51  ;;  %v1318_v56 = vpack.c.bf16 %v616_v54, %v614_v52 }
 0x112   :  { %v427_v57 = vpop.f32.mrf.mxu0  ;;  %v620_v58 = vpop.f32.mrf.mxu1 }
 0x113   :  { %1125 = vst [vmem:[#allocation2 + $0xb0] sm:$0xff] %v1317_v55  ;;  %1126 = vst [vmem:[#allocation2 + $0xb8] sm:$0xff] %v1318_v56 }
 0x114   :  { %v429_v59 = vpop.f32.mrf.mxu0  ;;  %v622_v60 = vpop.f32.mrf.mxu1 }
 0x115   :  { %v1319_v61 = vpack.c.bf16 %v429_v59, %v427_v57  ;;  %v1320_v62 = vpack.c.bf16 %v622_v60, %v620_v58 }
 0x116   :  { %v431_v63 = vpop.f32.mrf.mxu0  ;;  %v624_v0 = vpop.f32.mrf.mxu1 }
 0x117   :  { %1127 = vst [vmem:[#allocation2 + $0xc0] sm:$0xff] %v1319_v61  ;;  %1128 = vst [vmem:[#allocation2 + $0xc8] sm:$0xff] %v1320_v62 }
 0x118   :  { %v433_v1 = vpop.f32.mrf.mxu0  ;;  %v626_v2 = vpop.f32.mrf.mxu1 }
 0x119   :  { %v1321_v3 = vpack.c.bf16 %v433_v1, %v431_v63  ;;  %v1322_v4 = vpack.c.bf16 %v626_v2, %v624_v0 }
 0x11a   :  { %v437_v5 = vpop.f32.mrf.mxu0  ;;  %v630_v6 = vpop.f32.mrf.mxu1 }
 0x11b   :  { %1129 = vst [vmem:[#allocation2 + $0xd0] sm:$0xff] %v1321_v3  ;;  %1130 = vst [vmem:[#allocation2 + $0xd8] sm:$0xff] %v1322_v4 }
 0x11c   :  { %v439_v7 = vpop.f32.mrf.mxu0  ;;  %v632_v8 = vpop.f32.mrf.mxu1 }
 0x11d   :  { %v1323_v9 = vpack.c.bf16 %v439_v7, %v437_v5  ;;  %v1324_v10 = vpack.c.bf16 %v632_v8, %v630_v6 }
 0x11e   :  { %v441_v11 = vpop.f32.mrf.mxu0  ;;  %v634_v12 = vpop.f32.mrf.mxu1 }
 0x11f   :  { %1131 = vst [vmem:[#allocation2 + $0xe0] sm:$0xff] %v1323_v9  ;;  %1132 = vst [vmem:[#allocation2 + $0xe8] sm:$0xff] %v1324_v10 }
 0x120   :  { %v443_v13 = vpop.f32.mrf.mxu0  ;;  %v636_v14 = vpop.f32.mrf.mxu1 }
 0x121   :  { %v1325_v15 = vpack.c.bf16 %v443_v13, %v441_v11  ;;  %v1326_v16 = vpack.c.bf16 %v636_v14, %v634_v12 }
 0x122   :  { %v447_v17 = vpop.f32.mrf.mxu0  ;;  %v640_v18 = vpop.f32.mrf.mxu1 }
 0x123   :  { %1133 = vst [vmem:[#allocation2 + $0xf0] sm:$0xff] %v1325_v15  ;;  %1134 = vst [vmem:[#allocation2 + $0xf8] sm:$0xff] %v1326_v16 }
 0x124   :  { %v449_v19 = vpop.f32.mrf.mxu0  ;;  %v642_v20 = vpop.f32.mrf.mxu1 }
 0x125   :  { %v1327_v21 = vpack.c.bf16 %v449_v19, %v447_v17  ;;  %v1328_v22 = vpack.c.bf16 %v642_v20, %v640_v18 }
 0x126   :  { %v451_v23 = vpop.f32.mrf.mxu0  ;;  %v644_v24 = vpop.f32.mrf.mxu1 }
 0x127   :  { %1135 = vst [vmem:[#allocation2 + $0x100] sm:$0xff] %v1327_v21  ;;  %1136 = vst [vmem:[#allocation2 + $0x108] sm:$0xff] %v1328_v22 }
 0x128   :  { %v453_v25 = vpop.f32.mrf.mxu0  ;;  %v646_v26 = vpop.f32.mrf.mxu1 }
 0x129   :  { %v1329_v27 = vpack.c.bf16 %v453_v25, %v451_v23  ;;  %v1330_v28 = vpack.c.bf16 %v646_v26, %v644_v24 }
 0x12a   :  { %v457_v29 = vpop.f32.mrf.mxu0  ;;  %v650_v30 = vpop.f32.mrf.mxu1 }
 0x12b   :  { %1137 = vst [vmem:[#allocation2 + $0x110] sm:$0xff] %v1329_v27  ;;  %1138 = vst [vmem:[#allocation2 + $0x118] sm:$0xff] %v1330_v28 }
 0x12c   :  { %v459_v31 = vpop.f32.mrf.mxu0  ;;  %v652_v32 = vpop.f32.mrf.mxu1 }
 0x12d   :  { %v1331_v33 = vpack.c.bf16 %v459_v31, %v457_v29  ;;  %v1332_v34 = vpack.c.bf16 %v652_v32, %v650_v30 }
 0x12e   :  { %v461_v35 = vpop.f32.mrf.mxu0  ;;  %v654_v36 = vpop.f32.mrf.mxu1 }
 0x12f   :  { %1139 = vst [vmem:[#allocation2 + $0x120] sm:$0xff] %v1331_v33  ;;  %1140 = vst [vmem:[#allocation2 + $0x128] sm:$0xff] %v1332_v34 }
 0x130   :  { %v463_v37 = vpop.f32.mrf.mxu0  ;;  %v656_v38 = vpop.f32.mrf.mxu1 }
 0x131   :  { %v1333_v39 = vpack.c.bf16 %v463_v37, %v461_v35  ;;  %v1334_v40 = vpack.c.bf16 %v656_v38, %v654_v36 }
 0x132   :  { %v467_v41 = vpop.f32.mrf.mxu0  ;;  %v660_v42 = vpop.f32.mrf.mxu1 }
 0x133   :  { %1141 = vst [vmem:[#allocation2 + $0x130] sm:$0xff] %v1333_v39  ;;  %1142 = vst [vmem:[#allocation2 + $0x138] sm:$0xff] %v1334_v40 }
 0x134   :  { %v469_v43 = vpop.f32.mrf.mxu0  ;;  %v662_v44 = vpop.f32.mrf.mxu1 }
 0x135   :  { %v1335_v45 = vpack.c.bf16 %v469_v43, %v467_v41  ;;  %v1336_v46 = vpack.c.bf16 %v662_v44, %v660_v42 }
 0x136   :  { %v471_v47 = vpop.f32.mrf.mxu0  ;;  %v664_v48 = vpop.f32.mrf.mxu1 }
 0x137   :  { %1143 = vst [vmem:[#allocation2 + $0x140] sm:$0xff] %v1335_v45  ;;  %1144 = vst [vmem:[#allocation2 + $0x148] sm:$0xff] %v1336_v46 }
 0x138   :  { %v473_v49 = vpop.f32.mrf.mxu0  ;;  %v666_v50 = vpop.f32.mrf.mxu1 }
 0x139   :  { %v1337_v51 = vpack.c.bf16 %v473_v49, %v471_v47  ;;  %v1338_v52 = vpack.c.bf16 %v666_v50, %v664_v48 }
 0x13a   :  { %v477_v53 = vpop.f32.mrf.mxu0  ;;  %v670_v54 = vpop.f32.mrf.mxu1 }
 0x13b   :  { %1145 = vst [vmem:[#allocation2 + $0x150] sm:$0xff] %v1337_v51  ;;  %1146 = vst [vmem:[#allocation2 + $0x158] sm:$0xff] %v1338_v52 }
 0x13c   :  { %v479_v55 = vpop.f32.mrf.mxu0  ;;  %v672_v56 = vpop.f32.mrf.mxu1 }
 0x13d   :  { %v1339_v57 = vpack.c.bf16 %v479_v55, %v477_v53  ;;  %v1340_v58 = vpack.c.bf16 %v672_v56, %v670_v54 }
 0x13e   :  { %v481_v59 = vpop.f32.mrf.mxu0  ;;  %v674_v60 = vpop.f32.mrf.mxu1 }
 0x13f   :  { %1147 = vst [vmem:[#allocation2 + $0x160] sm:$0xff] %v1339_v57  ;;  %1148 = vst [vmem:[#allocation2 + $0x168] sm:$0xff] %v1340_v58 }
 0x140   :  { %v483_v61 = vpop.f32.mrf.mxu0  ;;  %v676_v62 = vpop.f32.mrf.mxu1 }
 0x141   :  { %v1341_v63 = vpack.c.bf16 %v483_v61, %v481_v59  ;;  %v1342_v0 = vpack.c.bf16 %v676_v62, %v674_v60 }
 0x142   :  { %v487_v1 = vpop.f32.mrf.mxu0  ;;  %v680_v2 = vpop.f32.mrf.mxu1 }
 0x143   :  { %1149 = vst [vmem:[#allocation2 + $0x170] sm:$0xff] %v1341_v63  ;;  %1150 = vst [vmem:[#allocation2 + $0x178] sm:$0xff] %v1342_v0 }
 0x144   :  { %v489_v3 = vpop.f32.mrf.mxu0  ;;  %v682_v4 = vpop.f32.mrf.mxu1 }
 0x145   :  { %v1343_v5 = vpack.c.bf16 %v489_v3, %v487_v1  ;;  %v1344_v6 = vpack.c.bf16 %v682_v4, %v680_v2 }
 0x146   :  { %v491_v7 = vpop.f32.mrf.mxu0  ;;  %v684_v8 = vpop.f32.mrf.mxu1 }
 0x147   :  { %1151 = vst [vmem:[#allocation2 + $0x180] sm:$0xff] %v1343_v5  ;;  %1152 = vst [vmem:[#allocation2 + $0x188] sm:$0xff] %v1344_v6 }
 0x148   :  { %v493_v9 = vpop.f32.mrf.mxu0  ;;  %v686_v10 = vpop.f32.mrf.mxu1 }
 0x149   :  { %v1345_v11 = vpack.c.bf16 %v493_v9, %v491_v7  ;;  %v1346_v12 = vpack.c.bf16 %v686_v10, %v684_v8 }
 0x14a   :  { %v497_v13 = vpop.f32.mrf.mxu0  ;;  %v690_v14 = vpop.f32.mrf.mxu1 }
 0x14b   :  { %1153 = vst [vmem:[#allocation2 + $0x190] sm:$0xff] %v1345_v11  ;;  %1154 = vst [vmem:[#allocation2 + $0x198] sm:$0xff] %v1346_v12 }
 0x14c   :  { %v499_v15 = vpop.f32.mrf.mxu0  ;;  %v692_v16 = vpop.f32.mrf.mxu1 }
 0x14d   :  { %v1347_v17 = vpack.c.bf16 %v499_v15, %v497_v13  ;;  %v1348_v18 = vpack.c.bf16 %v692_v16, %v690_v14 }
 0x14e   :  { %v501_v19 = vpop.f32.mrf.mxu0  ;;  %v694_v20 = vpop.f32.mrf.mxu1 }
 0x14f   :  { %1155 = vst [vmem:[#allocation2 + $0x1a0] sm:$0xff] %v1347_v17  ;;  %1156 = vst [vmem:[#allocation2 + $0x1a8] sm:$0xff] %v1348_v18 }
 0x150   :  { %v503_v21 = vpop.f32.mrf.mxu0  ;;  %v696_v22 = vpop.f32.mrf.mxu1 }
 0x151   :  { %v1349_v23 = vpack.c.bf16 %v503_v21, %v501_v19  ;;  %v1350_v24 = vpack.c.bf16 %v696_v22, %v694_v20 }
 0x152   :  { %v507_v25 = vpop.f32.mrf.mxu0  ;;  %v700_v26 = vpop.f32.mrf.mxu1 }
 0x153   :  { %1157 = vst [vmem:[#allocation2 + $0x1b0] sm:$0xff] %v1349_v23  ;;  %1158 = vst [vmem:[#allocation2 + $0x1b8] sm:$0xff] %v1350_v24 }
 0x154   :  { %v509_v27 = vpop.f32.mrf.mxu0  ;;  %v702_v28 = vpop.f32.mrf.mxu1 }
 0x155   :  { %v1351_v29 = vpack.c.bf16 %v509_v27, %v507_v25  ;;  %v1352_v30 = vpack.c.bf16 %v702_v28, %v700_v26 }
 0x156   :  { %v511_v31 = vpop.f32.mrf.mxu0  ;;  %v704_v32 = vpop.f32.mrf.mxu1 }
 0x157   :  { %1159 = vst [vmem:[#allocation2 + $0x1c0] sm:$0xff] %v1351_v29  ;;  %1160 = vst [vmem:[#allocation2 + $0x1c8] sm:$0xff] %v1352_v30 }
 0x158   :  { %v513_v33 = vpop.f32.mrf.mxu0  ;;  %v706_v34 = vpop.f32.mrf.mxu1 }
 0x159   :  { %v1353_v35 = vpack.c.bf16 %v513_v33, %v511_v31  ;;  %v1354_v36 = vpack.c.bf16 %v706_v34, %v704_v32 }
 0x15a   :  { %v517_v37 = vpop.f32.mrf.mxu0  ;;  %v710_v38 = vpop.f32.mrf.mxu1 }
 0x15b   :  { %1161 = vst [vmem:[#allocation2 + $0x1d0] sm:$0xff] %v1353_v35  ;;  %1162 = vst [vmem:[#allocation2 + $0x1d8] sm:$0xff] %v1354_v36 }
 0x15c   :  { %v519_v39 = vpop.f32.mrf.mxu0  ;;  %v712_v40 = vpop.f32.mrf.mxu1 }
 0x15d   :  { %v1355_v41 = vpack.c.bf16 %v519_v39, %v517_v37  ;;  %v1356_v42 = vpack.c.bf16 %v712_v40, %v710_v38 }
 0x15e   :  { %v521_v43 = vpop.f32.mrf.mxu0  ;;  %v714_v44 = vpop.f32.mrf.mxu1 }
 0x15f   :  { %1163 = vst [vmem:[#allocation2 + $0x1e0] sm:$0xff] %v1355_v41  ;;  %1164 = vst [vmem:[#allocation2 + $0x1e8] sm:$0xff] %v1356_v42 }
 0x160   :  { %v523_v45 = vpop.f32.mrf.mxu0  ;;  %v716_v46 = vpop.f32.mrf.mxu1 }
 0x161   :  { %v1357_v47 = vpack.c.bf16 %v523_v45, %v521_v43  ;;  %v1358_v48 = vpack.c.bf16 %v716_v46, %v714_v44 }
 0x163   :  { %1165 = vst [vmem:[#allocation2 + $0x1f0] sm:$0xff] %v1357_v47  ;;  %1166 = vst [vmem:[#allocation2 + $0x1f8] sm:$0xff] %v1358_v48 }
 0x164   :  { %1438 = shalt.err (!%p1435_p4)
}
 0x165   :  { %s1451_s21 = smov 256   ;;  %s1452_s22 = smov 16  }
 0x166   :  { %1178 = dma.vmem_to_hbm [thread:$0]  %s1173_s20, 8192, %s1649_s2, [#allocation3], %s1451_s21, %s1451_s21, %s1452_s22  }
 0x167   :  { %1447 = dma.done.wait [#allocation3], 8192  }
 0x168   :  { %1448 = vsyncadd [#allocation3], 4294959104 }
 0x169   :  { %1182 = vsyncpa [#allocation3], 1 }

</bundles_post_ra>
